<compile_context>
chip_gen: v5e
topology: v5e:2x2
jax: 0.10.0
libtpu: 0.0.40
codegen_flags: <defaults>
</compile_context>

<pallas_src>
import jax
import jax.numpy as jnp
import numpy as np
from jax import lax
from jax.experimental import pallas as pl
from jax.experimental.pallas import tpu as pltpu


LANE = 128           # padded feature width (lane-dense)
K = 5                # conv kernel size
H = W = 32           # input spatial size (CIFAR)
OH1 = OW1 = 28       # conv1 output
PH1 = PW1 = 14       # after pool1
OH2 = OW2 = 10       # conv2 output
PH2 = PW2 = 5        # after pool2
P1_ROWS = 208        # flattened pool1 map: 196 used rows + zero tail for offset slices
C2_WIDE = 140        # conv2 wide accumulator: 10 output rows x 14-wide rows
C1_CHUNK = 112       # 784 = 7 * 112 ; conv1 processed in aligned M-chunks


# ------------------------------ Pallas kernel ------------------------------

def _net_kernel(x_ref, w1_ref, b1_ref, w2_ref, b2_ref,
                wf1_ref, bf1_ref, wf2_ref, bf2_ref, wf3_ref, bf3_ref,
                out_ref, c1_ref, p1_ref):
    f32 = jnp.float32
    bf16 = jnp.bfloat16
    ipb = x_ref.shape[0]

    # Tiny even/odd column selectors for pool1's horizontal 2x2 max (exact 0/1 values).
    r = lax.broadcasted_iota(jnp.int32, (PW1, OW1), 0)
    c = lax.broadcasted_iota(jnp.int32, (PW1, OW1), 1)
    e1 = (c == 2 * r).astype(bf16)          # (14, 28)
    o1 = (c == 2 * r + 1).astype(bf16)      # (14, 28)

    for img in range(ipb):
        # ---- conv1: one im2col matmul (784,128)x(128,128) bf16, chunked along M;
        #      bias + ReLU fused, result kept in VMEM as bf16.
        for t in range(OH1 * OW1 // C1_CHUNK):
            a = jnp.dot(x_ref[img, pl.ds(t * C1_CHUNK, C1_CHUNK), :], w1_ref[...],
                        preferred_element_type=f32)
            c1_ref[pl.ds(t * C1_CHUNK, C1_CHUNK), :] = (
                jnp.maximum(a + b1_ref[...], 0.0).astype(bf16))

        # ---- pool1 (2x2 max) -> flattened (14*14, 128) map; tail rows kept zero so
        #      conv2's offset slices never read garbage.
        p1_ref[pl.ds(192, 16), :] = jnp.zeros((16, LANE), f32)
        for s in range(PH1):
            top = c1_ref[pl.ds((2 * s) * OW1, OW1), :]        # conv1 row 2s   (28,128)
            bot = c1_ref[pl.ds((2 * s + 1) * OW1, OW1), :]    # conv1 row 2s+1 (28,128)
            m = jnp.maximum(top, bot)
            pooled = jnp.maximum(
                jnp.dot(e1, m, preferred_element_type=f32),
                jnp.dot(o1, m, preferred_element_type=f32))   # (14, 128)
            p1_ref[pl.ds(s * PW1, PW1), :] = pooled

        # ---- conv2 (5x5, 6->16): wide-accumulator trick.  For tap (i,j) the needed
        #      rows are a single contiguous slice of the flattened pool1 map at offset
        #      i*14+j; rows with x2 >= 10 are junk but never read.
        acc = jnp.zeros((C2_WIDE, LANE), f32)
        for i in range(K):
            for j in range(K):
                lhs = p1_ref[pl.ds(i * PW1 + j, C2_WIDE), :][:, :8].astype(bf16)
                acc = acc + jnp.dot(lhs, w2_ref[i * K + j],
                                    preferred_element_type=f32)
        c2 = jnp.maximum(acc + b2_ref[...], 0.0)              # (140, 128)

        # ---- pool2 (2x2 max) fused with fc1 (torch flatten order folded into wf1).
        h1 = jnp.zeros((1, LANE), f32)
        for s in range(PH2):
            top = c2[(2 * s) * 14:(2 * s) * 14 + 14, :]       # y2 = 2s   (14,128)
            bot = c2[(2 * s + 1) * 14:(2 * s + 1) * 14 + 14, :]
            m = jnp.maximum(top, bot)
            for u in range(PW2):
                rrow = jnp.maximum(m[2 * u:2 * u + 1, :],
                                   m[2 * u + 1:2 * u + 2, :])  # (1,128) pooled pixel
                h1 = h1 + jnp.dot(rrow[:, :16].astype(bf16),
                                  wf1_ref[s * PW2 + u],
                                  preferred_element_type=f32)
        h1 = jnp.maximum(h1 + bf1_ref[...], 0.0)              # (1, 128)

        # ---- fc2 + ReLU, fc3
        h2 = jnp.maximum(
            jnp.dot(h1.astype(bf16), wf2_ref[...], preferred_element_type=f32)
            + bf2_ref[...], 0.0)                              # (1, 128)
        logits = (jnp.dot(h2.astype(bf16), wf3_ref[...], preferred_element_type=f32)
                  + bf3_ref[...])                             # (1, 128)
        out_ref[img] = logits


# ------------------------------ host wrappers -------------------------------

def _pad_to(a, shape):
    return jnp.pad(a, [(0, t - s) for s, t in zip(a.shape, shape)])


def prepare_params(params):
    """One-time weight permutation / compaction / bf16 cast (biases stay f32)."""
    f32, bf16 = jnp.float32, jnp.bfloat16
    # conv1 as an im2col matmul: row order (i*5 + j)*3 + c  -> (128, 128) bf16.
    w1 = jnp.transpose(params["conv1_w"], (2, 3, 1, 0)).reshape(K * K * 3, 6)
    w1 = _pad_to(w1, (LANE, LANE)).astype(bf16)
    b1 = _pad_to(params["conv1_b"].reshape(1, 6), (1, LANE)).astype(f32)
    # conv2: compact per-tap (8 in-ch, 128 out-ch) bf16.
    w2 = jnp.transpose(params["conv2_w"], (2, 3, 1, 0)).reshape(K * K, 6, 16)
    w2 = _pad_to(w2, (K * K, 8, LANE)).astype(bf16)
    b2 = _pad_to(params["conv2_b"].reshape(1, 16), (1, LANE)).astype(f32)
    # fc1: torch flatten index c*25 + h*5 + w  -> per-(h,w) compact (25, 16, 128) bf16.
    wf1 = params["fc1_w"].reshape(120, 16, PH2, PW2)
    wf1 = jnp.transpose(wf1, (2, 3, 1, 0)).reshape(PH2 * PW2, 16, 120)
    wf1 = _pad_to(wf1, (PH2 * PW2, 16, LANE)).astype(bf16)
    bf1 = _pad_to(params["fc1_b"].reshape(1, 120), (1, LANE)).astype(f32)
    wf2 = _pad_to(params["fc2_w"].T, (LANE, LANE)).astype(bf16)
    bf2 = _pad_to(params["fc2_b"].reshape(1, 84), (1, LANE)).astype(f32)
    wf3 = _pad_to(params["fc3_w"].T, (LANE, LANE)).astype(bf16)
    bf3 = _pad_to(params["fc3_b"].reshape(1, 10), (1, LANE)).astype(f32)
    return (w1, b1, w2, b2, wf1, bf1, wf2, bf2, wf3, bf3)


def _im2col_conv1(x_nchw):
    """Wrapper-side im2col: (B,3,32,32) -> (B, 784, 128) bf16, tap-major/channel-minor."""
    n = x_nchw.shape[0]
    x = jnp.transpose(x_nchw, (0, 2, 3, 1))                   # NHWC
    cols = jnp.concatenate(
        [x[:, i:i + OH1, j:j + OW1, :] for i in range(K) for j in range(K)],
        axis=-1)                                              # (n, 28, 28, 75)
    cols = cols.reshape(n, OH1 * OW1, K * K * 3)
    cols = _pad_to(cols, (n, OH1 * OW1, LANE))
    return cols.astype(jnp.bfloat16)


@jax.jit
def net_forward(prepped, x_nchw):
    w1, b1, w2, b2, wf1, bf1, wf2, bf2, wf3, bf3 = prepped
    n = x_nchw.shape[0]
    ipb = max(1, n // 2)          # >= 2 grid steps so v7x's two TensorCores both work
    nblk = pl.cdiv(n, ipb)
    n_pad = nblk * ipb
    cols = _im2col_conv1(x_nchw)
    if n_pad != n:
        cols = jnp.pad(cols, ((0, n_pad - n), (0, 0), (0, 0)))

    const2 = lambda b: (0, 0)
    const3 = lambda b: (0, 0, 0)
    grid_spec = pltpu.PrefetchScalarGridSpec(
        num_scalar_prefetch=0,
        grid=(nblk,),
        in_specs=[
            pl.BlockSpec((ipb, OH1 * OW1, LANE), lambda b: (b, 0, 0)),   # x im2col
            pl.BlockSpec((LANE, LANE), const2),                          # w1
            pl.BlockSpec((1, LANE), const2),                             # b1
            pl.BlockSpec((K * K, 8, LANE), const3),                      # w2 (compact)
            pl.BlockSpec((1, LANE), const2),                             # b2
            pl.BlockSpec((PH2 * PW2, 16, LANE), const3),                 # wf1 (compact)
            pl.BlockSpec((1, LANE), const2),                             # bf1
            pl.BlockSpec((LANE, LANE), const2),                          # wf2
            pl.BlockSpec((1, LANE), const2),                             # bf2
            pl.BlockSpec((LANE, LANE), const2),                          # wf3
            pl.BlockSpec((1, LANE), const2),                             # bf3
        ],
        out_specs=pl.BlockSpec((ipb, 1, LANE), lambda b: (b, 0, 0)),
        scratch_shapes=[
            pltpu.VMEM((OH1 * OW1, LANE), jnp.bfloat16),   # conv1 output (ReLU'd)
            pltpu.VMEM((P1_ROWS, LANE), jnp.float32),      # flattened pooled conv1
        ],
    )
    out = pl.pallas_call(
        _net_kernel,
        out_shape=jax.ShapeDtypeStruct((n_pad, 1, LANE), jnp.float32),
        grid_spec=grid_spec,
        compiler_params=pltpu.CompilerParams(
            dimension_semantics=("parallel",)),
    )(cols, w1, b1, w2, b2, wf1, bf1, wf2, bf2, wf3, bf3)
    return out[:n, 0, :10]


# ------------------------------ init / reference ----------------------------

def init_params(key):
    ks = jax.random.split(key, 10)

    def u(k, shape, fan_in):
        bound = 1.0 / np.sqrt(fan_in)
        return jax.random.uniform(k, shape, jnp.float32, -bound, bound)

    return {
        "conv1_w": u(ks[0], (6, 3, 5, 5), 3 * 5 * 5),     # OIHW (torch layout)
        "conv1_b": u(ks[1], (6,), 3 * 5 * 5),
        "conv2_w": u(ks[2], (16, 6, 5, 5), 6 * 5 * 5),
        "conv2_b": u(ks[3], (16,), 6 * 5 * 5),
        "fc1_w":   u(ks[4], (120, 400), 400),             # (out, in) torch layout
        "fc1_b":   u(ks[5], (120,), 400),
        "fc2_w":   u(ks[6], (84, 120), 120),
        "fc2_b":   u(ks[7], (84,), 120),
        "fc3_w":   u(ks[8], (10, 84), 84),
        "fc3_b":   u(ks[9], (10,), 84),
    }


def net_reference(params, x_nchw):
    """Pure-JAX reference mirroring the torch forward, for a sanity check."""
    dn = ("NCHW", "OIHW", "NCHW")
    y = lax.conv_general_dilated(x_nchw, params["conv1_w"], (1, 1), "VALID",
                                 dimension_numbers=dn)
    y = jax.nn.relu(y + params["conv1_b"][None, :, None, None])
    y = lax.reduce_window(y, -jnp.inf, lax.max, (1, 1, 2, 2), (1, 1, 2, 2), "VALID")
    y = lax.conv_general_dilated(y, params["conv2_w"], (1, 1), "VALID",
                                 dimension_numbers=dn)
    y = jax.nn.relu(y + params["conv2_b"][None, :, None, None])
    y = lax.reduce_window(y, -jnp.inf, lax.max, (1, 1, 2, 2), (1, 1, 2, 2), "VALID")
    y = y.reshape(y.shape[0], -1)
    y = jax.nn.relu(y @ params["fc1_w"].T + params["fc1_b"])
    y = jax.nn.relu(y @ params["fc2_w"].T + params["fc2_b"])
    y = y @ params["fc3_w"].T + params["fc3_b"]
    return y


if __name__ == "__main__":
    key = jax.random.PRNGKey(0)
    kx, kp = jax.random.split(key)
    # 16*5*5 flatten implies 32x32 CIFAR input: conv5->28, pool->14, conv5->10, pool->5.
    x = jax.random.normal(kx, (2, 3, 32, 32), jnp.float32)
    params = init_params(kp)
    prepped = prepare_params(params)

    out = jax.block_until_ready(net_forward(prepped, x))
    assert out.shape == (2, 10), out.shape

    ref = jax.block_until_ready(net_reference(params, x))
    # Looser tolerance than the all-f32 version: matmul operands are bf16 (f32 accum).
    np.testing.assert_allclose(np.asarray(out), np.asarray(ref),
                               rtol=1e-1, atol=1e-1)
    print("KERNEL_OK")
</pallas_src>

<mosaic_0001>
module attributes {stable_mosaic.version = 11 : i64} {
  func.func @_net_kernel(%arg0: i32, %arg1: memref<1x784x128xbf16, #tpu.memory_space<vmem>>, %arg2: memref<128x128xbf16, #tpu.memory_space<vmem>>, %arg3: memref<1x128xf32, #tpu.memory_space<vmem>>, %arg4: memref<25x8x128xbf16, #tpu.memory_space<vmem>>, %arg5: memref<1x128xf32, #tpu.memory_space<vmem>>, %arg6: memref<25x16x128xbf16, #tpu.memory_space<vmem>>, %arg7: memref<1x128xf32, #tpu.memory_space<vmem>>, %arg8: memref<128x128xbf16, #tpu.memory_space<vmem>>, %arg9: memref<1x128xf32, #tpu.memory_space<vmem>>, %arg10: memref<128x128xbf16, #tpu.memory_space<vmem>>, %arg11: memref<1x128xf32, #tpu.memory_space<vmem>>, %arg12: memref<1x1x128xf32, #tpu.memory_space<vmem>>, %arg13: memref<784x128xbf16, #tpu.memory_space<vmem>>, %arg14: memref<208x128xf32, #tpu.memory_space<vmem>>) attributes {dimension_semantics = [#tpu.dimension_semantics<parallel>], iteration_bounds = array<i64: 2>, scalar_prefetch = 0 : i64, scratch_operands = 2 : i64, tpu.core_type = #tpu.core_type<tc>, window_params = [{transform_indices = @transform_0, window_bounds = array<i64: 1, 784, 128>}, {pipeline_mode = #tpu.pipeline_mode<synchronous>, transform_indices = @transform_1, window_bounds = array<i64: 128, 128>}, {pipeline_mode = #tpu.pipeline_mode<synchronous>, transform_indices = @transform_2, window_bounds = array<i64: 1, 128>}, {pipeline_mode = #tpu.pipeline_mode<synchronous>, transform_indices = @transform_3, window_bounds = array<i64: 25, 8, 128>}, {pipeline_mode = #tpu.pipeline_mode<synchronous>, transform_indices = @transform_4, window_bounds = array<i64: 1, 128>}, {pipeline_mode = #tpu.pipeline_mode<synchronous>, transform_indices = @transform_5, window_bounds = array<i64: 25, 16, 128>}, {pipeline_mode = #tpu.pipeline_mode<synchronous>, transform_indices = @transform_6, window_bounds = array<i64: 1, 128>}, {pipeline_mode = #tpu.pipeline_mode<synchronous>, transform_indices = @transform_7, window_bounds = array<i64: 128, 128>}, {pipeline_mode = #tpu.pipeline_mode<synchronous>, transform_indices = @transform_8, window_bounds = array<i64: 1, 128>}, {pipeline_mode = #tpu.pipeline_mode<synchronous>, transform_indices = @transform_9, window_bounds = array<i64: 128, 128>}, {pipeline_mode = #tpu.pipeline_mode<synchronous>, transform_indices = @transform_10, window_bounds = array<i64: 1, 128>}, {transform_indices = @transform_11, window_bounds = array<i64: 1, 1, 128>}]} {
    %0 = tpu.iota {dimensions = array<i32: 0>} : vector<14x28xi32>
    %1 = tpu.iota {dimensions = array<i32: 1>} : vector<14x28xi32>
    %c2_i32 = arith.constant 2 : i32
    %2 = vector.broadcast %c2_i32 : i32 to vector<14x28xi32>
    %3 = arith.muli %2, %0 : vector<14x28xi32>
    %4 = arith.cmpi eq, %1, %3 : vector<14x28xi32>
    %5 = arith.extui %4 : vector<14x28xi1> to vector<14x28xi32>
    %6 = arith.sitofp %5 : vector<14x28xi32> to vector<14x28xf32>
    %7 = arith.truncf %6 : vector<14x28xf32> to vector<14x28xbf16>
    %c2_i32_0 = arith.constant 2 : i32
    %8 = vector.broadcast %c2_i32_0 : i32 to vector<14x28xi32>
    %9 = arith.muli %8, %0 : vector<14x28xi32>
    %c1_i32 = arith.constant 1 : i32
    %10 = vector.broadcast %c1_i32 : i32 to vector<14x28xi32>
    %11 = arith.addi %9, %10 : vector<14x28xi32>
    %12 = arith.cmpi eq, %1, %11 : vector<14x28xi32>
    %13 = arith.extui %12 : vector<14x28xi1> to vector<14x28xi32>
    %14 = arith.sitofp %13 : vector<14x28xi32> to vector<14x28xf32>
    %15 = arith.truncf %14 : vector<14x28xf32> to vector<14x28xbf16>
    %c0 = arith.constant 0 : index
    %c0_1 = arith.constant 0 : index
    %c0_2 = arith.constant 0 : index
    %16 = vector.load %arg1[%c0, %c0_1, %c0_2] : memref<1x784x128xbf16, #tpu.memory_space<vmem>>, vector<1x112x128xbf16>
    %17 = vector.shape_cast %16 : vector<1x112x128xbf16> to vector<112x128xbf16>
    %c0_3 = arith.constant 0 : index
    %c0_4 = arith.constant 0 : index
    %18 = vector.load %arg2[%c0_3, %c0_4] : memref<128x128xbf16, #tpu.memory_space<vmem>>, vector<128x128xbf16>
    %cst = arith.constant dense<0.000000e+00> : vector<112x128xf32>
    %19 = tpu.matmul %17, %18, %cst {dimension_numbers = #tpu.dot_dimension_numbers<[1], [0], [0], [1], [0, 0, 1, 1], [], []>} : vector<112x128xbf16>, vector<128x128xbf16>, vector<112x128xf32> -> vector<112x128xf32>
    %c0_5 = arith.constant 0 : index
    %c0_6 = arith.constant 0 : index
    %20 = vector.load %arg3[%c0_5, %c0_6] : memref<1x128xf32, #tpu.memory_space<vmem>>, vector<1x128xf32>
    %21 = vector.broadcast %20 : vector<1x128xf32> to vector<112x128xf32>
    %22 = arith.addf %19, %21 : vector<112x128xf32>
    %cst_7 = arith.constant 0.000000e+00 : f32
    %23 = vector.broadcast %cst_7 : f32 to vector<112x128xf32>
    %24 = arith.maximumf %22, %23 : vector<112x128xf32>
    %25 = arith.truncf %24 : vector<112x128xf32> to vector<112x128xbf16>
    %c0_8 = arith.constant 0 : index
    %c0_9 = arith.constant 0 : index
    %26 = vector.load %arg13[%c0_8, %c0_9] : memref<784x128xbf16, #tpu.memory_space<vmem>>, vector<112x128xbf16>
    tpu.vector_store %arg13[%c0_8, %c0_9], %25 {strides = array<i32>} : memref<784x128xbf16, #tpu.memory_space<vmem>>, vector<112x128xbf16>,
    %c0_10 = arith.constant 0 : index
    %c112 = arith.constant 112 : index
    %c0_11 = arith.constant 0 : index
    %27 = vector.load %arg1[%c0_10, %c112, %c0_11] : memref<1x784x128xbf16, #tpu.memory_space<vmem>>, vector<1x112x128xbf16>
    %28 = vector.shape_cast %27 : vector<1x112x128xbf16> to vector<112x128xbf16>
    %c0_12 = arith.constant 0 : index
    %c0_13 = arith.constant 0 : index
    %29 = vector.load %arg2[%c0_12, %c0_13] : memref<128x128xbf16, #tpu.memory_space<vmem>>, vector<128x128xbf16>
    %cst_14 = arith.constant dense<0.000000e+00> : vector<112x128xf32>
    %30 = tpu.matmul %28, %29, %cst_14 {dimension_numbers = #tpu.dot_dimension_numbers<[1], [0], [0], [1], [0, 0, 1, 1], [], []>} : vector<112x128xbf16>, vector<128x128xbf16>, vector<112x128xf32> -> vector<112x128xf32>
    %c0_15 = arith.constant 0 : index
    %c0_16 = arith.constant 0 : index
    %31 = vector.load %arg3[%c0_15, %c0_16] : memref<1x128xf32, #tpu.memory_space<vmem>>, vector<1x128xf32>
    %32 = vector.broadcast %31 : vector<1x128xf32> to vector<112x128xf32>
    %33 = arith.addf %30, %32 : vector<112x128xf32>
    %cst_17 = arith.constant 0.000000e+00 : f32
    %34 = vector.broadcast %cst_17 : f32 to vector<112x128xf32>
    %35 = arith.maximumf %33, %34 : vector<112x128xf32>
    %36 = arith.truncf %35 : vector<112x128xf32> to vector<112x128xbf16>
    %c112_18 = arith.constant 112 : index
    %c0_19 = arith.constant 0 : index
    %37 = vector.load %arg13[%c112_18, %c0_19] : memref<784x128xbf16, #tpu.memory_space<vmem>>, vector<112x128xbf16>
    tpu.vector_store %arg13[%c112_18, %c0_19], %36 {strides = array<i32>} : memref<784x128xbf16, #tpu.memory_space<vmem>>, vector<112x128xbf16>,
    %c0_20 = arith.constant 0 : index
    %c224 = arith.constant 224 : index
    %c0_21 = arith.constant 0 : index
    %38 = vector.load %arg1[%c0_20, %c224, %c0_21] : memref<1x784x128xbf16, #tpu.memory_space<vmem>>, vector<1x112x128xbf16>
    %39 = vector.shape_cast %38 : vector<1x112x128xbf16> to vector<112x128xbf16>
    %c0_22 = arith.constant 0 : index
    %c0_23 = arith.constant 0 : index
    %40 = vector.load %arg2[%c0_22, %c0_23] : memref<128x128xbf16, #tpu.memory_space<vmem>>, vector<128x128xbf16>
    %cst_24 = arith.constant dense<0.000000e+00> : vector<112x128xf32>
    %41 = tpu.matmul %39, %40, %cst_24 {dimension_numbers = #tpu.dot_dimension_numbers<[1], [0], [0], [1], [0, 0, 1, 1], [], []>} : vector<112x128xbf16>, vector<128x128xbf16>, vector<112x128xf32> -> vector<112x128xf32>
    %c0_25 = arith.constant 0 : index
    %c0_26 = arith.constant 0 : index
    %42 = vector.load %arg3[%c0_25, %c0_26] : memref<1x128xf32, #tpu.memory_space<vmem>>, vector<1x128xf32>
    %43 = vector.broadcast %42 : vector<1x128xf32> to vector<112x128xf32>
    %44 = arith.addf %41, %43 : vector<112x128xf32>
    %cst_27 = arith.constant 0.000000e+00 : f32
    %45 = vector.broadcast %cst_27 : f32 to vector<112x128xf32>
    %46 = arith.maximumf %44, %45 : vector<112x128xf32>
    %47 = arith.truncf %46 : vector<112x128xf32> to vector<112x128xbf16>
    %c224_28 = arith.constant 224 : index
    %c0_29 = arith.constant 0 : index
    %48 = vector.load %arg13[%c224_28, %c0_29] : memref<784x128xbf16, #tpu.memory_space<vmem>>, vector<112x128xbf16>
    tpu.vector_store %arg13[%c224_28, %c0_29], %47 {strides = array<i32>} : memref<784x128xbf16, #tpu.memory_space<vmem>>, vector<112x128xbf16>,
    %c0_30 = arith.constant 0 : index
    %c336 = arith.constant 336 : index
    %c0_31 = arith.constant 0 : index
    %49 = vector.load %arg1[%c0_30, %c336, %c0_31] : memref<1x784x128xbf16, #tpu.memory_space<vmem>>, vector<1x112x128xbf16>
    %50 = vector.shape_cast %49 : vector<1x112x128xbf16> to vector<112x128xbf16>
    %c0_32 = arith.constant 0 : index
    %c0_33 = arith.constant 0 : index
    %51 = vector.load %arg2[%c0_32, %c0_33] : memref<128x128xbf16, #tpu.memory_space<vmem>>, vector<128x128xbf16>
    %cst_34 = arith.constant dense<0.000000e+00> : vector<112x128xf32>
    %52 = tpu.matmul %50, %51, %cst_34 {dimension_numbers = #tpu.dot_dimension_numbers<[1], [0], [0], [1], [0, 0, 1, 1], [], []>} : vector<112x128xbf16>, vector<128x128xbf16>, vector<112x128xf32> -> vector<112x128xf32>
    %c0_35 = arith.constant 0 : index
    %c0_36 = arith.constant 0 : index
    %53 = vector.load %arg3[%c0_35, %c0_36] : memref<1x128xf32, #tpu.memory_space<vmem>>, vector<1x128xf32>
    %54 = vector.broadcast %53 : vector<1x128xf32> to vector<112x128xf32>
    %55 = arith.addf %52, %54 : vector<112x128xf32>
    %cst_37 = arith.constant 0.000000e+00 : f32
    %56 = vector.broadcast %cst_37 : f32 to vector<112x128xf32>
    %57 = arith.maximumf %55, %56 : vector<112x128xf32>
    %58 = arith.truncf %57 : vector<112x128xf32> to vector<112x128xbf16>
    %c336_38 = arith.constant 336 : index
    %c0_39 = arith.constant 0 : index
    %59 = vector.load %arg13[%c336_38, %c0_39] : memref<784x128xbf16, #tpu.memory_space<vmem>>, vector<112x128xbf16>
    tpu.vector_store %arg13[%c336_38, %c0_39], %58 {strides = array<i32>} : memref<784x128xbf16, #tpu.memory_space<vmem>>, vector<112x128xbf16>,
    %c0_40 = arith.constant 0 : index
    %c448 = arith.constant 448 : index
    %c0_41 = arith.constant 0 : index
    %60 = vector.load %arg1[%c0_40, %c448, %c0_41] : memref<1x784x128xbf16, #tpu.memory_space<vmem>>, vector<1x112x128xbf16>
    %61 = vector.shape_cast %60 : vector<1x112x128xbf16> to vector<112x128xbf16>
    %c0_42 = arith.constant 0 : index
    %c0_43 = arith.constant 0 : index
    %62 = vector.load %arg2[%c0_42, %c0_43] : memref<128x128xbf16, #tpu.memory_space<vmem>>, vector<128x128xbf16>
    %cst_44 = arith.constant dense<0.000000e+00> : vector<112x128xf32>
    %63 = tpu.matmul %61, %62, %cst_44 {dimension_numbers = #tpu.dot_dimension_numbers<[1], [0], [0], [1], [0, 0, 1, 1], [], []>} : vector<112x128xbf16>, vector<128x128xbf16>, vector<112x128xf32> -> vector<112x128xf32>
    %c0_45 = arith.constant 0 : index
    %c0_46 = arith.constant 0 : index
    %64 = vector.load %arg3[%c0_45, %c0_46] : memref<1x128xf32, #tpu.memory_space<vmem>>, vector<1x128xf32>
    %65 = vector.broadcast %64 : vector<1x128xf32> to vector<112x128xf32>
    %66 = arith.addf %63, %65 : vector<112x128xf32>
    %cst_47 = arith.constant 0.000000e+00 : f32
    %67 = vector.broadcast %cst_47 : f32 to vector<112x128xf32>
    %68 = arith.maximumf %66, %67 : vector<112x128xf32>
    %69 = arith.truncf %68 : vector<112x128xf32> to vector<112x128xbf16>
    %c448_48 = arith.constant 448 : index
    %c0_49 = arith.constant 0 : index
    %70 = vector.load %arg13[%c448_48, %c0_49] : memref<784x128xbf16, #tpu.memory_space<vmem>>, vector<112x128xbf16>
    tpu.vector_store %arg13[%c448_48, %c0_49], %69 {strides = array<i32>} : memref<784x128xbf16, #tpu.memory_space<vmem>>, vector<112x128xbf16>,
    %c0_50 = arith.constant 0 : index
    %c560 = arith.constant 560 : index
    %c0_51 = arith.constant 0 : index
    %71 = vector.load %arg1[%c0_50, %c560, %c0_51] : memref<1x784x128xbf16, #tpu.memory_space<vmem>>, vector<1x112x128xbf16>
    %72 = vector.shape_cast %71 : vector<1x112x128xbf16> to vector<112x128xbf16>
    %c0_52 = arith.constant 0 : index
    %c0_53 = arith.constant 0 : index
    %73 = vector.load %arg2[%c0_52, %c0_53] : memref<128x128xbf16, #tpu.memory_space<vmem>>, vector<128x128xbf16>
    %cst_54 = arith.constant dense<0.000000e+00> : vector<112x128xf32>
    %74 = tpu.matmul %72, %73, %cst_54 {dimension_numbers = #tpu.dot_dimension_numbers<[1], [0], [0], [1], [0, 0, 1, 1], [], []>} : vector<112x128xbf16>, vector<128x128xbf16>, vector<112x128xf32> -> vector<112x128xf32>
    %c0_55 = arith.constant 0 : index
    %c0_56 = arith.constant 0 : index
    %75 = vector.load %arg3[%c0_55, %c0_56] : memref<1x128xf32, #tpu.memory_space<vmem>>, vector<1x128xf32>
    %76 = vector.broadcast %75 : vector<1x128xf32> to vector<112x128xf32>
    %77 = arith.addf %74, %76 : vector<112x128xf32>
    %cst_57 = arith.constant 0.000000e+00 : f32
    %78 = vector.broadcast %cst_57 : f32 to vector<112x128xf32>
    %79 = arith.maximumf %77, %78 : vector<112x128xf32>
    %80 = arith.truncf %79 : vector<112x128xf32> to vector<112x128xbf16>
    %c560_58 = arith.constant 560 : index
    %c0_59 = arith.constant 0 : index
    %81 = vector.load %arg13[%c560_58, %c0_59] : memref<784x128xbf16, #tpu.memory_space<vmem>>, vector<112x128xbf16>
    tpu.vector_store %arg13[%c560_58, %c0_59], %80 {strides = array<i32>} : memref<784x128xbf16, #tpu.memory_space<vmem>>, vector<112x128xbf16>,
    %c0_60 = arith.constant 0 : index
    %c672 = arith.constant 672 : index
    %c0_61 = arith.constant 0 : index
    %82 = vector.load %arg1[%c0_60, %c672, %c0_61] : memref<1x784x128xbf16, #tpu.memory_space<vmem>>, vector<1x112x128xbf16>
    %83 = vector.shape_cast %82 : vector<1x112x128xbf16> to vector<112x128xbf16>
    %c0_62 = arith.constant 0 : index
    %c0_63 = arith.constant 0 : index
    %84 = vector.load %arg2[%c0_62, %c0_63] : memref<128x128xbf16, #tpu.memory_space<vmem>>, vector<128x128xbf16>
    %cst_64 = arith.constant dense<0.000000e+00> : vector<112x128xf32>
    %85 = tpu.matmul %83, %84, %cst_64 {dimension_numbers = #tpu.dot_dimension_numbers<[1], [0], [0], [1], [0, 0, 1, 1], [], []>} : vector<112x128xbf16>, vector<128x128xbf16>, vector<112x128xf32> -> vector<112x128xf32>
    %c0_65 = arith.constant 0 : index
    %c0_66 = arith.constant 0 : index
    %86 = vector.load %arg3[%c0_65, %c0_66] : memref<1x128xf32, #tpu.memory_space<vmem>>, vector<1x128xf32>
    %87 = vector.broadcast %86 : vector<1x128xf32> to vector<112x128xf32>
    %88 = arith.addf %85, %87 : vector<112x128xf32>
    %cst_67 = arith.constant 0.000000e+00 : f32
    %89 = vector.broadcast %cst_67 : f32 to vector<112x128xf32>
    %90 = arith.maximumf %88, %89 : vector<112x128xf32>
    %91 = arith.truncf %90 : vector<112x128xf32> to vector<112x128xbf16>
    %c672_68 = arith.constant 672 : index
    %c0_69 = arith.constant 0 : index
    %92 = vector.load %arg13[%c672_68, %c0_69] : memref<784x128xbf16, #tpu.memory_space<vmem>>, vector<112x128xbf16>
    tpu.vector_store %arg13[%c672_68, %c0_69], %91 {strides = array<i32>} : memref<784x128xbf16, #tpu.memory_space<vmem>>, vector<112x128xbf16>,
    %cst_70 = arith.constant 0.000000e+00 : f32
    %93 = vector.broadcast %cst_70 : f32 to vector<16x128xf32>
    %c192 = arith.constant 192 : index
    %c0_71 = arith.constant 0 : index
    %94 = vector.load %arg14[%c192, %c0_71] : memref<208x128xf32, #tpu.memory_space<vmem>>, vector<16x128xf32>
    tpu.vector_store %arg14[%c192, %c0_71], %93 {strides = array<i32>} : memref<208x128xf32, #tpu.memory_space<vmem>>, vector<16x128xf32>,
    %c0_72 = arith.constant 0 : index
    %c0_73 = arith.constant 0 : index
    %95 = vector.load %arg13[%c0_72, %c0_73] : memref<784x128xbf16, #tpu.memory_space<vmem>>, vector<28x128xbf16>
    %c28 = arith.constant 28 : index
    %c0_74 = arith.constant 0 : index
    %96 = vector.load %arg13[%c28, %c0_74] : memref<784x128xbf16, #tpu.memory_space<vmem>>, vector<28x128xbf16>
    %97 = arith.maximumf %95, %96 : vector<28x128xbf16>
    %cst_75 = arith.constant dense<0.000000e+00> : vector<14x128xf32>
    %98 = tpu.matmul %7, %97, %cst_75 {dimension_numbers = #tpu.dot_dimension_numbers<[1], [0], [0], [1], [0, 0, 1, 1], [], []>} : vector<14x28xbf16>, vector<28x128xbf16>, vector<14x128xf32> -> vector<14x128xf32>
    %cst_76 = arith.constant dense<0.000000e+00> : vector<14x128xf32>
    %99 = tpu.matmul %15, %97, %cst_76 {dimension_numbers = #tpu.dot_dimension_numbers<[1], [0], [0], [1], [0, 0, 1, 1], [], []>} : vector<14x28xbf16>, vector<28x128xbf16>, vector<14x128xf32> -> vector<14x128xf32>
    %100 = arith.maximumf %98, %99 : vector<14x128xf32>
    %c0_77 = arith.constant 0 : index
    %c0_78 = arith.constant 0 : index
    %101 = vector.load %arg14[%c0_77, %c0_78] : memref<208x128xf32, #tpu.memory_space<vmem>>, vector<14x128xf32>
    tpu.vector_store %arg14[%c0_77, %c0_78], %100 {strides = array<i32>} : memref<208x128xf32, #tpu.memory_space<vmem>>, vector<14x128xf32>,
    %c56 = arith.constant 56 : index
    %c0_79 = arith.constant 0 : index
    %102 = vector.load %arg13[%c56, %c0_79] : memref<784x128xbf16, #tpu.memory_space<vmem>>, vector<28x128xbf16>
    %c84 = arith.constant 84 : index
    %c0_80 = arith.constant 0 : index
    %103 = vector.load %arg13[%c84, %c0_80] : memref<784x128xbf16, #tpu.memory_space<vmem>>, vector<28x128xbf16>
    %104 = arith.maximumf %102, %103 : vector<28x128xbf16>
    %cst_81 = arith.constant dense<0.000000e+00> : vector<14x128xf32>
    %105 = tpu.matmul %7, %104, %cst_81 {dimension_numbers = #tpu.dot_dimension_numbers<[1], [0], [0], [1], [0, 0, 1, 1], [], []>} : vector<14x28xbf16>, vector<28x128xbf16>, vector<14x128xf32> -> vector<14x128xf32>
    %cst_82 = arith.constant dense<0.000000e+00> : vector<14x128xf32>
    %106 = tpu.matmul %15, %104, %cst_82 {dimension_numbers = #tpu.dot_dimension_numbers<[1], [0], [0], [1], [0, 0, 1, 1], [], []>} : vector<14x28xbf16>, vector<28x128xbf16>, vector<14x128xf32> -> vector<14x128xf32>
    %107 = arith.maximumf %105, %106 : vector<14x128xf32>
    %c14 = arith.constant 14 : index
    %c0_83 = arith.constant 0 : index
    %108 = vector.load %arg14[%c14, %c0_83] : memref<208x128xf32, #tpu.memory_space<vmem>>, vector<14x128xf32>
    tpu.vector_store %arg14[%c14, %c0_83], %107 {strides = array<i32>} : memref<208x128xf32, #tpu.memory_space<vmem>>, vector<14x128xf32>,
    %c112_84 = arith.constant 112 : index
    %c0_85 = arith.constant 0 : index
    %109 = vector.load %arg13[%c112_84, %c0_85] : memref<784x128xbf16, #tpu.memory_space<vmem>>, vector<28x128xbf16>
    %c140 = arith.constant 140 : index
    %c0_86 = arith.constant 0 : index
    %110 = vector.load %arg13[%c140, %c0_86] : memref<784x128xbf16, #tpu.memory_space<vmem>>, vector<28x128xbf16>
    %111 = arith.maximumf %109, %110 : vector<28x128xbf16>
    %cst_87 = arith.constant dense<0.000000e+00> : vector<14x128xf32>
    %112 = tpu.matmul %7, %111, %cst_87 {dimension_numbers = #tpu.dot_dimension_numbers<[1], [0], [0], [1], [0, 0, 1, 1], [], []>} : vector<14x28xbf16>, vector<28x128xbf16>, vector<14x128xf32> -> vector<14x128xf32>
    %cst_88 = arith.constant dense<0.000000e+00> : vector<14x128xf32>
    %113 = tpu.matmul %15, %111, %cst_88 {dimension_numbers = #tpu.dot_dimension_numbers<[1], [0], [0], [1], [0, 0, 1, 1], [], []>} : vector<14x28xbf16>, vector<28x128xbf16>, vector<14x128xf32> -> vector<14x128xf32>
    %114 = arith.maximumf %112, %113 : vector<14x128xf32>
    %c28_89 = arith.constant 28 : index
    %c0_90 = arith.constant 0 : index
    %115 = vector.load %arg14[%c28_89, %c0_90] : memref<208x128xf32, #tpu.memory_space<vmem>>, vector<14x128xf32>
    tpu.vector_store %arg14[%c28_89, %c0_90], %114 {strides = array<i32>} : memref<208x128xf32, #tpu.memory_space<vmem>>, vector<14x128xf32>,
    %c168 = arith.constant 168 : index
    %c0_91 = arith.constant 0 : index
    %116 = vector.load %arg13[%c168, %c0_91] : memref<784x128xbf16, #tpu.memory_space<vmem>>, vector<28x128xbf16>
    %c196 = arith.constant 196 : index
    %c0_92 = arith.constant 0 : index
    %117 = vector.load %arg13[%c196, %c0_92] : memref<784x128xbf16, #tpu.memory_space<vmem>>, vector<28x128xbf16>
    %118 = arith.maximumf %116, %117 : vector<28x128xbf16>
    %cst_93 = arith.constant dense<0.000000e+00> : vector<14x128xf32>
    %119 = tpu.matmul %7, %118, %cst_93 {dimension_numbers = #tpu.dot_dimension_numbers<[1], [0], [0], [1], [0, 0, 1, 1], [], []>} : vector<14x28xbf16>, vector<28x128xbf16>, vector<14x128xf32> -> vector<14x128xf32>
    %cst_94 = arith.constant dense<0.000000e+00> : vector<14x128xf32>
    %120 = tpu.matmul %15, %118, %cst_94 {dimension_numbers = #tpu.dot_dimension_numbers<[1], [0], [0], [1], [0, 0, 1, 1], [], []>} : vector<14x28xbf16>, vector<28x128xbf16>, vector<14x128xf32> -> vector<14x128xf32>
    %121 = arith.maximumf %119, %120 : vector<14x128xf32>
    %c42 = arith.constant 42 : index
    %c0_95 = arith.constant 0 : index
    %122 = vector.load %arg14[%c42, %c0_95] : memref<208x128xf32, #tpu.memory_space<vmem>>, vector<14x128xf32>
    tpu.vector_store %arg14[%c42, %c0_95], %121 {strides = array<i32>} : memref<208x128xf32, #tpu.memory_space<vmem>>, vector<14x128xf32>,
    %c224_96 = arith.constant 224 : index
    %c0_97 = arith.constant 0 : index
    %123 = vector.load %arg13[%c224_96, %c0_97] : memref<784x128xbf16, #tpu.memory_space<vmem>>, vector<28x128xbf16>
    %c252 = arith.constant 252 : index
    %c0_98 = arith.constant 0 : index
    %124 = vector.load %arg13[%c252, %c0_98] : memref<784x128xbf16, #tpu.memory_space<vmem>>, vector<28x128xbf16>
    %125 = arith.maximumf %123, %124 : vector<28x128xbf16>
    %cst_99 = arith.constant dense<0.000000e+00> : vector<14x128xf32>
    %126 = tpu.matmul %7, %125, %cst_99 {dimension_numbers = #tpu.dot_dimension_numbers<[1], [0], [0], [1], [0, 0, 1, 1], [], []>} : vector<14x28xbf16>, vector<28x128xbf16>, vector<14x128xf32> -> vector<14x128xf32>
    %cst_100 = arith.constant dense<0.000000e+00> : vector<14x128xf32>
    %127 = tpu.matmul %15, %125, %cst_100 {dimension_numbers = #tpu.dot_dimension_numbers<[1], [0], [0], [1], [0, 0, 1, 1], [], []>} : vector<14x28xbf16>, vector<28x128xbf16>, vector<14x128xf32> -> vector<14x128xf32>
    %128 = arith.maximumf %126, %127 : vector<14x128xf32>
    %c56_101 = arith.constant 56 : index
    %c0_102 = arith.constant 0 : index
    %129 = vector.load %arg14[%c56_101, %c0_102] : memref<208x128xf32, #tpu.memory_space<vmem>>, vector<14x128xf32>
    tpu.vector_store %arg14[%c56_101, %c0_102], %128 {strides = array<i32>} : memref<208x128xf32, #tpu.memory_space<vmem>>, vector<14x128xf32>,
    %c280 = arith.constant 280 : index
    %c0_103 = arith.constant 0 : index
    %130 = vector.load %arg13[%c280, %c0_103] : memref<784x128xbf16, #tpu.memory_space<vmem>>, vector<28x128xbf16>
    %c308 = arith.constant 308 : index
    %c0_104 = arith.constant 0 : index
    %131 = vector.load %arg13[%c308, %c0_104] : memref<784x128xbf16, #tpu.memory_space<vmem>>, vector<28x128xbf16>
    %132 = arith.maximumf %130, %131 : vector<28x128xbf16>
    %cst_105 = arith.constant dense<0.000000e+00> : vector<14x128xf32>
    %133 = tpu.matmul %7, %132, %cst_105 {dimension_numbers = #tpu.dot_dimension_numbers<[1], [0], [0], [1], [0, 0, 1, 1], [], []>} : vector<14x28xbf16>, vector<28x128xbf16>, vector<14x128xf32> -> vector<14x128xf32>
    %cst_106 = arith.constant dense<0.000000e+00> : vector<14x128xf32>
    %134 = tpu.matmul %15, %132, %cst_106 {dimension_numbers = #tpu.dot_dimension_numbers<[1], [0], [0], [1], [0, 0, 1, 1], [], []>} : vector<14x28xbf16>, vector<28x128xbf16>, vector<14x128xf32> -> vector<14x128xf32>
    %135 = arith.maximumf %133, %134 : vector<14x128xf32>
    %c70 = arith.constant 70 : index
    %c0_107 = arith.constant 0 : index
    %136 = vector.load %arg14[%c70, %c0_107] : memref<208x128xf32, #tpu.memory_space<vmem>>, vector<14x128xf32>
    tpu.vector_store %arg14[%c70, %c0_107], %135 {strides = array<i32>} : memref<208x128xf32, #tpu.memory_space<vmem>>, vector<14x128xf32>,
    %c336_108 = arith.constant 336 : index
    %c0_109 = arith.constant 0 : index
    %137 = vector.load %arg13[%c336_108, %c0_109] : memref<784x128xbf16, #tpu.memory_space<vmem>>, vector<28x128xbf16>
    %c364 = arith.constant 364 : index
    %c0_110 = arith.constant 0 : index
    %138 = vector.load %arg13[%c364, %c0_110] : memref<784x128xbf16, #tpu.memory_space<vmem>>, vector<28x128xbf16>
    %139 = arith.maximumf %137, %138 : vector<28x128xbf16>
    %cst_111 = arith.constant dense<0.000000e+00> : vector<14x128xf32>
    %140 = tpu.matmul %7, %139, %cst_111 {dimension_numbers = #tpu.dot_dimension_numbers<[1], [0], [0], [1], [0, 0, 1, 1], [], []>} : vector<14x28xbf16>, vector<28x128xbf16>, vector<14x128xf32> -> vector<14x128xf32>
    %cst_112 = arith.constant dense<0.000000e+00> : vector<14x128xf32>
    %141 = tpu.matmul %15, %139, %cst_112 {dimension_numbers = #tpu.dot_dimension_numbers<[1], [0], [0], [1], [0, 0, 1, 1], [], []>} : vector<14x28xbf16>, vector<28x128xbf16>, vector<14x128xf32> -> vector<14x128xf32>
    %142 = arith.maximumf %140, %141 : vector<14x128xf32>
    %c84_113 = arith.constant 84 : index
    %c0_114 = arith.constant 0 : index
    %143 = vector.load %arg14[%c84_113, %c0_114] : memref<208x128xf32, #tpu.memory_space<vmem>>, vector<14x128xf32>
    tpu.vector_store %arg14[%c84_113, %c0_114], %142 {strides = array<i32>} : memref<208x128xf32, #tpu.memory_space<vmem>>, vector<14x128xf32>,
    %c392 = arith.constant 392 : index
    %c0_115 = arith.constant 0 : index
    %144 = vector.load %arg13[%c392, %c0_115] : memref<784x128xbf16, #tpu.memory_space<vmem>>, vector<28x128xbf16>
    %c420 = arith.constant 420 : index
    %c0_116 = arith.constant 0 : index
    %145 = vector.load %arg13[%c420, %c0_116] : memref<784x128xbf16, #tpu.memory_space<vmem>>, vector<28x128xbf16>
    %146 = arith.maximumf %144, %145 : vector<28x128xbf16>
    %cst_117 = arith.constant dense<0.000000e+00> : vector<14x128xf32>
    %147 = tpu.matmul %7, %146, %cst_117 {dimension_numbers = #tpu.dot_dimension_numbers<[1], [0], [0], [1], [0, 0, 1, 1], [], []>} : vector<14x28xbf16>, vector<28x128xbf16>, vector<14x128xf32> -> vector<14x128xf32>
    %cst_118 = arith.constant dense<0.000000e+00> : vector<14x128xf32>
    %148 = tpu.matmul %15, %146, %cst_118 {dimension_numbers = #tpu.dot_dimension_numbers<[1], [0], [0], [1], [0, 0, 1, 1], [], []>} : vector<14x28xbf16>, vector<28x128xbf16>, vector<14x128xf32> -> vector<14x128xf32>
    %149 = arith.maximumf %147, %148 : vector<14x128xf32>
    %c98 = arith.constant 98 : index
    %c0_119 = arith.constant 0 : index
    %150 = vector.load %arg14[%c98, %c0_119] : memref<208x128xf32, #tpu.memory_space<vmem>>, vector<14x128xf32>
    tpu.vector_store %arg14[%c98, %c0_119], %149 {strides = array<i32>} : memref<208x128xf32, #tpu.memory_space<vmem>>, vector<14x128xf32>,
    %c448_120 = arith.constant 448 : index
    %c0_121 = arith.constant 0 : index
    %151 = vector.load %arg13[%c448_120, %c0_121] : memref<784x128xbf16, #tpu.memory_space<vmem>>, vector<28x128xbf16>
    %c476 = arith.constant 476 : index
    %c0_122 = arith.constant 0 : index
    %152 = vector.load %arg13[%c476, %c0_122] : memref<784x128xbf16, #tpu.memory_space<vmem>>, vector<28x128xbf16>
    %153 = arith.maximumf %151, %152 : vector<28x128xbf16>
    %cst_123 = arith.constant dense<0.000000e+00> : vector<14x128xf32>
    %154 = tpu.matmul %7, %153, %cst_123 {dimension_numbers = #tpu.dot_dimension_numbers<[1], [0], [0], [1], [0, 0, 1, 1], [], []>} : vector<14x28xbf16>, vector<28x128xbf16>, vector<14x128xf32> -> vector<14x128xf32>
    %cst_124 = arith.constant dense<0.000000e+00> : vector<14x128xf32>
    %155 = tpu.matmul %15, %153, %cst_124 {dimension_numbers = #tpu.dot_dimension_numbers<[1], [0], [0], [1], [0, 0, 1, 1], [], []>} : vector<14x28xbf16>, vector<28x128xbf16>, vector<14x128xf32> -> vector<14x128xf32>
    %156 = arith.maximumf %154, %155 : vector<14x128xf32>
    %c112_125 = arith.constant 112 : index
    %c0_126 = arith.constant 0 : index
    %157 = vector.load %arg14[%c112_125, %c0_126] : memref<208x128xf32, #tpu.memory_space<vmem>>, vector<14x128xf32>
    tpu.vector_store %arg14[%c112_125, %c0_126], %156 {strides = array<i32>} : memref<208x128xf32, #tpu.memory_space<vmem>>, vector<14x128xf32>,
    %c504 = arith.constant 504 : index
    %c0_127 = arith.constant 0 : index
    %158 = vector.load %arg13[%c504, %c0_127] : memref<784x128xbf16, #tpu.memory_space<vmem>>, vector<28x128xbf16>
    %c532 = arith.constant 532 : index
    %c0_128 = arith.constant 0 : index
    %159 = vector.load %arg13[%c532, %c0_128] : memref<784x128xbf16, #tpu.memory_space<vmem>>, vector<28x128xbf16>
    %160 = arith.maximumf %158, %159 : vector<28x128xbf16>
    %cst_129 = arith.constant dense<0.000000e+00> : vector<14x128xf32>
    %161 = tpu.matmul %7, %160, %cst_129 {dimension_numbers = #tpu.dot_dimension_numbers<[1], [0], [0], [1], [0, 0, 1, 1], [], []>} : vector<14x28xbf16>, vector<28x128xbf16>, vector<14x128xf32> -> vector<14x128xf32>
    %cst_130 = arith.constant dense<0.000000e+00> : vector<14x128xf32>
    %162 = tpu.matmul %15, %160, %cst_130 {dimension_numbers = #tpu.dot_dimension_numbers<[1], [0], [0], [1], [0, 0, 1, 1], [], []>} : vector<14x28xbf16>, vector<28x128xbf16>, vector<14x128xf32> -> vector<14x128xf32>
    %163 = arith.maximumf %161, %162 : vector<14x128xf32>
    %c126 = arith.constant 126 : index
    %c0_131 = arith.constant 0 : index
    %164 = vector.load %arg14[%c126, %c0_131] : memref<208x128xf32, #tpu.memory_space<vmem>>, vector<14x128xf32>
    tpu.vector_store %arg14[%c126, %c0_131], %163 {strides = array<i32>} : memref<208x128xf32, #tpu.memory_space<vmem>>, vector<14x128xf32>,
    %c560_132 = arith.constant 560 : index
    %c0_133 = arith.constant 0 : index
    %165 = vector.load %arg13[%c560_132, %c0_133] : memref<784x128xbf16, #tpu.memory_space<vmem>>, vector<28x128xbf16>
    %c588 = arith.constant 588 : index
    %c0_134 = arith.constant 0 : index
    %166 = vector.load %arg13[%c588, %c0_134] : memref<784x128xbf16, #tpu.memory_space<vmem>>, vector<28x128xbf16>
    %167 = arith.maximumf %165, %166 : vector<28x128xbf16>
    %cst_135 = arith.constant dense<0.000000e+00> : vector<14x128xf32>
    %168 = tpu.matmul %7, %167, %cst_135 {dimension_numbers = #tpu.dot_dimension_numbers<[1], [0], [0], [1], [0, 0, 1, 1], [], []>} : vector<14x28xbf16>, vector<28x128xbf16>, vector<14x128xf32> -> vector<14x128xf32>
    %cst_136 = arith.constant dense<0.000000e+00> : vector<14x128xf32>
    %169 = tpu.matmul %15, %167, %cst_136 {dimension_numbers = #tpu.dot_dimension_numbers<[1], [0], [0], [1], [0, 0, 1, 1], [], []>} : vector<14x28xbf16>, vector<28x128xbf16>, vector<14x128xf32> -> vector<14x128xf32>
    %170 = arith.maximumf %168, %169 : vector<14x128xf32>
    %c140_137 = arith.constant 140 : index
    %c0_138 = arith.constant 0 : index
    %171 = vector.load %arg14[%c140_137, %c0_138] : memref<208x128xf32, #tpu.memory_space<vmem>>, vector<14x128xf32>
    tpu.vector_store %arg14[%c140_137, %c0_138], %170 {strides = array<i32>} : memref<208x128xf32, #tpu.memory_space<vmem>>, vector<14x128xf32>,
    %c616 = arith.constant 616 : index
    %c0_139 = arith.constant 0 : index
    %172 = vector.load %arg13[%c616, %c0_139] : memref<784x128xbf16, #tpu.memory_space<vmem>>, vector<28x128xbf16>
    %c644 = arith.constant 644 : index
    %c0_140 = arith.constant 0 : index
    %173 = vector.load %arg13[%c644, %c0_140] : memref<784x128xbf16, #tpu.memory_space<vmem>>, vector<28x128xbf16>
    %174 = arith.maximumf %172, %173 : vector<28x128xbf16>
    %cst_141 = arith.constant dense<0.000000e+00> : vector<14x128xf32>
    %175 = tpu.matmul %7, %174, %cst_141 {dimension_numbers = #tpu.dot_dimension_numbers<[1], [0], [0], [1], [0, 0, 1, 1], [], []>} : vector<14x28xbf16>, vector<28x128xbf16>, vector<14x128xf32> -> vector<14x128xf32>
    %cst_142 = arith.constant dense<0.000000e+00> : vector<14x128xf32>
    %176 = tpu.matmul %15, %174, %cst_142 {dimension_numbers = #tpu.dot_dimension_numbers<[1], [0], [0], [1], [0, 0, 1, 1], [], []>} : vector<14x28xbf16>, vector<28x128xbf16>, vector<14x128xf32> -> vector<14x128xf32>
    %177 = arith.maximumf %175, %176 : vector<14x128xf32>
    %c154 = arith.constant 154 : index
    %c0_143 = arith.constant 0 : index
    %178 = vector.load %arg14[%c154, %c0_143] : memref<208x128xf32, #tpu.memory_space<vmem>>, vector<14x128xf32>
    tpu.vector_store %arg14[%c154, %c0_143], %177 {strides = array<i32>} : memref<208x128xf32, #tpu.memory_space<vmem>>, vector<14x128xf32>,
    %c672_144 = arith.constant 672 : index
    %c0_145 = arith.constant 0 : index
    %179 = vector.load %arg13[%c672_144, %c0_145] : memref<784x128xbf16, #tpu.memory_space<vmem>>, vector<28x128xbf16>
    %c700 = arith.constant 700 : index
    %c0_146 = arith.constant 0 : index
    %180 = vector.load %arg13[%c700, %c0_146] : memref<784x128xbf16, #tpu.memory_space<vmem>>, vector<28x128xbf16>
    %181 = arith.maximumf %179, %180 : vector<28x128xbf16>
    %cst_147 = arith.constant dense<0.000000e+00> : vector<14x128xf32>
    %182 = tpu.matmul %7, %181, %cst_147 {dimension_numbers = #tpu.dot_dimension_numbers<[1], [0], [0], [1], [0, 0, 1, 1], [], []>} : vector<14x28xbf16>, vector<28x128xbf16>, vector<14x128xf32> -> vector<14x128xf32>
    %cst_148 = arith.constant dense<0.000000e+00> : vector<14x128xf32>
    %183 = tpu.matmul %15, %181, %cst_148 {dimension_numbers = #tpu.dot_dimension_numbers<[1], [0], [0], [1], [0, 0, 1, 1], [], []>} : vector<14x28xbf16>, vector<28x128xbf16>, vector<14x128xf32> -> vector<14x128xf32>
    %184 = arith.maximumf %182, %183 : vector<14x128xf32>
    %c168_149 = arith.constant 168 : index
    %c0_150 = arith.constant 0 : index
    %185 = vector.load %arg14[%c168_149, %c0_150] : memref<208x128xf32, #tpu.memory_space<vmem>>, vector<14x128xf32>
    tpu.vector_store %arg14[%c168_149, %c0_150], %184 {strides = array<i32>} : memref<208x128xf32, #tpu.memory_space<vmem>>, vector<14x128xf32>,
    %c728 = arith.constant 728 : index
    %c0_151 = arith.constant 0 : index
    %186 = vector.load %arg13[%c728, %c0_151] : memref<784x128xbf16, #tpu.memory_space<vmem>>, vector<28x128xbf16>
    %c756 = arith.constant 756 : index
    %c0_152 = arith.constant 0 : index
    %187 = vector.load %arg13[%c756, %c0_152] : memref<784x128xbf16, #tpu.memory_space<vmem>>, vector<28x128xbf16>
    %188 = arith.maximumf %186, %187 : vector<28x128xbf16>
    %cst_153 = arith.constant dense<0.000000e+00> : vector<14x128xf32>
    %189 = tpu.matmul %7, %188, %cst_153 {dimension_numbers = #tpu.dot_dimension_numbers<[1], [0], [0], [1], [0, 0, 1, 1], [], []>} : vector<14x28xbf16>, vector<28x128xbf16>, vector<14x128xf32> -> vector<14x128xf32>
    %cst_154 = arith.constant dense<0.000000e+00> : vector<14x128xf32>
    %190 = tpu.matmul %15, %188, %cst_154 {dimension_numbers = #tpu.dot_dimension_numbers<[1], [0], [0], [1], [0, 0, 1, 1], [], []>} : vector<14x28xbf16>, vector<28x128xbf16>, vector<14x128xf32> -> vector<14x128xf32>
    %191 = arith.maximumf %189, %190 : vector<14x128xf32>
    %c182 = arith.constant 182 : index
    %c0_155 = arith.constant 0 : index
    %192 = vector.load %arg14[%c182, %c0_155] : memref<208x128xf32, #tpu.memory_space<vmem>>, vector<14x128xf32>
    tpu.vector_store %arg14[%c182, %c0_155], %191 {strides = array<i32>} : memref<208x128xf32, #tpu.memory_space<vmem>>, vector<14x128xf32>,
    %cst_156 = arith.constant 0.000000e+00 : f32
    %193 = vector.broadcast %cst_156 : f32 to vector<140x128xf32>
    %c0_157 = arith.constant 0 : index
    %c0_158 = arith.constant 0 : index
    %194 = vector.load %arg14[%c0_157, %c0_158] : memref<208x128xf32, #tpu.memory_space<vmem>>, vector<140x128xf32>
    %195 = vector.extract_strided_slice %194 {offsets = [0, 0], sizes = [140, 8], strides = [1, 1]} : vector<140x128xf32> to vector<140x8xf32>
    %196 = arith.truncf %195 : vector<140x8xf32> to vector<140x8xbf16>
    %c0_159 = arith.constant 0 : index
    %c0_160 = arith.constant 0 : index
    %c0_161 = arith.constant 0 : index
    %197 = vector.load %arg4[%c0_159, %c0_160, %c0_161] : memref<25x8x128xbf16, #tpu.memory_space<vmem>>, vector<1x8x128xbf16>
    %198 = vector.shape_cast %197 : vector<1x8x128xbf16> to vector<8x128xbf16>
    %cst_162 = arith.constant dense<0.000000e+00> : vector<140x128xf32>
    %199 = tpu.matmul %196, %198, %cst_162 {dimension_numbers = #tpu.dot_dimension_numbers<[1], [0], [0], [1], [0, 0, 1, 1], [], []>} : vector<140x8xbf16>, vector<8x128xbf16>, vector<140x128xf32> -> vector<140x128xf32>
    %200 = arith.addf %193, %199 : vector<140x128xf32>
    %c1 = arith.constant 1 : index
    %c0_163 = arith.constant 0 : index
    %201 = vector.load %arg14[%c1, %c0_163] : memref<208x128xf32, #tpu.memory_space<vmem>>, vector<140x128xf32>
    %202 = vector.extract_strided_slice %201 {offsets = [0, 0], sizes = [140, 8], strides = [1, 1]} : vector<140x128xf32> to vector<140x8xf32>
    %203 = arith.truncf %202 : vector<140x8xf32> to vector<140x8xbf16>
    %c1_164 = arith.constant 1 : index
    %c0_165 = arith.constant 0 : index
    %c0_166 = arith.constant 0 : index
    %204 = vector.load %arg4[%c1_164, %c0_165, %c0_166] : memref<25x8x128xbf16, #tpu.memory_space<vmem>>, vector<1x8x128xbf16>
    %205 = vector.shape_cast %204 : vector<1x8x128xbf16> to vector<8x128xbf16>
    %cst_167 = arith.constant dense<0.000000e+00> : vector<140x128xf32>
    %206 = tpu.matmul %203, %205, %cst_167 {dimension_numbers = #tpu.dot_dimension_numbers<[1], [0], [0], [1], [0, 0, 1, 1], [], []>} : vector<140x8xbf16>, vector<8x128xbf16>, vector<140x128xf32> -> vector<140x128xf32>
    %207 = arith.addf %200, %206 : vector<140x128xf32>
    %c2 = arith.constant 2 : index
    %c0_168 = arith.constant 0 : index
    %208 = vector.load %arg14[%c2, %c0_168] : memref<208x128xf32, #tpu.memory_space<vmem>>, vector<140x128xf32>
    %209 = vector.extract_strided_slice %208 {offsets = [0, 0], sizes = [140, 8], strides = [1, 1]} : vector<140x128xf32> to vector<140x8xf32>
    %210 = arith.truncf %209 : vector<140x8xf32> to vector<140x8xbf16>
    %c2_169 = arith.constant 2 : index
    %c0_170 = arith.constant 0 : index
    %c0_171 = arith.constant 0 : index
    %211 = vector.load %arg4[%c2_169, %c0_170, %c0_171] : memref<25x8x128xbf16, #tpu.memory_space<vmem>>, vector<1x8x128xbf16>
    %212 = vector.shape_cast %211 : vector<1x8x128xbf16> to vector<8x128xbf16>
    %cst_172 = arith.constant dense<0.000000e+00> : vector<140x128xf32>
    %213 = tpu.matmul %210, %212, %cst_172 {dimension_numbers = #tpu.dot_dimension_numbers<[1], [0], [0], [1], [0, 0, 1, 1], [], []>} : vector<140x8xbf16>, vector<8x128xbf16>, vector<140x128xf32> -> vector<140x128xf32>
    %214 = arith.addf %207, %213 : vector<140x128xf32>
    %c3 = arith.constant 3 : index
    %c0_173 = arith.constant 0 : index
    %215 = vector.load %arg14[%c3, %c0_173] : memref<208x128xf32, #tpu.memory_space<vmem>>, vector<140x128xf32>
    %216 = vector.extract_strided_slice %215 {offsets = [0, 0], sizes = [140, 8], strides = [1, 1]} : vector<140x128xf32> to vector<140x8xf32>
    %217 = arith.truncf %216 : vector<140x8xf32> to vector<140x8xbf16>
    %c3_174 = arith.constant 3 : index
    %c0_175 = arith.constant 0 : index
    %c0_176 = arith.constant 0 : index
    %218 = vector.load %arg4[%c3_174, %c0_175, %c0_176] : memref<25x8x128xbf16, #tpu.memory_space<vmem>>, vector<1x8x128xbf16>
    %219 = vector.shape_cast %218 : vector<1x8x128xbf16> to vector<8x128xbf16>
    %cst_177 = arith.constant dense<0.000000e+00> : vector<140x128xf32>
    %220 = tpu.matmul %217, %219, %cst_177 {dimension_numbers = #tpu.dot_dimension_numbers<[1], [0], [0], [1], [0, 0, 1, 1], [], []>} : vector<140x8xbf16>, vector<8x128xbf16>, vector<140x128xf32> -> vector<140x128xf32>
    %221 = arith.addf %214, %220 : vector<140x128xf32>
    %c4 = arith.constant 4 : index
    %c0_178 = arith.constant 0 : index
    %222 = vector.load %arg14[%c4, %c0_178] : memref<208x128xf32, #tpu.memory_space<vmem>>, vector<140x128xf32>
    %223 = vector.extract_strided_slice %222 {offsets = [0, 0], sizes = [140, 8], strides = [1, 1]} : vector<140x128xf32> to vector<140x8xf32>
    %224 = arith.truncf %223 : vector<140x8xf32> to vector<140x8xbf16>
    %c4_179 = arith.constant 4 : index
    %c0_180 = arith.constant 0 : index
    %c0_181 = arith.constant 0 : index
    %225 = vector.load %arg4[%c4_179, %c0_180, %c0_181] : memref<25x8x128xbf16, #tpu.memory_space<vmem>>, vector<1x8x128xbf16>
    %226 = vector.shape_cast %225 : vector<1x8x128xbf16> to vector<8x128xbf16>
    %cst_182 = arith.constant dense<0.000000e+00> : vector<140x128xf32>
    %227 = tpu.matmul %224, %226, %cst_182 {dimension_numbers = #tpu.dot_dimension_numbers<[1], [0], [0], [1], [0, 0, 1, 1], [], []>} : vector<140x8xbf16>, vector<8x128xbf16>, vector<140x128xf32> -> vector<140x128xf32>
    %228 = arith.addf %221, %227 : vector<140x128xf32>
    %c14_183 = arith.constant 14 : index
    %c0_184 = arith.constant 0 : index
    %229 = vector.load %arg14[%c14_183, %c0_184] : memref<208x128xf32, #tpu.memory_space<vmem>>, vector<140x128xf32>
    %230 = vector.extract_strided_slice %229 {offsets = [0, 0], sizes = [140, 8], strides = [1, 1]} : vector<140x128xf32> to vector<140x8xf32>
    %231 = arith.truncf %230 : vector<140x8xf32> to vector<140x8xbf16>
    %c5 = arith.constant 5 : index
    %c0_185 = arith.constant 0 : index
    %c0_186 = arith.constant 0 : index
    %232 = vector.load %arg4[%c5, %c0_185, %c0_186] : memref<25x8x128xbf16, #tpu.memory_space<vmem>>, vector<1x8x128xbf16>
    %233 = vector.shape_cast %232 : vector<1x8x128xbf16> to vector<8x128xbf16>
    %cst_187 = arith.constant dense<0.000000e+00> : vector<140x128xf32>
    %234 = tpu.matmul %231, %233, %cst_187 {dimension_numbers = #tpu.dot_dimension_numbers<[1], [0], [0], [1], [0, 0, 1, 1], [], []>} : vector<140x8xbf16>, vector<8x128xbf16>, vector<140x128xf32> -> vector<140x128xf32>
    %235 = arith.addf %228, %234 : vector<140x128xf32>
    %c15 = arith.constant 15 : index
    %c0_188 = arith.constant 0 : index
    %236 = vector.load %arg14[%c15, %c0_188] : memref<208x128xf32, #tpu.memory_space<vmem>>, vector<140x128xf32>
    %237 = vector.extract_strided_slice %236 {offsets = [0, 0], sizes = [140, 8], strides = [1, 1]} : vector<140x128xf32> to vector<140x8xf32>
    %238 = arith.truncf %237 : vector<140x8xf32> to vector<140x8xbf16>
    %c6 = arith.constant 6 : index
    %c0_189 = arith.constant 0 : index
    %c0_190 = arith.constant 0 : index
    %239 = vector.load %arg4[%c6, %c0_189, %c0_190] : memref<25x8x128xbf16, #tpu.memory_space<vmem>>, vector<1x8x128xbf16>
    %240 = vector.shape_cast %239 : vector<1x8x128xbf16> to vector<8x128xbf16>
    %cst_191 = arith.constant dense<0.000000e+00> : vector<140x128xf32>
    %241 = tpu.matmul %238, %240, %cst_191 {dimension_numbers = #tpu.dot_dimension_numbers<[1], [0], [0], [1], [0, 0, 1, 1], [], []>} : vector<140x8xbf16>, vector<8x128xbf16>, vector<140x128xf32> -> vector<140x128xf32>
    %242 = arith.addf %235, %241 : vector<140x128xf32>
    %c16 = arith.constant 16 : index
    %c0_192 = arith.constant 0 : index
    %243 = vector.load %arg14[%c16, %c0_192] : memref<208x128xf32, #tpu.memory_space<vmem>>, vector<140x128xf32>
    %244 = vector.extract_strided_slice %243 {offsets = [0, 0], sizes = [140, 8], strides = [1, 1]} : vector<140x128xf32> to vector<140x8xf32>
    %245 = arith.truncf %244 : vector<140x8xf32> to vector<140x8xbf16>
    %c7 = arith.constant 7 : index
    %c0_193 = arith.constant 0 : index
    %c0_194 = arith.constant 0 : index
    %246 = vector.load %arg4[%c7, %c0_193, %c0_194] : memref<25x8x128xbf16, #tpu.memory_space<vmem>>, vector<1x8x128xbf16>
    %247 = vector.shape_cast %246 : vector<1x8x128xbf16> to vector<8x128xbf16>
    %cst_195 = arith.constant dense<0.000000e+00> : vector<140x128xf32>
    %248 = tpu.matmul %245, %247, %cst_195 {dimension_numbers = #tpu.dot_dimension_numbers<[1], [0], [0], [1], [0, 0, 1, 1], [], []>} : vector<140x8xbf16>, vector<8x128xbf16>, vector<140x128xf32> -> vector<140x128xf32>
    %249 = arith.addf %242, %248 : vector<140x128xf32>
    %c17 = arith.constant 17 : index
    %c0_196 = arith.constant 0 : index
    %250 = vector.load %arg14[%c17, %c0_196] : memref<208x128xf32, #tpu.memory_space<vmem>>, vector<140x128xf32>
    %251 = vector.extract_strided_slice %250 {offsets = [0, 0], sizes = [140, 8], strides = [1, 1]} : vector<140x128xf32> to vector<140x8xf32>
    %252 = arith.truncf %251 : vector<140x8xf32> to vector<140x8xbf16>
    %c8 = arith.constant 8 : index
    %c0_197 = arith.constant 0 : index
    %c0_198 = arith.constant 0 : index
    %253 = vector.load %arg4[%c8, %c0_197, %c0_198] : memref<25x8x128xbf16, #tpu.memory_space<vmem>>, vector<1x8x128xbf16>
    %254 = vector.shape_cast %253 : vector<1x8x128xbf16> to vector<8x128xbf16>
    %cst_199 = arith.constant dense<0.000000e+00> : vector<140x128xf32>
    %255 = tpu.matmul %252, %254, %cst_199 {dimension_numbers = #tpu.dot_dimension_numbers<[1], [0], [0], [1], [0, 0, 1, 1], [], []>} : vector<140x8xbf16>, vector<8x128xbf16>, vector<140x128xf32> -> vector<140x128xf32>
    %256 = arith.addf %249, %255 : vector<140x128xf32>
    %c18 = arith.constant 18 : index
    %c0_200 = arith.constant 0 : index
    %257 = vector.load %arg14[%c18, %c0_200] : memref<208x128xf32, #tpu.memory_space<vmem>>, vector<140x128xf32>
    %258 = vector.extract_strided_slice %257 {offsets = [0, 0], sizes = [140, 8], strides = [1, 1]} : vector<140x128xf32> to vector<140x8xf32>
    %259 = arith.truncf %258 : vector<140x8xf32> to vector<140x8xbf16>
    %c9 = arith.constant 9 : index
    %c0_201 = arith.constant 0 : index
    %c0_202 = arith.constant 0 : index
    %260 = vector.load %arg4[%c9, %c0_201, %c0_202] : memref<25x8x128xbf16, #tpu.memory_space<vmem>>, vector<1x8x128xbf16>
    %261 = vector.shape_cast %260 : vector<1x8x128xbf16> to vector<8x128xbf16>
    %cst_203 = arith.constant dense<0.000000e+00> : vector<140x128xf32>
    %262 = tpu.matmul %259, %261, %cst_203 {dimension_numbers = #tpu.dot_dimension_numbers<[1], [0], [0], [1], [0, 0, 1, 1], [], []>} : vector<140x8xbf16>, vector<8x128xbf16>, vector<140x128xf32> -> vector<140x128xf32>
    %263 = arith.addf %256, %262 : vector<140x128xf32>
    %c28_204 = arith.constant 28 : index
    %c0_205 = arith.constant 0 : index
    %264 = vector.load %arg14[%c28_204, %c0_205] : memref<208x128xf32, #tpu.memory_space<vmem>>, vector<140x128xf32>
    %265 = vector.extract_strided_slice %264 {offsets = [0, 0], sizes = [140, 8], strides = [1, 1]} : vector<140x128xf32> to vector<140x8xf32>
    %266 = arith.truncf %265 : vector<140x8xf32> to vector<140x8xbf16>
    %c10 = arith.constant 10 : index
    %c0_206 = arith.constant 0 : index
    %c0_207 = arith.constant 0 : index
    %267 = vector.load %arg4[%c10, %c0_206, %c0_207] : memref<25x8x128xbf16, #tpu.memory_space<vmem>>, vector<1x8x128xbf16>
    %268 = vector.shape_cast %267 : vector<1x8x128xbf16> to vector<8x128xbf16>
    %cst_208 = arith.constant dense<0.000000e+00> : vector<140x128xf32>
    %269 = tpu.matmul %266, %268, %cst_208 {dimension_numbers = #tpu.dot_dimension_numbers<[1], [0], [0], [1], [0, 0, 1, 1], [], []>} : vector<140x8xbf16>, vector<8x128xbf16>, vector<140x128xf32> -> vector<140x128xf32>
    %270 = arith.addf %263, %269 : vector<140x128xf32>
    %c29 = arith.constant 29 : index
    %c0_209 = arith.constant 0 : index
    %271 = vector.load %arg14[%c29, %c0_209] : memref<208x128xf32, #tpu.memory_space<vmem>>, vector<140x128xf32>
    %272 = vector.extract_strided_slice %271 {offsets = [0, 0], sizes = [140, 8], strides = [1, 1]} : vector<140x128xf32> to vector<140x8xf32>
    %273 = arith.truncf %272 : vector<140x8xf32> to vector<140x8xbf16>
    %c11 = arith.constant 11 : index
    %c0_210 = arith.constant 0 : index
    %c0_211 = arith.constant 0 : index
    %274 = vector.load %arg4[%c11, %c0_210, %c0_211] : memref<25x8x128xbf16, #tpu.memory_space<vmem>>, vector<1x8x128xbf16>
    %275 = vector.shape_cast %274 : vector<1x8x128xbf16> to vector<8x128xbf16>
    %cst_212 = arith.constant dense<0.000000e+00> : vector<140x128xf32>
    %276 = tpu.matmul %273, %275, %cst_212 {dimension_numbers = #tpu.dot_dimension_numbers<[1], [0], [0], [1], [0, 0, 1, 1], [], []>} : vector<140x8xbf16>, vector<8x128xbf16>, vector<140x128xf32> -> vector<140x128xf32>
    %277 = arith.addf %270, %276 : vector<140x128xf32>
    %c30 = arith.constant 30 : index
    %c0_213 = arith.constant 0 : index
    %278 = vector.load %arg14[%c30, %c0_213] : memref<208x128xf32, #tpu.memory_space<vmem>>, vector<140x128xf32>
    %279 = vector.extract_strided_slice %278 {offsets = [0, 0], sizes = [140, 8], strides = [1, 1]} : vector<140x128xf32> to vector<140x8xf32>
    %280 = arith.truncf %279 : vector<140x8xf32> to vector<140x8xbf16>
    %c12 = arith.constant 12 : index
    %c0_214 = arith.constant 0 : index
    %c0_215 = arith.constant 0 : index
    %281 = vector.load %arg4[%c12, %c0_214, %c0_215] : memref<25x8x128xbf16, #tpu.memory_space<vmem>>, vector<1x8x128xbf16>
    %282 = vector.shape_cast %281 : vector<1x8x128xbf16> to vector<8x128xbf16>
    %cst_216 = arith.constant dense<0.000000e+00> : vector<140x128xf32>
    %283 = tpu.matmul %280, %282, %cst_216 {dimension_numbers = #tpu.dot_dimension_numbers<[1], [0], [0], [1], [0, 0, 1, 1], [], []>} : vector<140x8xbf16>, vector<8x128xbf16>, vector<140x128xf32> -> vector<140x128xf32>
    %284 = arith.addf %277, %283 : vector<140x128xf32>
    %c31 = arith.constant 31 : index
    %c0_217 = arith.constant 0 : index
    %285 = vector.load %arg14[%c31, %c0_217] : memref<208x128xf32, #tpu.memory_space<vmem>>, vector<140x128xf32>
    %286 = vector.extract_strided_slice %285 {offsets = [0, 0], sizes = [140, 8], strides = [1, 1]} : vector<140x128xf32> to vector<140x8xf32>
    %287 = arith.truncf %286 : vector<140x8xf32> to vector<140x8xbf16>
    %c13 = arith.constant 13 : index
    %c0_218 = arith.constant 0 : index
    %c0_219 = arith.constant 0 : index
    %288 = vector.load %arg4[%c13, %c0_218, %c0_219] : memref<25x8x128xbf16, #tpu.memory_space<vmem>>, vector<1x8x128xbf16>
    %289 = vector.shape_cast %288 : vector<1x8x128xbf16> to vector<8x128xbf16>
    %cst_220 = arith.constant dense<0.000000e+00> : vector<140x128xf32>
    %290 = tpu.matmul %287, %289, %cst_220 {dimension_numbers = #tpu.dot_dimension_numbers<[1], [0], [0], [1], [0, 0, 1, 1], [], []>} : vector<140x8xbf16>, vector<8x128xbf16>, vector<140x128xf32> -> vector<140x128xf32>
    %291 = arith.addf %284, %290 : vector<140x128xf32>
    %c32 = arith.constant 32 : index
    %c0_221 = arith.constant 0 : index
    %292 = vector.load %arg14[%c32, %c0_221] : memref<208x128xf32, #tpu.memory_space<vmem>>, vector<140x128xf32>
    %293 = vector.extract_strided_slice %292 {offsets = [0, 0], sizes = [140, 8], strides = [1, 1]} : vector<140x128xf32> to vector<140x8xf32>
    %294 = arith.truncf %293 : vector<140x8xf32> to vector<140x8xbf16>
    %c14_222 = arith.constant 14 : index
    %c0_223 = arith.constant 0 : index
    %c0_224 = arith.constant 0 : index
    %295 = vector.load %arg4[%c14_222, %c0_223, %c0_224] : memref<25x8x128xbf16, #tpu.memory_space<vmem>>, vector<1x8x128xbf16>
    %296 = vector.shape_cast %295 : vector<1x8x128xbf16> to vector<8x128xbf16>
    %cst_225 = arith.constant dense<0.000000e+00> : vector<140x128xf32>
    %297 = tpu.matmul %294, %296, %cst_225 {dimension_numbers = #tpu.dot_dimension_numbers<[1], [0], [0], [1], [0, 0, 1, 1], [], []>} : vector<140x8xbf16>, vector<8x128xbf16>, vector<140x128xf32> -> vector<140x128xf32>
    %298 = arith.addf %291, %297 : vector<140x128xf32>
    %c42_226 = arith.constant 42 : index
    %c0_227 = arith.constant 0 : index
    %299 = vector.load %arg14[%c42_226, %c0_227] : memref<208x128xf32, #tpu.memory_space<vmem>>, vector<140x128xf32>
    %300 = vector.extract_strided_slice %299 {offsets = [0, 0], sizes = [140, 8], strides = [1, 1]} : vector<140x128xf32> to vector<140x8xf32>
    %301 = arith.truncf %300 : vector<140x8xf32> to vector<140x8xbf16>
    %c15_228 = arith.constant 15 : index
    %c0_229 = arith.constant 0 : index
    %c0_230 = arith.constant 0 : index
    %302 = vector.load %arg4[%c15_228, %c0_229, %c0_230] : memref<25x8x128xbf16, #tpu.memory_space<vmem>>, vector<1x8x128xbf16>
    %303 = vector.shape_cast %302 : vector<1x8x128xbf16> to vector<8x128xbf16>
    %cst_231 = arith.constant dense<0.000000e+00> : vector<140x128xf32>
    %304 = tpu.matmul %301, %303, %cst_231 {dimension_numbers = #tpu.dot_dimension_numbers<[1], [0], [0], [1], [0, 0, 1, 1], [], []>} : vector<140x8xbf16>, vector<8x128xbf16>, vector<140x128xf32> -> vector<140x128xf32>
    %305 = arith.addf %298, %304 : vector<140x128xf32>
    %c43 = arith.constant 43 : index
    %c0_232 = arith.constant 0 : index
    %306 = vector.load %arg14[%c43, %c0_232] : memref<208x128xf32, #tpu.memory_space<vmem>>, vector<140x128xf32>
    %307 = vector.extract_strided_slice %306 {offsets = [0, 0], sizes = [140, 8], strides = [1, 1]} : vector<140x128xf32> to vector<140x8xf32>
    %308 = arith.truncf %307 : vector<140x8xf32> to vector<140x8xbf16>
    %c16_233 = arith.constant 16 : index
    %c0_234 = arith.constant 0 : index
    %c0_235 = arith.constant 0 : index
    %309 = vector.load %arg4[%c16_233, %c0_234, %c0_235] : memref<25x8x128xbf16, #tpu.memory_space<vmem>>, vector<1x8x128xbf16>
    %310 = vector.shape_cast %309 : vector<1x8x128xbf16> to vector<8x128xbf16>
    %cst_236 = arith.constant dense<0.000000e+00> : vector<140x128xf32>
    %311 = tpu.matmul %308, %310, %cst_236 {dimension_numbers = #tpu.dot_dimension_numbers<[1], [0], [0], [1], [0, 0, 1, 1], [], []>} : vector<140x8xbf16>, vector<8x128xbf16>, vector<140x128xf32> -> vector<140x128xf32>
    %312 = arith.addf %305, %311 : vector<140x128xf32>
    %c44 = arith.constant 44 : index
    %c0_237 = arith.constant 0 : index
    %313 = vector.load %arg14[%c44, %c0_237] : memref<208x128xf32, #tpu.memory_space<vmem>>, vector<140x128xf32>
    %314 = vector.extract_strided_slice %313 {offsets = [0, 0], sizes = [140, 8], strides = [1, 1]} : vector<140x128xf32> to vector<140x8xf32>
    %315 = arith.truncf %314 : vector<140x8xf32> to vector<140x8xbf16>
    %c17_238 = arith.constant 17 : index
    %c0_239 = arith.constant 0 : index
    %c0_240 = arith.constant 0 : index
    %316 = vector.load %arg4[%c17_238, %c0_239, %c0_240] : memref<25x8x128xbf16, #tpu.memory_space<vmem>>, vector<1x8x128xbf16>
    %317 = vector.shape_cast %316 : vector<1x8x128xbf16> to vector<8x128xbf16>
    %cst_241 = arith.constant dense<0.000000e+00> : vector<140x128xf32>
    %318 = tpu.matmul %315, %317, %cst_241 {dimension_numbers = #tpu.dot_dimension_numbers<[1], [0], [0], [1], [0, 0, 1, 1], [], []>} : vector<140x8xbf16>, vector<8x128xbf16>, vector<140x128xf32> -> vector<140x128xf32>
    %319 = arith.addf %312, %318 : vector<140x128xf32>
    %c45 = arith.constant 45 : index
    %c0_242 = arith.constant 0 : index
    %320 = vector.load %arg14[%c45, %c0_242] : memref<208x128xf32, #tpu.memory_space<vmem>>, vector<140x128xf32>
    %321 = vector.extract_strided_slice %320 {offsets = [0, 0], sizes = [140, 8], strides = [1, 1]} : vector<140x128xf32> to vector<140x8xf32>
    %322 = arith.truncf %321 : vector<140x8xf32> to vector<140x8xbf16>
    %c18_243 = arith.constant 18 : index
    %c0_244 = arith.constant 0 : index
    %c0_245 = arith.constant 0 : index
    %323 = vector.load %arg4[%c18_243, %c0_244, %c0_245] : memref<25x8x128xbf16, #tpu.memory_space<vmem>>, vector<1x8x128xbf16>
    %324 = vector.shape_cast %323 : vector<1x8x128xbf16> to vector<8x128xbf16>
    %cst_246 = arith.constant dense<0.000000e+00> : vector<140x128xf32>
    %325 = tpu.matmul %322, %324, %cst_246 {dimension_numbers = #tpu.dot_dimension_numbers<[1], [0], [0], [1], [0, 0, 1, 1], [], []>} : vector<140x8xbf16>, vector<8x128xbf16>, vector<140x128xf32> -> vector<140x128xf32>
    %326 = arith.addf %319, %325 : vector<140x128xf32>
    %c46 = arith.constant 46 : index
    %c0_247 = arith.constant 0 : index
    %327 = vector.load %arg14[%c46, %c0_247] : memref<208x128xf32, #tpu.memory_space<vmem>>, vector<140x128xf32>
    %328 = vector.extract_strided_slice %327 {offsets = [0, 0], sizes = [140, 8], strides = [1, 1]} : vector<140x128xf32> to vector<140x8xf32>
    %329 = arith.truncf %328 : vector<140x8xf32> to vector<140x8xbf16>
    %c19 = arith.constant 19 : index
    %c0_248 = arith.constant 0 : index
    %c0_249 = arith.constant 0 : index
    %330 = vector.load %arg4[%c19, %c0_248, %c0_249] : memref<25x8x128xbf16, #tpu.memory_space<vmem>>, vector<1x8x128xbf16>
    %331 = vector.shape_cast %330 : vector<1x8x128xbf16> to vector<8x128xbf16>
    %cst_250 = arith.constant dense<0.000000e+00> : vector<140x128xf32>
    %332 = tpu.matmul %329, %331, %cst_250 {dimension_numbers = #tpu.dot_dimension_numbers<[1], [0], [0], [1], [0, 0, 1, 1], [], []>} : vector<140x8xbf16>, vector<8x128xbf16>, vector<140x128xf32> -> vector<140x128xf32>
    %333 = arith.addf %326, %332 : vector<140x128xf32>
    %c56_251 = arith.constant 56 : index
    %c0_252 = arith.constant 0 : index
    %334 = vector.load %arg14[%c56_251, %c0_252] : memref<208x128xf32, #tpu.memory_space<vmem>>, vector<140x128xf32>
    %335 = vector.extract_strided_slice %334 {offsets = [0, 0], sizes = [140, 8], strides = [1, 1]} : vector<140x128xf32> to vector<140x8xf32>
    %336 = arith.truncf %335 : vector<140x8xf32> to vector<140x8xbf16>
    %c20 = arith.constant 20 : index
    %c0_253 = arith.constant 0 : index
    %c0_254 = arith.constant 0 : index
    %337 = vector.load %arg4[%c20, %c0_253, %c0_254] : memref<25x8x128xbf16, #tpu.memory_space<vmem>>, vector<1x8x128xbf16>
    %338 = vector.shape_cast %337 : vector<1x8x128xbf16> to vector<8x128xbf16>
    %cst_255 = arith.constant dense<0.000000e+00> : vector<140x128xf32>
    %339 = tpu.matmul %336, %338, %cst_255 {dimension_numbers = #tpu.dot_dimension_numbers<[1], [0], [0], [1], [0, 0, 1, 1], [], []>} : vector<140x8xbf16>, vector<8x128xbf16>, vector<140x128xf32> -> vector<140x128xf32>
    %340 = arith.addf %333, %339 : vector<140x128xf32>
    %c57 = arith.constant 57 : index
    %c0_256 = arith.constant 0 : index
    %341 = vector.load %arg14[%c57, %c0_256] : memref<208x128xf32, #tpu.memory_space<vmem>>, vector<140x128xf32>
    %342 = vector.extract_strided_slice %341 {offsets = [0, 0], sizes = [140, 8], strides = [1, 1]} : vector<140x128xf32> to vector<140x8xf32>
    %343 = arith.truncf %342 : vector<140x8xf32> to vector<140x8xbf16>
    %c21 = arith.constant 21 : index
    %c0_257 = arith.constant 0 : index
    %c0_258 = arith.constant 0 : index
    %344 = vector.load %arg4[%c21, %c0_257, %c0_258] : memref<25x8x128xbf16, #tpu.memory_space<vmem>>, vector<1x8x128xbf16>
    %345 = vector.shape_cast %344 : vector<1x8x128xbf16> to vector<8x128xbf16>
    %cst_259 = arith.constant dense<0.000000e+00> : vector<140x128xf32>
    %346 = tpu.matmul %343, %345, %cst_259 {dimension_numbers = #tpu.dot_dimension_numbers<[1], [0], [0], [1], [0, 0, 1, 1], [], []>} : vector<140x8xbf16>, vector<8x128xbf16>, vector<140x128xf32> -> vector<140x128xf32>
    %347 = arith.addf %340, %346 : vector<140x128xf32>
    %c58 = arith.constant 58 : index
    %c0_260 = arith.constant 0 : index
    %348 = vector.load %arg14[%c58, %c0_260] : memref<208x128xf32, #tpu.memory_space<vmem>>, vector<140x128xf32>
    %349 = vector.extract_strided_slice %348 {offsets = [0, 0], sizes = [140, 8], strides = [1, 1]} : vector<140x128xf32> to vector<140x8xf32>
    %350 = arith.truncf %349 : vector<140x8xf32> to vector<140x8xbf16>
    %c22 = arith.constant 22 : index
    %c0_261 = arith.constant 0 : index
    %c0_262 = arith.constant 0 : index
    %351 = vector.load %arg4[%c22, %c0_261, %c0_262] : memref<25x8x128xbf16, #tpu.memory_space<vmem>>, vector<1x8x128xbf16>
    %352 = vector.shape_cast %351 : vector<1x8x128xbf16> to vector<8x128xbf16>
    %cst_263 = arith.constant dense<0.000000e+00> : vector<140x128xf32>
    %353 = tpu.matmul %350, %352, %cst_263 {dimension_numbers = #tpu.dot_dimension_numbers<[1], [0], [0], [1], [0, 0, 1, 1], [], []>} : vector<140x8xbf16>, vector<8x128xbf16>, vector<140x128xf32> -> vector<140x128xf32>
    %354 = arith.addf %347, %353 : vector<140x128xf32>
    %c59 = arith.constant 59 : index
    %c0_264 = arith.constant 0 : index
    %355 = vector.load %arg14[%c59, %c0_264] : memref<208x128xf32, #tpu.memory_space<vmem>>, vector<140x128xf32>
    %356 = vector.extract_strided_slice %355 {offsets = [0, 0], sizes = [140, 8], strides = [1, 1]} : vector<140x128xf32> to vector<140x8xf32>
    %357 = arith.truncf %356 : vector<140x8xf32> to vector<140x8xbf16>
    %c23 = arith.constant 23 : index
    %c0_265 = arith.constant 0 : index
    %c0_266 = arith.constant 0 : index
    %358 = vector.load %arg4[%c23, %c0_265, %c0_266] : memref<25x8x128xbf16, #tpu.memory_space<vmem>>, vector<1x8x128xbf16>
    %359 = vector.shape_cast %358 : vector<1x8x128xbf16> to vector<8x128xbf16>
    %cst_267 = arith.constant dense<0.000000e+00> : vector<140x128xf32>
    %360 = tpu.matmul %357, %359, %cst_267 {dimension_numbers = #tpu.dot_dimension_numbers<[1], [0], [0], [1], [0, 0, 1, 1], [], []>} : vector<140x8xbf16>, vector<8x128xbf16>, vector<140x128xf32> -> vector<140x128xf32>
    %361 = arith.addf %354, %360 : vector<140x128xf32>
    %c60 = arith.constant 60 : index
    %c0_268 = arith.constant 0 : index
    %362 = vector.load %arg14[%c60, %c0_268] : memref<208x128xf32, #tpu.memory_space<vmem>>, vector<140x128xf32>
    %363 = vector.extract_strided_slice %362 {offsets = [0, 0], sizes = [140, 8], strides = [1, 1]} : vector<140x128xf32> to vector<140x8xf32>
    %364 = arith.truncf %363 : vector<140x8xf32> to vector<140x8xbf16>
    %c24 = arith.constant 24 : index
    %c0_269 = arith.constant 0 : index
    %c0_270 = arith.constant 0 : index
    %365 = vector.load %arg4[%c24, %c0_269, %c0_270] : memref<25x8x128xbf16, #tpu.memory_space<vmem>>, vector<1x8x128xbf16>
    %366 = vector.shape_cast %365 : vector<1x8x128xbf16> to vector<8x128xbf16>
    %cst_271 = arith.constant dense<0.000000e+00> : vector<140x128xf32>
    %367 = tpu.matmul %364, %366, %cst_271 {dimension_numbers = #tpu.dot_dimension_numbers<[1], [0], [0], [1], [0, 0, 1, 1], [], []>} : vector<140x8xbf16>, vector<8x128xbf16>, vector<140x128xf32> -> vector<140x128xf32>
    %368 = arith.addf %361, %367 : vector<140x128xf32>
    %c0_272 = arith.constant 0 : index
    %c0_273 = arith.constant 0 : index
    %369 = vector.load %arg5[%c0_272, %c0_273] : memref<1x128xf32, #tpu.memory_space<vmem>>, vector<1x128xf32>
    %370 = vector.broadcast %369 : vector<1x128xf32> to vector<140x128xf32>
    %371 = arith.addf %368, %370 : vector<140x128xf32>
    %cst_274 = arith.constant 0.000000e+00 : f32
    %372 = vector.broadcast %cst_274 : f32 to vector<140x128xf32>
    %373 = arith.maximumf %371, %372 : vector<140x128xf32>
    %cst_275 = arith.constant 0.000000e+00 : f32
    %374 = vector.broadcast %cst_275 : f32 to vector<1x128xf32>
    %375 = vector.extract_strided_slice %373 {offsets = [0, 0], sizes = [14, 128], strides = [1, 1]} : vector<140x128xf32> to vector<14x128xf32>
    %376 = vector.extract_strided_slice %373 {offsets = [14, 0], sizes = [14, 128], strides = [1, 1]} : vector<140x128xf32> to vector<14x128xf32>
    %377 = arith.maximumf %375, %376 : vector<14x128xf32>
    %378 = vector.extract_strided_slice %377 {offsets = [0, 0], sizes = [1, 128], strides = [1, 1]} : vector<14x128xf32> to vector<1x128xf32>
    %379 = vector.extract_strided_slice %377 {offsets = [1, 0], sizes = [1, 128], strides = [1, 1]} : vector<14x128xf32> to vector<1x128xf32>
    %380 = arith.maximumf %378, %379 : vector<1x128xf32>
    %381 = vector.extract_strided_slice %380 {offsets = [0, 0], sizes = [1, 16], strides = [1, 1]} : vector<1x128xf32> to vector<1x16xf32>
    %382 = arith.truncf %381 : vector<1x16xf32> to vector<1x16xbf16>
    %c0_276 = arith.constant 0 : index
    %c0_277 = arith.constant 0 : index
    %c0_278 = arith.constant 0 : index
    %383 = vector.load %arg6[%c0_276, %c0_277, %c0_278] : memref<25x16x128xbf16, #tpu.memory_space<vmem>>, vector<1x16x128xbf16>
    %384 = vector.shape_cast %383 : vector<1x16x128xbf16> to vector<16x128xbf16>
    %cst_279 = arith.constant dense<0.000000e+00> : vector<1x128xf32>
    %385 = tpu.matmul %382, %384, %cst_279 {dimension_numbers = #tpu.dot_dimension_numbers<[1], [0], [0], [1], [0, 0, 1, 1], [], []>} : vector<1x16xbf16>, vector<16x128xbf16>, vector<1x128xf32> -> vector<1x128xf32>
    %386 = arith.addf %374, %385 : vector<1x128xf32>
    %387 = vector.extract_strided_slice %377 {offsets = [2, 0], sizes = [1, 128], strides = [1, 1]} : vector<14x128xf32> to vector<1x128xf32>
    %388 = vector.extract_strided_slice %377 {offsets = [3, 0], sizes = [1, 128], strides = [1, 1]} : vector<14x128xf32> to vector<1x128xf32>
    %389 = arith.maximumf %387, %388 : vector<1x128xf32>
    %390 = vector.extract_strided_slice %389 {offsets = [0, 0], sizes = [1, 16], strides = [1, 1]} : vector<1x128xf32> to vector<1x16xf32>
    %391 = arith.truncf %390 : vector<1x16xf32> to vector<1x16xbf16>
    %c1_280 = arith.constant 1 : index
    %c0_281 = arith.constant 0 : index
    %c0_282 = arith.constant 0 : index
    %392 = vector.load %arg6[%c1_280, %c0_281, %c0_282] : memref<25x16x128xbf16, #tpu.memory_space<vmem>>, vector<1x16x128xbf16>
    %393 = vector.shape_cast %392 : vector<1x16x128xbf16> to vector<16x128xbf16>
    %cst_283 = arith.constant dense<0.000000e+00> : vector<1x128xf32>
    %394 = tpu.matmul %391, %393, %cst_283 {dimension_numbers = #tpu.dot_dimension_numbers<[1], [0], [0], [1], [0, 0, 1, 1], [], []>} : vector<1x16xbf16>, vector<16x128xbf16>, vector<1x128xf32> -> vector<1x128xf32>
    %395 = arith.addf %386, %394 : vector<1x128xf32>
    %396 = vector.extract_strided_slice %377 {offsets = [4, 0], sizes = [1, 128], strides = [1, 1]} : vector<14x128xf32> to vector<1x128xf32>
    %397 = vector.extract_strided_slice %377 {offsets = [5, 0], sizes = [1, 128], strides = [1, 1]} : vector<14x128xf32> to vector<1x128xf32>
    %398 = arith.maximumf %396, %397 : vector<1x128xf32>
    %399 = vector.extract_strided_slice %398 {offsets = [0, 0], sizes = [1, 16], strides = [1, 1]} : vector<1x128xf32> to vector<1x16xf32>
    %400 = arith.truncf %399 : vector<1x16xf32> to vector<1x16xbf16>
    %c2_284 = arith.constant 2 : index
    %c0_285 = arith.constant 0 : index
    %c0_286 = arith.constant 0 : index
    %401 = vector.load %arg6[%c2_284, %c0_285, %c0_286] : memref<25x16x128xbf16, #tpu.memory_space<vmem>>, vector<1x16x128xbf16>
    %402 = vector.shape_cast %401 : vector<1x16x128xbf16> to vector<16x128xbf16>
    %cst_287 = arith.constant dense<0.000000e+00> : vector<1x128xf32>
    %403 = tpu.matmul %400, %402, %cst_287 {dimension_numbers = #tpu.dot_dimension_numbers<[1], [0], [0], [1], [0, 0, 1, 1], [], []>} : vector<1x16xbf16>, vector<16x128xbf16>, vector<1x128xf32> -> vector<1x128xf32>
    %404 = arith.addf %395, %403 : vector<1x128xf32>
    %405 = vector.extract_strided_slice %377 {offsets = [6, 0], sizes = [1, 128], strides = [1, 1]} : vector<14x128xf32> to vector<1x128xf32>
    %406 = vector.extract_strided_slice %377 {offsets = [7, 0], sizes = [1, 128], strides = [1, 1]} : vector<14x128xf32> to vector<1x128xf32>
    %407 = arith.maximumf %405, %406 : vector<1x128xf32>
    %408 = vector.extract_strided_slice %407 {offsets = [0, 0], sizes = [1, 16], strides = [1, 1]} : vector<1x128xf32> to vector<1x16xf32>
    %409 = arith.truncf %408 : vector<1x16xf32> to vector<1x16xbf16>
    %c3_288 = arith.constant 3 : index
    %c0_289 = arith.constant 0 : index
    %c0_290 = arith.constant 0 : index
    %410 = vector.load %arg6[%c3_288, %c0_289, %c0_290] : memref<25x16x128xbf16, #tpu.memory_space<vmem>>, vector<1x16x128xbf16>
    %411 = vector.shape_cast %410 : vector<1x16x128xbf16> to vector<16x128xbf16>
    %cst_291 = arith.constant dense<0.000000e+00> : vector<1x128xf32>
    %412 = tpu.matmul %409, %411, %cst_291 {dimension_numbers = #tpu.dot_dimension_numbers<[1], [0], [0], [1], [0, 0, 1, 1], [], []>} : vector<1x16xbf16>, vector<16x128xbf16>, vector<1x128xf32> -> vector<1x128xf32>
    %413 = arith.addf %404, %412 : vector<1x128xf32>
    %414 = vector.extract_strided_slice %377 {offsets = [8, 0], sizes = [1, 128], strides = [1, 1]} : vector<14x128xf32> to vector<1x128xf32>
    %415 = vector.extract_strided_slice %377 {offsets = [9, 0], sizes = [1, 128], strides = [1, 1]} : vector<14x128xf32> to vector<1x128xf32>
    %416 = arith.maximumf %414, %415 : vector<1x128xf32>
    %417 = vector.extract_strided_slice %416 {offsets = [0, 0], sizes = [1, 16], strides = [1, 1]} : vector<1x128xf32> to vector<1x16xf32>
    %418 = arith.truncf %417 : vector<1x16xf32> to vector<1x16xbf16>
    %c4_292 = arith.constant 4 : index
    %c0_293 = arith.constant 0 : index
    %c0_294 = arith.constant 0 : index
    %419 = vector.load %arg6[%c4_292, %c0_293, %c0_294] : memref<25x16x128xbf16, #tpu.memory_space<vmem>>, vector<1x16x128xbf16>
    %420 = vector.shape_cast %419 : vector<1x16x128xbf16> to vector<16x128xbf16>
    %cst_295 = arith.constant dense<0.000000e+00> : vector<1x128xf32>
    %421 = tpu.matmul %418, %420, %cst_295 {dimension_numbers = #tpu.dot_dimension_numbers<[1], [0], [0], [1], [0, 0, 1, 1], [], []>} : vector<1x16xbf16>, vector<16x128xbf16>, vector<1x128xf32> -> vector<1x128xf32>
    %422 = arith.addf %413, %421 : vector<1x128xf32>
    %423 = vector.extract_strided_slice %373 {offsets = [28, 0], sizes = [14, 128], strides = [1, 1]} : vector<140x128xf32> to vector<14x128xf32>
    %424 = vector.extract_strided_slice %373 {offsets = [42, 0], sizes = [14, 128], strides = [1, 1]} : vector<140x128xf32> to vector<14x128xf32>
    %425 = arith.maximumf %423, %424 : vector<14x128xf32>
    %426 = vector.extract_strided_slice %425 {offsets = [0, 0], sizes = [1, 128], strides = [1, 1]} : vector<14x128xf32> to vector<1x128xf32>
    %427 = vector.extract_strided_slice %425 {offsets = [1, 0], sizes = [1, 128], strides = [1, 1]} : vector<14x128xf32> to vector<1x128xf32>
    %428 = arith.maximumf %426, %427 : vector<1x128xf32>
    %429 = vector.extract_strided_slice %428 {offsets = [0, 0], sizes = [1, 16], strides = [1, 1]} : vector<1x128xf32> to vector<1x16xf32>
    %430 = arith.truncf %429 : vector<1x16xf32> to vector<1x16xbf16>
    %c5_296 = arith.constant 5 : index
    %c0_297 = arith.constant 0 : index
    %c0_298 = arith.constant 0 : index
    %431 = vector.load %arg6[%c5_296, %c0_297, %c0_298] : memref<25x16x128xbf16, #tpu.memory_space<vmem>>, vector<1x16x128xbf16>
    %432 = vector.shape_cast %431 : vector<1x16x128xbf16> to vector<16x128xbf16>
    %cst_299 = arith.constant dense<0.000000e+00> : vector<1x128xf32>
    %433 = tpu.matmul %430, %432, %cst_299 {dimension_numbers = #tpu.dot_dimension_numbers<[1], [0], [0], [1], [0, 0, 1, 1], [], []>} : vector<1x16xbf16>, vector<16x128xbf16>, vector<1x128xf32> -> vector<1x128xf32>
    %434 = arith.addf %422, %433 : vector<1x128xf32>
    %435 = vector.extract_strided_slice %425 {offsets = [2, 0], sizes = [1, 128], strides = [1, 1]} : vector<14x128xf32> to vector<1x128xf32>
    %436 = vector.extract_strided_slice %425 {offsets = [3, 0], sizes = [1, 128], strides = [1, 1]} : vector<14x128xf32> to vector<1x128xf32>
    %437 = arith.maximumf %435, %436 : vector<1x128xf32>
    %438 = vector.extract_strided_slice %437 {offsets = [0, 0], sizes = [1, 16], strides = [1, 1]} : vector<1x128xf32> to vector<1x16xf32>
    %439 = arith.truncf %438 : vector<1x16xf32> to vector<1x16xbf16>
    %c6_300 = arith.constant 6 : index
    %c0_301 = arith.constant 0 : index
    %c0_302 = arith.constant 0 : index
    %440 = vector.load %arg6[%c6_300, %c0_301, %c0_302] : memref<25x16x128xbf16, #tpu.memory_space<vmem>>, vector<1x16x128xbf16>
    %441 = vector.shape_cast %440 : vector<1x16x128xbf16> to vector<16x128xbf16>
    %cst_303 = arith.constant dense<0.000000e+00> : vector<1x128xf32>
    %442 = tpu.matmul %439, %441, %cst_303 {dimension_numbers = #tpu.dot_dimension_numbers<[1], [0], [0], [1], [0, 0, 1, 1], [], []>} : vector<1x16xbf16>, vector<16x128xbf16>, vector<1x128xf32> -> vector<1x128xf32>
    %443 = arith.addf %434, %442 : vector<1x128xf32>
    %444 = vector.extract_strided_slice %425 {offsets = [4, 0], sizes = [1, 128], strides = [1, 1]} : vector<14x128xf32> to vector<1x128xf32>
    %445 = vector.extract_strided_slice %425 {offsets = [5, 0], sizes = [1, 128], strides = [1, 1]} : vector<14x128xf32> to vector<1x128xf32>
    %446 = arith.maximumf %444, %445 : vector<1x128xf32>
    %447 = vector.extract_strided_slice %446 {offsets = [0, 0], sizes = [1, 16], strides = [1, 1]} : vector<1x128xf32> to vector<1x16xf32>
    %448 = arith.truncf %447 : vector<1x16xf32> to vector<1x16xbf16>
    %c7_304 = arith.constant 7 : index
    %c0_305 = arith.constant 0 : index
    %c0_306 = arith.constant 0 : index
    %449 = vector.load %arg6[%c7_304, %c0_305, %c0_306] : memref<25x16x128xbf16, #tpu.memory_space<vmem>>, vector<1x16x128xbf16>
    %450 = vector.shape_cast %449 : vector<1x16x128xbf16> to vector<16x128xbf16>
    %cst_307 = arith.constant dense<0.000000e+00> : vector<1x128xf32>
    %451 = tpu.matmul %448, %450, %cst_307 {dimension_numbers = #tpu.dot_dimension_numbers<[1], [0], [0], [1], [0, 0, 1, 1], [], []>} : vector<1x16xbf16>, vector<16x128xbf16>, vector<1x128xf32> -> vector<1x128xf32>
    %452 = arith.addf %443, %451 : vector<1x128xf32>
    %453 = vector.extract_strided_slice %425 {offsets = [6, 0], sizes = [1, 128], strides = [1, 1]} : vector<14x128xf32> to vector<1x128xf32>
    %454 = vector.extract_strided_slice %425 {offsets = [7, 0], sizes = [1, 128], strides = [1, 1]} : vector<14x128xf32> to vector<1x128xf32>
    %455 = arith.maximumf %453, %454 : vector<1x128xf32>
    %456 = vector.extract_strided_slice %455 {offsets = [0, 0], sizes = [1, 16], strides = [1, 1]} : vector<1x128xf32> to vector<1x16xf32>
    %457 = arith.truncf %456 : vector<1x16xf32> to vector<1x16xbf16>
    %c8_308 = arith.constant 8 : index
    %c0_309 = arith.constant 0 : index
    %c0_310 = arith.constant 0 : index
    %458 = vector.load %arg6[%c8_308, %c0_309, %c0_310] : memref<25x16x128xbf16, #tpu.memory_space<vmem>>, vector<1x16x128xbf16>
    %459 = vector.shape_cast %458 : vector<1x16x128xbf16> to vector<16x128xbf16>
    %cst_311 = arith.constant dense<0.000000e+00> : vector<1x128xf32>
    %460 = tpu.matmul %457, %459, %cst_311 {dimension_numbers = #tpu.dot_dimension_numbers<[1], [0], [0], [1], [0, 0, 1, 1], [], []>} : vector<1x16xbf16>, vector<16x128xbf16>, vector<1x128xf32> -> vector<1x128xf32>
    %461 = arith.addf %452, %460 : vector<1x128xf32>
    %462 = vector.extract_strided_slice %425 {offsets = [8, 0], sizes = [1, 128], strides = [1, 1]} : vector<14x128xf32> to vector<1x128xf32>
    %463 = vector.extract_strided_slice %425 {offsets = [9, 0], sizes = [1, 128], strides = [1, 1]} : vector<14x128xf32> to vector<1x128xf32>
    %464 = arith.maximumf %462, %463 : vector<1x128xf32>
    %465 = vector.extract_strided_slice %464 {offsets = [0, 0], sizes = [1, 16], strides = [1, 1]} : vector<1x128xf32> to vector<1x16xf32>
    %466 = arith.truncf %465 : vector<1x16xf32> to vector<1x16xbf16>
    %c9_312 = arith.constant 9 : index
    %c0_313 = arith.constant 0 : index
    %c0_314 = arith.constant 0 : index
    %467 = vector.load %arg6[%c9_312, %c0_313, %c0_314] : memref<25x16x128xbf16, #tpu.memory_space<vmem>>, vector<1x16x128xbf16>
    %468 = vector.shape_cast %467 : vector<1x16x128xbf16> to vector<16x128xbf16>
    %cst_315 = arith.constant dense<0.000000e+00> : vector<1x128xf32>
    %469 = tpu.matmul %466, %468, %cst_315 {dimension_numbers = #tpu.dot_dimension_numbers<[1], [0], [0], [1], [0, 0, 1, 1], [], []>} : vector<1x16xbf16>, vector<16x128xbf16>, vector<1x128xf32> -> vector<1x128xf32>
    %470 = arith.addf %461, %469 : vector<1x128xf32>
    %471 = vector.extract_strided_slice %373 {offsets = [56, 0], sizes = [14, 128], strides = [1, 1]} : vector<140x128xf32> to vector<14x128xf32>
    %472 = vector.extract_strided_slice %373 {offsets = [70, 0], sizes = [14, 128], strides = [1, 1]} : vector<140x128xf32> to vector<14x128xf32>
    %473 = arith.maximumf %471, %472 : vector<14x128xf32>
    %474 = vector.extract_strided_slice %473 {offsets = [0, 0], sizes = [1, 128], strides = [1, 1]} : vector<14x128xf32> to vector<1x128xf32>
    %475 = vector.extract_strided_slice %473 {offsets = [1, 0], sizes = [1, 128], strides = [1, 1]} : vector<14x128xf32> to vector<1x128xf32>
    %476 = arith.maximumf %474, %475 : vector<1x128xf32>
    %477 = vector.extract_strided_slice %476 {offsets = [0, 0], sizes = [1, 16], strides = [1, 1]} : vector<1x128xf32> to vector<1x16xf32>
    %478 = arith.truncf %477 : vector<1x16xf32> to vector<1x16xbf16>
    %c10_316 = arith.constant 10 : index
    %c0_317 = arith.constant 0 : index
    %c0_318 = arith.constant 0 : index
    %479 = vector.load %arg6[%c10_316, %c0_317, %c0_318] : memref<25x16x128xbf16, #tpu.memory_space<vmem>>, vector<1x16x128xbf16>
    %480 = vector.shape_cast %479 : vector<1x16x128xbf16> to vector<16x128xbf16>
    %cst_319 = arith.constant dense<0.000000e+00> : vector<1x128xf32>
    %481 = tpu.matmul %478, %480, %cst_319 {dimension_numbers = #tpu.dot_dimension_numbers<[1], [0], [0], [1], [0, 0, 1, 1], [], []>} : vector<1x16xbf16>, vector<16x128xbf16>, vector<1x128xf32> -> vector<1x128xf32>
    %482 = arith.addf %470, %481 : vector<1x128xf32>
    %483 = vector.extract_strided_slice %473 {offsets = [2, 0], sizes = [1, 128], strides = [1, 1]} : vector<14x128xf32> to vector<1x128xf32>
    %484 = vector.extract_strided_slice %473 {offsets = [3, 0], sizes = [1, 128], strides = [1, 1]} : vector<14x128xf32> to vector<1x128xf32>
    %485 = arith.maximumf %483, %484 : vector<1x128xf32>
    %486 = vector.extract_strided_slice %485 {offsets = [0, 0], sizes = [1, 16], strides = [1, 1]} : vector<1x128xf32> to vector<1x16xf32>
    %487 = arith.truncf %486 : vector<1x16xf32> to vector<1x16xbf16>
    %c11_320 = arith.constant 11 : index
    %c0_321 = arith.constant 0 : index
    %c0_322 = arith.constant 0 : index
    %488 = vector.load %arg6[%c11_320, %c0_321, %c0_322] : memref<25x16x128xbf16, #tpu.memory_space<vmem>>, vector<1x16x128xbf16>
    %489 = vector.shape_cast %488 : vector<1x16x128xbf16> to vector<16x128xbf16>
    %cst_323 = arith.constant dense<0.000000e+00> : vector<1x128xf32>
    %490 = tpu.matmul %487, %489, %cst_323 {dimension_numbers = #tpu.dot_dimension_numbers<[1], [0], [0], [1], [0, 0, 1, 1], [], []>} : vector<1x16xbf16>, vector<16x128xbf16>, vector<1x128xf32> -> vector<1x128xf32>
    %491 = arith.addf %482, %490 : vector<1x128xf32>
    %492 = vector.extract_strided_slice %473 {offsets = [4, 0], sizes = [1, 128], strides = [1, 1]} : vector<14x128xf32> to vector<1x128xf32>
    %493 = vector.extract_strided_slice %473 {offsets = [5, 0], sizes = [1, 128], strides = [1, 1]} : vector<14x128xf32> to vector<1x128xf32>
    %494 = arith.maximumf %492, %493 : vector<1x128xf32>
    %495 = vector.extract_strided_slice %494 {offsets = [0, 0], sizes = [1, 16], strides = [1, 1]} : vector<1x128xf32> to vector<1x16xf32>
    %496 = arith.truncf %495 : vector<1x16xf32> to vector<1x16xbf16>
    %c12_324 = arith.constant 12 : index
    %c0_325 = arith.constant 0 : index
    %c0_326 = arith.constant 0 : index
    %497 = vector.load %arg6[%c12_324, %c0_325, %c0_326] : memref<25x16x128xbf16, #tpu.memory_space<vmem>>, vector<1x16x128xbf16>
    %498 = vector.shape_cast %497 : vector<1x16x128xbf16> to vector<16x128xbf16>
    %cst_327 = arith.constant dense<0.000000e+00> : vector<1x128xf32>
    %499 = tpu.matmul %496, %498, %cst_327 {dimension_numbers = #tpu.dot_dimension_numbers<[1], [0], [0], [1], [0, 0, 1, 1], [], []>} : vector<1x16xbf16>, vector<16x128xbf16>, vector<1x128xf32> -> vector<1x128xf32>
    %500 = arith.addf %491, %499 : vector<1x128xf32>
    %501 = vector.extract_strided_slice %473 {offsets = [6, 0], sizes = [1, 128], strides = [1, 1]} : vector<14x128xf32> to vector<1x128xf32>
    %502 = vector.extract_strided_slice %473 {offsets = [7, 0], sizes = [1, 128], strides = [1, 1]} : vector<14x128xf32> to vector<1x128xf32>
    %503 = arith.maximumf %501, %502 : vector<1x128xf32>
    %504 = vector.extract_strided_slice %503 {offsets = [0, 0], sizes = [1, 16], strides = [1, 1]} : vector<1x128xf32> to vector<1x16xf32>
    %505 = arith.truncf %504 : vector<1x16xf32> to vector<1x16xbf16>
    %c13_328 = arith.constant 13 : index
    %c0_329 = arith.constant 0 : index
    %c0_330 = arith.constant 0 : index
    %506 = vector.load %arg6[%c13_328, %c0_329, %c0_330] : memref<25x16x128xbf16, #tpu.memory_space<vmem>>, vector<1x16x128xbf16>
    %507 = vector.shape_cast %506 : vector<1x16x128xbf16> to vector<16x128xbf16>
    %cst_331 = arith.constant dense<0.000000e+00> : vector<1x128xf32>
    %508 = tpu.matmul %505, %507, %cst_331 {dimension_numbers = #tpu.dot_dimension_numbers<[1], [0], [0], [1], [0, 0, 1, 1], [], []>} : vector<1x16xbf16>, vector<16x128xbf16>, vector<1x128xf32> -> vector<1x128xf32>
    %509 = arith.addf %500, %508 : vector<1x128xf32>
    %510 = vector.extract_strided_slice %473 {offsets = [8, 0], sizes = [1, 128], strides = [1, 1]} : vector<14x128xf32> to vector<1x128xf32>
    %511 = vector.extract_strided_slice %473 {offsets = [9, 0], sizes = [1, 128], strides = [1, 1]} : vector<14x128xf32> to vector<1x128xf32>
    %512 = arith.maximumf %510, %511 : vector<1x128xf32>
    %513 = vector.extract_strided_slice %512 {offsets = [0, 0], sizes = [1, 16], strides = [1, 1]} : vector<1x128xf32> to vector<1x16xf32>
    %514 = arith.truncf %513 : vector<1x16xf32> to vector<1x16xbf16>
    %c14_332 = arith.constant 14 : index
    %c0_333 = arith.constant 0 : index
    %c0_334 = arith.constant 0 : index
    %515 = vector.load %arg6[%c14_332, %c0_333, %c0_334] : memref<25x16x128xbf16, #tpu.memory_space<vmem>>, vector<1x16x128xbf16>
    %516 = vector.shape_cast %515 : vector<1x16x128xbf16> to vector<16x128xbf16>
    %cst_335 = arith.constant dense<0.000000e+00> : vector<1x128xf32>
    %517 = tpu.matmul %514, %516, %cst_335 {dimension_numbers = #tpu.dot_dimension_numbers<[1], [0], [0], [1], [0, 0, 1, 1], [], []>} : vector<1x16xbf16>, vector<16x128xbf16>, vector<1x128xf32> -> vector<1x128xf32>
    %518 = arith.addf %509, %517 : vector<1x128xf32>
    %519 = vector.extract_strided_slice %373 {offsets = [84, 0], sizes = [14, 128], strides = [1, 1]} : vector<140x128xf32> to vector<14x128xf32>
    %520 = vector.extract_strided_slice %373 {offsets = [98, 0], sizes = [14, 128], strides = [1, 1]} : vector<140x128xf32> to vector<14x128xf32>
    %521 = arith.maximumf %519, %520 : vector<14x128xf32>
    %522 = vector.extract_strided_slice %521 {offsets = [0, 0], sizes = [1, 128], strides = [1, 1]} : vector<14x128xf32> to vector<1x128xf32>
    %523 = vector.extract_strided_slice %521 {offsets = [1, 0], sizes = [1, 128], strides = [1, 1]} : vector<14x128xf32> to vector<1x128xf32>
    %524 = arith.maximumf %522, %523 : vector<1x128xf32>
    %525 = vector.extract_strided_slice %524 {offsets = [0, 0], sizes = [1, 16], strides = [1, 1]} : vector<1x128xf32> to vector<1x16xf32>
    %526 = arith.truncf %525 : vector<1x16xf32> to vector<1x16xbf16>
    %c15_336 = arith.constant 15 : index
    %c0_337 = arith.constant 0 : index
    %c0_338 = arith.constant 0 : index
    %527 = vector.load %arg6[%c15_336, %c0_337, %c0_338] : memref<25x16x128xbf16, #tpu.memory_space<vmem>>, vector<1x16x128xbf16>
    %528 = vector.shape_cast %527 : vector<1x16x128xbf16> to vector<16x128xbf16>
    %cst_339 = arith.constant dense<0.000000e+00> : vector<1x128xf32>
    %529 = tpu.matmul %526, %528, %cst_339 {dimension_numbers = #tpu.dot_dimension_numbers<[1], [0], [0], [1], [0, 0, 1, 1], [], []>} : vector<1x16xbf16>, vector<16x128xbf16>, vector<1x128xf32> -> vector<1x128xf32>
    %530 = arith.addf %518, %529 : vector<1x128xf32>
    %531 = vector.extract_strided_slice %521 {offsets = [2, 0], sizes = [1, 128], strides = [1, 1]} : vector<14x128xf32> to vector<1x128xf32>
    %532 = vector.extract_strided_slice %521 {offsets = [3, 0], sizes = [1, 128], strides = [1, 1]} : vector<14x128xf32> to vector<1x128xf32>
    %533 = arith.maximumf %531, %532 : vector<1x128xf32>
    %534 = vector.extract_strided_slice %533 {offsets = [0, 0], sizes = [1, 16], strides = [1, 1]} : vector<1x128xf32> to vector<1x16xf32>
    %535 = arith.truncf %534 : vector<1x16xf32> to vector<1x16xbf16>
    %c16_340 = arith.constant 16 : index
    %c0_341 = arith.constant 0 : index
    %c0_342 = arith.constant 0 : index
    %536 = vector.load %arg6[%c16_340, %c0_341, %c0_342] : memref<25x16x128xbf16, #tpu.memory_space<vmem>>, vector<1x16x128xbf16>
    %537 = vector.shape_cast %536 : vector<1x16x128xbf16> to vector<16x128xbf16>
    %cst_343 = arith.constant dense<0.000000e+00> : vector<1x128xf32>
    %538 = tpu.matmul %535, %537, %cst_343 {dimension_numbers = #tpu.dot_dimension_numbers<[1], [0], [0], [1], [0, 0, 1, 1], [], []>} : vector<1x16xbf16>, vector<16x128xbf16>, vector<1x128xf32> -> vector<1x128xf32>
    %539 = arith.addf %530, %538 : vector<1x128xf32>
    %540 = vector.extract_strided_slice %521 {offsets = [4, 0], sizes = [1, 128], strides = [1, 1]} : vector<14x128xf32> to vector<1x128xf32>
    %541 = vector.extract_strided_slice %521 {offsets = [5, 0], sizes = [1, 128], strides = [1, 1]} : vector<14x128xf32> to vector<1x128xf32>
    %542 = arith.maximumf %540, %541 : vector<1x128xf32>
    %543 = vector.extract_strided_slice %542 {offsets = [0, 0], sizes = [1, 16], strides = [1, 1]} : vector<1x128xf32> to vector<1x16xf32>
    %544 = arith.truncf %543 : vector<1x16xf32> to vector<1x16xbf16>
    %c17_344 = arith.constant 17 : index
    %c0_345 = arith.constant 0 : index
    %c0_346 = arith.constant 0 : index
    %545 = vector.load %arg6[%c17_344, %c0_345, %c0_346] : memref<25x16x128xbf16, #tpu.memory_space<vmem>>, vector<1x16x128xbf16>
    %546 = vector.shape_cast %545 : vector<1x16x128xbf16> to vector<16x128xbf16>
    %cst_347 = arith.constant dense<0.000000e+00> : vector<1x128xf32>
    %547 = tpu.matmul %544, %546, %cst_347 {dimension_numbers = #tpu.dot_dimension_numbers<[1], [0], [0], [1], [0, 0, 1, 1], [], []>} : vector<1x16xbf16>, vector<16x128xbf16>, vector<1x128xf32> -> vector<1x128xf32>
    %548 = arith.addf %539, %547 : vector<1x128xf32>
    %549 = vector.extract_strided_slice %521 {offsets = [6, 0], sizes = [1, 128], strides = [1, 1]} : vector<14x128xf32> to vector<1x128xf32>
    %550 = vector.extract_strided_slice %521 {offsets = [7, 0], sizes = [1, 128], strides = [1, 1]} : vector<14x128xf32> to vector<1x128xf32>
    %551 = arith.maximumf %549, %550 : vector<1x128xf32>
    %552 = vector.extract_strided_slice %551 {offsets = [0, 0], sizes = [1, 16], strides = [1, 1]} : vector<1x128xf32> to vector<1x16xf32>
    %553 = arith.truncf %552 : vector<1x16xf32> to vector<1x16xbf16>
    %c18_348 = arith.constant 18 : index
    %c0_349 = arith.constant 0 : index
    %c0_350 = arith.constant 0 : index
    %554 = vector.load %arg6[%c18_348, %c0_349, %c0_350] : memref<25x16x128xbf16, #tpu.memory_space<vmem>>, vector<1x16x128xbf16>
    %555 = vector.shape_cast %554 : vector<1x16x128xbf16> to vector<16x128xbf16>
    %cst_351 = arith.constant dense<0.000000e+00> : vector<1x128xf32>
    %556 = tpu.matmul %553, %555, %cst_351 {dimension_numbers = #tpu.dot_dimension_numbers<[1], [0], [0], [1], [0, 0, 1, 1], [], []>} : vector<1x16xbf16>, vector<16x128xbf16>, vector<1x128xf32> -> vector<1x128xf32>
    %557 = arith.addf %548, %556 : vector<1x128xf32>
    %558 = vector.extract_strided_slice %521 {offsets = [8, 0], sizes = [1, 128], strides = [1, 1]} : vector<14x128xf32> to vector<1x128xf32>
    %559 = vector.extract_strided_slice %521 {offsets = [9, 0], sizes = [1, 128], strides = [1, 1]} : vector<14x128xf32> to vector<1x128xf32>
    %560 = arith.maximumf %558, %559 : vector<1x128xf32>
    %561 = vector.extract_strided_slice %560 {offsets = [0, 0], sizes = [1, 16], strides = [1, 1]} : vector<1x128xf32> to vector<1x16xf32>
    %562 = arith.truncf %561 : vector<1x16xf32> to vector<1x16xbf16>
    %c19_352 = arith.constant 19 : index
    %c0_353 = arith.constant 0 : index
    %c0_354 = arith.constant 0 : index
    %563 = vector.load %arg6[%c19_352, %c0_353, %c0_354] : memref<25x16x128xbf16, #tpu.memory_space<vmem>>, vector<1x16x128xbf16>
    %564 = vector.shape_cast %563 : vector<1x16x128xbf16> to vector<16x128xbf16>
    %cst_355 = arith.constant dense<0.000000e+00> : vector<1x128xf32>
    %565 = tpu.matmul %562, %564, %cst_355 {dimension_numbers = #tpu.dot_dimension_numbers<[1], [0], [0], [1], [0, 0, 1, 1], [], []>} : vector<1x16xbf16>, vector<16x128xbf16>, vector<1x128xf32> -> vector<1x128xf32>
    %566 = arith.addf %557, %565 : vector<1x128xf32>
    %567 = vector.extract_strided_slice %373 {offsets = [112, 0], sizes = [14, 128], strides = [1, 1]} : vector<140x128xf32> to vector<14x128xf32>
    %568 = vector.extract_strided_slice %373 {offsets = [126, 0], sizes = [14, 128], strides = [1, 1]} : vector<140x128xf32> to vector<14x128xf32>
    %569 = arith.maximumf %567, %568 : vector<14x128xf32>
    %570 = vector.extract_strided_slice %569 {offsets = [0, 0], sizes = [1, 128], strides = [1, 1]} : vector<14x128xf32> to vector<1x128xf32>
    %571 = vector.extract_strided_slice %569 {offsets = [1, 0], sizes = [1, 128], strides = [1, 1]} : vector<14x128xf32> to vector<1x128xf32>
    %572 = arith.maximumf %570, %571 : vector<1x128xf32>
    %573 = vector.extract_strided_slice %572 {offsets = [0, 0], sizes = [1, 16], strides = [1, 1]} : vector<1x128xf32> to vector<1x16xf32>
    %574 = arith.truncf %573 : vector<1x16xf32> to vector<1x16xbf16>
    %c20_356 = arith.constant 20 : index
    %c0_357 = arith.constant 0 : index
    %c0_358 = arith.constant 0 : index
    %575 = vector.load %arg6[%c20_356, %c0_357, %c0_358] : memref<25x16x128xbf16, #tpu.memory_space<vmem>>, vector<1x16x128xbf16>
    %576 = vector.shape_cast %575 : vector<1x16x128xbf16> to vector<16x128xbf16>
    %cst_359 = arith.constant dense<0.000000e+00> : vector<1x128xf32>
    %577 = tpu.matmul %574, %576, %cst_359 {dimension_numbers = #tpu.dot_dimension_numbers<[1], [0], [0], [1], [0, 0, 1, 1], [], []>} : vector<1x16xbf16>, vector<16x128xbf16>, vector<1x128xf32> -> vector<1x128xf32>
    %578 = arith.addf %566, %577 : vector<1x128xf32>
    %579 = vector.extract_strided_slice %569 {offsets = [2, 0], sizes = [1, 128], strides = [1, 1]} : vector<14x128xf32> to vector<1x128xf32>
    %580 = vector.extract_strided_slice %569 {offsets = [3, 0], sizes = [1, 128], strides = [1, 1]} : vector<14x128xf32> to vector<1x128xf32>
    %581 = arith.maximumf %579, %580 : vector<1x128xf32>
    %582 = vector.extract_strided_slice %581 {offsets = [0, 0], sizes = [1, 16], strides = [1, 1]} : vector<1x128xf32> to vector<1x16xf32>
    %583 = arith.truncf %582 : vector<1x16xf32> to vector<1x16xbf16>
    %c21_360 = arith.constant 21 : index
    %c0_361 = arith.constant 0 : index
    %c0_362 = arith.constant 0 : index
    %584 = vector.load %arg6[%c21_360, %c0_361, %c0_362] : memref<25x16x128xbf16, #tpu.memory_space<vmem>>, vector<1x16x128xbf16>
    %585 = vector.shape_cast %584 : vector<1x16x128xbf16> to vector<16x128xbf16>
    %cst_363 = arith.constant dense<0.000000e+00> : vector<1x128xf32>
    %586 = tpu.matmul %583, %585, %cst_363 {dimension_numbers = #tpu.dot_dimension_numbers<[1], [0], [0], [1], [0, 0, 1, 1], [], []>} : vector<1x16xbf16>, vector<16x128xbf16>, vector<1x128xf32> -> vector<1x128xf32>
    %587 = arith.addf %578, %586 : vector<1x128xf32>
    %588 = vector.extract_strided_slice %569 {offsets = [4, 0], sizes = [1, 128], strides = [1, 1]} : vector<14x128xf32> to vector<1x128xf32>
    %589 = vector.extract_strided_slice %569 {offsets = [5, 0], sizes = [1, 128], strides = [1, 1]} : vector<14x128xf32> to vector<1x128xf32>
    %590 = arith.maximumf %588, %589 : vector<1x128xf32>
    %591 = vector.extract_strided_slice %590 {offsets = [0, 0], sizes = [1, 16], strides = [1, 1]} : vector<1x128xf32> to vector<1x16xf32>
    %592 = arith.truncf %591 : vector<1x16xf32> to vector<1x16xbf16>
    %c22_364 = arith.constant 22 : index
    %c0_365 = arith.constant 0 : index
    %c0_366 = arith.constant 0 : index
    %593 = vector.load %arg6[%c22_364, %c0_365, %c0_366] : memref<25x16x128xbf16, #tpu.memory_space<vmem>>, vector<1x16x128xbf16>
    %594 = vector.shape_cast %593 : vector<1x16x128xbf16> to vector<16x128xbf16>
    %cst_367 = arith.constant dense<0.000000e+00> : vector<1x128xf32>
    %595 = tpu.matmul %592, %594, %cst_367 {dimension_numbers = #tpu.dot_dimension_numbers<[1], [0], [0], [1], [0, 0, 1, 1], [], []>} : vector<1x16xbf16>, vector<16x128xbf16>, vector<1x128xf32> -> vector<1x128xf32>
    %596 = arith.addf %587, %595 : vector<1x128xf32>
    %597 = vector.extract_strided_slice %569 {offsets = [6, 0], sizes = [1, 128], strides = [1, 1]} : vector<14x128xf32> to vector<1x128xf32>
    %598 = vector.extract_strided_slice %569 {offsets = [7, 0], sizes = [1, 128], strides = [1, 1]} : vector<14x128xf32> to vector<1x128xf32>
    %599 = arith.maximumf %597, %598 : vector<1x128xf32>
    %600 = vector.extract_strided_slice %599 {offsets = [0, 0], sizes = [1, 16], strides = [1, 1]} : vector<1x128xf32> to vector<1x16xf32>
    %601 = arith.truncf %600 : vector<1x16xf32> to vector<1x16xbf16>
    %c23_368 = arith.constant 23 : index
    %c0_369 = arith.constant 0 : index
    %c0_370 = arith.constant 0 : index
    %602 = vector.load %arg6[%c23_368, %c0_369, %c0_370] : memref<25x16x128xbf16, #tpu.memory_space<vmem>>, vector<1x16x128xbf16>
    %603 = vector.shape_cast %602 : vector<1x16x128xbf16> to vector<16x128xbf16>
    %cst_371 = arith.constant dense<0.000000e+00> : vector<1x128xf32>
    %604 = tpu.matmul %601, %603, %cst_371 {dimension_numbers = #tpu.dot_dimension_numbers<[1], [0], [0], [1], [0, 0, 1, 1], [], []>} : vector<1x16xbf16>, vector<16x128xbf16>, vector<1x128xf32> -> vector<1x128xf32>
    %605 = arith.addf %596, %604 : vector<1x128xf32>
    %606 = vector.extract_strided_slice %569 {offsets = [8, 0], sizes = [1, 128], strides = [1, 1]} : vector<14x128xf32> to vector<1x128xf32>
    %607 = vector.extract_strided_slice %569 {offsets = [9, 0], sizes = [1, 128], strides = [1, 1]} : vector<14x128xf32> to vector<1x128xf32>
    %608 = arith.maximumf %606, %607 : vector<1x128xf32>
    %609 = vector.extract_strided_slice %608 {offsets = [0, 0], sizes = [1, 16], strides = [1, 1]} : vector<1x128xf32> to vector<1x16xf32>
    %610 = arith.truncf %609 : vector<1x16xf32> to vector<1x16xbf16>
    %c24_372 = arith.constant 24 : index
    %c0_373 = arith.constant 0 : index
    %c0_374 = arith.constant 0 : index
    %611 = vector.load %arg6[%c24_372, %c0_373, %c0_374] : memref<25x16x128xbf16, #tpu.memory_space<vmem>>, vector<1x16x128xbf16>
    %612 = vector.shape_cast %611 : vector<1x16x128xbf16> to vector<16x128xbf16>
    %cst_375 = arith.constant dense<0.000000e+00> : vector<1x128xf32>
    %613 = tpu.matmul %610, %612, %cst_375 {dimension_numbers = #tpu.dot_dimension_numbers<[1], [0], [0], [1], [0, 0, 1, 1], [], []>} : vector<1x16xbf16>, vector<16x128xbf16>, vector<1x128xf32> -> vector<1x128xf32>
    %614 = arith.addf %605, %613 : vector<1x128xf32>
    %c0_376 = arith.constant 0 : index
    %c0_377 = arith.constant 0 : index
    %615 = vector.load %arg7[%c0_376, %c0_377] : memref<1x128xf32, #tpu.memory_space<vmem>>, vector<1x128xf32>
    %616 = arith.addf %614, %615 : vector<1x128xf32>
    %cst_378 = arith.constant 0.000000e+00 : f32
    %617 = vector.broadcast %cst_378 : f32 to vector<1x128xf32>
    %618 = arith.maximumf %616, %617 : vector<1x128xf32>
    %619 = arith.truncf %618 : vector<1x128xf32> to vector<1x128xbf16>
    %c0_379 = arith.constant 0 : index
    %c0_380 = arith.constant 0 : index
    %620 = vector.load %arg8[%c0_379, %c0_380] : memref<128x128xbf16, #tpu.memory_space<vmem>>, vector<128x128xbf16>
    %cst_381 = arith.constant dense<0.000000e+00> : vector<1x128xf32>
    %621 = tpu.matmul %619, %620, %cst_381 {dimension_numbers = #tpu.dot_dimension_numbers<[1], [0], [0], [1], [0, 0, 1, 1], [], []>} : vector<1x128xbf16>, vector<128x128xbf16>, vector<1x128xf32> -> vector<1x128xf32>
    %c0_382 = arith.constant 0 : index
    %c0_383 = arith.constant 0 : index
    %622 = vector.load %arg9[%c0_382, %c0_383] : memref<1x128xf32, #tpu.memory_space<vmem>>, vector<1x128xf32>
    %623 = arith.addf %621, %622 : vector<1x128xf32>
    %cst_384 = arith.constant 0.000000e+00 : f32
    %624 = vector.broadcast %cst_384 : f32 to vector<1x128xf32>
    %625 = arith.maximumf %623, %624 : vector<1x128xf32>
    %626 = arith.truncf %625 : vector<1x128xf32> to vector<1x128xbf16>
    %c0_385 = arith.constant 0 : index
    %c0_386 = arith.constant 0 : index
    %627 = vector.load %arg10[%c0_385, %c0_386] : memref<128x128xbf16, #tpu.memory_space<vmem>>, vector<128x128xbf16>
    %cst_387 = arith.constant dense<0.000000e+00> : vector<1x128xf32>
    %628 = tpu.matmul %626, %627, %cst_387 {dimension_numbers = #tpu.dot_dimension_numbers<[1], [0], [0], [1], [0, 0, 1, 1], [], []>} : vector<1x128xbf16>, vector<128x128xbf16>, vector<1x128xf32> -> vector<1x128xf32>
    %c0_388 = arith.constant 0 : index
    %c0_389 = arith.constant 0 : index
    %629 = vector.load %arg11[%c0_388, %c0_389] : memref<1x128xf32, #tpu.memory_space<vmem>>, vector<1x128xf32>
    %630 = arith.addf %628, %629 : vector<1x128xf32>
    %c0_390 = arith.constant 0 : index
    %c0_391 = arith.constant 0 : index
    %c0_392 = arith.constant 0 : index
    %631 = vector.load %arg12[%c0_390, %c0_391, %c0_392] : memref<1x1x128xf32, #tpu.memory_space<vmem>>, vector<1x1x128xf32>
    %632 = vector.shape_cast %631 : vector<1x1x128xf32> to vector<1x128xf32>
    %633 = vector.shape_cast %630 : vector<1x128xf32> to vector<1x1x128xf32>
    tpu.vector_store %arg12[%c0_390, %c0_391, %c0_392], %633 {strides = array<i32>} : memref<1x1x128xf32, #tpu.memory_space<vmem>>, vector<1x1x128xf32>,
    return
  }
  func.func @transform_0(%arg0: i32) -> (i32, i32, i32) {
    %c0_i32 = arith.constant 0 : i32
    %c0_i32_0 = arith.constant 0 : i32
    %c0_i32_1 = arith.constant 0 : i32
    return %arg0, %c0_i32, %c0_i32_0 : i32, i32, i32
  }
  func.func @transform_1(%arg0: i32) -> (i32, i32) {
    %c0_i32 = arith.constant 0 : i32
    %c0_i32_0 = arith.constant 0 : i32
    %c0_i32_1 = arith.constant 0 : i32
    return %c0_i32, %c0_i32_0 : i32, i32
  }
  func.func @transform_2(%arg0: i32) -> (i32, i32) {
    %c0_i32 = arith.constant 0 : i32
    %c0_i32_0 = arith.constant 0 : i32
    %c0_i32_1 = arith.constant 0 : i32
    return %c0_i32, %c0_i32_0 : i32, i32
  }
  func.func @transform_3(%arg0: i32) -> (i32, i32, i32) {
    %c0_i32 = arith.constant 0 : i32
    %c0_i32_0 = arith.constant 0 : i32
    %c0_i32_1 = arith.constant 0 : i32
    %c0_i32_2 = arith.constant 0 : i32
    return %c0_i32, %c0_i32_0, %c0_i32_1 : i32, i32, i32
  }
  func.func @transform_4(%arg0: i32) -> (i32, i32) {
    %c0_i32 = arith.constant 0 : i32
    %c0_i32_0 = arith.constant 0 : i32
    %c0_i32_1 = arith.constant 0 : i32
    return %c0_i32, %c0_i32_0 : i32, i32
  }
  func.func @transform_5(%arg0: i32) -> (i32, i32, i32) {
    %c0_i32 = arith.constant 0 : i32
    %c0_i32_0 = arith.constant 0 : i32
    %c0_i32_1 = arith.constant 0 : i32
    %c0_i32_2 = arith.constant 0 : i32
    return %c0_i32, %c0_i32_0, %c0_i32_1 : i32, i32, i32
  }
  func.func @transform_6(%arg0: i32) -> (i32, i32) {
    %c0_i32 = arith.constant 0 : i32
    %c0_i32_0 = arith.constant 0 : i32
    %c0_i32_1 = arith.constant 0 : i32
    return %c0_i32, %c0_i32_0 : i32, i32
  }
  func.func @transform_7(%arg0: i32) -> (i32, i32) {
    %c0_i32 = arith.constant 0 : i32
    %c0_i32_0 = arith.constant 0 : i32
    %c0_i32_1 = arith.constant 0 : i32
    return %c0_i32, %c0_i32_0 : i32, i32
  }
  func.func @transform_8(%arg0: i32) -> (i32, i32) {
    %c0_i32 = arith.constant 0 : i32
    %c0_i32_0 = arith.constant 0 : i32
    %c0_i32_1 = arith.constant 0 : i32
    return %c0_i32, %c0_i32_0 : i32, i32
  }
  func.func @transform_9(%arg0: i32) -> (i32, i32) {
    %c0_i32 = arith.constant 0 : i32
    %c0_i32_0 = arith.constant 0 : i32
    %c0_i32_1 = arith.constant 0 : i32
    return %c0_i32, %c0_i32_0 : i32, i32
  }
  func.func @transform_10(%arg0: i32) -> (i32, i32) {
    %c0_i32 = arith.constant 0 : i32
    %c0_i32_0 = arith.constant 0 : i32
    %c0_i32_1 = arith.constant 0 : i32
    return %c0_i32, %c0_i32_0 : i32, i32
  }
  func.func @transform_11(%arg0: i32) -> (i32, i32, i32) {
    %c0_i32 = arith.constant 0 : i32
    %c0_i32_0 = arith.constant 0 : i32
    %c0_i32_1 = arith.constant 0 : i32
    return %arg0, %c0_i32, %c0_i32_0 : i32, i32, i32
  }
}

</mosaic_0001>

<bundles_post_ra>
// kernel: net_forward.1
= control target key start
LH: loop header
LB: loop body
LE: loop exit
PB: predicated region body
PF: predicated region fallthrough
CT: control target
= control target key end

     0   :  { %16 = vsyncpa [#allocation5], 0  ;;  %s10912_s0 = inlined_call_operand.vmem [shape: bf16[2,784,128], index: 0, kind: input, shape index: {}]   ;;  %s10913_s1 = inlined_call_operand.vmem [shape: bf16[128,128], index: 1, kind: input, shape index: {}]   ;;  %s10914_s2 = inlined_call_operand.vmem [shape: f32[1,128], index: 2, kind: input, shape index: {}]   ;;  %s10915_s3 = inlined_call_operand.vmem [shape: bf16[25,8,128], index: 3, kind: input, shape index: {}]   ;;  %s10916_s4 = inlined_call_operand.vmem [shape: f32[1,128], index: 4, kind: input, shape index: {}]   ;;  %s10917_s5 = inlined_call_operand.vmem [shape: bf16[25,16,128], index: 5, kind: input, shape index: {}]   ;;  %s10918_s6 = inlined_call_operand.vmem [shape: f32[1,128], index: 6, kind: input, shape index: {}]   ;;  %s10919_s7 = inlined_call_operand.vmem [shape: bf16[128,128], index: 7, kind: input, shape index: {}]   ;;  %s10920_s8 = inlined_call_operand.vmem [shape: f32[1,128], index: 8, kind: input, shape index: {}]   ;;  %s10921_s9 = inlined_call_operand.vmem [shape: bf16[128,128], index: 9, kind: input, shape index: {}]   ;;  %s10922_s10 = inlined_call_operand.vmem [shape: f32[1,128], index: 10, kind: input, shape index: {}]   ;;  %s10923_s11 = inlined_call_operand.hbm [shape: f32[2,1,128], index: 11, kind: output, shape index: {}]  }
   0x1   :  { %18 = vsyncpa [#allocation5 + $0x1], 0  ;;  %s8891_s17 = smov 0   ;;  %s8893_s18 = smov 0  }
   0x2   :  { %s8895_s19 = smov 0   ;;  %s8897_s20 = smov 0  }
   0x3 LB: > { %10926 = sst [smem:[#allocation7_spill]] %s8824_s19  ;;  %s8912_s21 = sadd.s32 4294967295, %s8828_s20   ;;  %s8828_s20 = sphi %s8897_s20, %s10948_s20   ;;  %s8824_s19 = sphi %s8895_s19, %s10945_s19   ;;  %s8820_s18 = sphi %s8893_s18, %s10947_s18   ;;  %s8816_s17 = sphi %s8891_s17, %s10946_s17  }
   0x4   : > { %s7184_s22 = sadd.s32 4294967294, %s8828_s20   ;;  %s8916_s23 = sadd.s32 1, %s8828_s20  }
   0x5   : > { %s267_s24 = sadd.s32 1, %s8824_s19  ;;  %s264_s25 = ssub.s32 %s8828_s20, %s8916_s23 }
   0x6   : > { %p277_p0 = scmp.ne.s32.totalorder %s8824_s19, %s8820_s18  ;;  %p265_p1 = scmp.eq.s32.totalorder %s264_s25, 0 }
   0x7   : > { %p278_p2 = scmp.eq.s32.totalorder %s8912_s21, 1  ;;  %p283_p3 = scmp.ne.s32.totalorder %s8820_s18, %s8816_s17 }
   0x8   : > { %p284_p4 = scmp.eq.s32.totalorder %s7184_s22, 1  ;;  %p7187_p7 = scmp.ge.s32.totalorder %s8828_s20, 1 }
   0x9   : > { %s8927_s26 = scalar_select %p265_p1, %s8824_s19, %s267_s24  }
   0xa   : > { %p8929_p5 = por %p278_p2, %p277_p0  ;;  %p8933_p6 = por %p284_p4, %p283_p3 }
   0xb   : > { %10927 = sst [smem:[#allocation8_spill]] %s8927_s26  ;;  %p340_p8 = scmp.lt.s32.totalorder %s8828_s20, 3 }
   0xd   : > { %p341_p9 = pnand %p7187_p7, %p340_p8 }
   0xf   : > { %344 = sbr.rel (%p341_p9) target bundleno = 2042 (0x7fa), region = 64 }
  0x14   : > { %v8143_v0 = vld [vmem:[%s10913_s1 + $0x38] sm:$0xff]  ;;  %v8142_v2 = vld [vmem:[%s10913_s1 + $0x30] sm:$0xff]  ;;  %v8141_v5 = vld [vmem:[%s10913_s1 + $0x28] sm:$0xff]  ;;  %p379_p10 = scmp.lt.s32.totalorder %s8912_s21, 1  ;;  %vm1900_vm0 = vcmask 1043456   ;;  %vm1922_vm3 = vcmask 1045504   ;;  %s7125_s15 = scalar_lea.hbm %s10923_s11, %s8912_s21 }
  0x15   : > { %v8158_v1 = vld [vmem:[%s10913_s1 + $0x38] sm:$0xff]  ;;  %532 = vmatpush.bf16.msra.mxu0 %v8143_v0  ;;  %v8157_v3 = vld [vmem:[%s10913_s1 + $0x30] sm:$0xff]  ;;  %v8156_v6 = vld [vmem:[%s10913_s1 + $0x28] sm:$0xff]  ;;  %vm1918_vm4 = vcmask 228352   ;;  %vm2954_vm7 = vcmask 64512   ;;  %vm6179_vm8 = vcmask 1041408  }
  0x16   : > { %742 = vmatpush.bf16.msra.mxu1 %v8158_v1  ;;  %v8173_v4 = vld [vmem:[%s10913_s1 + $0x38] sm:$0xff]  ;;  %v8172_v7 = vld [vmem:[%s10913_s1 + $0x30] sm:$0xff]  ;;  %v8140_v8 = vld [vmem:[%s10913_s1 + $0x20] sm:$0xff]  ;;  %s380_s14 = scalar_select %p379_p10, %s8912_s21, 1  ;;  %vm6207_vm9 = vcmask 130048  }
  0x17   : > { %952 = vmatpush.bf16.msra.mxu2 %v8173_v4  ;;  %v8155_v9 = vld [vmem:[%s10913_s1 + $0x20] sm:$0xff]  ;;  %v8171_v10 = vld [vmem:[%s10913_s1 + $0x28] sm:$0xff]  ;;  %v8188_v11 = vld [vmem:[%s10913_s1 + $0x38] sm:$0xff]  ;;  %s7129_s19 = sshll.u32 %s7125_s15, 4  ;;  %s8786_s13 = scalar_lea.hbm %s10923_s11, 2  ;;  %s7130_s19 = int_to_ptr.hbm [resolvable:$true] %s7129_s19 }
  0x18   : > { %v8187_v12 = vld [vmem:[%s10913_s1 + $0x30] sm:$0xff]  ;;  %1162 = vmatpush.bf16.msra.mxu3 %v8188_v11  ;;  %v8139_v13 = vld [vmem:[%s10913_s1 + $0x18] sm:$0xff]  ;;  %v8170_v15 = vld [vmem:[%s10913_s1 + $0x20] sm:$0xff]  ;;  %s8707_s30 = smul.u32 392, %s380_s14  ;;  %s8780_s14 = sshra.s32 %s7130_s19, 4  ;;  %s8781_s14 = int_to_ptr.hbm [resolvable:$true] %s8780_s14 }
  0x19   : > { %533 = vmatpush.bf16.msra.mxu0 %v8142_v2  ;;  %v8154_v14 = vld [vmem:[%s10913_s1 + $0x18] sm:$0xff]  ;;  %v8186_v16 = vld [vmem:[%s10913_s1 + $0x28] sm:$0xff]  ;;  %v8138_v17 = vld [vmem:[%s10913_s1 + $0x10] sm:$0xff]  ;;  %s8782_s25 = scalar_lea.hbm %s8781_s14, 1  ;;  %p8787_p0 = scmp.lt.s32.totalorder %s8781_s14, %s10923_s11 }
  0x1a   : > { %743 = vmatpush.bf16.msra.mxu1 %v8157_v3  ;;  %v8153_v18 = vld [vmem:[%s10913_s1 + $0x10] sm:$0xff]  ;;  %v8169_v19 = vld [vmem:[%s10913_s1 + $0x18] sm:$0xff]  ;;  %v8185_v20 = vld [vmem:[%s10913_s1 + $0x20] sm:$0xff]  ;;  %s9025_s29 = scalar_lea.vmem %s10912_s0, %s8707_s30  ;;  %p8783_p11 = scmp.ne.s32.totalorder %s8781_s14, %s8782_s25 }
  0x1b   : > { %953 = vmatpush.bf16.msra.mxu2 %v8172_v7  ;;  %v8137_v21 = vld [vmem:[%s10913_s1 + $0x8] sm:$0xff]  ;;  %v8168_v23 = vld [vmem:[%s10913_s1 + $0x10] sm:$0xff]  ;;  %v8184_v24 = vld [vmem:[%s10913_s1 + $0x18] sm:$0xff]  ;;  %p8788_p1 = scmp.lt.s32.totalorder %s8786_s13, %s8782_s25 }
  0x1c   : > { %1163 = vmatpush.bf16.msra.mxu3 %v8187_v12  ;;  %v8152_v22 = vld [vmem:[%s10913_s1 + $0x8] sm:$0xff]  ;;  %v8136_v25 = vld [vmem:[%s10913_s1] sm:$0xff]  ;;  %v8183_v28 = vld [vmem:[%s10913_s1 + $0x10] sm:$0xff]  ;;  %p8784_p12 = pnand %p8783_p11, %p8929_p5 }
  0x1d   : > { %534 = vmatpush.bf16.msra.mxu0 %v8141_v5  ;;  %v8151_v26 = vld [vmem:[%s10913_s1] sm:$0xff]  ;;  %v8167_v27 = vld [vmem:[%s10913_s1 + $0x8] sm:$0xff]  ;;  %v8144_v30 = vld [vmem:[%s9025_s29 + $0x38] sm:$0xff]  ;;  %p8789_p2 = por %p8788_p1, %p8787_p0 }
  0x1e   : > { %744 = vmatpush.bf16.msra.mxu1 %v8156_v6  ;;  %v8129_v29 = vld [vmem:[%s9025_s29] sm:$0xff]  ;;  %v8182_v32 = vld [vmem:[%s10913_s1 + $0x8] sm:$0xff]  ;;  %v8159_v33 = vld [vmem:[%s9025_s29 + $0x70] sm:$0xff]  ;;  %p8785_p13 = pneg %p8784_p12 }
  0x1f   : > { %954 = vmatpush.bf16.msra.mxu2 %v8171_v10  ;;  %v8166_v31 = vld [vmem:[%s10913_s1] sm:$0xff]  ;;  %v8174_v35 = vld [vmem:[%s9025_s29 + $0xa8] sm:$0xff]  ;;  %v8160_v38 = vld [vmem:[%s9025_s29 + $0x78] sm:$0xff] }
  0x20   : > { %1164 = vmatpush.bf16.msra.mxu3 %v8186_v16  ;;  %v8181_v34 = vld [vmem:[%s10913_s1] sm:$0xff]  ;;  %v8130_v36 = vld [vmem:[%s9025_s29 + $0x8] sm:$0xff]  ;;  %v8175_v39 = vld [vmem:[%s9025_s29 + $0xb0] sm:$0xff]  ;;  %p8790_p3 = pnand %p8789_p2, %p8785_p13 }
  0x21   : > { %535 = vmatpush.bf16.msra.mxu0 %v8140_v8  ;;  %v8145_v37 = vld [vmem:[%s9025_s29 + $0x40] sm:$0xff]  ;;  %v8131_v40 = vld [vmem:[%s9025_s29 + $0x10] sm:$0xff]  ;;  %v8146_v41 = vld [vmem:[%s9025_s29 + $0x48] sm:$0xff] }
  0x22   : > { %745 = vmatpush.bf16.msra.mxu1 %v8155_v9  ;;  %v8161_v42 = vld [vmem:[%s9025_s29 + $0x80] sm:$0xff]  ;;  %v8176_v43 = vld [vmem:[%s9025_s29 + $0xb8] sm:$0xff]  ;;  %v8147_v45 = vld [vmem:[%s9025_s29 + $0x50] sm:$0xff] }
  0x23   : > { %955 = vmatpush.bf16.msra.mxu2 %v8170_v15  ;;  %v8132_v44 = vld [vmem:[%s9025_s29 + $0x18] sm:$0xff]  ;;  %v8162_v47 = vld [vmem:[%s9025_s29 + $0x88] sm:$0xff]  ;;  %v8202_v48 = vld [vmem:[%s10913_s1 + $0x30] sm:$0xff] }
  0x24   : > { %1165 = vmatpush.bf16.msra.mxu3 %v8185_v20  ;;  %v8203_v46 = vld [vmem:[%s10913_s1 + $0x38] sm:$0xff]  ;;  %v8177_v50 = vld [vmem:[%s9025_s29 + $0xc0] sm:$0xff]  ;;  %v8201_v51 = vld [vmem:[%s10913_s1 + $0x28] sm:$0xff] }
  0x25   : > { %536 = vmatpush.bf16.msra.mxu0 %v8139_v13  ;;  %v8218_v49 = vld [vmem:[%s10913_s1 + $0x38] sm:$0xff]  ;;  %v8217_v52 = vld [vmem:[%s10913_s1 + $0x30] sm:$0xff]  ;;  %v8200_v54 = vld [vmem:[%s10913_s1 + $0x20] sm:$0xff] }
  0x26   : > { %746 = vmatpush.bf16.msra.mxu1 %v8154_v14  ;;  %v8233_v53 = vld [vmem:[%s10913_s1 + $0x38] sm:$0xff]  ;;  %v8133_v55 = vld [vmem:[%s9025_s29 + $0x20] sm:$0xff]  ;;  %v8216_v57 = vld [vmem:[%s10913_s1 + $0x28] sm:$0xff] }
  0x27   : > { %956 = vmatpush.bf16.msra.mxu2 %v8169_v19  ;;  %v8148_v56 = vld [vmem:[%s9025_s29 + $0x58] sm:$0xff]  ;;  %v8232_v58 = vld [vmem:[%s10913_s1 + $0x30] sm:$0xff]  ;;  %v8215_v62 = vld [vmem:[%s10913_s1 + $0x20] sm:$0xff] }
  0x28   : > { %1166 = vmatpush.bf16.msra.mxu3 %v8184_v24  ;;  %v8199_v59 = vld [vmem:[%s10913_s1 + $0x18] sm:$0xff]  ;;  %v8163_v60 = vld [vmem:[%s9025_s29 + $0x90] sm:$0xff]  ;;  %v8231_v63 = vld [vmem:[%s10913_s1 + $0x28] sm:$0xff] }
  0x29   : > { %537 = vmatpush.bf16.msra.mxu0 %v8138_v17  ;;  %v8198_v61 = vld [vmem:[%s10913_s1 + $0x10] sm:$0xff]  ;;  %v8214_v0 = vld [vmem:[%s10913_s1 + $0x18] sm:$0xff]  ;;  %v8197_v1 = vld [vmem:[%s10913_s1 + $0x8] sm:$0xff] }
  0x2a   : > { %747 = vmatpush.bf16.msra.mxu1 %v8153_v18  ;;  %v8230_v2 = vld [vmem:[%s10913_s1 + $0x20] sm:$0xff]  ;;  %v8213_v3 = vld [vmem:[%s10913_s1 + $0x10] sm:$0xff]  ;;  %v8229_v4 = vld [vmem:[%s10913_s1 + $0x18] sm:$0xff] }
  0x2b   : > { %957 = vmatpush.bf16.msra.mxu2 %v8168_v23  ;;  %v8196_v5 = vld [vmem:[%s10913_s1] sm:$0xff]  ;;  %v8134_v6 = vld [vmem:[%s9025_s29 + $0x28] sm:$0xff]  ;;  %v8228_v9 = vld [vmem:[%s10913_s1 + $0x10] sm:$0xff] }
  0x2c   : > { %1167 = vmatpush.bf16.msra.mxu3 %v8183_v28  ;;  %v8149_v7 = vld [vmem:[%s9025_s29 + $0x60] sm:$0xff]  ;;  %v8212_v8 = vld [vmem:[%s10913_s1 + $0x8] sm:$0xff]  ;;  %v8164_v11 = vld [vmem:[%s9025_s29 + $0x98] sm:$0xff] }
  0x2d   : > { %538 = vmatpush.bf16.msra.mxu0 %v8137_v21  ;;  %v8211_v10 = vld [vmem:[%s10913_s1] sm:$0xff]  ;;  %v8227_v12 = vld [vmem:[%s10913_s1 + $0x8] sm:$0xff]  ;;  %v8135_v15 = vld [vmem:[%s9025_s29 + $0x30] sm:$0xff] }
  0x2e   : > { %748 = vmatpush.bf16.msra.mxu1 %v8152_v22  ;;  %v8178_v13 = vld [vmem:[%s9025_s29 + $0xc8] sm:$0xff]  ;;  %v8226_v14 = vld [vmem:[%s10913_s1] sm:$0xff]  ;;  %v8179_v18 = vld [vmem:[%s9025_s29 + $0xd0] sm:$0xff] }
  0x2f   : > { %958 = vmatpush.bf16.msra.mxu2 %v8167_v27  ;;  %v8150_v16 = vld [vmem:[%s9025_s29 + $0x68] sm:$0xff]  ;;  %v8165_v17 = vld [vmem:[%s9025_s29 + $0xa0] sm:$0xff]  ;;  %v8204_v20 = vld [vmem:[%s9025_s29 + $0x118] sm:$0xff] }
  0x30   : > { %1168 = vmatpush.bf16.msra.mxu3 %v8182_v32  ;;  %v8189_v19 = vld [vmem:[%s9025_s29 + $0xe0] sm:$0xff]  ;;  %v8219_v21 = vld [vmem:[%s9025_s29 + $0x150] sm:$0xff]  ;;  %v8180_v22 = vld [vmem:[%s9025_s29 + $0xd8] sm:$0xff] }
  0x31   : > { %539 = vmatpush.bf16.msra.mxu0 %v8136_v25  ;;  %v8190_v23 = vld [vmem:[%s9025_s29 + $0xe8] sm:$0xff]  ;;  %v8205_v24 = vld [vmem:[%s9025_s29 + $0x120] sm:$0xff] }
  0x32   : > { %749 = vmatpush.bf16.msra.mxu1 %v8151_v26  ;;  %v9150_v27 = vld [vmem:[%s10914_s2] ss:$0 sm:$0xff] }
  0x33   : > { %959 = vmatpush.bf16.msra.mxu2 %v8166_v31  ;;  %v9155_v28 = vld [vmem:[%s10914_s2] ss:$0 sm:$0xff] }
  0x34   : > { %540 = vmatmul.bf16.vlgmr.msra.gmra.mxu0 %v8129_v29  ;;  %1169 = vmatpush.bf16.msra.mxu3 %v8181_v34  ;;  %v8220_v29 = vld [vmem:[%s9025_s29 + $0x158] sm:$0xff] }
  0x35   : > { %750 = vmatmul.bf16.vlgmr.msra.gmra.mxu1 %v8144_v30  ;;  %1372 = vmatpush.bf16.msrb.mxu0 %v8203_v46  ;;  %v9181_v46 = vld [vmem:[%s10914_s2] ss:$0 sm:$0xff] }
  0x36   : > { %960 = vmatmul.bf16.vlgmr.msra.gmra.mxu2 %v8159_v33  ;;  %1582 = vmatpush.bf16.msrb.mxu1 %v8218_v49 }
  0x37   : > { %1170 = vmatmul.bf16.vlgmr.msra.gmra.mxu3 %v8174_v35  ;;  %1792 = vmatpush.bf16.msrb.mxu2 %v8233_v53 }
  0x39   : > { %1373 = vmatpush.bf16.msrb.mxu0 %v8202_v48 }
  0x3a   : > { %1583 = vmatpush.bf16.msrb.mxu1 %v8217_v52 }
  0x3b   : > { %1793 = vmatpush.bf16.msrb.mxu2 %v8232_v58 }
  0x3d   : > { %1374 = vmatpush.bf16.msrb.mxu0 %v8201_v51  ;;  %v8221_v51 = vld [vmem:[%s9025_s29 + $0x160] sm:$0xff] }
  0x3e   : > { %1584 = vmatpush.bf16.msrb.mxu1 %v8216_v57 }
  0x3f   : > { %1794 = vmatpush.bf16.msrb.mxu2 %v8231_v63 }
  0x41   : > { %1375 = vmatpush.bf16.msrb.mxu0 %v8200_v54 }
  0x42   : > { %1585 = vmatpush.bf16.msrb.mxu1 %v8215_v62 }
  0x43   : > { %1795 = vmatpush.bf16.msrb.mxu2 %v8230_v2 }
  0x44   : > { %545 = vmatmul.bf16.gmra.mxu0 %v8130_v36 }
  0x45   : > { %755 = vmatmul.bf16.gmra.mxu1 %v8145_v37  ;;  %1376 = vmatpush.bf16.msrb.mxu0 %v8199_v59 }
  0x46   : > { %965 = vmatmul.bf16.gmra.mxu2 %v8160_v38  ;;  %1586 = vmatpush.bf16.msrb.mxu1 %v8214_v0 }
  0x47   : > { %1175 = vmatmul.bf16.gmra.mxu3 %v8175_v39  ;;  %1796 = vmatpush.bf16.msrb.mxu2 %v8229_v4  ;;  %v8207_v4 = vld [vmem:[%s9025_s29 + $0x130] sm:$0xff] }
  0x49   : > { %1377 = vmatpush.bf16.msrb.mxu0 %v8198_v61 }
  0x4a   : > { %1587 = vmatpush.bf16.msrb.mxu1 %v8213_v3  ;;  %v8192_v3 = vld [vmem:[%s9025_s29 + $0xf8] sm:$0xff] }
  0x4b   : > { %1797 = vmatpush.bf16.msrb.mxu2 %v8228_v9 }
  0x4d   : > { %1378 = vmatpush.bf16.msrb.mxu0 %v8197_v1 }
  0x4e   : > { %1588 = vmatpush.bf16.msrb.mxu1 %v8212_v8 }
  0x4f   : > { %1798 = vmatpush.bf16.msrb.mxu2 %v8227_v12  ;;  %v8222_v12 = vld [vmem:[%s9025_s29 + $0x168] sm:$0xff] }
  0x51   : > { %1379 = vmatpush.bf16.msrb.mxu0 %v8196_v5 }
  0x52   : > { %1589 = vmatpush.bf16.msrb.mxu1 %v8211_v10 }
  0x53   : > { %1799 = vmatpush.bf16.msrb.mxu2 %v8226_v14 }
  0x54   : > { %550 = vmatmul.bf16.gmra.mxu0 %v8131_v40 }
  0x55   : > { %760 = vmatmul.bf16.gmra.mxu1 %v8146_v41  ;;  %v8191_v41 = vld [vmem:[%s9025_s29 + $0xf0] sm:$0xff] }
  0x56   : > { %970 = vmatmul.bf16.gmra.mxu2 %v8161_v42  ;;  %v8206_v42 = vld [vmem:[%s9025_s29 + $0x128] sm:$0xff] }
  0x57   : > { %1180 = vmatmul.bf16.gmra.mxu3 %v8176_v43 }
  0x64   : > { %555 = vmatmul.bf16.gmra.mxu0 %v8132_v44 }
  0x65   : > { %765 = vmatmul.bf16.gmra.mxu1 %v8147_v45 }
  0x66   : > { %975 = vmatmul.bf16.gmra.mxu2 %v8162_v47 }
  0x67   : > { %1185 = vmatmul.bf16.gmra.mxu3 %v8177_v50 }
  0x74   : > { %560 = vmatmul.bf16.gmra.mxu0 %v8133_v55 }
  0x75   : > { %770 = vmatmul.bf16.gmra.mxu1 %v8148_v56 }
  0x76   : > { %980 = vmatmul.bf16.gmra.mxu2 %v8163_v60 }
  0x77   : > { %1190 = vmatmul.bf16.gmra.mxu3 %v8178_v13 }
  0x84   : > { %565 = vmatmul.bf16.gmra.mxu0 %v8134_v6 }
  0x85   : > { %775 = vmatmul.bf16.gmra.mxu1 %v8149_v7 }
  0x86   : > { %985 = vmatmul.bf16.gmra.mxu2 %v8164_v11 }
  0x87   : > { %1195 = vmatmul.bf16.gmra.mxu3 %v8179_v18 }
  0x94   : > { %570 = vmatmul.bf16.gmra.mxu0 %v8135_v15 }
  0x95   : > { %780 = vmatmul.bf16.gmra.mxu1 %v8150_v16 }
  0x96   : > { %990 = vmatmul.bf16.gmra.mxu2 %v8165_v17 }
  0x97   : > { %1200 = vmatmul.bf16.gmra.mxu3 %v8180_v22 }
  0xa4   : > { %1380 = vmatmul.bf16.vlgmr.msrb.gmra.mxu0 %v8189_v19 }
  0xa5   : > { %1590 = vmatmul.bf16.vlgmr.msrb.gmra.mxu1 %v8204_v20 }
  0xa6   : > { %1800 = vmatmul.bf16.vlgmr.msrb.gmra.mxu2 %v8219_v21 }
  0xb1   : > { %v541_v25 = vpop.f32.mrf.mxu0 }
  0xb2   : > { %v751_v26 = vpop.f32.mrf.mxu1  ;;  %v9162_v31 = vadd.f32 %v9150_v27, %v541_v25 }
  0xb3   : > { %v9159_v30 = vadd.f32 %v9155_v28, %v751_v26 }
  0xb4   : > { %1385 = vmatmul.bf16.gmra.mxu0 %v8190_v23  ;;  %v576_v37 = vmax.f32 %v9162_v31, 0.0 }
  0xb5   : > { %1595 = vmatmul.bf16.gmra.mxu1 %v8205_v24  ;;  %v786_v34 = vmax.f32 %v9159_v30, 0.0 }
  0xb6   : > { %1805 = vmatmul.bf16.gmra.mxu2 %v8220_v29 }
  0xb9   : > { %v543_v32 = vpop.f32.mrf.mxu0  ;;  %v961_v40 = vpop.f32.mrf.mxu2 }
  0xba   : > { %v753_v33 = vpop.f32.mrf.mxu1  ;;  %v9166_v35 = vadd.f32 %v9150_v27, %v543_v32  ;;  %v9176_v43 = vpop.f32.mrf.mxu3  ;;  %v9184_v47 = vadd.f32 %v9181_v46, %v961_v40  ;;  %v8208_v40 = vld [vmem:[%s9025_s29 + $0x138] sm:$0xff] }
  0xbb   : > { %v9169_v36 = vadd.f32 %v9155_v28, %v753_v33  ;;  %v8193_v33 = vld [vmem:[%s9025_s29 + $0x100] sm:$0xff] }
  0xbc   : > { %v577_v38 = vmax.f32 %v9166_v35, 0.0  ;;  %v996_v49 = vmax.f32 %v9184_v47, 0.0 }
  0xbd   : > { %v787_v39 = vmax.f32 %v9169_v36, 0.0 }
  0xc1   : > { %v546_v44 = vpop.f32.mrf.mxu0  ;;  %v963_v48 = vpop.f32.mrf.mxu2 }
  0xc2   : > { %v756_v45 = vpop.f32.mrf.mxu1  ;;  %v9188_v50 = vadd.f32 %v9181_v46, %v963_v48  ;;  %v547_v54 = vadd.f32 %v9150_v27, %v546_v44  ;;  %v9194_v55 = vpop.f32.mrf.mxu3 }
  0xc3   : > { %v757_v52 = vadd.f32 %v9155_v28, %v756_v45 }
  0xc4   : > { %1390 = vmatmul.bf16.gmra.mxu0 %v8191_v41  ;;  %v997_v53 = vmax.f32 %v9188_v50, 0.0  ;;  %v578_v61 = vmax.f32 %v547_v54, 0.0 }
  0xc5   : > { %1600 = vmatmul.bf16.gmra.mxu1 %v8206_v42  ;;  %v788_v58 = vmax.f32 %v757_v52, 0.0 }
  0xc6   : > { %1810 = vmatmul.bf16.gmra.mxu2 %v8221_v51 }
  0xc9   : > { %v548_v56 = vpop.f32.mrf.mxu0  ;;  %v966_v0 = vpop.f32.mrf.mxu2 }
  0xca   : > { %v758_v57 = vpop.f32.mrf.mxu1  ;;  %v549_v59 = vadd.f32 %v9150_v27, %v548_v56  ;;  %v9200_v5 = vpop.f32.mrf.mxu3  ;;  %v967_v8 = vadd.f32 %v9181_v46, %v966_v0 }
  0xcb   : > { %v759_v60 = vadd.f32 %v9155_v28, %v758_v57 }
  0xcc   : > { %v579_v62 = vmax.f32 %v549_v59, 0.0  ;;  %v998_v10 = vmax.f32 %v967_v8, 0.0  ;;  %v385_v59 = vlaneseq }
  0xcd   : > { %v789_v63 = vmax.f32 %v759_v60, 0.0 }
  0xce   : > { %v8283_v1 = vpack.c.bf16 %v579_v62, %v578_v61  ;;  %v9241_v8 = vshrl.u32 %v385_v59, 7 }
  0xcf   : > { %v8318_v2 = vpack.c.bf16 %v789_v63, %v788_v58  ;;  %v8223_v58 = vld [vmem:[%s9025_s29 + $0x170] sm:$0xff] }
  0xd0   : > { %8632 = vst [vmem:[#allocation2 + $0x8] sm:$0xff] %v8283_v1  }
  0xd1   : > { %8639 = vst [vmem:[#allocation2 + $0x40] sm:$0xff] %v8318_v2   ;;  %v551_v6 = vpop.f32.mrf.mxu0  ;;  %v968_v9 = vpop.f32.mrf.mxu2  ;;  %v8830_v2 = vmov 0.0  }
  0xd2   : > { %v761_v7 = vpop.f32.mrf.mxu1  ;;  %v969_v11 = vadd.f32 %v9181_v46, %v968_v9  ;;  %v9207_v15 = vadd.f32 %v9150_v27, %v551_v6  ;;  %v9209_v16 = vpop.f32.mrf.mxu3  ;;  %1878 = vst [vmem:[#allocation3 + $0xc0] sm:$0xff] %v8830_v2 }
  0xd3   : > { %v762_v13 = vadd.f32 %v9155_v28, %v761_v7 }
  0xd4   : > { %1395 = vmatmul.bf16.gmra.mxu0 %v8192_v3  ;;  %v999_v14 = vmax.f32 %v969_v11, 0.0  ;;  %v580_v24 = vmax.f32 %v9207_v15, 0.0 }
  0xd5   : > { %1605 = vmatmul.bf16.gmra.mxu1 %v8207_v4  ;;  %v790_v20 = vmax.f32 %v762_v13, 0.0 }
  0xd6   : > { %v8353_v19 = vpack.c.bf16 %v999_v14, %v998_v10  ;;  %1815 = vmatmul.bf16.gmra.mxu2 %v8222_v12  ;;  %v9248_v14 = vadd.s32 8, %v9241_v8 }
  0xd7   : > { %v2054_v52 = vrot.slane %v790_v20, 4  ;;  %v1884_v11 = vld [vmem:[#allocation2 + $0xc] sm:$0xc] }
  0xd8   : > { %8646 = vst [vmem:[#allocation2 + $0x78] sm:$0xff] %v8353_v19   ;;  %v2037_v23 = vld [vmem:[#allocation2 + $0x44] sm:$0xc]  ;;  %v8194_v19 = vld [vmem:[%s9025_s29 + $0x108] sm:$0xff] }
  0xd9   : > { %v553_v17 = vpop.f32.mrf.mxu0  ;;  %v971_v29 = vpop.f32.mrf.mxu2  ;;  %v2045_v32 = vunpack.c.l.bf16 %v2037_v23  ;;  %v9252_v23 = vand.u32 127, %v385_v59 }
  0xda   : > { %v763_v18 = vpop.f32.mrf.mxu1  ;;  %v554_v21 = vadd.f32 %v9150_v27, %v553_v17  ;;  %v9216_v41 = vpop.f32.mrf.mxu3  ;;  %v9219_v45 = vadd.f32 %v9181_v46, %v971_v29 }
  0xdb   : > { %v764_v22 = vadd.f32 %v9155_v28, %v763_v18  ;;  %v2053_v48 = vrot.slane %v2045_v32, 4  ;;  %v1892_v18 = vunpack.c.l.bf16 %v1884_v11  ;;  %v9283_v11 = vld [vmem:[%s10914_s2] ss:$0 sm:$0xff] }
  0xdc   : > { %v581_v25 = vmax.f32 %v554_v21, 0.0  ;;  %v1000_v56 = vmax.f32 %v9219_v45, 0.0  ;;  %v1902_v21 = vrot.slane %v580_v24, 4 }
  0xdd   : > { %v791_v26 = vmax.f32 %v764_v22, 0.0  ;;  %v2055_v61 = vsel %vm1900_vm0, %v2053_v48, %v2054_v52  ;;  %v8209_v22 = vld [vmem:[%s9025_s29 + $0x140] sm:$0xff]  ;;  %v1882_v48 = vld [vmem:[#allocation2 + $0x8] sm:$0xf] }
  0xde   : > { %v2064_v0 = vmax.f32 %v786_v34, %v2055_v61  ;;  %v1904_v20 = vrot.slane %v581_v25, 4  ;;  %v8224_v61 = vld [vmem:[%s9025_s29 + $0x178] sm:$0xff] }
  0xdf   : > { %v9221_v51 = vrot.slane %v791_v26, 4  ;;  %v390_v26 = vmul.u32 2, %v9241_v8 }
  0xe0   : > { %v1905_v25 = vsel %vm1900_vm0, %v1902_v21, %v1904_v20 }
  0xe1   : > { %v556_v42 = vpop.f32.mrf.mxu0  ;;  %v973_v54 = vpop.f32.mrf.mxu2  ;;  %v2057_v63 = vsel %vm1900_vm0, %v2054_v52, %v9221_v51  ;;  %v1883_v52 = vld [vmem:[#allocation2 + $0xc] sm:$0x3]  ;;  %vm392_vm1 = vcmp.eq.s32.totalorder %v9252_v23, %v390_v26 }
  0xe2   : > { %v766_v44 = vpop.f32.mrf.mxu1  ;;  %v9225_v57 = vadd.f32 %v9181_v46, %v973_v54  ;;  %v557_v1 = vadd.f32 %v9150_v27, %v556_v42  ;;  %v2065_v3 = vmax.f32 %v787_v39, %v2057_v63  ;;  %v9239_v4 = vpop.f32.mrf.mxu3  ;;  %v391_v42 = vmul.u32 2, %v9248_v14  ;;  %v2181_v63 = vld [vmem:[#allocation2 + $0x7c] sm:$0xc] }
  0xe3   : > { %v767_v60 = vadd.f32 %v9155_v28, %v766_v44  ;;  %v1901_v44 = vrot.slane %v1892_v18, 4 }
  0xe4   : > { %1400 = vmatmul.bf16.gmra.mxu0 %v8193_v33  ;;  %v1001_v62 = vmax.f32 %v9225_v57, 0.0  ;;  %v9245_v10 = vpack.c.bf16 %v2065_v3, %v2064_v0  ;;  %v582_v12 = vmax.f32 %v557_v1, 0.0  ;;  %vm393_vm2 = vcmp.eq.s32.totalorder %v9252_v23, %v391_v42 }
  0xe5   : > { %1610 = vmatmul.bf16.gmra.mxu1 %v8208_v40  ;;  %v792_v9 = vmax.f32 %v767_v60, 0.0  ;;  %v1903_v24 = vsel %vm1900_vm0, %v1901_v44, %v1902_v21  ;;  %v1890_v1 = vunpack.c.l.bf16 %v1882_v48  ;;  %v1891_v3 = vunpack.c.l.bf16 %v1883_v52 }
  0xe6   : > { %1820 = vmatmul.bf16.gmra.mxu2 %v8223_v58 }
  0xe9   : > { %v558_v6 = vpop.f32.mrf.mxu0  ;;  %v976_v13 = vpop.f32.mrf.mxu2 }
  0xea   : > { %v768_v7 = vpop.f32.mrf.mxu1  ;;  %v559_v30 = vadd.f32 %v9150_v27, %v558_v6  ;;  %v1186_v29 = vpop.f32.mrf.mxu3  ;;  %v977_v40 = vadd.f32 %v9181_v46, %v976_v13 }
  0xeb   : > { %v769_v34 = vadd.f32 %v9155_v28, %v768_v7  ;;  %v1912_v7 = vmax.f32 %v576_v37, %v1903_v24  ;;  %v1187_v44 = vadd.f32 %v9283_v11, %v1186_v29  ;;  %v9310_v29 = vadd.f32 %v9283_v11, %v9216_v41 }
  0xec   : > { %v583_v36 = vmax.f32 %v559_v30, 0.0  ;;  %v1002_v59 = vmax.f32 %v977_v40, 0.0 }
  0xed   : > { %v793_v39 = vmax.f32 %v769_v34, 0.0  ;;  %v7189_v34 = vsel %vm392_vm1, 1.0, %v8830_v2 }
  0xee   : > { %v8293_v15 = vpack.c.bf16 %v583_v36, %v582_v12  ;;  %v7190_v36 = vsel %vm393_vm2, 1.0, %v8830_v2 }
  0xef   : > { %v8328_v17 = vpack.c.bf16 %v793_v39, %v792_v9  ;;  %v1913_v9 = vmax.f32 %v577_v38, %v1905_v25  ;;  %v2189_v39 = vunpack.c.l.bf16 %v2181_v63  ;;  %v1177_v38 = vadd.f32 %v9283_v11, %v9200_v5 }
  0xf0   : > { %8634 = vst [vmem:[#allocation2 + $0x18] sm:$0xff] %v8293_v15  }
  0xf1   : > { %8641 = vst [vmem:[#allocation2 + $0x50] sm:$0xff] %v8328_v17   ;;  %v561_v32 = vpop.f32.mrf.mxu0  ;;  %v978_v54 = vpop.f32.mrf.mxu2  ;;  %v1179_v17 = vadd.f32 %v9283_v11, %v9209_v16 }
  0xf2   : > { %v771_v33 = vpop.f32.mrf.mxu1  ;;  %v9263_v58 = vadd.f32 %v9150_v27, %v561_v32  ;;  %v979_v60 = vadd.f32 %v9181_v46, %v978_v54  ;;  %v1188_v13 = vpop.f32.mrf.mxu3  ;;  %v2179_v32 = vld [vmem:[#allocation2 + $0x78] sm:$0xf] }
  0xf3   : > { %v9271_v0 = vadd.f32 %v9155_v28, %v771_v33  ;;  %v1208_v33 = vmax.f32 %v1177_v38, 0.0  ;;  %v1209_v40 = vmax.f32 %v1179_v17, 0.0  ;;  %v1189_v5 = vadd.f32 %v9283_v11, %v1188_v13  ;;  %v2180_v13 = vld [vmem:[#allocation2 + $0x7c] sm:$0x3] }
  0xf4   : > { %1405 = vmatmul.bf16.gmra.mxu0 %v8194_v19  ;;  %v1003_v30 = vmax.f32 %v979_v60, 0.0  ;;  %v584_v31 = vmax.f32 %v9263_v58, 0.0  ;;  %v9306_v60 = vpack.c.bf16 %v7190_v36, %v7189_v34  ;;  %v2187_v63 = vunpack.c.l.bf16 %v2179_v32 }
  0xf5   : > { %1615 = vmatmul.bf16.gmra.mxu1 %v8209_v22  ;;  %v794_v18 = vmax.f32 %v9271_v0, 0.0  ;;  %v1213_v34 = vmax.f32 %v1189_v5, 0.0  ;;  %v2200_v38 = vrot.slane %v1001_v62, 4 }
  0xf6   : > { %v8363_v35 = vpack.c.bf16 %v1003_v30, %v1002_v59  ;;  %1825 = vmatmul.bf16.gmra.mxu2 %v8224_v61  ;;  %v9304_v59 = vpack.c.bf16 %v1913_v9, %v1912_v7  ;;  %v8388_v61 = vpack.c.bf16 %v1209_v40, %v1208_v33  ;;  %v1210_v7 = vmax.f32 %v9310_v29, 0.0 }
  0xf7   : > { %v9273_v6 = vld [vmem:[#allocation2 + $0x18] sm:$0xff]   ;;  %v1212_v9 = vmax.f32 %v1187_v44, 0.0 }
  0xf8   : > { %v1895_v12 = vunpack.c.l.bf16 %v9273_v6  ;;  %8648 = vst [vmem:[#allocation2 + $0x88] sm:$0xff] %v8363_v35  }
  0xf9   : > { %v563_v37 = vpop.f32.mrf.mxu0  ;;  %v981_v25 = vpop.f32.mrf.mxu2  ;;  %8653 = vst [vmem:[#allocation2 + $0xb0] sm:$0xff] %v8388_v61   ;;  %v8398_v44 = vpack.c.bf16 %v1213_v34, %v1212_v9 }
  0xfa   : > { %v773_v15 = vpop.f32.mrf.mxu1  ;;  %v9294_v19 = vadd.f32 %v9150_v27, %v563_v37  ;;  %v1906_v22 = vrot.slane %v1895_v12, 4  ;;  %v8195_v12 = vld [vmem:[%s9025_s29 + $0x110] sm:$0xff]  ;;  %v2197_v37 = vrot.slane %v2189_v39, 4  ;;  %v9323_v35 = vadd.f32 %v9181_v46, %v981_v25 }
  0xfb   : > { %v9297_v21 = vadd.f32 %v9155_v28, %v773_v15  ;;  %v9327_v39 = vadd.f32 %v9283_v11, %v9176_v43  ;;  %v400_v25 = vadd.s32 1, %v391_v42  ;;  %8655 = vst [vmem:[#allocation2 + $0xc0] sm:$0xff] %v8398_v44  }
  0xfc   : > { %v585_v16 = vmax.f32 %v9294_v19, 0.0  ;;  %v1907_v52 = vsel %vm1900_vm0, %v1904_v20, %v1906_v22  ;;  %v1915_v24 = vmax.f32 %v1891_v3, %v1906_v22  ;;  %v9315_v20 = vadd.f32 %v9283_v11, %v9239_v4 }
  0xfd   : > { %v795_v48 = vmax.f32 %v9297_v21, 0.0  ;;  %v1914_v54 = vmax.f32 %v1890_v1, %v1907_v52  ;;  %v8210_v1 = vld [vmem:[%s9025_s29 + $0x148] sm:$0xff]  ;;  %v2198_v3 = vrot.slane %v1000_v56, 4  ;;  %v9331_v4 = vadd.f32 %v9283_v11, %v9194_v55  ;;  %v8225_v52 = vld [vmem:[%s9025_s29 + $0x180] sm:$0xff]  ;;  %s377_s29 = sand.u32 1, %s8820_s18  }
  0xfe   : > { %v2188_v56 = vunpack.c.l.bf16 %v2180_v13  ;;  %v1211_v17 = vmax.f32 %v9315_v20, 0.0  ;;  %v1206_v22 = vmax.f32 %v9327_v39, 0.0  ;;  %v399_v55 = vadd.s32 1, %v390_v26  ;;  %s378_s22 = scalar_lea.vmem [#allocation4], %s377_s29  ;;  %s7117_s26 = scalar_lea.sflag [#allocation5], %s377_s29 }
  0xff   : > { %v1917_v30 = vpack.c.bf16 %v1915_v24, %v1914_v54  ;;  %v9333_v45 = vld [vmem:[#allocation2 + $0x88] sm:$0xff]   ;;  %v1207_v32 = vmax.f32 %v9331_v4, 0.0  ;;  %v2199_v40 = vsel %vm1900_vm0, %v2197_v37, %v2198_v3  ;;  %v1004_v57 = vmax.f32 %v9323_v35, 0.0  ;;  %s7127_s24 = sshll.u32 %s378_s22, 4  ;;  %s7128_s24 = int_to_ptr.vmem [resolvable:$true] %s7127_s24 }
 0x100   : > { %v2192_v43 = vunpack.c.l.bf16 %v9333_v45  ;;  %v2201_v8 = vsel %vm1900_vm0, %v2198_v3, %v2200_v38  ;;  %v2208_v13 = vmax.f32 %v996_v49, %v2199_v40  ;;  %vm401_vm5 = vcmp.eq.s32.totalorder %v9252_v23, %v399_v55  ;;  %v2325_v42 = vld [vmem:[#allocation2 + $0xb4] sm:$0xc]  ;;  %v2324_v50 = vld [vmem:[#allocation2 + $0xb4] sm:$0x3]  ;;  %v2323_v40 = vld [vmem:[#allocation2 + $0xb0] sm:$0xf] }
 0x101   : > { %v566_v36 = vpop.f32.mrf.mxu0  ;;  %v1924_v15 = vsel %vm1922_vm3, %v1917_v30, 0  ;;  %v983_v33 = vpop.f32.mrf.mxu2  ;;  %v2209_v14 = vmax.f32 %v997_v53, %v2201_v8  ;;  %vm402_vm6 = vcmp.eq.s32.totalorder %v9252_v23, %v400_v25  ;;  %v2333_v53 = vunpack.c.l.bf16 %v2325_v42 }
 0x102   : > { %v776_v41 = vpop.f32.mrf.mxu1  ;;  %1932 = vmatpush.bf16.msrb.mxu3 %v1924_v15  ;;  %v9346_v62 = vadd.f32 %v9181_v46, %v983_v33  ;;  %v2202_v5 = vrot.slane %v2192_v43, 4  ;;  %v567_v26 = vadd.f32 %v9150_v27, %v566_v36  ;;  %v7192_v44 = vsel %vm402_vm6, 1.0, %v8830_v2 }
 0x103   : > { %v777_v24 = vadd.f32 %v9155_v28, %v776_v41 }
 0x104   : > { %1410 = vmatmul.bf16.gmra.mxu0 %v8195_v12  ;;  %v1005_v54 = vmax.f32 %v9346_v62, 0.0  ;;  %v2203_v61 = vsel %vm1900_vm0, %v2200_v38, %v2202_v5  ;;  %v2211_v30 = vmax.f32 %v2188_v56, %v2202_v5  ;;  %v586_v49 = vmax.f32 %v567_v26, 0.0  ;;  %v9371_v38 = vpop.f32.mrf.mxu3 }
 0x105   : > { %1620 = vmatmul.bf16.gmra.mxu1 %v8210_v1  ;;  %v2210_v12 = vmax.f32 %v2187_v63, %v2203_v61  ;;  %v796_v1 = vmax.f32 %v777_v24, 0.0  ;;  %v2212_v56 = vpack.c.bf16 %v2209_v14, %v2208_v13  ;;  %v2332_v24 = vunpack.c.l.bf16 %v2324_v50 }
 0x106   : > { %1933 = vmatpush.bf16.msrb.mxu3 %v9304_v59  ;;  %1830 = vmatmul.bf16.gmra.mxu2 %v8225_v52  ;;  %v9380_v52 = vld [vmem:[#allocation2 + $0xc0] sm:$0xff]   ;;  %v2344_v26 = vrot.slane %v1211_v17, 4  ;;  %v2341_v61 = vrot.slane %v2333_v53, 4 }
 0x107   : > { %v2213_v47 = vpack.c.bf16 %v2211_v30, %v2210_v12  ;;  %v2336_v8 = vunpack.c.l.bf16 %v9380_v52  ;;  %v2342_v30 = vrot.slane %v1210_v7, 4 }
 0x109   : > { %v568_v37 = vpop.f32.mrf.mxu0  ;;  %7613 = vmatmul.msk.bf16.vlgmr.msrb.gmra.mxu3 %vm1918_vm4, %v9306_v60  ;;  %v986_v36 = vpop.f32.mrf.mxu2  ;;  %v2215_v41 = vsel %vm1922_vm3, %v2213_v47, 0  ;;  %v2346_v23 = vrot.slane %v2336_v8, 4  ;;  %v2343_v7 = vsel %vm1900_vm0, %v2341_v61, %v2342_v30 }
 0x10a   : > { %1949 = vmatpush.bf16.msra.mxu3 %v1924_v15  ;;  %v778_v20 = vpop.f32.mrf.mxu1  ;;  %v569_v3 = vadd.f32 %v9150_v27, %v568_v37  ;;  %v9369_v15 = vld [vmem:[#allocation2 + $0x50] sm:$0xff]   ;;  %2223 = vmatpush.bf16.msra.mxu1 %v2215_v41  ;;  %v987_v13 = vadd.f32 %v9181_v46, %v986_v36 }
 0x10b   : > { %v779_v63 = vadd.f32 %v9155_v28, %v778_v20  ;;  %2237 = vmatpush.bf16.msra.mxu2 %v2215_v41  ;;  %v2048_v5 = vunpack.c.l.bf16 %v9369_v15  ;;  %v2347_v17 = vsel %vm1900_vm0, %v2344_v26, %v2346_v23  ;;  %v2355_v29 = vmax.f32 %v2332_v24, %v2346_v23 }
 0x10c   : > { %v587_v9 = vmax.f32 %v569_v3, 0.0  ;;  %v1006_v14 = vmax.f32 %v987_v13, 0.0 }
 0x10d   : > { %v797_v34 = vmax.f32 %v779_v63, 0.0  ;;  %v2058_v37 = vrot.slane %v2048_v5, 4  ;;  %v2345_v63 = vsel %vm1900_vm0, %v2342_v30, %v2344_v26 }
 0x10e   : > { %1950 = vmatpush.bf16.msra.mxu3 %v9304_v59  ;;  %v8303_v43 = vpack.c.bf16 %v587_v9, %v586_v49  ;;  %v7191_v59 = vsel %vm401_vm5, 1.0, %v8830_v2  ;;  %2224 = vmatpush.bf16.msra.mxu1 %v2212_v56  ;;  %v2331_v2 = vunpack.c.l.bf16 %v2323_v40  ;;  %v2035_v49 = vld [vmem:[#allocation2 + $0x40] sm:$0xf]  ;;  %v2036_v9 = vld [vmem:[#allocation2 + $0x44] sm:$0x3] }
 0x10f   : > { %v8338_v33 = vpack.c.bf16 %v797_v34, %v796_v1  ;;  %2238 = vmatpush.bf16.msra.mxu2 %v2212_v56  ;;  %v9386_v25 = vpack.c.bf16 %v7192_v44, %v7191_v59  ;;  %v9393_v1 = vpop.f32.mrf.mxu3  ;;  %v2043_v24 = vunpack.c.l.bf16 %v2035_v49  ;;  %v2044_v8 = vunpack.c.l.bf16 %v2036_v9 }
 0x110   : > { %8636 = vst [vmem:[#allocation2 + $0x28] sm:$0xff] %v8303_v43   ;;  %v2354_v3 = vmax.f32 %v2331_v2, %v2347_v17  ;;  %v2352_v43 = vmax.f32 %v1206_v22, %v2343_v7  ;;  %v2059_v26 = vsel %vm1900_vm0, %v9221_v51, %v2058_v37  ;;  %v1969_v17 = vunpack.c.h.bf16 %v9273_v6 }
 0x111   : > { %8643 = vst [vmem:[#allocation2 + $0x60] sm:$0xff] %v8338_v33   ;;  %v571_v55 = vpop.f32.mrf.mxu0  ;;  %v988_v20 = vpop.f32.mrf.mxu2  ;;  %v2353_v33 = vmax.f32 %v1207_v32, %v2345_v63 }
 0x112   : > { %v781_v12 = vpop.f32.mrf.mxu1  ;;  %v989_v42 = vadd.f32 %v9181_v46, %v988_v20  ;;  %v2357_v41 = vpack.c.bf16 %v2355_v29, %v2354_v3  ;;  %v572_v50 = vadd.f32 %v9150_v27, %v571_v55  ;;  %v9412_v29 = vmax.f32 %v2043_v24, %v2059_v26 }
 0x113   : > { %v782_v47 = vadd.f32 %v9155_v28, %v781_v12  ;;  %v2356_v51 = vpack.c.bf16 %v2353_v33, %v2352_v43  ;;  %v9428_v43 = vld [vmem:[%s10914_s2] ss:$0 sm:$0xff] }
 0x114   : > { %v1007_v34 = vmax.f32 %v989_v42, 0.0  ;;  %v2359_v12 = vsel %vm1922_vm3, %v2357_v41, 0  ;;  %v588_v13 = vmax.f32 %v572_v50, 0.0  ;;  %v9421_v42 = vld [vmem:[%s10914_s2] ss:$0 sm:$0xff] }
 0x115   : > { %7621 = vmatmul.msk.bf16.vlgmr.msra.gmra.mxu1 %vm1918_vm4, %v9306_v60  ;;  %v798_v39 = vmax.f32 %v782_v47, 0.0  ;;  %2381 = vmatpush.bf16.msrb.mxu2 %v2359_v12 }
 0x116   : > { %v8373_v44 = vpack.c.bf16 %v1007_v34, %v1006_v14  ;;  %7622 = vmatmul.msk.bf16.vlgmr.msra.gmra.mxu2 %vm1918_vm4, %v9386_v25  ;;  %2367 = vmatpush.bf16.msrb.mxu1 %v2359_v12  ;;  %v1984_v41 = vrot.slane %v588_v13, 4 }
 0x117   : > { %v1965_v36 = vld [vmem:[#allocation2 + $0x28] sm:$0xc]  ;;  %v1966_v53 = vld [vmem:[#allocation2 + $0x2c] sm:$0xf]  ;;  %v1964_v7 = vld [vmem:[#allocation2 + $0x28] sm:$0x3] }
 0x118   : > { %v2109_v56 = vld [vmem:[#allocation2 + $0x60] sm:$0xc]  ;;  %v2110_v5 = vld [vmem:[#allocation2 + $0x64] sm:$0xf]  ;;  %v1973_v32 = vunpack.c.l.bf16 %v1965_v36  ;;  %8650 = vst [vmem:[#allocation2 + $0x98] sm:$0xff] %v8373_v44   ;;  %v1974_v61 = vunpack.c.l.bf16 %v1966_v53  ;;  %v1972_v9 = vunpack.c.l.bf16 %v1964_v7  ;;  %v2128_v53 = vrot.slane %v798_v39, 4 }
 0x119   : > { %v573_v40 = vpop.f32.mrf.mxu0  ;;  %7614 = vmatmul.msk.bf16.vlgmr.msra.gmra.mxu3 %vm1918_vm4, %v9386_v25  ;;  %v2117_v30 = vunpack.c.l.bf16 %v2109_v56  ;;  %v2118_v55 = vunpack.c.l.bf16 %v2110_v5  ;;  %v991_v20 = vpop.f32.mrf.mxu2  ;;  %v2108_v14 = vld [vmem:[#allocation2 + $0x60] sm:$0x3]  ;;  %2382 = vmatpush.bf16.msrb.mxu2 %v2356_v51 }
 0x11a   : > { %v783_v59 = vpop.f32.mrf.mxu1  ;;  %v574_v22 = vadd.f32 %v9150_v27, %v573_v40  ;;  %v9414_v27 = vmax.f32 %v2044_v8, %v2058_v37  ;;  %v1981_v3 = vrot.slane %v1973_v32, 4  ;;  %v1982_v63 = vrot.slane %v1974_v61, 4  ;;  %2368 = vmatpush.bf16.msrb.mxu1 %v2356_v51 }
 0x11b   : > { %v784_v4 = vadd.f32 %v9155_v28, %v783_v59  ;;  %v9416_v28 = vpop.f32.mrf.mxu3  ;;  %v2125_v47 = vrot.slane %v2117_v30, 4  ;;  %v2126_v49 = vrot.slane %v2118_v55, 4  ;;  %v2116_v34 = vunpack.c.l.bf16 %v2108_v14 }
 0x11c   : > { %v589_v2 = vmax.f32 %v574_v22, 0.0  ;;  %v2113_v37 = vunpack.c.h.bf16 %v9369_v15  ;;  %v992_v56 = vadd.f32 %v9181_v46, %v991_v20  ;;  %v1983_v59 = vsel %vm1900_vm0, %v1981_v3, %v1982_v63 }
 0x11d   : > { %v799_v23 = vmax.f32 %v784_v4, 0.0  ;;  %v2127_v44 = vsel %vm1900_vm0, %v2125_v47, %v2126_v49  ;;  %v1985_v24 = vsel %vm1900_vm0, %v1982_v63, %v1984_v41  ;;  %v2129_v12 = vsel %vm1900_vm0, %v2126_v49, %v2128_v53 }
 0x11e   : > { %v1986_v50 = vrot.slane %v589_v2, 4  ;;  %v1993_v32 = vmax.f32 %v584_v31, %v1985_v24  ;;  %v1008_v13 = vmax.f32 %v992_v56, 0.0  ;;  %v1992_v19 = vmax.f32 %v1969_v17, %v1983_v59 }
 0x11f   : > { %v2130_v40 = vrot.slane %v799_v23, 4  ;;  %v2253_v61 = vld [vmem:[#allocation2 + $0x98] sm:$0xc]  ;;  %v2252_v23 = vld [vmem:[#allocation2 + $0x98] sm:$0x3]  ;;  %v2137_v51 = vmax.f32 %v794_v18, %v2129_v12 }
 0x120   : > { %v1987_v15 = vsel %vm1900_vm0, %v1984_v41, %v1986_v50  ;;  %v1995_v5 = vmax.f32 %v1972_v9, %v1986_v50  ;;  %v2254_v14 = vld [vmem:[#allocation2 + $0x9c] sm:$0xf]  ;;  %v2261_v3 = vunpack.c.l.bf16 %v2253_v61  ;;  %v2260_v49 = vunpack.c.l.bf16 %v2252_v23 }
 0x121   : > { %v1381_v6 = vpop.f32.mrf.mxu0  ;;  %v993_v8 = vpop.f32.mrf.mxu2  ;;  %v1994_v39 = vmax.f32 %v585_v16, %v1987_v15  ;;  %v2131_v22 = vsel %vm1900_vm0, %v2128_v53, %v2130_v40  ;;  %v2139_v4 = vmax.f32 %v2116_v34, %v2130_v40  ;;  %v2136_v16 = vmax.f32 %v2113_v37, %v2127_v44  ;;  %v9476_v53 = vld [vmem:[%s10914_s2] ss:$0 sm:$0xff] }
 0x122   : > { %v1591_v36 = vpop.f32.mrf.mxu1  ;;  %v9431_v33 = vadd.f32 %v9421_v42, %v1381_v6  ;;  %v2138_v55 = vmax.f32 %v795_v48, %v2131_v22  ;;  %v994_v2 = vadd.f32 %v9181_v46, %v993_v8  ;;  %v1996_v48 = vpack.c.bf16 %v1993_v32, %v1992_v19 }
 0x123   : > { %v9438_v26 = vadd.f32 %v9428_v43, %v1591_v36  ;;  %v1198_v30 = vpop.f32.mrf.mxu3  ;;  %v1997_v20 = vpack.c.bf16 %v1995_v5, %v1994_v39  ;;  %v9468_v6 = vpack.c.bf16 %v2137_v51, %v2136_v16  ;;  %v2257_v9 = vunpack.c.h.bf16 %v9333_v45 }
 0x124   : > { %v1416_v58 = vmax.f32 %v9431_v33, 0.0  ;;  %v2141_v31 = vpack.c.bf16 %v2139_v4, %v2138_v55  ;;  %v1009_v7 = vmax.f32 %v994_v2, 0.0  ;;  %v2262_v34 = vunpack.c.l.bf16 %v2254_v14 }
 0x125   : > { %7625 = vmatmul.msk.bf16.vlgmr.msrb.gmra.mxu1 %vm1918_vm4, %v9306_v60  ;;  %v1999_v21 = vsel %vm1922_vm3, %v1997_v20, 0  ;;  %v1626_v47 = vmax.f32 %v9438_v26, 0.0  ;;  %v2269_v37 = vrot.slane %v2261_v3, 4  ;;  %v2272_v59 = vrot.slane %v1008_v13, 4 }
 0x126   : > { %7626 = vmatmul.msk.bf16.vlgmr.msrb.gmra.mxu2 %vm1918_vm4, %v9386_v25  ;;  %2007 = vmatpush.bf16.msrb.mxu3 %v1999_v21  ;;  %v9459_v0 = vsel %vm1922_vm3, %v2141_v31, 0  ;;  %v2270_v56 = vrot.slane %v2262_v34, 4  ;;  %v2274_v44 = vrot.slane %v1009_v7, 4  ;;  %v2069_v45 = vpack.c.bf16 %v9414_v27, %v9412_v29 }
 0x127   : > { %2165 = vmatpush.bf16.msra.mxu0 %v9459_v0  ;;  %v1197_v27 = vadd.f32 %v9283_v11, %v9416_v28  ;;  %v1199_v55 = vadd.f32 %v9283_v11, %v1198_v30  ;;  %v1192_v16 = vadd.f32 %v9283_v11, %v9371_v38  ;;  %v1194_v51 = vadd.f32 %v9283_v11, %v9393_v1 }
 0x128   : > { %v2271_v5 = vsel %vm1900_vm0, %v2269_v37, %v2270_v56  ;;  %v2275_v24 = vsel %vm1900_vm0, %v2272_v59, %v2274_v44  ;;  %v2283_v8 = vmax.f32 %v2260_v49, %v2274_v44  ;;  %v2273_v39 = vsel %vm1900_vm0, %v2270_v56, %v2272_v59 }
 0x129   : > { %v1383_v63 = vpop.f32.mrf.mxu0  ;;  %v1801_v50 = vpop.f32.mrf.mxu2  ;;  %v2280_v22 = vmax.f32 %v2257_v9, %v2271_v5  ;;  %v2282_v61 = vmax.f32 %v1005_v54, %v2275_v24  ;;  %v2281_v29 = vmax.f32 %v1004_v57, %v2273_v39  ;;  %v2071_v12 = vsel %vm1922_vm3, %v2069_v45, 0 }
 0x12a   : > { %v1593_v46 = vpop.f32.mrf.mxu1  ;;  %v9462_v18 = vadd.f32 %v9421_v42, %v1383_v63  ;;  %2008 = vmatpush.bf16.msrb.mxu3 %v1996_v48  ;;  %v9482_v15 = vadd.f32 %v9476_v53, %v1801_v50  ;;  %v1216_v2 = vmax.f32 %v1197_v27, 0.0  ;;  %v1217_v57 = vmax.f32 %v1199_v55, 0.0 }
 0x12b   : > { %v9465_v17 = vadd.f32 %v9428_v43, %v1593_v46  ;;  %v1201_v40 = vpop.f32.mrf.mxu3  ;;  %2166 = vmatpush.bf16.msra.mxu0 %v9468_v6  ;;  %v2285_v13 = vpack.c.bf16 %v2283_v8, %v2282_v61  ;;  %v9508_v20 = vpack.c.bf16 %v2281_v29, %v2280_v22 }
 0x12c   : > { %v1417_v36 = vmax.f32 %v9462_v18, 0.0  ;;  %v1836_v54 = vmax.f32 %v9482_v15, 0.0  ;;  %v8408_v31 = vpack.c.bf16 %v1217_v57, %v1216_v2  ;;  %v1202_v7 = vadd.f32 %v9283_v11, %v1201_v40 }
 0x12d   : > { %v1627_v41 = vmax.f32 %v9465_v17, 0.0  ;;  %7615 = vmatmul.msk.bf16.vlgmr.msrb.gmra.mxu3 %vm1918_vm4, %v9306_v60  ;;  %v9506_v30 = vsel %vm1922_vm3, %v2285_v13, 0 }
 0x12e   : > { %2021 = vmatpush.bf16.msra.mxu3 %v1999_v21  ;;  %7620 = vmatmul.msk.bf16.vlgmr.msra.gmra.mxu0 %vm1918_vm4, %v9386_v25  ;;  %v1214_v21 = vmax.f32 %v1192_v16, 0.0  ;;  %8657 = vst [vmem:[#allocation2 + $0xd0] sm:$0xff] %v8408_v31   ;;  %v1218_v63 = vmax.f32 %v1202_v7, 0.0 }
 0x12f   : > { %2309 = vmatpush.bf16.msrb.mxu0 %v9506_v30 }
 0x130   : > { %v2416_v45 = vrot.slane %v1218_v63, 4 }
 0x131   : > { %v1386_v4 = vpop.f32.mrf.mxu0  ;;  %v1803_v35 = vpop.f32.mrf.mxu2 }
 0x132   : > { %v1596_v32 = vpop.f32.mrf.mxu1  ;;  %2022 = vmatpush.bf16.msra.mxu3 %v1996_v48  ;;  %v1387_v62 = vadd.f32 %v9421_v42, %v1386_v4  ;;  %v9503_v28 = vadd.f32 %v9476_v53, %v1803_v35  ;;  %v1215_v48 = vmax.f32 %v1194_v51, 0.0 }
 0x133   : > { %v1597_v23 = vadd.f32 %v9428_v43, %v1596_v32  ;;  %v1203_v19 = vpop.f32.mrf.mxu3  ;;  %2310 = vmatpush.bf16.msrb.mxu0 %v9508_v20 }
 0x134   : > { %v1837_v14 = vmax.f32 %v9503_v28, 0.0  ;;  %v1204_v3 = vadd.f32 %v9283_v11, %v1203_v19  ;;  %v1418_v46 = vmax.f32 %v1387_v62, 0.0 }
 0x135   : > { %v1628_v1 = vmax.f32 %v1597_v23, 0.0  ;;  %v2396_v44 = vld [vmem:[#allocation2 + $0xd0] sm:$0x3]  ;;  %v2397_v39 = vld [vmem:[#allocation2 + $0xd0] sm:$0xc]  ;;  %v2401_v23 = vunpack.c.h.bf16 %v9380_v52 }
 0x136   : > { %2079 = vmatpush.bf16.msrb.mxu3 %v2071_v12  ;;  %v1219_v38 = vmax.f32 %v1204_v3, 0.0  ;;  %v2404_v8 = vunpack.c.l.bf16 %v2396_v44  ;;  %v2398_v22 = vld [vmem:[#allocation2 + $0xd4] sm:$0xf]  ;;  %v2405_v29 = vunpack.c.l.bf16 %v2397_v39 }
 0x137   : > { %v2406_v27 = vunpack.c.l.bf16 %v2398_v22 }
 0x138   : > { %v2418_v5 = vrot.slane %v1219_v38, 4  ;;  %v2413_v2 = vrot.slane %v2405_v29, 4 }
 0x139   : > { %v1388_v49 = vpop.f32.mrf.mxu0  ;;  %v1806_v11 = vpop.f32.mrf.mxu2  ;;  %v2414_v62 = vrot.slane %v2406_v27, 4 }
 0x13a   : > { %2080 = vmatpush.bf16.msrb.mxu3 %v9245_v10  ;;  %v1598_v9 = vpop.f32.mrf.mxu1  ;;  %v1389_v34 = vadd.f32 %v9421_v42, %v1388_v49  ;;  %v1807_v24 = vadd.f32 %v9476_v53, %v1806_v11  ;;  %v2419_v61 = vsel %vm1900_vm0, %v2416_v45, %v2418_v5  ;;  %v2427_v13 = vmax.f32 %v2404_v8, %v2418_v5 }
 0x13b   : > { %v1599_v37 = vadd.f32 %v9428_v43, %v1598_v9  ;;  %v2426_v55 = vmax.f32 %v1215_v48, %v2419_v61  ;;  %v2415_v51 = vsel %vm1900_vm0, %v2413_v2, %v2414_v62  ;;  %v2417_v31 = vsel %vm1900_vm0, %v2414_v62, %v2416_v45 }
 0x13c   : > { %v1419_v50 = vmax.f32 %v1389_v34, 0.0  ;;  %v1838_v35 = vmax.f32 %v1807_v24, 0.0  ;;  %v2424_v7 = vmax.f32 %v2401_v23, %v2415_v51  ;;  %v2425_v3 = vmax.f32 %v1214_v21, %v2417_v31 }
 0x13d   : > { %v1629_v56 = vmax.f32 %v1599_v37, 0.0  ;;  %7616 = vmatmul.msk.bf16.vlgmr.msra.gmra.mxu3 %vm1918_vm4, %v9386_v25  ;;  %v2429_v16 = vpack.c.bf16 %v2427_v13, %v2426_v55 }
 0x13e   : > { %v8423_v40 = vpack.c.bf16 %v1419_v50, %v1418_v46  ;;  %2093 = vmatpush.bf16.msra.mxu3 %v2071_v12  ;;  %7624 = vmatmul.msk.bf16.vlgmr.msrb.gmra.mxu0 %vm1918_vm4, %v9386_v25  ;;  %v9540_v52 = vpack.c.bf16 %v2425_v3, %v2424_v7 }
 0x13f   : > { %v8458_v59 = vpack.c.bf16 %v1629_v56, %v1628_v1  ;;  %v9538_v46 = vsel %vm1922_vm3, %v2429_v16, 0 }
 0x140   : > { %8660 = vst [vmem:[#allocation2 + $0xe8] sm:$0xff] %v8423_v40   ;;  %2453 = vmatpush.bf16.msra.mxu0 %v9538_v46 }
 0x141   : > { %v1391_v4 = vpop.f32.mrf.mxu0  ;;  %8667 = vst [vmem:[#allocation2 + $0x120] sm:$0xff] %v8458_v59   ;;  %v1808_v57 = vpop.f32.mrf.mxu2 }
 0x142   : > { %v1601_v32 = vpop.f32.mrf.mxu1  ;;  %v1809_v19 = vadd.f32 %v9476_v53, %v1808_v57  ;;  %2094 = vmatpush.bf16.msra.mxu3 %v9245_v10  ;;  %v1392_v12 = vadd.f32 %v9421_v42, %v1391_v4 }
 0x143   : > { %v9535_v48 = vadd.f32 %v9428_v43, %v1601_v32 }
 0x144   : > { %v1839_v63 = vmax.f32 %v1809_v19, 0.0  ;;  %v1420_v34 = vmax.f32 %v1392_v12, 0.0  ;;  %2454 = vmatpush.bf16.msra.mxu0 %v9540_v52 }
 0x145   : > { %v1630_v21 = vmax.f32 %v9535_v48, 0.0 }
 0x146   : > { %v8493_v38 = vpack.c.bf16 %v1839_v63, %v1838_v35 }
 0x147   : > { %v2469_v2 = vld [vmem:[#allocation2 + $0xec] sm:$0xc]  ;;  %v2467_v16 = vld [vmem:[#allocation2 + $0xe8] sm:$0xf]  ;;  %v2468_v31 = vld [vmem:[#allocation2 + $0xec] sm:$0x3] }
 0x148   : > { %8674 = vst [vmem:[#allocation2 + $0x158] sm:$0xff] %v8493_v38   ;;  %v2477_v35 = vunpack.c.l.bf16 %v2469_v2  ;;  %v2613_v51 = vld [vmem:[#allocation2 + $0x124] sm:$0xc]  ;;  %v2611_v12 = vld [vmem:[#allocation2 + $0x120] sm:$0xf]  ;;  %v2475_v3 = vunpack.c.l.bf16 %v2467_v16 }
 0x149   : > { %v1393_v49 = vpop.f32.mrf.mxu0  ;;  %v1811_v56 = vpop.f32.mrf.mxu2 }
 0x14a   : > { %v1603_v9 = vpop.f32.mrf.mxu1  ;;  %v1394_v10 = vadd.f32 %v9421_v42, %v1393_v49  ;;  %v9553_v59 = vadd.f32 %v9476_v53, %v1811_v56  ;;  %v2485_v63 = vrot.slane %v2477_v35, 4  ;;  %v2486_v49 = vrot.slane %v1420_v34, 4 }
 0x14b   : > { %v9545_v1 = vadd.f32 %v9428_v43, %v1603_v9  ;;  %v2612_v9 = vld [vmem:[#allocation2 + $0x124] sm:$0x3]  ;;  %v2621_v56 = vunpack.c.l.bf16 %v2613_v51 }
 0x14c   : > { %v1421_v37 = vmax.f32 %v1394_v10, 0.0  ;;  %v1840_v45 = vmax.f32 %v9553_v59, 0.0  ;;  %v2620_v34 = vunpack.c.l.bf16 %v2612_v9 }
 0x14d   : > { %v1631_v50 = vmax.f32 %v9545_v1, 0.0  ;;  %7617 = vmatmul.msk.bf16.vlgmr.msrb.gmra.mxu3 %vm1918_vm4, %v9306_v60 }
 0x14e   : > { %2151 = vmatpush.bf16.msrb.mxu3 %v9459_v0  ;;  %7628 = vmatmul.msk.bf16.vlgmr.msra.gmra.mxu0 %vm1918_vm4, %v9386_v25  ;;  %v2488_v1 = vrot.slane %v1421_v37, 4 }
 0x151   : > { %v1396_v11 = vpop.f32.mrf.mxu0  ;;  %v1813_v44 = vpop.f32.mrf.mxu2 }
 0x152   : > { %v1606_v40 = vpop.f32.mrf.mxu1  ;;  %v9560_v5 = vadd.f32 %v9476_v53, %v1813_v44  ;;  %2152 = vmatpush.bf16.msrb.mxu3 %v9468_v6  ;;  %v1397_v24 = vadd.f32 %v9421_v42, %v1396_v11 }
 0x153   : > { %v1607_v8 = vadd.f32 %v9428_v43, %v1606_v40  ;;  %v2476_v40 = vunpack.c.l.bf16 %v2468_v31 }
 0x154   : > { %v1841_v39 = vmax.f32 %v9560_v5, 0.0  ;;  %v1422_v0 = vmax.f32 %v1397_v24, 0.0 }
 0x155   : > { %v1632_v61 = vmax.f32 %v1607_v8, 0.0 }
 0x159   : > { %v1398_v22 = vpop.f32.mrf.mxu0  ;;  %v1816_v13 = vpop.f32.mrf.mxu2 }
 0x15a   : > { %v1608_v4 = vpop.f32.mrf.mxu1  ;;  %v1399_v32 = vadd.f32 %v9421_v42, %v1398_v22  ;;  %v1817_v19 = vadd.f32 %v9476_v53, %v1816_v13 }
 0x15b   : > { %v1609_v29 = vadd.f32 %v9428_v43, %v1608_v4  ;;  %v2487_v4 = vsel %vm1900_vm0, %v2485_v63, %v2486_v49 }
 0x15c   : > { %v1423_v27 = vmax.f32 %v1399_v32, 0.0  ;;  %v1842_v38 = vmax.f32 %v1817_v19, 0.0  ;;  %v2757_v19 = vld [vmem:[#allocation2 + $0x15c] sm:$0xc] }
 0x15d   : > { %v1633_v55 = vmax.f32 %v1609_v29, 0.0  ;;  %7618 = vmatmul.msk.bf16.vlgmr.msra.gmra.mxu3 %vm1918_vm4, %v9386_v25  ;;  %v2489_v29 = vsel %vm1900_vm0, %v2486_v49, %v2488_v1 }
 0x15e   : > { %v8433_v62 = vpack.c.bf16 %v1423_v27, %v1422_v0  ;;  %2295 = vmatpush.bf16.msra.mxu3 %v9506_v30  ;;  %v2619_v30 = vunpack.c.l.bf16 %v2611_v12  ;;  %v2632_v0 = vrot.slane %v1631_v50, 4  ;;  %v2496_v50 = vmax.f32 %v1416_v58, %v2487_v4 }
 0x15f   : > { %v8468_v6 = vpack.c.bf16 %v1633_v55, %v1632_v61  ;;  %v2629_v55 = vrot.slane %v2621_v56, 4  ;;  %v2497_v49 = vmax.f32 %v1417_v36, %v2489_v29 }
 0x160   : > { %8662 = vst [vmem:[#allocation2 + $0xf8] sm:$0xff] %v8433_v62  }
 0x161   : > { %v1401_v57 = vpop.f32.mrf.mxu0  ;;  %8669 = vst [vmem:[#allocation2 + $0x130] sm:$0xff] %v8468_v6   ;;  %v1818_v7 = vpop.f32.mrf.mxu2 }
 0x162   : > { %v1611_v23 = vpop.f32.mrf.mxu1  ;;  %v1819_v10 = vadd.f32 %v9476_v53, %v1818_v7  ;;  %2296 = vmatpush.bf16.msra.mxu3 %v9508_v20  ;;  %v9575_v11 = vadd.f32 %v9421_v42, %v1401_v57 }
 0x163   : > { %v9578_v44 = vadd.f32 %v9428_v43, %v1611_v23  ;;  %v2630_v23 = vrot.slane %v1630_v21, 4 }
 0x164   : > { %v1843_v24 = vmax.f32 %v1819_v10, 0.0  ;;  %v1424_v13 = vmax.f32 %v9575_v11, 0.0 }
 0x165   : > { %v1634_v35 = vmax.f32 %v9578_v44, 0.0  ;;  %v2631_v21 = vsel %vm1900_vm0, %v2629_v55, %v2630_v23  ;;  %v2633_v56 = vsel %vm1900_vm0, %v2630_v23, %v2632_v0 }
 0x166   : > { %v8503_v61 = vpack.c.bf16 %v1843_v24, %v1842_v38  ;;  %v2765_v38 = vunpack.c.l.bf16 %v2757_v19  ;;  %v2756_v24 = vld [vmem:[#allocation2 + $0x15c] sm:$0x3] }
 0x167   : > { %v9580_v8 = vld [vmem:[#allocation2 + $0xf8] sm:$0xff]  }
 0x168   : > { %v2480_v22 = vunpack.c.l.bf16 %v9580_v8  ;;  %v9584_v37 = vld [vmem:[#allocation2 + $0x130] sm:$0xff]   ;;  %8676 = vst [vmem:[#allocation2 + $0x168] sm:$0xff] %v8503_v61   ;;  %v2773_v4 = vrot.slane %v2765_v38, 4 }
 0x169   : > { %v1403_v20 = vpop.f32.mrf.mxu0  ;;  %v2624_v27 = vunpack.c.l.bf16 %v9584_v37  ;;  %v1821_v31 = vpop.f32.mrf.mxu2 }
 0x16a   : > { %v1613_v32 = vpop.f32.mrf.mxu1  ;;  %v9590_v2 = vadd.f32 %v9421_v42, %v1403_v20  ;;  %v2490_v6 = vrot.slane %v2480_v22, 4  ;;  %v9611_v18 = vadd.f32 %v9476_v53, %v1821_v31  ;;  %v2641_v20 = vmax.f32 %v1627_v41, %v2633_v56 }
 0x16b   : > { %v9593_v62 = vadd.f32 %v9428_v43, %v1613_v32  ;;  %v2634_v57 = vrot.slane %v2624_v27, 4  ;;  %v2764_v32 = vunpack.c.l.bf16 %v2756_v24 }
 0x16c   : > { %v1425_v16 = vmax.f32 %v9590_v2, 0.0  ;;  %v2491_v12 = vsel %vm1900_vm0, %v2488_v1, %v2490_v6  ;;  %v2499_v7 = vmax.f32 %v2476_v40, %v2490_v6  ;;  %v2755_v40 = vld [vmem:[#allocation2 + $0x158] sm:$0xf]  ;;  %v1844_v55 = vmax.f32 %v9611_v18, 0.0  ;;  %v2924_v18 = vld [vmem:[%s10915_s3] sm:$0xf] }
 0x16d   : > { %v1635_v51 = vmax.f32 %v9593_v62, 0.0  ;;  %v2498_v63 = vmax.f32 %v2475_v3, %v2491_v12  ;;  %v2635_v33 = vsel %vm1900_vm0, %v2632_v0, %v2634_v57  ;;  %v2643_v58 = vmax.f32 %v2620_v34, %v2634_v57  ;;  %7619 = vmatmul.msk.bf16.vlgmr.msrb.gmra.mxu3 %vm1918_vm4, %v9306_v60 }
 0x16e   : > { %v2642_v9 = vmax.f32 %v2619_v30, %v2635_v33  ;;  %2439 = vmatpush.bf16.msrb.mxu3 %v9538_v46  ;;  %v2500_v30 = vpack.c.bf16 %v2497_v49, %v2496_v50  ;;  %v2640_v34 = vmax.f32 %v1626_v47, %v2631_v21  ;;  %v2774_v0 = vrot.slane %v1840_v45, 4 }
 0x16f   : > { %v2501_v48 = vpack.c.bf16 %v2499_v7, %v2498_v63  ;;  %v9617_v22 = vld [vmem:[#allocation2 + $0x168] sm:$0xff]   ;;  %v2776_v46 = vrot.slane %v1841_v39, 4  ;;  %v2763_v47 = vunpack.c.l.bf16 %v2755_v40 }
 0x170   : > { %v2645_v10 = vpack.c.bf16 %v2643_v58, %v2642_v9  ;;  %v2768_v61 = vunpack.c.l.bf16 %v9617_v22  ;;  %v2775_v41 = vsel %vm1900_vm0, %v2773_v4, %v2774_v0  ;;  %v2644_v57 = vpack.c.bf16 %v2641_v20, %v2640_v34 }
 0x171   : > { %v1406_v1 = vpop.f32.mrf.mxu0  ;;  %v2503_v36 = vsel %vm1922_vm3, %v2501_v48, 0  ;;  %v1823_v29 = vpop.f32.mrf.mxu2  ;;  %v2777_v5 = vsel %vm1900_vm0, %v2774_v0, %v2776_v46 }
 0x172   : > { %v1616_v3 = vpop.f32.mrf.mxu1  ;;  %2511 = vmatpush.bf16.msra.mxu1 %v2503_v36  ;;  %2525 = vmatpush.bf16.msra.mxu2 %v2503_v36  ;;  %v2647_v26 = vsel %vm1922_vm3, %v2645_v10, 0  ;;  %v1407_v27 = vadd.f32 %v9421_v42, %v1406_v1  ;;  %v9630_v59 = vadd.f32 %v9476_v53, %v1823_v29  ;;  %v2778_v45 = vrot.slane %v2768_v61, 4 }
 0x173   : > { %v1617_v17 = vadd.f32 %v9428_v43, %v1616_v3  ;;  %2440 = vmatpush.bf16.msrb.mxu3 %v9540_v52  ;;  %v2784_v52 = vmax.f32 %v1836_v54, %v2775_v41  ;;  %v2785_v7 = vmax.f32 %v1837_v14, %v2777_v5 }
 0x174   : > { %v1845_v39 = vmax.f32 %v9630_v59, 0.0  ;;  %v2779_v6 = vsel %vm1900_vm0, %v2776_v46, %v2778_v45  ;;  %v2787_v50 = vmax.f32 %v2764_v32, %v2778_v45  ;;  %v1426_v19 = vmax.f32 %v1407_v27, 0.0 }
 0x175   : > { %v2786_v23 = vmax.f32 %v2763_v47, %v2779_v6  ;;  %v1636_v49 = vmax.f32 %v1617_v17, 0.0  ;;  %v2788_v54 = vpack.c.bf16 %v2785_v7, %v2784_v52 }
 0x176   : > { %2512 = vmatpush.bf16.msra.mxu1 %v2500_v30  ;;  %2526 = vmatpush.bf16.msra.mxu2 %v2500_v30 }
 0x177   : > { %v2789_v58 = vpack.c.bf16 %v2787_v50, %v2786_v23 }
 0x179   : > { %v1408_v31 = vpop.f32.mrf.mxu0  ;;  %7629 = vmatmul.msk.bf16.vlgmr.msra.gmra.mxu1 %vm1918_vm4, %v9306_v60  ;;  %7630 = vmatmul.msk.bf16.vlgmr.msra.gmra.mxu2 %vm1918_vm4, %v9386_v25  ;;  %v1826_v48 = vpop.f32.mrf.mxu2  ;;  %v2791_v15 = vsel %vm1922_vm3, %v2789_v58, 0 }
 0x17a   : > { %2655 = vmatpush.bf16.msrb.mxu1 %v2647_v26  ;;  %2669 = vmatpush.bf16.msrb.mxu2 %v2647_v26  ;;  %v1618_v12 = vpop.f32.mrf.mxu1  ;;  %v1409_v63 = vadd.f32 %v9421_v42, %v1408_v31  ;;  %v1827_v56 = vadd.f32 %v9476_v53, %v1826_v48 }
 0x17b   : > { %v1619_v33 = vadd.f32 %v9428_v43, %v1618_v12 }
 0x17c   : > { %v1427_v9 = vmax.f32 %v1409_v63, 0.0  ;;  %v1846_v1 = vmax.f32 %v1827_v56, 0.0 }
 0x17d   : > { %v1637_v38 = vmax.f32 %v1619_v33, 0.0  ;;  %7623 = vmatmul.msk.bf16.vlgmr.msra.gmra.mxu3 %vm1918_vm4, %v9306_v60 }
 0x17e   : > { %2656 = vmatpush.bf16.msrb.mxu1 %v2644_v57  ;;  %2670 = vmatpush.bf16.msrb.mxu2 %v2644_v57  ;;  %v8443_v28 = vpack.c.bf16 %v1427_v9, %v1426_v19 }
 0x17f   : > { %v8478_v14 = vpack.c.bf16 %v1637_v38, %v1636_v49 }
 0x180   : > { %8664 = vst [vmem:[#allocation2 + $0x108] sm:$0xff] %v8443_v28  }
 0x181   : > { %v1411_v21 = vpop.f32.mrf.mxu0  ;;  %8671 = vst [vmem:[#allocation2 + $0x140] sm:$0xff] %v8478_v14   ;;  %v1828_v24 = vpop.f32.mrf.mxu2 }
 0x182   : > { %2799 = vmatpush.bf16.msra.mxu1 %v2791_v15  ;;  %2813 = vmatpush.bf16.msra.mxu2 %v2791_v15  ;;  %v1621_v10 = vpop.f32.mrf.mxu1  ;;  %v1829_v3 = vadd.f32 %v9476_v53, %v1828_v24  ;;  %v1412_v36 = vadd.f32 %v9421_v42, %v1411_v21 }
 0x183   : > { %v1622_v40 = vadd.f32 %v9428_v43, %v1621_v10 }
 0x184   : > { %v1847_v30 = vmax.f32 %v1829_v3, 0.0  ;;  %v1428_v20 = vmax.f32 %v1412_v36, 0.0 }
 0x185   : > { %v1638_v61 = vmax.f32 %v1622_v40, 0.0 }
 0x186   : > { %2800 = vmatpush.bf16.msra.mxu1 %v2788_v54  ;;  %2814 = vmatpush.bf16.msra.mxu2 %v2788_v54  ;;  %v8513_v0 = vpack.c.bf16 %v1847_v30, %v1846_v1  ;;  %v2560_v49 = vrot.slane %v1428_v20, 4 }
 0x187   : > { %v2541_v29 = vld [vmem:[#allocation2 + $0x108] sm:$0xc]  ;;  %v2542_v26 = vld [vmem:[#allocation2 + $0x10c] sm:$0xf]  ;;  %v2540_v47 = vld [vmem:[#allocation2 + $0x108] sm:$0x3] }
 0x188   : > { %8678 = vst [vmem:[#allocation2 + $0x178] sm:$0xff] %v8513_v0   ;;  %v2685_v5 = vld [vmem:[#allocation2 + $0x140] sm:$0xc]  ;;  %v2686_v6 = vld [vmem:[#allocation2 + $0x144] sm:$0xf]  ;;  %v2549_v50 = vunpack.c.l.bf16 %v2541_v29  ;;  %v2550_v57 = vunpack.c.l.bf16 %v2542_v26  ;;  %v2548_v19 = vunpack.c.l.bf16 %v2540_v47  ;;  %v2704_v58 = vrot.slane %v1638_v61, 4 }
 0x189   : > { %v1413_v34 = vpop.f32.mrf.mxu0  ;;  %7633 = vmatmul.msk.bf16.vlgmr.msrb.gmra.mxu1 %vm1918_vm4, %v9306_v60  ;;  %7634 = vmatmul.msk.bf16.vlgmr.msrb.gmra.mxu2 %vm1918_vm4, %v9386_v25  ;;  %v1831_v41 = vpop.f32.mrf.mxu2  ;;  %v2684_v23 = vld [vmem:[#allocation2 + $0x140] sm:$0x3]  ;;  %v2693_v31 = vunpack.c.l.bf16 %v2685_v5  ;;  %v2694_v12 = vunpack.c.l.bf16 %v2686_v6 }
 0x18a   : > { %v1623_v4 = vpop.f32.mrf.mxu1  ;;  %v1414_v32 = vadd.f32 %v9421_v42, %v1413_v34  ;;  %v2545_v42 = vunpack.c.h.bf16 %v9580_v8  ;;  %v2557_v52 = vrot.slane %v2549_v50, 4  ;;  %v2558_v7 = vrot.slane %v2550_v57, 4 }
 0x18b   : > { %v1624_v46 = vadd.f32 %v9428_v43, %v1623_v4  ;;  %v1832_v43 = vadd.f32 %v9476_v53, %v1831_v41  ;;  %v2692_v63 = vunpack.c.l.bf16 %v2684_v23  ;;  %v2701_v38 = vrot.slane %v2693_v31, 4 }
 0x18c   : > { %v1429_v27 = vmax.f32 %v1414_v32, 0.0  ;;  %v1935_v45 = vpop.f32.mrf.mxu3  ;;  %v2702_v48 = vrot.slane %v2694_v12, 4  ;;  %v2561_v56 = vsel %vm1900_vm0, %v2558_v7, %v2560_v49  ;;  %v2559_v40 = vsel %vm1900_vm0, %v2557_v52, %v2558_v7 }
 0x18d   : > { %v1639_v17 = vmax.f32 %v1624_v46, 0.0  ;;  %7627 = vmatmul.msk.bf16.vlgmr.msrb.gmra.mxu3 %vm1918_vm4, %v9306_v60  ;;  %v1848_v8 = vmax.f32 %v1832_v43, 0.0  ;;  %v2689_v34 = vunpack.c.h.bf16 %v9584_v37  ;;  %v2568_v46 = vmax.f32 %v2545_v42, %v2559_v40 }
 0x18e   : > { %v2562_v33 = vrot.slane %v1429_v27, 4  ;;  %v2703_v20 = vsel %vm1900_vm0, %v2701_v38, %v2702_v48  ;;  %v2705_v2 = vsel %vm1900_vm0, %v2702_v48, %v2704_v58  ;;  %v2833_v50 = vunpack.c.h.bf16 %v9617_v22 }
 0x18f   : > { %v2706_v9 = vrot.slane %v1639_v17, 4  ;;  %v2829_v3 = vld [vmem:[#allocation2 + $0x178] sm:$0xc]  ;;  %v2830_v36 = vld [vmem:[#allocation2 + $0x17c] sm:$0xf]  ;;  %v2712_v37 = vmax.f32 %v2689_v34, %v2703_v20  ;;  %v2713_v29 = vmax.f32 %v1634_v35, %v2705_v2  ;;  %v2848_v5 = vrot.slane %v1848_v8, 4 }
 0x190   : > { %v2563_v54 = vsel %vm1900_vm0, %v2560_v49, %v2562_v33  ;;  %v2571_v28 = vmax.f32 %v2548_v19, %v2562_v33  ;;  %v2828_v32 = vld [vmem:[#allocation2 + $0x178] sm:$0x3]  ;;  %v2837_v62 = vunpack.c.l.bf16 %v2829_v3  ;;  %v7670_v33 = vld [vmem:[%s10915_s3 + $0xc] sm:$0xf] }
 0x191   : > { %v1833_v14 = vpop.f32.mrf.mxu2  ;;  %v2707_v21 = vsel %vm1900_vm0, %v2704_v58, %v2706_v9  ;;  %v2570_v10 = vmax.f32 %v1425_v16, %v2563_v54  ;;  %v2715_v30 = vmax.f32 %v2692_v63, %v2706_v9  ;;  %v2569_v16 = vmax.f32 %v1424_v13, %v2561_v56 }
 0x192   : > { %v1834_v24 = vadd.f32 %v9476_v53, %v1833_v14  ;;  %v2714_v1 = vmax.f32 %v1635_v51, %v2707_v21  ;;  %v2838_v51 = vunpack.c.l.bf16 %v2830_v36  ;;  %v2845_v26 = vrot.slane %v2837_v62, 4 }
 0x193   : > { %v2573_v4 = vpack.c.bf16 %v2571_v28, %v2570_v10  ;;  %v2836_v11 = vunpack.c.l.bf16 %v2828_v32  ;;  %v2572_v27 = vpack.c.bf16 %v2569_v16, %v2568_v46  ;;  %v2716_v44 = vpack.c.bf16 %v2713_v29, %v2712_v37 }
 0x194   : > { %v9665_v15 = vpop.f32.mrf.mxu3  ;;  %v1849_v0 = vmax.f32 %v1834_v24, 0.0  ;;  %v2717_v53 = vpack.c.bf16 %v2715_v30, %v2714_v1  ;;  %v2846_v47 = vrot.slane %v2838_v51, 4  ;;  %v3067_v63 = vsel %vm1900_vm0, %v2924_v18, 0  ;;  %v2226_v30 = vpop.f32.mrf.mxu1 }
 0x195   : > { %v2575_v61 = vsel %vm1922_vm3, %v2573_v4, 0  ;;  %3076 = vmatpush.bf16.msrb.mxu2 %v3067_v63  ;;  %v3311_v58 = vsel %vm1900_vm0, %v7670_v33, 0 }
 0x196   : > { %2583 = vmatpush.bf16.msra.mxu3 %v2575_v61  ;;  %2597 = vmatpush.bf16.msrb.mxu0 %v2575_v61  ;;  %v2719_v17 = vsel %vm1922_vm3, %v2717_v53, 0  ;;  %v2850_v6 = vrot.slane %v1849_v0, 4  ;;  %v2847_v35 = vsel %vm1900_vm0, %v2845_v26, %v2846_v47  ;;  %v2849_v23 = vsel %vm1900_vm0, %v2846_v47, %v2848_v5 }
 0x197   : > { %v2856_v22 = vmax.f32 %v2833_v50, %v2847_v35  ;;  %v2857_v43 = vmax.f32 %v1844_v55, %v2849_v23  ;;  %v7660_v55 = vld [vmem:[%s10915_s3 + $0x8] sm:$0xf] }
 0x198   : > { %v2851_v57 = vsel %vm1900_vm0, %v2848_v5, %v2850_v6  ;;  %v2859_v42 = vmax.f32 %v2836_v11, %v2850_v6  ;;  %v3180_v49 = vsel %vm1900_vm0, %v7660_v55, 0 }
 0x199   : > { %7637 = vmatmul.msk.bf16.vlgmr.msra.gmra.mxu1 %vm1918_vm4, %v9306_v60  ;;  %7638 = vmatmul.msk.bf16.vlgmr.msra.gmra.mxu2 %vm1918_vm4, %v9386_v25  ;;  %v2860_v59 = vpack.c.bf16 %v2857_v43, %v2856_v22  ;;  %v2240_v34 = vpop.f32.mrf.mxu2 }
 0x19a   : > { %2584 = vmatpush.bf16.msra.mxu3 %v2572_v27  ;;  %2598 = vmatpush.bf16.msrb.mxu0 %v2572_v27  ;;  %v9738_v20 = vmax.f32 %v2226_v30, %v2240_v34 }
 0x19c   : > { %v1952_v13 = vpop.f32.mrf.mxu3  ;;  %v2228_v0 = vpop.f32.mrf.mxu1  ;;  %2247 = vst [vmem:[#allocation3 + $0x38] sm:$0xff] %v9738_v20 }
 0x19d   : > { %v9689_v41 = vmax.f32 %v1935_v45, %v1952_v13  ;;  %v2858_v45 = vmax.f32 %v1845_v39, %v2851_v57  ;;  %7631 = vmatmul.msk.bf16.vlgmr.msra.gmra.mxu3 %vm1918_vm4, %v9306_v60  ;;  %7632 = vmatmul.msk.bf16.vlgmr.msrb.gmra.mxu0 %vm1918_vm4, %v9386_v25  ;;  %v7641_v39 = vld [vmem:[%s10915_s3 + $0x4] sm:$0xf] }
 0x19e   : > { %2727 = vmatpush.bf16.msrb.mxu3 %v2719_v17  ;;  %2741 = vmatpush.bf16.msra.mxu0 %v2719_v17  ;;  %v2983_v7 = vsel %vm1900_vm0, %v7641_v39, 0 }
 0x19f   : > { %1959 = vst [vmem:[#allocation3] sm:$0xff] %v9689_v41  ;;  %v2861_v19 = vpack.c.bf16 %v2859_v42, %v2858_v45  ;;  %2992 = vmatpush.bf16.msrb.mxu1 %v2983_v7 }
 0x1a1   : > { %v2863_v12 = vsel %vm1922_vm3, %v2861_v19, 0  ;;  %v2242_v2 = vpop.f32.mrf.mxu2 }
 0x1a2   : > { %2728 = vmatpush.bf16.msrb.mxu3 %v2716_v44  ;;  %2742 = vmatpush.bf16.msra.mxu0 %v2716_v44  ;;  %v2246_v16 = vmax.f32 %v2228_v0, %v2242_v2 }
 0x1a4   : > { %v1954_v31 = vpop.f32.mrf.mxu3  ;;  %2248 = vst [vmem:[#allocation3 + $0x40] sm:$0x3f] %v2246_v16  ;;  %v2370_v51 = vpop.f32.mrf.mxu1 }
 0x1a5   : > { %v1958_v52 = vmax.f32 %v9665_v15, %v1954_v31 }
 0x1a6   : > { %2871 = vmatpush.bf16.msra.mxu3 %v2863_v12  ;;  %2885 = vmatpush.bf16.msrb.mxu0 %v2863_v12 }
 0x1a7   : > { %1960 = vst [vmem:[#allocation3 + $0x8] sm:$0x3f] %v1958_v52 }
 0x1a9   : > { %v2384_v61 = vpop.f32.mrf.mxu2 }
 0x1aa   : > { %2872 = vmatpush.bf16.msra.mxu3 %v2860_v59  ;;  %2886 = vmatpush.bf16.msrb.mxu0 %v2860_v59  ;;  %v9744_v5 = vmax.f32 %v2370_v51, %v2384_v61 }
 0x1ab   : > { %v2168_v32 = vpop.f32.mrf.mxu0  ;;  %v2932_v34 = vld [vmem:[#allocation3 + $0x39] sm:$0xff] }
 0x1ac   : > { %v2372_v11 = vpop.f32.mrf.mxu1  ;;  %2391 = vst [vmem:[#allocation3 + $0x54] sm:$0xff] %v9744_v5  ;;  %v3130_v16 = vld [vmem:[#allocation3 + $0x3a] sm:$0xff] }
 0x1ad   : > { %7635 = vmatmul.msk.bf16.vlgmr.msrb.gmra.mxu3 %vm1918_vm4, %v9306_v60  ;;  %7636 = vmatmul.msk.bf16.vlgmr.msra.gmra.mxu0 %vm1918_vm4, %v9386_v25  ;;  %v9782_v61 = vld [vmem:[#allocation3 + $0x3c] sm:$0xff] }
 0x1ae   : > { %3189 = vmatpush.bf16.msrb.mxu3 %v3180_v49  ;;  %3320 = vmatpush.bf16.msra.mxu0 %v3311_v58  ;;  %v2925_v28 = vld [vmem:[#allocation3 + $0x1] sm:$0xff] }
 0x1af   : > { %v3123_v14 = vld [vmem:[#allocation3 + $0x2] sm:$0xff] }
 0x1b0   : > { %v2010_v9 = vpop.f32.mrf.mxu3  ;;  %v3254_v3 = vld [vmem:[#allocation3 + $0x3] sm:$0xff] }
 0x1b1   : > { %v2386_v6 = vpop.f32.mrf.mxu2 }
 0x1b2   : > { %v2390_v23 = vmax.f32 %v2372_v11, %v2386_v6 }
 0x1b4   : > { %2392 = vst [vmem:[#allocation3 + $0x5c] sm:$0x3f] %v2390_v23 }
 0x1b8   : > { %v2012_v38 = vpop.f32.mrf.mxu3 }
 0x1bd   : > { %7639 = vmatmul.msk.bf16.vlgmr.msra.gmra.mxu3 %vm1918_vm4, %v9306_v60  ;;  %7640 = vmatmul.msk.bf16.vlgmr.msrb.gmra.mxu0 %vm1918_vm4, %v9386_v25 }
 0x1c0   : > { %v2024_v48 = vpop.f32.mrf.mxu3 }
 0x1c1   : > { %v9730_v15 = vmax.f32 %v2010_v9, %v2024_v48 }
 0x1c3   : > { %2031 = vst [vmem:[#allocation3 + $0xe] sm:$0xff] %v9730_v15 }
 0x1c8   : > { %v2026_v8 = vpop.f32.mrf.mxu3 }
 0x1c9   : > { %v2030_v54 = vmax.f32 %v2012_v38, %v2026_v8 }
 0x1ca   : > { %v2926_v21 = vld [vmem:[#allocation3 + $0x9] sm:$0xff] }
 0x1cb   : > { %v2898_v10 = vld [vmem:[#allocation3 + $0x8] sm:$0xff]  ;;  %2032 = vst [vmem:[#allocation3 + $0x16] sm:$0x3f] %v2030_v54  ;;  %v2943_v24 = vpack.c.bf16 %v2926_v21, %v2925_v28 }
 0x1cc   : > { %v3124_v56 = vld [vmem:[#allocation3 + $0xa] sm:$0xff]  ;;  %v2915_v60 = vpack.c.bf16 %v2898_v10, %v9689_v41  ;;  %v2170_v41 = vpop.f32.mrf.mxu0 }
 0x1cd   : > { %v3141_v1 = vpack.c.bf16 %v3124_v56, %v3123_v14  ;;  %v3255_v25 = vld [vmem:[#allocation3 + $0xb] sm:$0xff]  ;;  %7642 = vmatmul.msk.bf16.vlgmr.msrb.gmra.mxu1 %vm2954_vm7, %v2943_v24 }
 0x1ce   : > { %v3272_v36 = vpack.c.bf16 %v3255_v25, %v3254_v3  ;;  %7651 = vmatmul.msk.bf16.vlgmr.msrb.gmra.mxu2 %vm2954_vm7, %v2915_v60 }
 0x1cf   : > { %7661 = vmatmul.msk.bf16.vlgmr.msrb.gmra.mxu3 %vm2954_vm7, %v3141_v1 }
 0x1d0   : > { %7671 = vmatmul.msk.bf16.vlgmr.msra.gmra.mxu0 %vm2954_vm7, %v3272_v36  ;;  %v2082_v40 = vpop.f32.mrf.mxu3 }
 0x1d2   : > { %v2927_v29 = vld [vmem:[#allocation3 + $0x11] sm:$0xff] }
 0x1d3   : > { %v2899_v26 = vld [vmem:[#allocation3 + $0x10] sm:$0xff] }
 0x1d4   : > { %v3125_v47 = vld [vmem:[#allocation3 + $0x12] sm:$0xff]  ;;  %v2312_v19 = vpop.f32.mrf.mxu0 }
 0x1d5   : > { %v3256_v57 = vld [vmem:[#allocation3 + $0x13] sm:$0xff] }
 0x1d8   : > { %v2084_v4 = vpop.f32.mrf.mxu3 }
 0x1dc   : > { %v2314_v38 = vpop.f32.mrf.mxu0 }
 0x1e0   : > { %v2096_v53 = vpop.f32.mrf.mxu3 }
 0x1e1   : > { %v9741_v62 = vmax.f32 %v2082_v40, %v2096_v53 }
 0x1e3   : > { %2103 = vst [vmem:[#allocation3 + $0x1c] sm:$0xff] %v9741_v62 }
 0x1e4   : > { %v2456_v1 = vpop.f32.mrf.mxu0 }
 0x1e8   : > { %v2098_v46 = vpop.f32.mrf.mxu3 }
 0x1e9   : > { %v2102_v37 = vmax.f32 %v2084_v4, %v2098_v46 }
 0x1ea   : > { %v2928_v13 = vld [vmem:[#allocation3 + $0x19] sm:$0xff] }
 0x1eb   : > { %v2900_v27 = vld [vmem:[#allocation3 + $0x18] sm:$0xff]  ;;  %2104 = vst [vmem:[#allocation3 + $0x24] sm:$0x3f] %v2102_v37  ;;  %v2944_v50 = vpack.c.bf16 %v2928_v13, %v2927_v29 }
 0x1ec   : > { %v3126_v17 = vld [vmem:[#allocation3 + $0x1a] sm:$0xff]  ;;  %v9746_v44 = vpack.c.bf16 %v2900_v27, %v2899_v26 }
 0x1ed   : > { %v3142_v35 = vpack.c.bf16 %v3126_v17, %v3125_v47  ;;  %v3257_v42 = vld [vmem:[#allocation3 + $0x1b] sm:$0xff]  ;;  %7643 = vmatmul.msk.bf16.gmra.mxu1 %vm2954_vm7, %v2944_v50  ;;  %v2458_v50 = vpop.f32.mrf.mxu0 }
 0x1ee   : > { %v3273_v45 = vpack.c.bf16 %v3257_v42, %v3256_v57  ;;  %7652 = vmatmul.msk.bf16.gmra.mxu2 %vm2954_vm7, %v9746_v44  ;;  %v9786_v47 = vld [vmem:[#allocation3 + $0x3a] sm:$0xff] }
 0x1ef   : > { %7662 = vmatmul.msk.bf16.gmra.mxu3 %vm2954_vm7, %v3142_v35 }
 0x1f0   : > { %7672 = vmatmul.msk.bf16.gmra.mxu0 %vm2954_vm7, %v3273_v45  ;;  %v2154_v22 = vpop.f32.mrf.mxu3  ;;  %v7680_v45 = vld [vmem:[%s10915_s3 + $0x10] sm:$0xf] }
 0x1f1   : > { %v2173_v43 = vmax.f32 %v2154_v22, %v2168_v32  ;;  %v3442_v22 = vsel %vm1900_vm0, %v7680_v45, 0 }
 0x1f2   : > { %v2929_v52 = vld [vmem:[#allocation3 + $0x21] sm:$0xff]  ;;  %3451 = vmatpush.bf16.msra.mxu1 %v3442_v22 }
 0x1f3   : > { %2175 = vst [vmem:[#allocation3 + $0x2a] sm:$0xff] %v2173_v43  ;;  %v3127_v59 = vld [vmem:[#allocation3 + $0x22] sm:$0xff] }
 0x1f4   : > { %v2901_v55 = vld [vmem:[#allocation3 + $0x20] sm:$0xff]  ;;  %v3143_v9 = vpack.c.bf16 %v2173_v43, %v3127_v59 }
 0x1f6   : > { %v2514_v39 = vpop.f32.mrf.mxu1 }
 0x1f8   : > { %v2156_v31 = vpop.f32.mrf.mxu3 }
 0x1f9   : > { %v2174_v12 = vmax.f32 %v2156_v31, %v2170_v41  ;;  %v3261_v41 = vld [vmem:[#allocation3 + $0x3b] sm:$0xff] }
 0x1fa   : > { %v2930_v18 = vld [vmem:[#allocation3 + $0x29] sm:$0xff] }
 0x1fb   : > { %v2902_v7 = vld [vmem:[#allocation3 + $0x28] sm:$0xff]  ;;  %2176 = vst [vmem:[#allocation3 + $0x32] sm:$0x3f] %v2174_v12  ;;  %v2945_v49 = vpack.c.bf16 %v2930_v18, %v2929_v52 }
 0x1fc   : > { %v2528_v63 = vpop.f32.mrf.mxu2  ;;  %v9754_v33 = vpack.c.bf16 %v2902_v7, %v2901_v55  ;;  %v3258_v54 = vld [vmem:[#allocation3 + $0x23] sm:$0xff] }
 0x1fd   : > { %v9756_v58 = vmax.f32 %v2514_v39, %v2528_v63  ;;  %7644 = vmatmul.msk.bf16.gmra.mxu1 %vm2954_vm7, %v2945_v49  ;;  %v9771_v3 = vld [vmem:[#allocation3 + $0x2a] sm:$0xff] }
 0x1fe   : > { %7653 = vmatmul.msk.bf16.gmra.mxu2 %vm2954_vm7, %v9754_v33  ;;  %v2516_v10 = vpop.f32.mrf.mxu1 }
 0x1ff   : > { %2535 = vst [vmem:[#allocation3 + $0x70] sm:$0xff] %v9756_v58  ;;  %7663 = vmatmul.msk.bf16.gmra.mxu3 %vm2954_vm7, %v3143_v9 }
 0x200   : > { %v2298_v48 = vpop.f32.mrf.mxu3 }
 0x201   : > { %v9763_v8 = vmax.f32 %v2298_v48, %v2312_v19 }
 0x202   : > { %v3259_v28 = vld [vmem:[#allocation3 + $0x2b] sm:$0xff]  ;;  %v9769_v60 = vld [vmem:[#allocation3 + $0x34] sm:$0xff] }
 0x203   : > { %v3274_v14 = vpack.c.bf16 %v3259_v28, %v3258_v54  ;;  %2319 = vst [vmem:[#allocation3 + $0x46] sm:$0xff] %v9763_v8  ;;  %v9766_v21 = vld [vmem:[#allocation3 + $0x2c] sm:$0xff] }
 0x204   : > { %v2530_v56 = vpop.f32.mrf.mxu2  ;;  %v9775_v36 = vld [vmem:[#allocation3 + $0x32] sm:$0xff] }
 0x205   : > { %7673 = vmatmul.msk.bf16.gmra.mxu0 %vm2954_vm7, %v3274_v14  ;;  %v2534_v24 = vmax.f32 %v2516_v10, %v2530_v56  ;;  %v2931_v30 = vld [vmem:[#allocation3 + $0x31] sm:$0xff]  ;;  %v9814_v14 = vld [vmem:[#allocation3 + $0x5a] sm:$0xff] }
 0x206   : > { %v2903_v4 = vld [vmem:[#allocation3 + $0x30] sm:$0xff]  ;;  %v2946_v32 = vpack.c.bf16 %v2932_v34, %v2931_v30  ;;  %v2658_v29 = vpop.f32.mrf.mxu1 }
 0x207   : > { %2536 = vst [vmem:[#allocation3 + $0x78] sm:$0x3f] %v2534_v24  ;;  %v3129_v2 = vld [vmem:[#allocation3 + $0x32] sm:$0xff]  ;;  %v9780_v51 = vpack.c.bf16 %v9738_v20, %v2903_v4 }
 0x208   : > { %v2300_v0 = vpop.f32.mrf.mxu3  ;;  %v3144_v37 = vpack.c.bf16 %v3130_v16, %v3129_v2  ;;  %v3260_v17 = vld [vmem:[#allocation3 + $0x33] sm:$0xff] }
 0x209   : > { %v2318_v53 = vmax.f32 %v2300_v0, %v2314_v38  ;;  %v3275_v57 = vpack.c.bf16 %v3261_v41, %v3260_v17 }
 0x20a   : > { %v9784_v46 = vld [vmem:[#allocation3 + $0x44] sm:$0xff] }
 0x20b   : > { %2320 = vst [vmem:[#allocation3 + $0x4e] sm:$0x3f] %v2318_v53  ;;  %v9790_v13 = vld [vmem:[#allocation3 + $0x42] sm:$0xff] }
 0x20c   : > { %v2672_v26 = vpop.f32.mrf.mxu2  ;;  %v2933_v18 = vld [vmem:[#allocation3 + $0x41] sm:$0xff] }
 0x20d   : > { %7645 = vmatmul.msk.bf16.gmra.mxu1 %vm2954_vm7, %v2946_v32  ;;  %v2677_v20 = vmax.f32 %v2658_v29, %v2672_v26  ;;  %v2905_v55 = vld [vmem:[#allocation3 + $0x40] sm:$0xff] }
 0x20e   : > { %7654 = vmatmul.msk.bf16.gmra.mxu2 %vm2954_vm7, %v9780_v51  ;;  %v2660_v42 = vpop.f32.mrf.mxu1  ;;  %v3131_v38 = vld [vmem:[#allocation3 + $0x42] sm:$0xff]  ;;  %v9826_v16 = vld [vmem:[#allocation3 + $0x74] sm:$0xff] }
 0x20f   : > { %7664 = vmatmul.msk.bf16.gmra.mxu3 %vm2954_vm7, %v3144_v37  ;;  %2679 = vst [vmem:[#allocation3 + $0x8c] sm:$0xff] %v2677_v20  ;;  %v3262_v0 = vld [vmem:[#allocation3 + $0x43] sm:$0xff]  ;;  %v9835_v26 = vld [vmem:[#allocation3 + $0x72] sm:$0xff] }
 0x210   : > { %v2442_v6 = vpop.f32.mrf.mxu3 }
 0x211   : > { %v9798_v35 = vmax.f32 %v2442_v6, %v2456_v1  ;;  %v2936_v6 = vld [vmem:[#allocation3 + $0x59] sm:$0xff] }
 0x212   : > { %v2934_v43 = vld [vmem:[#allocation3 + $0x49] sm:$0xff]  ;;  %v9808_v39 = vld [vmem:[#allocation3 + $0x52] sm:$0xff] }
 0x213   : > { %2463 = vst [vmem:[#allocation3 + $0x62] sm:$0xff] %v9798_v35  ;;  %v2906_v19 = vld [vmem:[#allocation3 + $0x48] sm:$0xff]  ;;  %v2947_v49 = vpack.c.bf16 %v2934_v43, %v2933_v18  ;;  %v3133_v22 = vld [vmem:[#allocation3 + $0x52] sm:$0xff]  ;;  %v3134_v43 = vld [vmem:[#allocation3 + $0x5a] sm:$0xff] }
 0x214   : > { %v2674_v23 = vpop.f32.mrf.mxu2  ;;  %v9806_v12 = vld [vmem:[#allocation3 + $0x4a] sm:$0xff]  ;;  %v9812_v9 = vpack.c.bf16 %v2906_v19, %v2905_v55  ;;  %v3146_v18 = vpack.c.bf16 %v3134_v43, %v3133_v22 }
 0x215   : > { %7674 = vmatmul.msk.bf16.gmra.mxu0 %vm2954_vm7, %v3275_v57  ;;  %v3132_v52 = vld [vmem:[#allocation3 + $0x4a] sm:$0xff]  ;;  %v2678_v56 = vmax.f32 %v2660_v42, %v2674_v23  ;;  %v2908_v23 = vld [vmem:[#allocation3 + $0x58] sm:$0xff] }
 0x216   : > { %v3145_v48 = vpack.c.bf16 %v3132_v52, %v3131_v38  ;;  %v2802_v54 = vpop.f32.mrf.mxu1  ;;  %v3263_v30 = vld [vmem:[#allocation3 + $0x4b] sm:$0xff] }
 0x217   : > { %2680 = vst [vmem:[#allocation3 + $0x94] sm:$0x3f] %v2678_v56  ;;  %v3276_v53 = vpack.c.bf16 %v3263_v30, %v3262_v0  ;;  %v2935_v57 = vld [vmem:[#allocation3 + $0x51] sm:$0xff] }
 0x218   : > { %v2444_v31 = vpop.f32.mrf.mxu3  ;;  %v2907_v42 = vld [vmem:[#allocation3 + $0x50] sm:$0xff]  ;;  %v2948_v52 = vpack.c.bf16 %v2936_v6, %v2935_v57  ;;  %v3649_v6 = vld [vmem:[#allocation3 + $0x1f] sm:$0xff] }
 0x219   : > { %v2462_v59 = vmax.f32 %v2444_v31, %v2458_v50 }
 0x21a   : > { %v2600_v7 = vpop.f32.mrf.mxu0  ;;  %v9816_v10 = vld [vmem:[#allocation3 + $0x62] sm:$0xff] }
 0x21b   : > { %2464 = vst [vmem:[#allocation3 + $0x6a] sm:$0x3f] %v2462_v59  ;;  %v9829_v32 = vld [vmem:[#allocation3 + $0x5c] sm:$0xff]  ;;  %v9846_v59 = vpack.c.bf16 %v2908_v23, %v2907_v42 }
 0x21c   : > { %v2816_v28 = vpop.f32.mrf.mxu2  ;;  %v3265_v38 = vld [vmem:[#allocation3 + $0x5b] sm:$0xff] }
 0x21d   : > { %7646 = vmatmul.msk.bf16.gmra.mxu1 %vm2954_vm7, %v2947_v49  ;;  %v2821_v24 = vmax.f32 %v2802_v54, %v2816_v28  ;;  %v3264_v28 = vld [vmem:[#allocation3 + $0x53] sm:$0xff] }
 0x21e   : > { %7655 = vmatmul.msk.bf16.gmra.mxu2 %vm2954_vm7, %v9812_v9  ;;  %v2804_v55 = vpop.f32.mrf.mxu1  ;;  %v3277_v56 = vpack.c.bf16 %v3265_v38, %v3264_v28  ;;  %v9857_v0 = vld [vmem:[#allocation3 + $0x92] sm:$0xff] }
 0x21f   : > { %7665 = vmatmul.msk.bf16.gmra.mxu3 %vm2954_vm7, %v3145_v48  ;;  %2823 = vst [vmem:[#allocation3 + $0xa8] sm:$0xff] %v2821_v24 }
 0x220   : > { %v2586_v34 = vpop.f32.mrf.mxu3 }
 0x221   : > { %v9824_v4 = vmax.f32 %v2586_v34, %v2600_v7 }
 0x222   : > { %v2602_v2 = vpop.f32.mrf.mxu0  ;;  %v9831_v37 = vld [vmem:[#allocation3 + $0x64] sm:$0xff]  ;;  %v9833_v29 = vld [vmem:[#allocation3 + $0x6c] sm:$0xff] }
 0x223   : > { %2607 = vst [vmem:[#allocation3 + $0x7e] sm:$0xff] %v9824_v4  ;;  %v9842_v41 = vld [vmem:[#allocation3 + $0x6a] sm:$0xff] }
 0x224   : > { %v2818_v7 = vpop.f32.mrf.mxu2  ;;  %v2938_v23 = vld [vmem:[#allocation3 + $0x69] sm:$0xff] }
 0x225   : > { %7675 = vmatmul.msk.bf16.gmra.mxu0 %vm2954_vm7, %v3276_v53  ;;  %v2822_v49 = vmax.f32 %v2804_v55, %v2818_v7  ;;  %v2937_v53 = vld [vmem:[#allocation3 + $0x61] sm:$0xff] }
 0x226   : > { %v2910_v22 = vld [vmem:[#allocation3 + $0x68] sm:$0xff]  ;;  %v2949_v55 = vpack.c.bf16 %v2938_v23, %v2937_v53 }
 0x227   : > { %2824 = vst [vmem:[#allocation3 + $0xb0] sm:$0x3f] %v2822_v49 }
 0x228   : > { %v2588_v45 = vpop.f32.mrf.mxu3 }
 0x229   : > { %v2606_v19 = vmax.f32 %v2588_v45, %v2602_v2  ;;  %v2909_v45 = vld [vmem:[#allocation3 + $0x60] sm:$0xff] }
 0x22a   : > { %v2744_v31 = vpop.f32.mrf.mxu0  ;;  %v9852_v30 = vld [vmem:[#allocation3 + $0x7c] sm:$0xff]  ;;  %v9871_v7 = vpack.c.bf16 %v2910_v22, %v2909_v45  ;;  %v3137_v22 = vld [vmem:[#allocation3 + $0x72] sm:$0xff] }
 0x22b   : > { %2608 = vst [vmem:[#allocation3 + $0x86] sm:$0x3f] %v2606_v19  ;;  %v9855_v34 = vld [vmem:[#allocation3 + $0x7a] sm:$0xff] }
 0x22c   : > { %v2940_v53 = vld [vmem:[#allocation3 + $0x79] sm:$0xff] }
 0x22d   : > { %7647 = vmatmul.msk.bf16.gmra.mxu1 %vm2954_vm7, %v2948_v52  ;;  %v3136_v52 = vld [vmem:[#allocation3 + $0x6a] sm:$0xff]  ;;  %v2912_v23 = vld [vmem:[#allocation3 + $0x78] sm:$0xff] }
 0x22e   : > { %7656 = vmatmul.msk.bf16.gmra.mxu2 %vm2954_vm7, %v9846_v59  ;;  %v3147_v49 = vpack.c.bf16 %v3136_v52, %v9798_v35 }
 0x22f   : > { %7666 = vmatmul.msk.bf16.gmra.mxu3 %vm2954_vm7, %v3146_v18 }
 0x230   : > { %v2730_v48 = vpop.f32.mrf.mxu3 }
 0x231   : > { %v2749_v54 = vmax.f32 %v2730_v48, %v2744_v31  ;;  %v3266_v48 = vld [vmem:[#allocation3 + $0x63] sm:$0xff] }
 0x232   : > { %v2746_v24 = vpop.f32.mrf.mxu0  ;;  %v9859_v2 = vld [vmem:[#allocation3 + $0x84] sm:$0xff] }
 0x233   : > { %2751 = vst [vmem:[#allocation3 + $0x9a] sm:$0xff] %v2749_v54  ;;  %v9863_v57 = vld [vmem:[#allocation3 + $0x82] sm:$0xff]  ;;  %v9865_v42 = vld [vmem:[#allocation3 + $0x8a] sm:$0xff] }
 0x234   : > { %10930 = vst [vmem:[#allocation9_spill] sm:$0xff] %v9865_v42  ;;  %v3267_v54 = vld [vmem:[#allocation3 + $0x6b] sm:$0xff] }
 0x235   : > { %7676 = vmatmul.msk.bf16.gmra.mxu0 %vm2954_vm7, %v3277_v56  ;;  %v3278_v31 = vpack.c.bf16 %v3267_v54, %v3266_v48 }
 0x238   : > { %v2732_v43 = vpop.f32.mrf.mxu3 }
 0x239   : > { %v2750_v18 = vmax.f32 %v2732_v43, %v2746_v24  ;;  %v2939_v24 = vld [vmem:[#allocation3 + $0x71] sm:$0xff]  ;;  %v3138_v43 = vld [vmem:[#allocation3 + $0x7a] sm:$0xff] }
 0x23a   : > { %v2888_v38 = vpop.f32.mrf.mxu0  ;;  %v3148_v54 = vpack.c.bf16 %v3138_v43, %v3137_v22 }
 0x23b   : > { %2752 = vst [vmem:[#allocation3 + $0xa2] sm:$0x3f] %v2750_v18  ;;  %v7690_v18 = vld [vmem:[%s10915_s3 + $0x14] sm:$0xf] }
 0x23d   : > { %7648 = vmatmul.msk.bf16.gmra.mxu1 %vm2954_vm7, %v2949_v55  ;;  %v7700_v55 = vld [vmem:[%s10915_s3 + $0x18] sm:$0xf] }
 0x23e   : > { %7657 = vmatmul.msk.bf16.gmra.mxu2 %vm2954_vm7, %v9871_v7  ;;  %v3704_v48 = vsel %vm1900_vm0, %v7700_v55, 0  ;;  %v2941_v55 = vld [vmem:[#allocation3 + $0x81] sm:$0xff] }
 0x23f   : > { %7667 = vmatmul.msk.bf16.gmra.mxu3 %vm2954_vm7, %v3147_v49  ;;  %v2950_v49 = vpack.c.bf16 %v2940_v53, %v2939_v24 }
 0x240   : > { %v2874_v28 = vpop.f32.mrf.mxu3  ;;  %3713 = vmatpush.bf16.msra.mxu3 %v3704_v48  ;;  %v3139_v48 = vld [vmem:[#allocation3 + $0x82] sm:$0xff] }
 0x241   : > { %v2893_v56 = vmax.f32 %v2874_v28, %v2888_v38  ;;  %v9886_v38 = vpack.c.bf16 %v2912_v23, %v9756_v58  ;;  %v3268_v28 = vld [vmem:[#allocation3 + $0x73] sm:$0xff] }
 0x242   : > { %v2890_v45 = vpop.f32.mrf.mxu0 }
 0x243   : > { %2895 = vst [vmem:[#allocation3 + $0xb6] sm:$0xff] %v2893_v56  ;;  %v3269_v56 = vld [vmem:[#allocation3 + $0x7b] sm:$0xff] }
 0x245   : > { %7677 = vmatmul.msk.bf16.gmra.mxu0 %vm2954_vm7, %v3278_v31  ;;  %v3573_v31 = vsel %vm1900_vm0, %v7690_v18, 0 }
 0x246   : > { %3582 = vmatpush.bf16.msra.mxu2 %v3573_v31  ;;  %v2914_v31 = vld [vmem:[#allocation3 + $0x88] sm:$0xf] }
 0x248   : > { %v2876_v35 = vpop.f32.mrf.mxu3 }
 0x249   : > { %v2894_v52 = vmax.f32 %v2876_v35, %v2890_v45  ;;  %v7710_v35 = vld [vmem:[%s10915_s3 + $0x1c] sm:$0xf]  ;;  %v3279_v45 = vpack.c.bf16 %v3269_v56, %v3268_v28  ;;  %v3270_v56 = vld [vmem:[#allocation3 + $0x83] sm:$0xff] }
 0x24a   : > { %v2994_v24 = vpop.f32.mrf.mxu1  ;;  %v3835_v43 = vsel %vm1900_vm0, %v7710_v35, 0 }
 0x24b   : > { %2896 = vst [vmem:[#allocation3 + $0xbe] sm:$0x3f] %v2894_v52  ;;  %3844 = vmatpush.bf16.msrb.mxu0 %v3835_v43  ;;  %v3386_v43 = vld [vmem:[#allocation3 + $0xc] sm:$0xff] }
 0x24d   : > { %7649 = vmatmul.msk.bf16.gmra.mxu1 %vm2954_vm7, %v2950_v49  ;;  %v3322_v52 = vpop.f32.mrf.mxu0  ;;  %v2942_v49 = vld [vmem:[#allocation3 + $0x89] sm:$0xf] }
 0x24e   : > { %7658 = vmatmul.msk.bf16.gmra.mxu2 %vm2954_vm7, %v9886_v38 }
 0x24f   : > { %7668 = vmatmul.msk.bf16.gmra.mxu3 %vm2954_vm7, %v3148_v54  ;;  %v3140_v54 = vld [vmem:[#allocation3 + $0x8a] sm:$0xf] }
 0x250   : > { %v3149_v28 = vpack.c.bf16 %v3140_v54, %v3139_v48 }
 0x251   : > { %v3078_v58 = vpop.f32.mrf.mxu2 }
 0x252   : > { %v3079_v53 = vadd.f32 %v3078_v58, %v2994_v24  ;;  %v3191_v23 = vpop.f32.mrf.mxu3  ;;  %v9901_v24 = vld [vmem:[#allocation3 + $0x80] sm:$0xff]  ;;  %v2951_v58 = vpack.c.bf16 %v2942_v49, %v2941_v55  ;;  %v3648_v49 = vld [vmem:[#allocation3 + $0x17] sm:$0xff] }
 0x253   : > { %v2923_v19 = vpack.c.bf16 %v2914_v31, %v9901_v24 }
 0x254   : > { %v3236_v22 = vadd.f32 %v3191_v23, %v3079_v53  ;;  %v3271_v53 = vld [vmem:[#allocation3 + $0x8b] sm:$0xf]  ;;  %v9907_v23 = vpop.f32.mrf.mxu1 }
 0x255   : > { %7678 = vmatmul.msk.bf16.gmra.mxu0 %vm2954_vm7, %v3279_v45  ;;  %v3280_v35 = vpack.c.bf16 %v3271_v53, %v3270_v56 }
 0x256   : > { %v9899_v18 = vadd.f32 %v3322_v52, %v3236_v22  ;;  %v9912_v22 = vpop.f32.mrf.mxu0  ;;  %v3517_v52 = vld [vmem:[#allocation3 + $0x16] sm:$0xff] }
 0x257   : > { %v3534_v54 = vpack.c.bf16 %v3517_v52, %v9730_v15 }
 0x259   : > { %v9910_v45 = vpop.f32.mrf.mxu2 }
 0x25a   : > { %v9914_v55 = vpop.f32.mrf.mxu3 }
 0x25d   : > { %7650 = vmatmul.msk.bf16.gmra.mxu1 %vm2954_vm7, %v2951_v58  ;;  %v3647_v58 = vld [vmem:[#allocation3 + $0xf] sm:$0xff] }
 0x25e   : > { %7659 = vmatmul.msk.bf16.gmra.mxu2 %vm2954_vm7, %v2923_v19  ;;  %v3385_v19 = vld [vmem:[#allocation3 + $0x4] sm:$0xff] }
 0x25f   : > { %7669 = vmatmul.msk.bf16.gmra.mxu3 %vm2954_vm7, %v3149_v28  ;;  %v3403_v48 = vpack.c.bf16 %v3386_v43, %v3385_v19  ;;  %v3665_v28 = vpack.c.bf16 %v3648_v49, %v3647_v58  ;;  %v3519_v43 = vld [vmem:[#allocation3 + $0x26] sm:$0xff]  ;;  %v3387_v58 = vld [vmem:[#allocation3 + $0x14] sm:$0xff] }
 0x260   : > { %v3650_v19 = vld [vmem:[#allocation3 + $0x27] sm:$0xff] }
 0x265   : > { %7679 = vmatmul.msk.bf16.gmra.mxu0 %vm2954_vm7, %v3280_v35 }
 0x26a   : > { %v2999_v31 = vpop.f32.mrf.mxu1 }
 0x26d   : > { %7681 = vmatmul.msk.bf16.vlgmr.msra.gmra.mxu1 %vm2954_vm7, %v3403_v48  ;;  %v3327_v53 = vpop.f32.mrf.mxu0 }
 0x26e   : > { %7691 = vmatmul.msk.bf16.vlgmr.msra.gmra.mxu2 %vm2954_vm7, %v3534_v54 }
 0x26f   : > { %7701 = vmatmul.msk.bf16.vlgmr.msra.gmra.mxu3 %vm2954_vm7, %v3665_v28  ;;  %v3518_v28 = vld [vmem:[#allocation3 + $0x1e] sm:$0xff] }
 0x271   : > { %v3083_v56 = vpop.f32.mrf.mxu2 }
 0x272   : > { %v3084_v35 = vadd.f32 %v3083_v56, %v2999_v31  ;;  %v3196_v50 = vpop.f32.mrf.mxu3  ;;  %v3001_v1 = vpop.f32.mrf.mxu1  ;;  %v3404_v31 = vpack.c.bf16 %v9741_v62, %v3387_v58  ;;  %v3535_v56 = vpack.c.bf16 %v3519_v43, %v3518_v28 }
 0x274   : > { %v3238_v63 = vadd.f32 %v3196_v50, %v3084_v35  ;;  %v3666_v50 = vpack.c.bf16 %v3650_v19, %v3649_v6  ;;  %v3521_v6 = vld [vmem:[#allocation3 + $0x36] sm:$0xff] }
 0x275   : > { %7711 = vmatmul.msk.bf16.vlgmr.msrb.gmra.mxu0 %vm2954_vm7, %v9746_v44  ;;  %v3329_v54 = vpop.f32.mrf.mxu0  ;;  %v3651_v19 = vld [vmem:[#allocation3 + $0x2f] sm:$0xff] }
 0x276   : > { %v9920_v27 = vadd.f32 %v3327_v53, %v3238_v63 }
 0x279   : > { %v3085_v15 = vpop.f32.mrf.mxu2 }
 0x27a   : > { %v3086_v52 = vadd.f32 %v3085_v15, %v3001_v1  ;;  %v3198_v49 = vpop.f32.mrf.mxu3  ;;  %v3004_v48 = vpop.f32.mrf.mxu1 }
 0x27c   : > { %v3239_v40 = vadd.f32 %v3198_v49, %v3086_v52 }
 0x27d   : > { %7682 = vmatmul.msk.bf16.gmra.mxu1 %vm2954_vm7, %v3404_v31  ;;  %v9934_v31 = vld [vmem:[#allocation3 + $0x24] sm:$0xff] }
 0x27e   : > { %v9925_v63 = vadd.f32 %v3329_v54, %v3239_v40  ;;  %7692 = vmatmul.msk.bf16.gmra.mxu2 %vm2954_vm7, %v3535_v56  ;;  %v3520_v40 = vld [vmem:[#allocation3 + $0x2e] sm:$0xff]  ;;  %v3652_v54 = vld [vmem:[#allocation3 + $0x37] sm:$0xff]  ;;  %v3405_v56 = vpack.c.bf16 %v9766_v21, %v9934_v31 }
 0x27f   : > { %7702 = vmatmul.msk.bf16.gmra.mxu3 %vm2954_vm7, %v3666_v50  ;;  %v3667_v50 = vpack.c.bf16 %v3652_v54, %v3651_v19  ;;  %v3654_v54 = vld [vmem:[#allocation3 + $0x47] sm:$0xff] }
 0x281   : > { %v3088_v44 = vpop.f32.mrf.mxu2 }
 0x282   : > { %v3089_v1 = vadd.f32 %v3088_v44, %v3004_v48  ;;  %v3201_v53 = vpop.f32.mrf.mxu3  ;;  %v3006_v35 = vpop.f32.mrf.mxu1 }
 0x283   : > { %v3332_v15 = vpop.f32.mrf.mxu0 }
 0x284   : > { %v3240_v17 = vadd.f32 %v3201_v53, %v3089_v1 }
 0x285   : > { %7712 = vmatmul.msk.bf16.gmra.mxu0 %vm2954_vm7, %v9754_v33 }
 0x286   : > { %v9930_v52 = vadd.f32 %v3332_v15, %v3240_v17  ;;  %v3536_v17 = vpack.c.bf16 %v3521_v6, %v3520_v40  ;;  %v3522_v6 = vld [vmem:[#allocation3 + $0x3e] sm:$0xff] }
 0x289   : > { %v3090_v62 = vpop.f32.mrf.mxu2 }
 0x28a   : > { %v3091_v43 = vadd.f32 %v3090_v62, %v3006_v35  ;;  %v3203_v49 = vpop.f32.mrf.mxu3  ;;  %v3009_v58 = vpop.f32.mrf.mxu1 }
 0x28b   : > { %v3334_v28 = vpop.f32.mrf.mxu0 }
 0x28c   : > { %v3241_v48 = vadd.f32 %v3203_v49, %v3091_v43 }
 0x28d   : > { %7683 = vmatmul.msk.bf16.gmra.mxu1 %vm2954_vm7, %v3405_v56 }
 0x28e   : > { %v9938_v44 = vadd.f32 %v3334_v28, %v3241_v48  ;;  %7693 = vmatmul.msk.bf16.gmra.mxu2 %vm2954_vm7, %v3536_v17  ;;  %v3537_v17 = vpack.c.bf16 %v9763_v8, %v3522_v6  ;;  %v7720_v8 = vld [vmem:[%s10915_s3 + $0x20] sm:$0xf] }
 0x28f   : > { %7703 = vmatmul.msk.bf16.gmra.mxu3 %vm2954_vm7, %v3667_v50  ;;  %v3653_v50 = vld [vmem:[#allocation3 + $0x3f] sm:$0xff]  ;;  %v3966_v6 = vsel %vm1900_vm0, %v7720_v8, 0 }
 0x290   : > { %3975 = vmatpush.bf16.msrb.mxu1 %v3966_v6 }
 0x291   : > { %v3093_v33 = vpop.f32.mrf.mxu2 }
 0x292   : > { %v3094_v1 = vadd.f32 %v3093_v33, %v3009_v58  ;;  %v3206_v53 = vpop.f32.mrf.mxu3  ;;  %v3011_v35 = vpop.f32.mrf.mxu1  ;;  %v3406_v58 = vpack.c.bf16 %v9782_v61, %v9769_v60  ;;  %v3668_v33 = vpack.c.bf16 %v3654_v54, %v3653_v50  ;;  %v9963_v54 = vld [vmem:[#allocation3 + $0x4c] sm:$0xff]  ;;  %v3656_v50 = vld [vmem:[#allocation3 + $0x57] sm:$0xff] }
 0x293   : > { %v3337_v15 = vpop.f32.mrf.mxu0 }
 0x294   : > { %v3242_v62 = vadd.f32 %v3206_v53, %v3094_v1 }
 0x295   : > { %7713 = vmatmul.msk.bf16.gmra.mxu0 %vm2954_vm7, %v9780_v51 }
 0x296   : > { %v9943_v43 = vadd.f32 %v3337_v15, %v3242_v62 }
 0x299   : > { %v3095_v40 = vpop.f32.mrf.mxu2 }
 0x29a   : > { %v3096_v49 = vadd.f32 %v3095_v40, %v3011_v35  ;;  %v3208_v19 = vpop.f32.mrf.mxu3  ;;  %v3014_v28 = vpop.f32.mrf.mxu1 }
 0x29b   : > { %v3339_v48 = vpop.f32.mrf.mxu0 }
 0x29c   : > { %v3243_v56 = vadd.f32 %v3208_v19, %v3096_v49 }
 0x29d   : > { %7684 = vmatmul.msk.bf16.gmra.mxu1 %vm2954_vm7, %v3406_v58 }
 0x29e   : > { %v9950_v1 = vadd.f32 %v3339_v48, %v3243_v56  ;;  %7694 = vmatmul.msk.bf16.gmra.mxu2 %vm2954_vm7, %v3537_v17  ;;  %v3525_v48 = vld [vmem:[#allocation3 + $0x56] sm:$0xff] }
 0x29f   : > { %7704 = vmatmul.msk.bf16.gmra.mxu3 %vm2954_vm7, %v3668_v33  ;;  %v3655_v17 = vld [vmem:[#allocation3 + $0x4f] sm:$0xff] }
 0x2a1   : > { %v3098_v51 = vpop.f32.mrf.mxu2 }
 0x2a2   : > { %v3099_v53 = vadd.f32 %v3098_v51, %v3014_v28  ;;  %v3211_v35 = vpop.f32.mrf.mxu3  ;;  %v3016_v15 = vpop.f32.mrf.mxu1  ;;  %v3524_v28 = vld [vmem:[#allocation3 + $0x4e] sm:$0xff] }
 0x2a3   : > { %v3342_v62 = vpop.f32.mrf.mxu0 }
 0x2a4   : > { %v3244_v40 = vadd.f32 %v3211_v35, %v3099_v53  ;;  %v3538_v35 = vpack.c.bf16 %v3525_v48, %v3524_v28  ;;  %v3526_v48 = vld [vmem:[#allocation3 + $0x5e] sm:$0xff] }
 0x2a5   : > { %7714 = vmatmul.msk.bf16.gmra.mxu0 %vm2954_vm7, %v9812_v9  ;;  %v3407_v9 = vpack.c.bf16 %v9963_v54, %v9784_v46 }
 0x2a6   : > { %v9955_v49 = vadd.f32 %v3342_v62, %v3244_v40  ;;  %v3669_v62 = vpack.c.bf16 %v3656_v50, %v3655_v17 }
 0x2a9   : > { %v3100_v19 = vpop.f32.mrf.mxu2 }
 0x2aa   : > { %v3101_v56 = vadd.f32 %v3100_v19, %v3016_v15  ;;  %v3213_v58 = vpop.f32.mrf.mxu3  ;;  %v3019_v33 = vpop.f32.mrf.mxu1 }
 0x2ab   : > { %v3344_v51 = vpop.f32.mrf.mxu0 }
 0x2ac   : > { %v3245_v53 = vadd.f32 %v3213_v58, %v3101_v56  ;;  %v3527_v58 = vld [vmem:[#allocation3 + $0x66] sm:$0xff] }
 0x2ad   : > { %7685 = vmatmul.msk.bf16.gmra.mxu1 %vm2954_vm7, %v3407_v9 }
 0x2ae   : > { %v9967_v40 = vadd.f32 %v3344_v51, %v3245_v53  ;;  %7695 = vmatmul.msk.bf16.gmra.mxu2 %vm2954_vm7, %v3538_v35  ;;  %v3657_v51 = vld [vmem:[#allocation3 + $0x5f] sm:$0xff]  ;;  %v3658_v53 = vld [vmem:[#allocation3 + $0x67] sm:$0xff] }
 0x2af   : > { %7705 = vmatmul.msk.bf16.gmra.mxu3 %vm2954_vm7, %v3669_v62 }
 0x2b1   : > { %v3103_v15 = vpop.f32.mrf.mxu2 }
 0x2b2   : > { %v3104_v8 = vadd.f32 %v3103_v15, %v3019_v33  ;;  %v3216_v6 = vpop.f32.mrf.mxu3  ;;  %v3021_v19 = vpop.f32.mrf.mxu1  ;;  %v3408_v33 = vpack.c.bf16 %v9829_v32, %v9744_v5  ;;  %v3539_v15 = vpack.c.bf16 %v3527_v58, %v3526_v48  ;;  %v3528_v48 = vld [vmem:[#allocation3 + $0x6e] sm:$0xff]  ;;  %v3529_v58 = vld [vmem:[#allocation3 + $0x76] sm:$0xff] }
 0x2b3   : > { %v3347_v20 = vpop.f32.mrf.mxu0 }
 0x2b4   : > { %v3246_v11 = vadd.f32 %v3216_v6, %v3104_v8  ;;  %v3670_v8 = vpack.c.bf16 %v3658_v53, %v3657_v51  ;;  %v3659_v53 = vld [vmem:[#allocation3 + $0x6f] sm:$0xff] }
 0x2b5   : > { %7715 = vmatmul.msk.bf16.gmra.mxu0 %vm2954_vm7, %v9846_v59 }
 0x2b6   : > { %v9972_v56 = vadd.f32 %v3347_v20, %v3246_v11 }
 0x2b9   : > { %v3105_v28 = vpop.f32.mrf.mxu2 }
 0x2ba   : > { %v3106_v17 = vadd.f32 %v3105_v28, %v3021_v19  ;;  %v3218_v50 = vpop.f32.mrf.mxu3  ;;  %v3024_v9 = vpop.f32.mrf.mxu1 }
 0x2bb   : > { %v3349_v35 = vpop.f32.mrf.mxu0 }
 0x2bc   : > { %v3247_v62 = vadd.f32 %v3218_v50, %v3106_v17 }
 0x2bd   : > { %7686 = vmatmul.msk.bf16.gmra.mxu1 %vm2954_vm7, %v3408_v33 }
 0x2be   : > { %v9978_v11 = vadd.f32 %v3349_v35, %v3247_v62  ;;  %7696 = vmatmul.msk.bf16.gmra.mxu2 %vm2954_vm7, %v3539_v15  ;;  %v3660_v35 = vld [vmem:[#allocation3 + $0x77] sm:$0xff] }
 0x2bf   : > { %7706 = vmatmul.msk.bf16.gmra.mxu3 %vm2954_vm7, %v3670_v8  ;;  %v3540_v8 = vpack.c.bf16 %v3529_v58, %v3528_v48  ;;  %v3531_v58 = vld [vmem:[#allocation3 + $0x86] sm:$0xff] }
 0x2c1   : > { %v3108_v20 = vpop.f32.mrf.mxu2 }
 0x2c2   : > { %v3109_v59 = vadd.f32 %v3108_v20, %v3024_v9  ;;  %v3221_v6 = vpop.f32.mrf.mxu3  ;;  %v3026_v19 = vpop.f32.mrf.mxu1  ;;  %v3409_v9 = vpack.c.bf16 %v9833_v29, %v9831_v37  ;;  %v3671_v20 = vpack.c.bf16 %v3660_v35, %v3659_v53  ;;  %v3661_v35 = vld [vmem:[#allocation3 + $0x7f] sm:$0xff] }
 0x2c3   : > { %v3352_v28 = vpop.f32.mrf.mxu0 }
 0x2c4   : > { %v3248_v25 = vadd.f32 %v3221_v6, %v3109_v59 }
 0x2c5   : > { %7716 = vmatmul.msk.bf16.gmra.mxu0 %vm2954_vm7, %v9871_v7 }
 0x2c6   : > { %v9983_v17 = vadd.f32 %v3352_v28, %v3248_v25 }
 0x2c9   : > { %v3110_v5 = vpop.f32.mrf.mxu2 }
 0x2ca   : > { %v3111_v50 = vadd.f32 %v3110_v5, %v3026_v19  ;;  %v3223_v51 = vpop.f32.mrf.mxu3  ;;  %v3029_v62 = vpop.f32.mrf.mxu1 }
 0x2cb   : > { %v3354_v33 = vpop.f32.mrf.mxu0 }
 0x2cc   : > { %v3249_v15 = vadd.f32 %v3223_v51, %v3111_v50 }
 0x2cd   : > { %7687 = vmatmul.msk.bf16.gmra.mxu1 %vm2954_vm7, %v3409_v9 }
 0x2ce   : > { %v9989_v25 = vadd.f32 %v3354_v33, %v3249_v15  ;;  %7697 = vmatmul.msk.bf16.gmra.mxu2 %vm2954_vm7, %v3540_v8  ;;  %v3662_v33 = vld [vmem:[#allocation3 + $0x87] sm:$0xff] }
 0x2cf   : > { %7707 = vmatmul.msk.bf16.gmra.mxu3 %vm2954_vm7, %v3671_v20  ;;  %v3541_v20 = vpack.c.bf16 %v3531_v58, %v9824_v4 }
 0x2d1   : > { %v3113_v7 = vpop.f32.mrf.mxu2 }
 0x2d2   : > { %v3114_v59 = vadd.f32 %v3113_v7, %v3029_v62  ;;  %v3226_v6 = vpop.f32.mrf.mxu3  ;;  %v3031_v19 = vpop.f32.mrf.mxu1  ;;  %v3410_v62 = vpack.c.bf16 %v9852_v30, %v9826_v16  ;;  %v3672_v7 = vpack.c.bf16 %v3662_v33, %v3661_v35 }
 0x2d3   : > { %v3357_v28 = vpop.f32.mrf.mxu0 }
 0x2d4   : > { %v3250_v5 = vadd.f32 %v3226_v6, %v3114_v59  ;;  %v7740_v6 = vld [vmem:[%s10915_s3 + $0x28] sm:$0xf] }
 0x2d5   : > { %7717 = vmatmul.msk.bf16.gmra.mxu0 %vm2954_vm7, %v9886_v38  ;;  %v7730_v38 = vld [vmem:[%s10915_s3 + $0x24] sm:$0xf]  ;;  %v4228_v4 = vsel %vm1900_vm0, %v7740_v6, 0 }
 0x2d6   : > { %v9994_v50 = vadd.f32 %v3357_v28, %v3250_v5  ;;  %4237 = vmatpush.bf16.msrb.mxu3 %v4228_v4  ;;  %v3793_v5 = vld [vmem:[#allocation3 + $0x88] sm:$0xff] }
 0x2d7   : > { %v3803_v33 = vpack.c.bf16 %v3793_v5, %v9901_v24  ;;  %v3663_v4 = vld [vmem:[#allocation3 + $0x8f] sm:$0xff] }
 0x2d9   : > { %v3115_v48 = vpop.f32.mrf.mxu2 }
 0x2da   : > { %v3116_v51 = vadd.f32 %v3115_v48, %v3031_v19  ;;  %v3228_v53 = vpop.f32.mrf.mxu3  ;;  %v3034_v15 = vpop.f32.mrf.mxu1  ;;  %v4097_v19 = vsel %vm1900_vm0, %v7730_v38, 0  ;;  %v3533_v38 = vld [vmem:[#allocation3 + $0x96] sm:$0xf] }
 0x2db   : > { %v3359_v9 = vpop.f32.mrf.mxu0  ;;  %4106 = vmatpush.bf16.msrb.mxu2 %v4097_v19 }
 0x2dc   : > { %v3251_v8 = vadd.f32 %v3228_v53, %v3116_v51 }
 0x2dd   : > { %7688 = vmatmul.msk.bf16.gmra.mxu1 %vm2954_vm7, %v3410_v62 }
 0x2de   : > { %v10001_v59 = vadd.f32 %v3359_v9, %v3251_v8  ;;  %7698 = vmatmul.msk.bf16.gmra.mxu2 %vm2954_vm7, %v3541_v20  ;;  %v7750_v8 = vld [vmem:[%s10915_s3 + $0x2c] sm:$0xf] }
 0x2df   : > { %7708 = vmatmul.msk.bf16.gmra.mxu3 %vm2954_vm7, %v3672_v7  ;;  %v4359_v62 = vsel %vm1900_vm0, %v7750_v8, 0  ;;  %v3402_v7 = vld [vmem:[#allocation3 + $0x8c] sm:$0xf]  ;;  %v3081_v8 = vadd.f32 %v9910_v45, %v9907_v23 }
 0x2e0   : > { %4368 = vmatpush.bf16.msra.mxu0 %v4359_v62 }
 0x2e1   : > { %v3118_v28 = vpop.f32.mrf.mxu2 }
 0x2e2   : > { %v3119_v48 = vadd.f32 %v3118_v28, %v3034_v15  ;;  %v3231_v58 = vpop.f32.mrf.mxu3  ;;  %v3036_v51 = vpop.f32.mrf.mxu1  ;;  %v3532_v15 = vld [vmem:[#allocation3 + $0x8e] sm:$0xff]  ;;  %v3664_v28 = vld [vmem:[#allocation3 + $0x97] sm:$0xf] }
 0x2e3   : > { %v3362_v53 = vpop.f32.mrf.mxu0 }
 0x2e4   : > { %v3252_v35 = vadd.f32 %v3231_v58, %v3119_v48 }
 0x2e5   : > { %7718 = vmatmul.msk.bf16.gmra.mxu0 %vm2954_vm7, %v3803_v33  ;;  %v3673_v33 = vpack.c.bf16 %v3664_v28, %v3663_v4 }
 0x2e6   : > { %v10015_v9 = vadd.f32 %v3362_v53, %v3252_v35  ;;  %v3411_v53 = vpack.c.bf16 %v3402_v7, %v9859_v2  ;;  %v3542_v35 = vpack.c.bf16 %v3533_v38, %v3532_v15 }
 0x2e9   : > { %v3120_v20 = vpop.f32.mrf.mxu2 }
 0x2ea   : > { %v3121_v6 = vadd.f32 %v3120_v20, %v3036_v51  ;;  %v3233_v19 = vpop.f32.mrf.mxu3  ;;  %v3453_v5 = vpop.f32.mrf.mxu1  ;;  %v3794_v20 = vld [vmem:[#allocation3 + $0x90] sm:$0xff] }
 0x2eb   : > { %v3364_v24 = vpop.f32.mrf.mxu0  ;;  %v3498_v58 = vadd.f32 %v3453_v5, %v9899_v18  ;;  %v3237_v18 = vadd.f32 %v9914_v55, %v3081_v8  ;;  %v4040_v8 = vld [vmem:[#allocation3 + $0x12] sm:$0xff] }
 0x2ec   : > { %v3253_v48 = vadd.f32 %v3233_v19, %v3121_v6  ;;  %v3795_v6 = vld [vmem:[#allocation3 + $0x98] sm:$0xf] }
 0x2ed   : > { %7689 = vmatmul.msk.bf16.gmra.mxu1 %vm2954_vm7, %v3411_v53  ;;  %v3804_v28 = vpack.c.bf16 %v3795_v6, %v3794_v20  ;;  %v3368_v23 = vadd.f32 %v9912_v22, %v3237_v18  ;;  %v4041_v53 = vld [vmem:[#allocation3 + $0x1a] sm:$0xff] }
 0x2ee   : > { %v10026_v62 = vadd.f32 %v3364_v24, %v3253_v48  ;;  %7699 = vmatmul.msk.bf16.gmra.mxu2 %vm2954_vm7, %v3542_v35  ;;  %v3910_v48 = vld [vmem:[#allocation3 + $0x19] sm:$0xff]  ;;  %v4058_v6 = vpack.c.bf16 %v4041_v53, %v4040_v8 }
 0x2ef   : > { %7709 = vmatmul.msk.bf16.gmra.mxu3 %vm2954_vm7, %v3673_v33  ;;  %v4171_v22 = vld [vmem:[#allocation3 + $0x1c] sm:$0xff] }
 0x2f0   : > { %v4189_v18 = vpack.c.bf16 %v9934_v31, %v4171_v22 }
 0x2f1   : > { %v3584_v51 = vpop.f32.mrf.mxu2 }
 0x2f2   : > { %v3629_v19 = vadd.f32 %v3584_v51, %v3498_v58  ;;  %v3715_v7 = vpop.f32.mrf.mxu3  ;;  %v3455_v15 = vpop.f32.mrf.mxu1  ;;  %v3909_v58 = vld [vmem:[#allocation3 + $0x11] sm:$0xff] }
 0x2f3   : > { %v3846_v38 = vpop.f32.mrf.mxu0  ;;  %v3499_v24 = vadd.f32 %v3455_v15, %v3368_v23  ;;  %v3927_v20 = vpack.c.bf16 %v3910_v48, %v3909_v58 }
 0x2f4   : > { %v3760_v4 = vadd.f32 %v3715_v7, %v3629_v19 }
 0x2f5   : > { %7719 = vmatmul.msk.bf16.gmra.mxu0 %vm2954_vm7, %v3804_v28 }
 0x2f6   : > { %v10033_v45 = vadd.f32 %v3846_v38, %v3760_v4  ;;  %v4303_v38 = vld [vmem:[#allocation3 + $0x25] sm:$0xff] }
 0x2f9   : > { %v3586_v5 = vpop.f32.mrf.mxu2 }
 0x2fa   : > { %v3630_v35 = vadd.f32 %v3586_v5, %v3499_v24  ;;  %v3717_v33 = vpop.f32.mrf.mxu3  ;;  %v3458_v42 = vpop.f32.mrf.mxu1 }
 0x2fb   : > { %v3848_v55 = vpop.f32.mrf.mxu0  ;;  %v3500_v19 = vadd.f32 %v3458_v42, %v9920_v27  ;;  %v4302_v27 = vld [vmem:[#allocation3 + $0x1d] sm:$0xff] }
 0x2fc   : > { %v3761_v51 = vadd.f32 %v3717_v33, %v3630_v35  ;;  %v4320_v48 = vpack.c.bf16 %v4303_v38, %v4302_v27  ;;  %v3912_v35 = vld [vmem:[#allocation3 + $0x29] sm:$0xff] }
 0x2fd   : > { %7721 = vmatmul.msk.bf16.vlgmr.msrb.gmra.mxu1 %vm2954_vm7, %v3927_v20 }
 0x2fe   : > { %v10038_v7 = vadd.f32 %v3848_v55, %v3761_v51  ;;  %7731 = vmatmul.msk.bf16.vlgmr.msrb.gmra.mxu2 %vm2954_vm7, %v4058_v6  ;;  %v3911_v51 = vld [vmem:[#allocation3 + $0x21] sm:$0xff] }
 0x2ff   : > { %7741 = vmatmul.msk.bf16.vlgmr.msrb.gmra.mxu3 %vm2954_vm7, %v4189_v18  ;;  %v3928_v22 = vpack.c.bf16 %v3912_v35, %v3911_v51 }
 0x301   : > { %v3589_v15 = vpop.f32.mrf.mxu2 }
 0x302   : > { %v3631_v4 = vadd.f32 %v3589_v15, %v3500_v19  ;;  %v3720_v28 = vpop.f32.mrf.mxu3  ;;  %v3460_v23 = vpop.f32.mrf.mxu1  ;;  %v4042_v19 = vld [vmem:[#allocation3 + $0x22] sm:$0xff]  ;;  %v10931_v15 = vpack.c.bf16 %v9769_v60, %v9766_v21  ;;  %v3914_v21 = vld [vmem:[#allocation3 + $0x39] sm:$0xff] }
 0x303   : > { %v3851_v24 = vpop.f32.mrf.mxu0  ;;  %v3501_v5 = vadd.f32 %v3460_v23, %v9925_v63  ;;  %v4059_v18 = vpack.c.bf16 %v9771_v3, %v4042_v19 }
 0x304   : > { %v3762_v42 = vadd.f32 %v3720_v28, %v3631_v4  ;;  %v4304_v4 = vld [vmem:[#allocation3 + $0x2d] sm:$0xff]  ;;  %v4305_v28 = vld [vmem:[#allocation3 + $0x35] sm:$0xff] }
 0x305   : > { %7751 = vmatmul.msk.bf16.vlgmr.msra.gmra.mxu0 %vm2954_vm7, %v4320_v48  ;;  %v4321_v48 = vpack.c.bf16 %v4305_v28, %v4304_v4 }
 0x306   : > { %v10044_v31 = vadd.f32 %v3851_v24, %v3762_v42 }
 0x309   : > { %v3591_v53 = vpop.f32.mrf.mxu2 }
 0x30a   : > { %v3632_v33 = vadd.f32 %v3591_v53, %v3501_v5  ;;  %v3722_v55 = vpop.f32.mrf.mxu3  ;;  %v3463_v58 = vpop.f32.mrf.mxu1 }
 0x30b   : > { %v3853_v8 = vpop.f32.mrf.mxu0  ;;  %v3502_v6 = vadd.f32 %v3463_v58, %v9930_v52 }
 0x30c   : > { %v3763_v20 = vadd.f32 %v3722_v55, %v3632_v33  ;;  %v3913_v33 = vld [vmem:[#allocation3 + $0x31] sm:$0xff] }
 0x30d   : > { %7722 = vmatmul.msk.bf16.gmra.mxu1 %vm2954_vm7, %v3928_v22 }
 0x30e   : > { %v10049_v63 = vadd.f32 %v3853_v8, %v3763_v20  ;;  %7732 = vmatmul.msk.bf16.gmra.mxu2 %vm2954_vm7, %v4059_v18  ;;  %v3929_v20 = vpack.c.bf16 %v3914_v21, %v3913_v33  ;;  %v10932_v18 = vpack.c.bf16 %v9784_v46, %v9782_v61  ;;  %v4178_v33 = vld [vmem:[#allocation3 + $0x54] sm:$0xff] }
 0x30f   : > { %7742 = vmatmul.msk.bf16.gmra.mxu3 %vm2954_vm7, %v10931_v15 }
 0x311   : > { %v3594_v38 = vpop.f32.mrf.mxu2 }
 0x312   : > { %v3633_v23 = vadd.f32 %v3594_v38, %v3502_v6  ;;  %v3725_v24 = vpop.f32.mrf.mxu3  ;;  %v3465_v52 = vpop.f32.mrf.mxu1  ;;  %v8756_v6 = vld [vmem:[#allocation3 + $0x32] sm:$0xff]  ;;  %v4307_v38 = vld [vmem:[#allocation3 + $0x45] sm:$0xff] }
 0x313   : > { %v3856_v27 = vpop.f32.mrf.mxu0  ;;  %v3503_v5 = vadd.f32 %v3465_v52, %v9938_v44  ;;  %v4060_v22 = vpack.c.bf16 %v9786_v47, %v8756_v6 }
 0x314   : > { %v3764_v42 = vadd.f32 %v3725_v24, %v3633_v23  ;;  %v4306_v24 = vld [vmem:[#allocation3 + $0x3d] sm:$0xff] }
 0x315   : > { %7752 = vmatmul.msk.bf16.gmra.mxu0 %vm2954_vm7, %v4321_v48 }
 0x316   : > { %v10058_v53 = vadd.f32 %v3856_v27, %v3764_v42  ;;  %v4322_v42 = vpack.c.bf16 %v4307_v38, %v4306_v24 }
 0x319   : > { %v3596_v35 = vpop.f32.mrf.mxu2 }
 0x31a   : > { %v3634_v60 = vadd.f32 %v3596_v35, %v3503_v5  ;;  %v3727_v55 = vpop.f32.mrf.mxu3  ;;  %v3468_v58 = vpop.f32.mrf.mxu1  ;;  %v3916_v35 = vld [vmem:[#allocation3 + $0x49] sm:$0xff] }
 0x31b   : > { %v3858_v8 = vpop.f32.mrf.mxu0  ;;  %v3504_v19 = vadd.f32 %v3468_v58, %v9943_v43 }
 0x31c   : > { %v3765_v51 = vadd.f32 %v3727_v55, %v3634_v60  ;;  %v3915_v55 = vld [vmem:[#allocation3 + $0x41] sm:$0xff] }
 0x31d   : > { %7723 = vmatmul.msk.bf16.gmra.mxu1 %vm2954_vm7, %v3929_v20  ;;  %v4192_v20 = vpack.c.bf16 %v4178_v33, %v9963_v54 }
 0x31e   : > { %v10063_v44 = vadd.f32 %v3858_v8, %v3765_v51  ;;  %7733 = vmatmul.msk.bf16.gmra.mxu2 %vm2954_vm7, %v4060_v22  ;;  %v3930_v51 = vpack.c.bf16 %v3916_v35, %v3915_v55  ;;  %v3918_v35 = vld [vmem:[#allocation3 + $0x59] sm:$0xff] }
 0x31f   : > { %7743 = vmatmul.msk.bf16.gmra.mxu3 %vm2954_vm7, %v10932_v18  ;;  %v4308_v18 = vld [vmem:[#allocation3 + $0x4d] sm:$0xff] }
 0x321   : > { %v3599_v15 = vpop.f32.mrf.mxu2 }
 0x322   : > { %v3635_v4 = vadd.f32 %v3599_v15, %v3504_v19  ;;  %v3730_v28 = vpop.f32.mrf.mxu3  ;;  %v3470_v43 = vpop.f32.mrf.mxu1  ;;  %v8757_v19 = vld [vmem:[#allocation3 + $0x42] sm:$0xff]  ;;  %v4309_v15 = vld [vmem:[#allocation3 + $0x55] sm:$0xff] }
 0x323   : > { %v3861_v23 = vpop.f32.mrf.mxu0  ;;  %v3505_v27 = vadd.f32 %v3470_v43, %v9950_v1  ;;  %v4061_v1 = vpack.c.bf16 %v9806_v12, %v8757_v19  ;;  %v4323_v24 = vpack.c.bf16 %v4309_v15, %v4308_v18  ;;  %v4311_v18 = vld [vmem:[#allocation3 + $0x65] sm:$0xff] }
 0x324   : > { %v3766_v52 = vadd.f32 %v3730_v28, %v3635_v4 }
 0x325   : > { %7753 = vmatmul.msk.bf16.gmra.mxu0 %vm2954_vm7, %v4322_v42 }
 0x326   : > { %v10072_v5 = vadd.f32 %v3861_v23, %v3766_v52  ;;  %v7760_v52 = vld [vmem:[%s10915_s3 + $0x30] sm:$0xf] }
 0x329   : > { %v3601_v48 = vpop.f32.mrf.mxu2 }
 0x32a   : > { %v3636_v61 = vadd.f32 %v3601_v48, %v3505_v27  ;;  %v3732_v46 = vpop.f32.mrf.mxu3  ;;  %v3473_v21 = vpop.f32.mrf.mxu1  ;;  %v4490_v27 = vsel %vm1900_vm0, %v7760_v52, 0  ;;  %v3917_v48 = vld [vmem:[#allocation3 + $0x51] sm:$0xff]  ;;  %v3919_v52 = vld [vmem:[#allocation3 + $0x61] sm:$0xff] }
 0x32b   : > { %v3863_v60 = vpop.f32.mrf.mxu0  ;;  %v3506_v8 = vadd.f32 %v3473_v21, %v9955_v49  ;;  %4499 = vmatpush.bf16.msra.mxu1 %v4490_v27  ;;  %v3931_v55 = vpack.c.bf16 %v3918_v35, %v3917_v48 }
 0x32c   : > { %v3767_v58 = vadd.f32 %v3732_v46, %v3636_v61 }
 0x32d   : > { %7724 = vmatmul.msk.bf16.gmra.mxu1 %vm2954_vm7, %v3930_v51 }
 0x32e   : > { %v10078_v6 = vadd.f32 %v3863_v60, %v3767_v58  ;;  %7734 = vmatmul.msk.bf16.gmra.mxu2 %vm2954_vm7, %v4061_v1  ;;  %v8758_v58 = vld [vmem:[#allocation3 + $0x52] sm:$0xff]  ;;  %v10933_v1 = vpack.c.bf16 %v9831_v37, %v9829_v32  ;;  %v3920_v32 = vld [vmem:[#allocation3 + $0x69] sm:$0xff] }
 0x32f   : > { %7744 = vmatmul.msk.bf16.gmra.mxu3 %vm2954_vm7, %v4192_v20 }
 0x331   : > { %v3604_v22 = vpop.f32.mrf.mxu2 }
 0x332   : > { %v3637_v38 = vadd.f32 %v3604_v22, %v3506_v8  ;;  %v3735_v4 = vpop.f32.mrf.mxu3  ;;  %v3475_v49 = vpop.f32.mrf.mxu1  ;;  %v8759_v8 = vld [vmem:[#allocation3 + $0x5a] sm:$0xff] }
 0x333   : > { %v3866_v28 = vpop.f32.mrf.mxu0  ;;  %v3507_v23 = vadd.f32 %v3475_v49, %v9967_v40  ;;  %v4062_v51 = vpack.c.bf16 %v8759_v8, %v8758_v58  ;;  %v4310_v22 = vld [vmem:[#allocation3 + $0x5d] sm:$0xff]  ;;  %v4312_v58 = vld [vmem:[#allocation3 + $0x6d] sm:$0xff]  ;;  %v4313_v8 = vld [vmem:[#allocation3 + $0x75] sm:$0xff] }
 0x334   : > { %v3768_v43 = vadd.f32 %v3735_v4, %v3637_v38 }
 0x335   : > { %7754 = vmatmul.msk.bf16.gmra.mxu0 %vm2954_vm7, %v4323_v24 }
 0x336   : > { %v10084_v54 = vadd.f32 %v3866_v28, %v3768_v43  ;;  %v4324_v43 = vpack.c.bf16 %v4311_v18, %v4310_v22 }
 0x339   : > { %v3606_v42 = vpop.f32.mrf.mxu2 }
 0x33a   : > { %v3638_v61 = vadd.f32 %v3606_v42, %v3507_v23  ;;  %v3737_v46 = vpop.f32.mrf.mxu3  ;;  %v3478_v33 = vpop.f32.mrf.mxu1 }
 0x33b   : > { %v3868_v21 = vpop.f32.mrf.mxu0  ;;  %v3508_v60 = vadd.f32 %v3478_v33, %v9972_v56  ;;  %v8760_v33 = vld [vmem:[#allocation3 + $0x62] sm:$0xff] }
 0x33c   : > { %v3769_v40 = vadd.f32 %v3737_v46, %v3638_v61  ;;  %v3932_v46 = vpack.c.bf16 %v3920_v32, %v3919_v52 }
 0x33d   : > { %7725 = vmatmul.msk.bf16.gmra.mxu1 %vm2954_vm7, %v3931_v55 }
 0x33e   : > { %v10092_v19 = vadd.f32 %v3868_v21, %v3769_v40  ;;  %7735 = vmatmul.msk.bf16.gmra.mxu2 %vm2954_vm7, %v4062_v51  ;;  %v8761_v21 = vld [vmem:[#allocation3 + $0x6a] sm:$0xff] }
 0x33f   : > { %7745 = vmatmul.msk.bf16.gmra.mxu3 %vm2954_vm7, %v10933_v1  ;;  %v4063_v40 = vpack.c.bf16 %v8761_v21, %v8760_v33 }
 0x341   : > { %v3609_v20 = vpop.f32.mrf.mxu2 }
 0x342   : > { %v3639_v15 = vadd.f32 %v3609_v20, %v3508_v60  ;;  %v3740_v56 = vpop.f32.mrf.mxu3  ;;  %v3480_v38 = vpop.f32.mrf.mxu1  ;;  %v10934_v60 = vpack.c.bf16 %v9826_v16, %v9833_v29  ;;  %v3922_v16 = vld [vmem:[#allocation3 + $0x79] sm:$0xff] }
 0x343   : > { %v3871_v4 = vpop.f32.mrf.mxu0  ;;  %v3509_v28 = vadd.f32 %v3480_v38, %v9978_v11 }
 0x344   : > { %v3770_v49 = vadd.f32 %v3740_v56, %v3639_v15  ;;  %v4325_v15 = vpack.c.bf16 %v4313_v8, %v4312_v58 }
 0x345   : > { %7755 = vmatmul.msk.bf16.gmra.mxu0 %vm2954_vm7, %v4324_v43 }
 0x346   : > { %v10101_v23 = vadd.f32 %v3871_v4, %v3770_v49  ;;  %v3921_v4 = vld [vmem:[#allocation3 + $0x71] sm:$0xff] }
 0x347   : > { %v3933_v32 = vpack.c.bf16 %v3922_v16, %v3921_v4  ;;  %v8763_v16 = vld [vmem:[#allocation3 + $0x82] sm:$0xff] }
 0x349   : > { %v3611_v24 = vpop.f32.mrf.mxu2 }
 0x34a   : > { %v3640_v37 = vadd.f32 %v3611_v24, %v3509_v28  ;;  %v3742_v27 = vpop.f32.mrf.mxu3  ;;  %v3483_v42 = vpop.f32.mrf.mxu1 }
 0x34b   : > { %v3873_v48 = vpop.f32.mrf.mxu0  ;;  %v3510_v61 = vadd.f32 %v3483_v42, %v9983_v17  ;;  %v10935_v42 = vpack.c.bf16 %v9859_v2, %v9852_v30  ;;  %v3924_v30 = vld [vmem:[#allocation3 + $0x89] sm:$0xff] }
 0x34c   : > { %v3771_v35 = vadd.f32 %v3742_v27, %v3640_v37  ;;  %v8762_v37 = vld [vmem:[#allocation3 + $0x72] sm:$0xff] }
 0x34d   : > { %7726 = vmatmul.msk.bf16.gmra.mxu1 %vm2954_vm7, %v3932_v46  ;;  %v4064_v27 = vpack.c.bf16 %v9855_v34, %v8762_v37  ;;  %v4316_v37 = vld [vmem:[#allocation3 + $0x8d] sm:$0xff] }
 0x34e   : > { %v10105_v11 = vadd.f32 %v3873_v48, %v3771_v35  ;;  %7736 = vmatmul.msk.bf16.gmra.mxu2 %vm2954_vm7, %v4063_v40  ;;  %v4314_v35 = vld [vmem:[#allocation3 + $0x7d] sm:$0xff] }
 0x34f   : > { %7746 = vmatmul.msk.bf16.gmra.mxu3 %vm2954_vm7, %v10934_v60 }
 0x351   : > { %v3614_v55 = vpop.f32.mrf.mxu2 }
 0x352   : > { %v3641_v51 = vadd.f32 %v3614_v55, %v3510_v61  ;;  %v3745_v17 = vpop.f32.mrf.mxu3  ;;  %v3485_v1 = vpop.f32.mrf.mxu1  ;;  %v4315_v61 = vld [vmem:[#allocation3 + $0x85] sm:$0xff] }
 0x353   : > { %v3876_v20 = vpop.f32.mrf.mxu0  ;;  %v3511_v18 = vadd.f32 %v3485_v1, %v9989_v25  ;;  %v4326_v55 = vpack.c.bf16 %v4315_v61, %v4314_v35  ;;  %v4185_v1 = vld [vmem:[#allocation3 + $0x8c] sm:$0xff] }
 0x354   : > { %v3772_v22 = vadd.f32 %v3745_v17, %v3641_v51  ;;  %v3923_v51 = vld [vmem:[#allocation3 + $0x81] sm:$0xff] }
 0x355   : > { %7756 = vmatmul.msk.bf16.gmra.mxu0 %vm2954_vm7, %v4325_v15  ;;  %v3934_v4 = vpack.c.bf16 %v3924_v30, %v3923_v51  ;;  %v3926_v51 = vld [vmem:[#allocation3 + $0x99] sm:$0xf] }
 0x356   : > { %v10114_v56 = vadd.f32 %v3876_v20, %v3772_v22  ;;  %v4186_v20 = vld [vmem:[#allocation3 + $0x94] sm:$0xff] }
 0x357   : > { %v4057_v30 = vld [vmem:[#allocation3 + $0x9a] sm:$0xf] }
 0x359   : > { %v3616_v38 = vpop.f32.mrf.mxu2 }
 0x35a   : > { %v3642_v29 = vadd.f32 %v3616_v38, %v3511_v18  ;;  %v3747_v49 = vpop.f32.mrf.mxu3  ;;  %v3488_v28 = vpop.f32.mrf.mxu1 }
 0x35b   : > { %v3878_v43 = vpop.f32.mrf.mxu0  ;;  %v3512_v52 = vadd.f32 %v3488_v28, %v9994_v50 }
 0x35c   : > { %v3773_v24 = vadd.f32 %v3747_v49, %v3642_v29  ;;  %v4196_v49 = vpack.c.bf16 %v4186_v20, %v4185_v1  ;;  %v4187_v1 = vld [vmem:[#allocation3 + $0x9c] sm:$0xff] }
 0x35d   : > { %7727 = vmatmul.msk.bf16.gmra.mxu1 %vm2954_vm7, %v3933_v32 }
 0x35e   : > { %v10119_v25 = vadd.f32 %v3878_v43, %v3773_v24  ;;  %7737 = vmatmul.msk.bf16.gmra.mxu2 %vm2954_vm7, %v4064_v27  ;;  %v7770_v43 = vld [vmem:[%s10915_s3 + $0x34] sm:$0xf]  ;;  %v7780_v24 = vld [vmem:[%s10915_s3 + $0x38] sm:$0xf]  ;;  %v4317_v27 = vld [vmem:[#allocation3 + $0x95] sm:$0xff] }
 0x35f   : > { %7747 = vmatmul.msk.bf16.gmra.mxu3 %vm2954_vm7, %v10935_v42 }
 0x361   : > { %v3619_v48 = vpop.f32.mrf.mxu2 }
 0x362   : > { %v3643_v46 = vadd.f32 %v3619_v48, %v3512_v52  ;;  %v3750_v50 = vpop.f32.mrf.mxu3  ;;  %v3490_v33 = vpop.f32.mrf.mxu1  ;;  %v4752_v52 = vsel %vm1900_vm0, %v7780_v24, 0  ;;  %v4319_v24 = vld [vmem:[#allocation3 + $0xa5] sm:$0xf] }
 0x363   : > { %v3881_v21 = vpop.f32.mrf.mxu0  ;;  %v3513_v60 = vadd.f32 %v3490_v33, %v10001_v59  ;;  %v8764_v59 = vld [vmem:[#allocation3 + $0x8a] sm:$0xff]  ;;  %4761 = vmatpush.bf16.msra.mxu3 %v4752_v52  ;;  %v4327_v33 = vpack.c.bf16 %v4317_v27, %v4316_v37 }
 0x364   : > { %v3774_v40 = vadd.f32 %v3750_v50, %v3643_v46  ;;  %v4065_v29 = vpack.c.bf16 %v8764_v59, %v8763_v16 }
 0x365   : > { %7757 = vmatmul.msk.bf16.gmra.mxu0 %vm2954_vm7, %v4326_v55 }
 0x366   : > { %v10128_v58 = vadd.f32 %v3881_v21, %v3774_v40  ;;  %v7790_v40 = vld [vmem:[%s10915_s3 + $0x3c] sm:$0xf] }
 0x369   : > { %v3621_v8 = vpop.f32.mrf.mxu2 }
 0x36a   : > { %v3644_v2 = vadd.f32 %v3621_v8, %v3513_v60  ;;  %v3752_v17 = vpop.f32.mrf.mxu3  ;;  %v3493_v22 = vpop.f32.mrf.mxu1  ;;  %v4883_v60 = vsel %vm1900_vm0, %v7790_v40, 0  ;;  %v3925_v8 = vld [vmem:[#allocation3 + $0x91] sm:$0xff]  ;;  %v4696_v40 = vld [vmem:[#allocation3 + $0x28] sm:$0xff] }
 0x36b   : > { %v3883_v18 = vpop.f32.mrf.mxu0  ;;  %v3514_v38 = vadd.f32 %v3493_v22, %v10015_v9  ;;  %v4621_v9 = vsel %vm1900_vm0, %v7770_v43, 0  ;;  %4892 = vmatpush.bf16.msrb.mxu0 %v4883_v60  ;;  %v4318_v43 = vld [vmem:[#allocation3 + $0x9d] sm:$0xff] }
 0x36c   : > { %v3775_v15 = vadd.f32 %v3752_v17, %v3644_v2  ;;  %4630 = vmatpush.bf16.msra.mxu2 %v4621_v9 }
 0x36d   : > { %7728 = vmatmul.msk.bf16.gmra.mxu1 %vm2954_vm7, %v3934_v4  ;;  %v8765_v4 = vld [vmem:[#allocation3 + $0x92] sm:$0xff] }
 0x36e   : > { %v10132_v28 = vadd.f32 %v3883_v18, %v3775_v15  ;;  %7738 = vmatmul.msk.bf16.gmra.mxu2 %vm2954_vm7, %v4065_v29  ;;  %v4066_v16 = vpack.c.bf16 %v4057_v30, %v8765_v4 }
 0x36f   : > { %7748 = vmatmul.msk.bf16.gmra.mxu3 %vm2954_vm7, %v4196_v49 }
 0x371   : > { %v3624_v32 = vpop.f32.mrf.mxu2 }
 0x372   : > { %v3645_v42 = vadd.f32 %v3624_v32, %v3514_v38  ;;  %v3755_v48 = vpop.f32.mrf.mxu3  ;;  %v3495_v35 = vpop.f32.mrf.mxu1  ;;  %v3935_v38 = vpack.c.bf16 %v3926_v51, %v3925_v8  ;;  %v4433_v8 = vld [vmem:[#allocation3 + $0x1e] sm:$0xff] }
 0x373   : > { %v3886_v61 = vpop.f32.mrf.mxu0  ;;  %v3515_v50 = vadd.f32 %v3495_v35, %v10026_v62  ;;  %v4188_v62 = vld [vmem:[#allocation3 + $0xa4] sm:$0xf] }
 0x374   : > { %v3776_v46 = vadd.f32 %v3755_v48, %v3645_v42  ;;  %v4197_v59 = vpack.c.bf16 %v4188_v62, %v4187_v1  ;;  %v4328_v42 = vpack.c.bf16 %v4319_v24, %v4318_v43  ;;  %v4564_v51 = vld [vmem:[#allocation3 + $0x1f] sm:$0xff]  ;;  %v4435_v43 = vld [vmem:[#allocation3 + $0x2e] sm:$0xff] }
 0x375   : > { %7758 = vmatmul.msk.bf16.gmra.mxu0 %vm2954_vm7, %v4327_v33  ;;  %v4695_v1 = vld [vmem:[#allocation3 + $0x20] sm:$0xff] }
 0x376   : > { %v10146_v21 = vadd.f32 %v3886_v61, %v3776_v46  ;;  %v4434_v61 = vld [vmem:[#allocation3 + $0x26] sm:$0xff]  ;;  %v4713_v62 = vpack.c.bf16 %v4696_v40, %v4695_v1 }
 0x377   : > { %v4565_v46 = vld [vmem:[#allocation3 + $0x27] sm:$0xff] }
 0x378   : > { %v4438_v1 = vld [vmem:[#allocation3 + $0x46] sm:$0xff] }
 0x379   : > { %v3626_v55 = vpop.f32.mrf.mxu2 }
 0x37a   : > { %v3646_v2 = vadd.f32 %v3626_v55, %v3515_v50  ;;  %v3757_v17 = vpop.f32.mrf.mxu3  ;;  %v3977_v22 = vpop.f32.mrf.mxu1 }
 0x37b   : > { %v3888_v20 = vpop.f32.mrf.mxu0  ;;  %v4022_v15 = vadd.f32 %v3977_v22, %v10033_v45 }
 0x37c   : > { %v3777_v18 = vadd.f32 %v3757_v17, %v3646_v2  ;;  %v4451_v17 = vpack.c.bf16 %v4434_v61, %v4433_v8 }
 0x37d   : > { %7729 = vmatmul.msk.bf16.gmra.mxu1 %vm2954_vm7, %v3935_v38 }
 0x37e   : > { %v10154_v29 = vadd.f32 %v3888_v20, %v3777_v18  ;;  %7739 = vmatmul.msk.bf16.gmra.mxu2 %vm2954_vm7, %v4066_v16 }
 0x37f   : > { %7749 = vmatmul.msk.bf16.gmra.mxu3 %vm2954_vm7, %v4197_v59 }
 0x381   : > { %v4108_v49 = vpop.f32.mrf.mxu2 }
 0x382   : > { %v4153_v9 = vadd.f32 %v4108_v49, %v4022_v15  ;;  %v4239_v52 = vpop.f32.mrf.mxu3  ;;  %v3979_v32 = vpop.f32.mrf.mxu1  ;;  %v10936_v49 = vpack.c.bf16 %v9775_v36, %v9771_v3 }
 0x383   : > { %v4370_v37 = vpop.f32.mrf.mxu0  ;;  %v4023_v27 = vadd.f32 %v3979_v32, %v10038_v7  ;;  %v4582_v7 = vpack.c.bf16 %v4565_v46, %v4564_v51  ;;  %v4567_v32 = vld [vmem:[#allocation3 + $0x37] sm:$0xff] }
 0x384   : > { %v4284_v45 = vadd.f32 %v4239_v52, %v4153_v9  ;;  %v4436_v9 = vld [vmem:[#allocation3 + $0x36] sm:$0xff] }
 0x385   : > { %7759 = vmatmul.msk.bf16.gmra.mxu0 %vm2954_vm7, %v4328_v42  ;;  %v4566_v52 = vld [vmem:[#allocation3 + $0x2f] sm:$0xff]  ;;  %v4698_v42 = vld [vmem:[#allocation3 + $0x38] sm:$0xff] }
 0x386   : > { %v10160_v48 = vadd.f32 %v4370_v37, %v4284_v45 }
 0x389   : > { %v4110_v35 = vpop.f32.mrf.mxu2 }
 0x38a   : > { %v4154_v50 = vadd.f32 %v4110_v35, %v4023_v27  ;;  %v4241_v33 = vpop.f32.mrf.mxu3  ;;  %v3982_v60 = vpop.f32.mrf.mxu1  ;;  %v4697_v27 = vld [vmem:[#allocation3 + $0x30] sm:$0xff] }
 0x38b   : > { %v4372_v55 = vpop.f32.mrf.mxu0  ;;  %v4024_v2 = vadd.f32 %v3982_v60, %v10044_v31  ;;  %v4714_v3 = vpack.c.bf16 %v4698_v42, %v4697_v27 }
 0x38c   : > { %v4285_v30 = vadd.f32 %v4241_v33, %v4154_v50  ;;  %v10177_v50 = vpack.c.bf16 %v4436_v9, %v4435_v43  ;;  %v4583_v33 = vpack.c.bf16 %v4567_v32, %v4566_v52  ;;  %v4699_v9 = vld [vmem:[#allocation3 + $0x40] sm:$0xff] }
 0x38d   : > { %7761 = vmatmul.msk.bf16.vlgmr.msra.gmra.mxu1 %vm2954_vm7, %v4451_v17  ;;  %v10937_v17 = vpack.c.bf16 %v9790_v13, %v9786_v47 }
 0x38e   : > { %v10164_v20 = vadd.f32 %v4372_v55, %v4285_v30  ;;  %7771 = vmatmul.msk.bf16.vlgmr.msra.gmra.mxu2 %vm2954_vm7, %v4582_v7 }
 0x38f   : > { %7781 = vmatmul.msk.bf16.vlgmr.msra.gmra.mxu3 %vm2954_vm7, %v4713_v62  ;;  %v4569_v62 = vld [vmem:[#allocation3 + $0x47] sm:$0xff] }
 0x391   : > { %v4113_v22 = vpop.f32.mrf.mxu2 }
 0x392   : > { %v4155_v18 = vadd.f32 %v4113_v22, %v4024_v2  ;;  %v4244_v15 = vpop.f32.mrf.mxu3  ;;  %v3984_v38 = vpop.f32.mrf.mxu1 }
 0x393   : > { %v4375_v4 = vpop.f32.mrf.mxu0  ;;  %v4025_v31 = vadd.f32 %v3984_v38, %v10049_v63 }
 0x394   : > { %v4286_v16 = vadd.f32 %v4244_v15, %v4155_v18  ;;  %v4700_v15 = vld [vmem:[#allocation3 + $0x48] sm:$0xff] }
 0x395   : > { %7791 = vmatmul.msk.bf16.vlgmr.msrb.gmra.mxu0 %vm2954_vm7, %v10936_v49  ;;  %v4715_v47 = vpack.c.bf16 %v4700_v15, %v4699_v9 }
 0x396   : > { %v10170_v59 = vadd.f32 %v4375_v4, %v4286_v16  ;;  %v4437_v16 = vld [vmem:[#allocation3 + $0x3e] sm:$0xff] }
 0x397   : > { %v10193_v43 = vpack.c.bf16 %v4438_v1, %v4437_v16 }
 0x399   : > { %v4115_v24 = vpop.f32.mrf.mxu2 }
 0x39a   : > { %v4156_v37 = vadd.f32 %v4115_v24, %v4025_v31  ;;  %v4246_v45 = vpop.f32.mrf.mxu3  ;;  %v3987_v35 = vpop.f32.mrf.mxu1  ;;  %v4568_v31 = vld [vmem:[#allocation3 + $0x3f] sm:$0xff] }
 0x39b   : > { %v4377_v61 = vpop.f32.mrf.mxu0  ;;  %v4026_v63 = vadd.f32 %v3987_v35, %v10058_v53  ;;  %v4584_v24 = vpack.c.bf16 %v4569_v62, %v4568_v31  ;;  %v10939_v31 = vpack.c.bf16 %v9816_v10, %v9814_v14 }
 0x39c   : > { %v4287_v46 = vadd.f32 %v4246_v45, %v4156_v37 }
 0x39d   : > { %7762 = vmatmul.msk.bf16.gmra.mxu1 %vm2954_vm7, %v10177_v50 }
 0x39e   : > { %v10179_v36 = vadd.f32 %v4377_v61, %v4287_v46  ;;  %7772 = vmatmul.msk.bf16.gmra.mxu2 %vm2954_vm7, %v4583_v33  ;;  %v10938_v61 = vpack.c.bf16 %v9808_v39, %v9806_v12  ;;  %v4440_v46 = vld [vmem:[#allocation3 + $0x56] sm:$0xff]  ;;  %v4439_v33 = vld [vmem:[#allocation3 + $0x4e] sm:$0xff] }
 0x39f   : > { %7782 = vmatmul.msk.bf16.gmra.mxu3 %vm2954_vm7, %v4714_v3  ;;  %v4570_v3 = vld [vmem:[#allocation3 + $0x4f] sm:$0xff] }
 0x3a1   : > { %v4118_v40 = vpop.f32.mrf.mxu2 }
 0x3a2   : > { %v4157_v60 = vadd.f32 %v4118_v40, %v4026_v63  ;;  %v4249_v55 = vpop.f32.mrf.mxu3  ;;  %v3989_v8 = vpop.f32.mrf.mxu1  ;;  %v4571_v40 = vld [vmem:[#allocation3 + $0x57] sm:$0xff] }
 0x3a3   : > { %v4380_v51 = vpop.f32.mrf.mxu0  ;;  %v4027_v53 = vadd.f32 %v3989_v8, %v10063_v44  ;;  %v4701_v8 = vld [vmem:[#allocation3 + $0x50] sm:$0xff]  ;;  %v4585_v1 = vpack.c.bf16 %v4571_v40, %v4570_v3 }
 0x3a4   : > { %v4288_v30 = vadd.f32 %v4249_v55, %v4157_v60 }
 0x3a5   : > { %7792 = vmatmul.msk.bf16.gmra.mxu0 %vm2954_vm7, %v10937_v17 }
 0x3a6   : > { %v10186_v2 = vadd.f32 %v4380_v51, %v4288_v30  ;;  %v4702_v51 = vld [vmem:[#allocation3 + $0x58] sm:$0xff] }
 0x3a7   : > { %v4716_v12 = vpack.c.bf16 %v4702_v51, %v4701_v8 }
 0x3a9   : > { %v4120_v7 = vpop.f32.mrf.mxu2 }
 0x3aa   : > { %v4158_v22 = vadd.f32 %v4120_v7, %v4027_v53  ;;  %v4251_v18 = vpop.f32.mrf.mxu3  ;;  %v3992_v38 = vpop.f32.mrf.mxu1  ;;  %v10209_v7 = vpack.c.bf16 %v4440_v46, %v4439_v33 }
 0x3ab   : > { %v4382_v4 = vpop.f32.mrf.mxu0  ;;  %v4028_v44 = vadd.f32 %v3992_v38, %v10072_v5 }
 0x3ac   : > { %v4289_v49 = vadd.f32 %v4251_v18, %v4158_v22 }
 0x3ad   : > { %7763 = vmatmul.msk.bf16.gmra.mxu1 %vm2954_vm7, %v10193_v43 }
 0x3ae   : > { %v10195_v13 = vadd.f32 %v4382_v4, %v4289_v49  ;;  %7773 = vmatmul.msk.bf16.gmra.mxu2 %vm2954_vm7, %v4584_v24  ;;  %v7800_v49 = vld [vmem:[%s10915_s3 + $0x40] sm:$0xf]  ;;  %v4441_v24 = vld [vmem:[#allocation3 + $0x5e] sm:$0xff] }
 0x3af   : > { %7783 = vmatmul.msk.bf16.gmra.mxu3 %vm2954_vm7, %v4715_v47  ;;  %v4442_v47 = vld [vmem:[#allocation3 + $0x66] sm:$0xff] }
 0x3b1   : > { %v4123_v52 = vpop.f32.mrf.mxu2 }
 0x3b2   : > { %v4159_v32 = vadd.f32 %v4123_v52, %v4028_v44  ;;  %v4254_v37 = vpop.f32.mrf.mxu3  ;;  %v3994_v45 = vpop.f32.mrf.mxu1  ;;  %v5014_v44 = vsel %vm1900_vm0, %v7800_v49, 0  ;;  %v4572_v52 = vld [vmem:[#allocation3 + $0x5f] sm:$0xff] }
 0x3b3   : > { %v4385_v27 = vpop.f32.mrf.mxu0  ;;  %v4029_v42 = vadd.f32 %v3994_v45, %v10078_v6  ;;  %5023 = vmatpush.bf16.msrb.mxu1 %v5014_v44  ;;  %v4703_v45 = vld [vmem:[#allocation3 + $0x60] sm:$0xff] }
 0x3b4   : > { %v4290_v5 = vadd.f32 %v4254_v37, %v4159_v32  ;;  %v4573_v32 = vld [vmem:[#allocation3 + $0x67] sm:$0xff] }
 0x3b5   : > { %7793 = vmatmul.msk.bf16.gmra.mxu0 %vm2954_vm7, %v10938_v61  ;;  %v10229_v61 = vpack.c.bf16 %v4442_v47, %v4441_v24  ;;  %v4586_v46 = vpack.c.bf16 %v4573_v32, %v4572_v52 }
 0x3b6   : > { %v10202_v35 = vadd.f32 %v4385_v27, %v4290_v5  ;;  %v4704_v27 = vld [vmem:[#allocation3 + $0x68] sm:$0xff] }
 0x3b9   : > { %v4125_v63 = vpop.f32.mrf.mxu2 }
 0x3ba   : > { %v4160_v60 = vadd.f32 %v4125_v63, %v4029_v42  ;;  %v4256_v55 = vpop.f32.mrf.mxu3  ;;  %v3997_v30 = vpop.f32.mrf.mxu1  ;;  %v4717_v63 = vpack.c.bf16 %v4704_v27, %v4703_v45  ;;  %v10941_v45 = vpack.c.bf16 %v9863_v57, %v9855_v34  ;;  %v4445_v27 = vld [vmem:[#allocation3 + $0x7e] sm:$0xff] }
 0x3bb   : > { %v4387_v53 = vpop.f32.mrf.mxu0  ;;  %v4030_v6 = vadd.f32 %v3997_v30, %v10084_v54 }
 0x3bc   : > { %v4291_v17 = vadd.f32 %v4256_v55, %v4160_v60 }
 0x3bd   : > { %7764 = vmatmul.msk.bf16.gmra.mxu1 %vm2954_vm7, %v10209_v7 }
 0x3be   : > { %v10211_v39 = vadd.f32 %v4387_v53, %v4291_v17  ;;  %7774 = vmatmul.msk.bf16.gmra.mxu2 %vm2954_vm7, %v4585_v1  ;;  %v10940_v53 = vpack.c.bf16 %v9835_v26, %v9842_v41  ;;  %v4444_v17 = vld [vmem:[#allocation3 + $0x76] sm:$0xff]  ;;  %v4443_v1 = vld [vmem:[#allocation3 + $0x6e] sm:$0xff] }
 0x3bf   : > { %7784 = vmatmul.msk.bf16.gmra.mxu3 %vm2954_vm7, %v4716_v12  ;;  %v4574_v12 = vld [vmem:[#allocation3 + $0x6f] sm:$0xff]  ;;  %v10245_v49 = vpack.c.bf16 %v4444_v17, %v4443_v1 }
 0x3c1   : > { %v4128_v62 = vpop.f32.mrf.mxu2 }
 0x3c2   : > { %v4161_v22 = vadd.f32 %v4128_v62, %v4030_v6  ;;  %v4259_v18 = vpop.f32.mrf.mxu3  ;;  %v3999_v15 = vpop.f32.mrf.mxu1  ;;  %v4575_v62 = vld [vmem:[#allocation3 + $0x77] sm:$0xff] }
 0x3c3   : > { %v4390_v38 = vpop.f32.mrf.mxu0  ;;  %v4031_v54 = vadd.f32 %v3999_v15, %v10092_v19  ;;  %v4705_v15 = vld [vmem:[#allocation3 + $0x70] sm:$0xff]  ;;  %v4587_v44 = vpack.c.bf16 %v4575_v62, %v4574_v12 }
 0x3c4   : > { %v4292_v4 = vadd.f32 %v4259_v18, %v4161_v22 }
 0x3c5   : > { %7794 = vmatmul.msk.bf16.gmra.mxu0 %vm2954_vm7, %v10939_v31 }
 0x3c6   : > { %v10218_v16 = vadd.f32 %v4390_v38, %v4292_v4  ;;  %v4706_v38 = vld [vmem:[#allocation3 + $0x78] sm:$0xff] }
 0x3c7   : > { %v4718_v26 = vpack.c.bf16 %v4706_v38, %v4705_v15  ;;  %v4447_v38 = vld [vmem:[#allocation3 + $0x8e] sm:$0xff] }
 0x3c9   : > { %v4130_v9 = vpop.f32.mrf.mxu2 }
 0x3ca   : > { %v4162_v19 = vadd.f32 %v4130_v9, %v4031_v54  ;;  %v4261_v37 = vpop.f32.mrf.mxu3  ;;  %v4002_v5 = vpop.f32.mrf.mxu1 }
 0x3cb   : > { %v4392_v14 = vpop.f32.mrf.mxu0  ;;  %v4032_v42 = vadd.f32 %v4002_v5, %v10101_v23 }
 0x3cc   : > { %v4293_v10 = vadd.f32 %v4261_v37, %v4162_v19 }
 0x3cd   : > { %7765 = vmatmul.msk.bf16.gmra.mxu1 %vm2954_vm7, %v10229_v61 }
 0x3ce   : > { %v10231_v33 = vadd.f32 %v4392_v14, %v4293_v10  ;;  %7775 = vmatmul.msk.bf16.gmra.mxu2 %vm2954_vm7, %v4586_v46  ;;  %v4446_v14 = vld [vmem:[#allocation3 + $0x86] sm:$0xff] }
 0x3cf   : > { %7785 = vmatmul.msk.bf16.gmra.mxu3 %vm2954_vm7, %v4717_v63  ;;  %v4576_v10 = vld [vmem:[#allocation3 + $0x7f] sm:$0xff] }
 0x3d1   : > { %v4133_v3 = vpop.f32.mrf.mxu2 }
 0x3d2   : > { %v4163_v40 = vadd.f32 %v4133_v3, %v4032_v42  ;;  %v4264_v60 = vpop.f32.mrf.mxu3  ;;  %v4004_v55 = vpop.f32.mrf.mxu1  ;;  %v4577_v42 = vld [vmem:[#allocation3 + $0x87] sm:$0xff] }
 0x3d3   : > { %v4395_v8 = vpop.f32.mrf.mxu0  ;;  %v4033_v23 = vadd.f32 %v4004_v55, %v10105_v11  ;;  %v4707_v3 = vld [vmem:[#allocation3 + $0x80] sm:$0xff] }
 0x3d4   : > { %v4294_v51 = vadd.f32 %v4264_v60, %v4163_v40  ;;  %v4708_v40 = vld [vmem:[#allocation3 + $0x88] sm:$0xff] }
 0x3d5   : > { %7795 = vmatmul.msk.bf16.gmra.mxu0 %vm2954_vm7, %v10940_v53  ;;  %v4719_v34 = vpack.c.bf16 %v4708_v40, %v4707_v3 }
 0x3d6   : > { %v10238_v30 = vadd.f32 %v4395_v8, %v4294_v51  ;;  %v10261_v51 = vpack.c.bf16 %v4446_v14, %v4445_v27  ;;  %v7810_v27 = vld [vmem:[%s10915_s3 + $0x44] sm:$0xf] }
 0x3d9   : > { %v4135_v6 = vpop.f32.mrf.mxu2 }
 0x3da   : > { %v4164_v22 = vadd.f32 %v4135_v6, %v4033_v23  ;;  %v4266_v18 = vpop.f32.mrf.mxu3  ;;  %v4007_v4 = vpop.f32.mrf.mxu1  ;;  %v4588_v23 = vpack.c.bf16 %v4577_v42, %v4576_v10  ;;  %v4840_v42 = vld [vmem:[#allocation3 + $0x9a] sm:$0xff] }
 0x3db   : > { %v4397_v54 = vpop.f32.mrf.mxu0  ;;  %v4034_v11 = vadd.f32 %v4007_v4, %v10114_v56 }
 0x3dc   : > { %v4295_v31 = vadd.f32 %v4266_v18, %v4164_v22  ;;  %v10942_v18 = vld [vmem:[#allocation9_spill] sm:$0xff] }
 0x3dd   : > { %7766 = vmatmul.msk.bf16.gmra.mxu1 %vm2954_vm7, %v10245_v49  ;;  %v10943_v15 = vpack.c.bf16 %v9857_v0, %v10942_v18  ;;  %v4711_v18 = vld [vmem:[#allocation3 + $0xa0] sm:$0xff] }
 0x3de   : > { %v10247_v41 = vadd.f32 %v4397_v54, %v4295_v31  ;;  %7776 = vmatmul.msk.bf16.gmra.mxu2 %vm2954_vm7, %v4587_v44  ;;  %v4448_v54 = vld [vmem:[#allocation3 + $0x96] sm:$0xff] }
 0x3df   : > { %7786 = vmatmul.msk.bf16.gmra.mxu3 %vm2954_vm7, %v4718_v26  ;;  %v4578_v31 = vld [vmem:[#allocation3 + $0x8f] sm:$0xff] }
 0x3e1   : > { %v4138_v24 = vpop.f32.mrf.mxu2 }
 0x3e2   : > { %v4165_v9 = vadd.f32 %v4138_v24, %v4034_v11  ;;  %v4269_v47 = vpop.f32.mrf.mxu3  ;;  %v4009_v52 = vpop.f32.mrf.mxu1  ;;  %v4579_v11 = vld [vmem:[#allocation3 + $0x97] sm:$0xff] }
 0x3e3   : > { %v4400_v32 = vpop.f32.mrf.mxu0  ;;  %v4035_v56 = vadd.f32 %v4009_v52, %v10119_v25  ;;  %v4709_v24 = vld [vmem:[#allocation3 + $0x90] sm:$0xff] }
 0x3e4   : > { %v4296_v19 = vadd.f32 %v4269_v47, %v4165_v9  ;;  %v4710_v9 = vld [vmem:[#allocation3 + $0x98] sm:$0xff] }
 0x3e5   : > { %7796 = vmatmul.msk.bf16.gmra.mxu0 %vm2954_vm7, %v10941_v45  ;;  %v4720_v0 = vpack.c.bf16 %v4710_v9, %v4709_v24 }
 0x3e6   : > { %v10254_v37 = vadd.f32 %v4400_v32, %v4296_v19  ;;  %v10277_v19 = vpack.c.bf16 %v4448_v54, %v4447_v38 }
 0x3e9   : > { %v4140_v5 = vpop.f32.mrf.mxu2 }
 0x3ea   : > { %v4166_v46 = vadd.f32 %v4140_v5, %v4035_v56  ;;  %v4271_v63 = vpop.f32.mrf.mxu3  ;;  %v4012_v60 = vpop.f32.mrf.mxu1  ;;  %v4589_v56 = vpack.c.bf16 %v4579_v11, %v4578_v31  ;;  %v7820_v5 = vld [vmem:[%s10915_s3 + $0x48] sm:$0xf] }
 0x3eb   : > { %v4402_v55 = vpop.f32.mrf.mxu0  ;;  %v4036_v25 = vadd.f32 %v4012_v60, %v10128_v58  ;;  %v5276_v14 = vsel %vm1900_vm0, %v7820_v5, 0 }
 0x3ec   : > { %v4297_v8 = vadd.f32 %v4271_v63, %v4166_v46  ;;  %5285 = vmatpush.bf16.msrb.mxu3 %v5276_v14  ;;  %v4841_v46 = vld [vmem:[#allocation3 + $0xa2] sm:$0xff]  ;;  %v4957_v14 = vld [vmem:[#allocation3 + $0x2b] sm:$0xff] }
 0x3ed   : > { %7767 = vmatmul.msk.bf16.gmra.mxu1 %vm2954_vm7, %v10261_v51 }
 0x3ee   : > { %v10263_v57 = vadd.f32 %v4402_v55, %v4297_v8  ;;  %7777 = vmatmul.msk.bf16.gmra.mxu2 %vm2954_vm7, %v4588_v23 }
 0x3ef   : > { %7787 = vmatmul.msk.bf16.gmra.mxu3 %vm2954_vm7, %v4719_v34  ;;  %v7830_v34 = vld [vmem:[%s10915_s3 + $0x4c] sm:$0xf] }
 0x3f1   : > { %v4143_v53 = vpop.f32.mrf.mxu2 }
 0x3f2   : > { %v4167_v17 = vadd.f32 %v4143_v53, %v4036_v25  ;;  %v4274_v6 = vpop.f32.mrf.mxu3  ;;  %v4014_v1 = vpop.f32.mrf.mxu1  ;;  %v4851_v25 = vpack.c.bf16 %v4841_v46, %v4840_v42  ;;  %v5407_v53 = vsel %vm1900_vm0, %v7830_v34, 0  ;;  %v4958_v42 = vld [vmem:[#allocation3 + $0x33] sm:$0xff] }
 0x3f3   : > { %v4405_v12 = vpop.f32.mrf.mxu0  ;;  %v4037_v58 = vadd.f32 %v4014_v1, %v10132_v28  ;;  %5416 = vmatpush.bf16.msra.mxu0 %v5407_v53  ;;  %v4450_v1 = vld [vmem:[#allocation3 + $0xa6] sm:$0xf]  ;;  %v5088_v46 = vld [vmem:[#allocation3 + $0x2c] sm:$0xff] }
 0x3f4   : > { %v4298_v62 = vadd.f32 %v4274_v6, %v4167_v17  ;;  %v10301_v17 = vld [vmem:[#allocation3 + $0x9e] sm:$0xff] }
 0x3f5   : > { %7797 = vmatmul.msk.bf16.gmra.mxu0 %vm2954_vm7, %v10943_v15  ;;  %v4712_v15 = vld [vmem:[#allocation3 + $0xa8] sm:$0xf]  ;;  %v4459_v11 = vpack.c.bf16 %v4450_v1, %v10301_v17 }
 0x3f6   : > { %v10270_v22 = vadd.f32 %v4405_v12, %v4298_v62  ;;  %v4580_v12 = vld [vmem:[#allocation3 + $0x9f] sm:$0xff]  ;;  %v4581_v62 = vld [vmem:[#allocation3 + $0xa7] sm:$0xf] }
 0x3f9   : > { %v4145_v4 = vpop.f32.mrf.mxu2 }
 0x3fa   : > { %v4168_v44 = vadd.f32 %v4145_v4, %v4037_v58  ;;  %v4276_v26 = vpop.f32.mrf.mxu3  ;;  %v4017_v47 = vpop.f32.mrf.mxu1 }
 0x3fb   : > { %v4407_v52 = vpop.f32.mrf.mxu0  ;;  %v4038_v28 = vadd.f32 %v4017_v47, %v10146_v21  ;;  %v5145_v21 = vsel %vm1900_vm0, %v7810_v27, 0  ;;  %v4842_v47 = vld [vmem:[#allocation3 + $0xaa] sm:$0xff] }
 0x3fc   : > { %v4299_v32 = vadd.f32 %v4276_v26, %v4168_v44  ;;  %5154 = vmatpush.bf16.msrb.mxu2 %v5145_v21  ;;  %v4590_v44 = vpack.c.bf16 %v4581_v62, %v4580_v12  ;;  %v4721_v26 = vpack.c.bf16 %v4712_v15, %v4711_v18 }
 0x3fd   : > { %7768 = vmatmul.msk.bf16.gmra.mxu1 %vm2954_vm7, %v10277_v19 }
 0x3fe   : > { %v10279_v45 = vadd.f32 %v4407_v52, %v4299_v32  ;;  %7778 = vmatmul.msk.bf16.gmra.mxu2 %vm2954_vm7, %v4589_v56  ;;  %v4843_v52 = vld [vmem:[#allocation3 + $0xb2] sm:$0xf] }
 0x3ff   : > { %7788 = vmatmul.msk.bf16.gmra.mxu3 %vm2954_vm7, %v4720_v0  ;;  %v4852_v5 = vpack.c.bf16 %v4843_v52, %v4842_v47 }
 0x401   : > { %v4148_v10 = vpop.f32.mrf.mxu2 }
 0x402   : > { %v4169_v63 = vadd.f32 %v4148_v10, %v4038_v28  ;;  %v4279_v3 = vpop.f32.mrf.mxu3  ;;  %v4019_v40 = vpop.f32.mrf.mxu1 }
 0x403   : > { %v4410_v60 = vpop.f32.mrf.mxu0  ;;  %v4039_v8 = vadd.f32 %v4019_v40, %v10154_v29 }
 0x404   : > { %v4300_v55 = vadd.f32 %v4279_v3, %v4169_v63  ;;  %v5089_v63 = vld [vmem:[#allocation3 + $0x34] sm:$0xff] }
 0x405   : > { %7798 = vmatmul.msk.bf16.gmra.mxu0 %vm2954_vm7, %v4851_v25 }
 0x406   : > { %v10294_v23 = vadd.f32 %v4410_v60, %v4300_v55  ;;  %v5219_v60 = vld [vmem:[#allocation3 + $0x2d] sm:$0xff]  ;;  %v5220_v55 = vld [vmem:[#allocation3 + $0x35] sm:$0xff] }
 0x407   : > { %v5237_v1 = vpack.c.bf16 %v5220_v55, %v5219_v60  ;;  %v5093_v60 = vld [vmem:[#allocation3 + $0x54] sm:$0xff] }
 0x409   : > { %v4150_v6 = vpop.f32.mrf.mxu2 }
 0x40a   : > { %v4170_v58 = vadd.f32 %v4150_v6, %v4039_v8  ;;  %v4281_v29 = vpop.f32.mrf.mxu3  ;;  %v4501_v4 = vpop.f32.mrf.mxu1  ;;  %v5106_v6 = vpack.c.bf16 %v5089_v63, %v5088_v46 }
 0x40b   : > { %v4412_v38 = vpop.f32.mrf.mxu0  ;;  %v4546_v31 = vadd.f32 %v4501_v4, %v10160_v48 }
 0x40c   : > { %v4301_v54 = vadd.f32 %v4281_v29, %v4170_v58 }
 0x40d   : > { %7769 = vmatmul.msk.bf16.gmra.mxu1 %vm2954_vm7, %v4459_v11  ;;  %v5091_v11 = vld [vmem:[#allocation3 + $0x44] sm:$0xff] }
 0x40e   : > { %v10305_v24 = vadd.f32 %v4412_v38, %v4301_v54  ;;  %7779 = vmatmul.msk.bf16.gmra.mxu2 %vm2954_vm7, %v4590_v44 }
 0x40f   : > { %7789 = vmatmul.msk.bf16.gmra.mxu3 %vm2954_vm7, %v4721_v26 }
 0x411   : > { %v4632_v9 = vpop.f32.mrf.mxu2 }
 0x412   : > { %v4677_v32 = vadd.f32 %v4632_v9, %v4546_v31  ;;  %v4763_v28 = vpop.f32.mrf.mxu3  ;;  %v4503_v56 = vpop.f32.mrf.mxu1  ;;  %v4960_v31 = vld [vmem:[#allocation3 + $0x43] sm:$0xff] }
 0x413   : > { %v4894_v0 = vpop.f32.mrf.mxu0  ;;  %v4547_v27 = vadd.f32 %v4503_v56, %v10164_v20  ;;  %v4975_v20 = vpack.c.bf16 %v4958_v42, %v4957_v14  ;;  %v5222_v9 = vld [vmem:[#allocation3 + $0x45] sm:$0xff] }
 0x414   : > { %v4808_v48 = vadd.f32 %v4763_v28, %v4677_v32  ;;  %v4959_v32 = vld [vmem:[#allocation3 + $0x3b] sm:$0xff] }
 0x415   : > { %7799 = vmatmul.msk.bf16.gmra.mxu0 %vm2954_vm7, %v4852_v5  ;;  %v5090_v28 = vld [vmem:[#allocation3 + $0x3c] sm:$0xff] }
 0x416   : > { %v10311_v21 = vadd.f32 %v4894_v0, %v4808_v48  ;;  %v10326_v48 = vpack.c.bf16 %v4960_v31, %v4959_v32  ;;  %v4964_v32 = vld [vmem:[#allocation3 + $0x63] sm:$0xff] }
 0x419   : > { %v4634_v10 = vpop.f32.mrf.mxu2 }
 0x41a   : > { %v4678_v3 = vadd.f32 %v4634_v10, %v4547_v27  ;;  %v4765_v40 = vpop.f32.mrf.mxu3  ;;  %v4506_v8 = vpop.f32.mrf.mxu1  ;;  %v5221_v27 = vld [vmem:[#allocation3 + $0x3d] sm:$0xff] }
 0x41b   : > { %v4896_v25 = vpop.f32.mrf.mxu0  ;;  %v4548_v53 = vadd.f32 %v4506_v8, %v10170_v59  ;;  %v5238_v5 = vpack.c.bf16 %v5222_v9, %v5221_v27  ;;  %v4961_v8 = vld [vmem:[#allocation3 + $0x4b] sm:$0xff]  ;;  %v5225_v27 = vld [vmem:[#allocation3 + $0x5d] sm:$0xff] }
 0x41c   : > { %v4809_v34 = vadd.f32 %v4765_v40, %v4678_v3 }
 0x41d   : > { %7801 = vmatmul.msk.bf16.vlgmr.msrb.gmra.mxu1 %vm2954_vm7, %v4975_v20 }
 0x41e   : > { %v10315_v12 = vadd.f32 %v4896_v25, %v4809_v34  ;;  %7811 = vmatmul.msk.bf16.vlgmr.msrb.gmra.mxu2 %vm2954_vm7, %v5106_v6  ;;  %v4962_v25 = vld [vmem:[#allocation3 + $0x53] sm:$0xff] }
 0x41f   : > { %7821 = vmatmul.msk.bf16.vlgmr.msrb.gmra.mxu3 %vm2954_vm7, %v5237_v1  ;;  %v5092_v34 = vld [vmem:[#allocation3 + $0x4c] sm:$0xff]  ;;  %v5224_v1 = vld [vmem:[#allocation3 + $0x55] sm:$0xff] }
 0x420   : > { %v5223_v6 = vld [vmem:[#allocation3 + $0x4d] sm:$0xff] }
 0x421   : > { %v4637_v62 = vpop.f32.mrf.mxu2 }
 0x422   : > { %v4679_v58 = vadd.f32 %v4637_v62, %v4548_v53  ;;  %v4768_v29 = vpop.f32.mrf.mxu3  ;;  %v4508_v18 = vpop.f32.mrf.mxu1 }
 0x423   : > { %v4899_v15 = vpop.f32.mrf.mxu0  ;;  %v4549_v4 = vadd.f32 %v4508_v18, %v10179_v36  ;;  %v5107_v36 = vpack.c.bf16 %v5091_v11, %v5090_v28  ;;  %v5094_v28 = vld [vmem:[#allocation3 + $0x5c] sm:$0xff] }
 0x424   : > { %v4810_v38 = vadd.f32 %v4768_v29, %v4679_v58 }
 0x425   : > { %7831 = vmatmul.msk.bf16.vlgmr.msra.gmra.mxu0 %vm2954_vm7, %v10177_v50 }
 0x426   : > { %v10321_v59 = vadd.f32 %v4899_v15, %v4810_v38  ;;  %v5108_v15 = vpack.c.bf16 %v5093_v60, %v5092_v34  ;;  %v5239_v38 = vpack.c.bf16 %v5224_v1, %v5223_v6  ;;  %v4965_v1 = vld [vmem:[#allocation3 + $0x6b] sm:$0xff] }
 0x429   : > { %v4639_v54 = vpop.f32.mrf.mxu2 }
 0x42a   : > { %v4680_v44 = vadd.f32 %v4639_v54, %v4549_v4  ;;  %v4770_v26 = vpop.f32.mrf.mxu3  ;;  %v4511_v47 = vpop.f32.mrf.mxu1 }
 0x42b   : > { %v4901_v52 = vpop.f32.mrf.mxu0  ;;  %v4550_v0 = vadd.f32 %v4511_v47, %v10186_v2  ;;  %v4963_v47 = vld [vmem:[#allocation3 + $0x5b] sm:$0xff] }
 0x42c   : > { %v4811_v56 = vadd.f32 %v4770_v26, %v4680_v44 }
 0x42d   : > { %7802 = vmatmul.msk.bf16.gmra.mxu1 %vm2954_vm7, %v10326_v48 }
 0x42e   : > { %v10328_v14 = vadd.f32 %v4901_v52, %v4811_v56  ;;  %7812 = vmatmul.msk.bf16.gmra.mxu2 %vm2954_vm7, %v5107_v36  ;;  %v5095_v56 = vld [vmem:[#allocation3 + $0x64] sm:$0xff] }
 0x42f   : > { %7822 = vmatmul.msk.bf16.gmra.mxu3 %vm2954_vm7, %v5238_v5  ;;  %v5226_v5 = vld [vmem:[#allocation3 + $0x65] sm:$0xff] }
 0x431   : > { %v4642_v50 = vpop.f32.mrf.mxu2 }
 0x432   : > { %v4681_v10 = vadd.f32 %v4642_v50, %v4550_v0  ;;  %v4773_v42 = vpop.f32.mrf.mxu3  ;;  %v4513_v46 = vpop.f32.mrf.mxu1 }
 0x433   : > { %v4904_v63 = vpop.f32.mrf.mxu0  ;;  %v4551_v3 = vadd.f32 %v4513_v46, %v10195_v13  ;;  %v10340_v13 = vpack.c.bf16 %v4962_v25, %v4961_v8 }
 0x434   : > { %v4812_v2 = vadd.f32 %v4773_v42, %v4681_v10 }
 0x435   : > { %7832 = vmatmul.msk.bf16.gmra.mxu0 %vm2954_vm7, %v10193_v43 }
 0x436   : > { %v10335_v40 = vadd.f32 %v4904_v63, %v4812_v2  ;;  %v5109_v63 = vpack.c.bf16 %v5095_v56, %v5094_v28  ;;  %v5240_v2 = vpack.c.bf16 %v5226_v5, %v5225_v27  ;;  %v4967_v5 = vld [vmem:[#allocation3 + $0x7b] sm:$0xff] }
 0x439   : > { %v4644_v55 = vpop.f32.mrf.mxu2 }
 0x43a   : > { %v4682_v53 = vadd.f32 %v4644_v55, %v4551_v3  ;;  %v4775_v20 = vpop.f32.mrf.mxu3  ;;  %v4516_v62 = vpop.f32.mrf.mxu1 }
 0x43b   : > { %v4906_v58 = vpop.f32.mrf.mxu0  ;;  %v4552_v18 = vadd.f32 %v4516_v62, %v10202_v35 }
 0x43c   : > { %v4813_v29 = vadd.f32 %v4775_v20, %v4682_v53  ;;  %v7840_v20 = vld [vmem:[%s10915_s3 + $0x50] sm:$0xf] }
 0x43d   : > { %7803 = vmatmul.msk.bf16.gmra.mxu1 %vm2954_vm7, %v10340_v13  ;;  %v5538_v6 = vsel %vm1900_vm0, %v7840_v20, 0 }
 0x43e   : > { %v10342_v4 = vadd.f32 %v4906_v58, %v4813_v29  ;;  %7813 = vmatmul.msk.bf16.gmra.mxu2 %vm2954_vm7, %v5108_v15  ;;  %5547 = vmatpush.bf16.msra.mxu1 %v5538_v6  ;;  %v4966_v58 = vld [vmem:[#allocation3 + $0x73] sm:$0xff] }
 0x43f   : > { %7823 = vmatmul.msk.bf16.gmra.mxu3 %vm2954_vm7, %v5239_v38  ;;  %v5096_v29 = vld [vmem:[#allocation3 + $0x6c] sm:$0xff] }
 0x441   : > { %v4647_v43 = vpop.f32.mrf.mxu2 }
 0x442   : > { %v4683_v54 = vadd.f32 %v4647_v43, %v4552_v18  ;;  %v4778_v31 = vpop.f32.mrf.mxu3  ;;  %v4518_v11 = vpop.f32.mrf.mxu1  ;;  %v5097_v18 = vld [vmem:[#allocation3 + $0x74] sm:$0xff] }
 0x443   : > { %v4909_v44 = vpop.f32.mrf.mxu0  ;;  %v4553_v35 = vadd.f32 %v4518_v11, %v10211_v39  ;;  %v10354_v39 = vpack.c.bf16 %v4964_v32, %v4963_v47  ;;  %v5228_v43 = vld [vmem:[#allocation3 + $0x75] sm:$0xff] }
 0x444   : > { %v4814_v26 = vadd.f32 %v4778_v31, %v4683_v54 }
 0x445   : > { %7833 = vmatmul.msk.bf16.gmra.mxu0 %vm2954_vm7, %v10209_v7 }
 0x446   : > { %v10349_v9 = vadd.f32 %v4909_v44, %v4814_v26  ;;  %v10372_v44 = vpack.c.bf16 %v4966_v58, %v4965_v1  ;;  %v5110_v26 = vpack.c.bf16 %v5097_v18, %v5096_v29 }
 0x449   : > { %v4649_v52 = vpop.f32.mrf.mxu2 }
 0x44a   : > { %v4684_v0 = vadd.f32 %v4649_v52, %v4553_v35  ;;  %v4780_v36 = vpop.f32.mrf.mxu3  ;;  %v4521_v50 = vpop.f32.mrf.mxu1 }
 0x44b   : > { %v4911_v10 = vpop.f32.mrf.mxu0  ;;  %v4554_v46 = vadd.f32 %v4521_v50, %v10218_v16 }
 0x44c   : > { %v4815_v42 = vadd.f32 %v4780_v36, %v4684_v0 }
 0x44d   : > { %7804 = vmatmul.msk.bf16.gmra.mxu1 %vm2954_vm7, %v10354_v39 }
 0x44e   : > { %v10356_v3 = vadd.f32 %v4911_v10, %v4815_v42  ;;  %7814 = vmatmul.msk.bf16.gmra.mxu2 %vm2954_vm7, %v5109_v63  ;;  %v4968_v10 = vld [vmem:[#allocation3 + $0x83] sm:$0xff] }
 0x44f   : > { %7824 = vmatmul.msk.bf16.gmra.mxu3 %vm2954_vm7, %v5240_v2  ;;  %v5098_v42 = vld [vmem:[#allocation3 + $0x7c] sm:$0xff] }
 0x451   : > { %v4652_v7 = vpop.f32.mrf.mxu2 }
 0x452   : > { %v4685_v60 = vadd.f32 %v4652_v7, %v4554_v46  ;;  %v4783_v55 = vpop.f32.mrf.mxu3  ;;  %v4523_v8 = vpop.f32.mrf.mxu1  ;;  %v5099_v46 = vld [vmem:[#allocation3 + $0x84] sm:$0xff] }
 0x453   : > { %v4914_v25 = vpop.f32.mrf.mxu0  ;;  %v4555_v16 = vadd.f32 %v4523_v8, %v10231_v33  ;;  %v5227_v33 = vld [vmem:[#allocation3 + $0x6d] sm:$0xff]  ;;  %v5229_v7 = vld [vmem:[#allocation3 + $0x7d] sm:$0xff] }
 0x454   : > { %v4816_v34 = vadd.f32 %v4783_v55, %v4685_v60  ;;  %v5241_v35 = vpack.c.bf16 %v5228_v43, %v5227_v33  ;;  %v5230_v60 = vld [vmem:[#allocation3 + $0x85] sm:$0xff]  ;;  %v4970_v43 = vld [vmem:[#allocation3 + $0x93] sm:$0xff] }
 0x455   : > { %7834 = vmatmul.msk.bf16.gmra.mxu0 %vm2954_vm7, %v10229_v61  ;;  %v5242_v20 = vpack.c.bf16 %v5230_v60, %v5229_v7  ;;  %v4972_v60 = vld [vmem:[#allocation3 + $0xa3] sm:$0xff] }
 0x456   : > { %v10363_v53 = vadd.f32 %v4914_v25, %v4816_v34 }
 0x459   : > { %v4654_v62 = vpop.f32.mrf.mxu2 }
 0x45a   : > { %v4686_v15 = vadd.f32 %v4654_v62, %v4555_v16  ;;  %v4785_v38 = vpop.f32.mrf.mxu3  ;;  %v4526_v54 = vpop.f32.mrf.mxu1  ;;  %v10388_v16 = vpack.c.bf16 %v5099_v46, %v5098_v42 }
 0x45b   : > { %v4916_v31 = vpop.f32.mrf.mxu0  ;;  %v4556_v61 = vadd.f32 %v4526_v54, %v10238_v30  ;;  %v5100_v54 = vld [vmem:[#allocation3 + $0x8c] sm:$0xff] }
 0x45c   : > { %v4817_v11 = vadd.f32 %v4785_v38, %v4686_v15  ;;  %v4969_v38 = vld [vmem:[#allocation3 + $0x8b] sm:$0xff] }
 0x45d   : > { %7805 = vmatmul.msk.bf16.gmra.mxu1 %vm2954_vm7, %v10372_v44 }
 0x45e   : > { %v10374_v47 = vadd.f32 %v4916_v31, %v4817_v11  ;;  %7815 = vmatmul.msk.bf16.gmra.mxu2 %vm2954_vm7, %v5110_v26  ;;  %v5101_v31 = vld [vmem:[#allocation3 + $0x94] sm:$0xff] }
 0x45f   : > { %7825 = vmatmul.msk.bf16.gmra.mxu3 %vm2954_vm7, %v5241_v35  ;;  %v5231_v26 = vld [vmem:[#allocation3 + $0x8d] sm:$0xff]  ;;  %v5232_v35 = vld [vmem:[#allocation3 + $0x95] sm:$0xff] }
 0x461   : > { %v4657_v52 = vpop.f32.mrf.mxu2 }
 0x462   : > { %v4687_v32 = vadd.f32 %v4657_v52, %v4556_v61  ;;  %v4788_v28 = vpop.f32.mrf.mxu3  ;;  %v4528_v56 = vpop.f32.mrf.mxu1 }
 0x463   : > { %v4919_v0 = vpop.f32.mrf.mxu0  ;;  %v4557_v30 = vadd.f32 %v4528_v56, %v10247_v41  ;;  %v10386_v41 = vpack.c.bf16 %v4968_v10, %v4967_v5 }
 0x464   : > { %v4818_v36 = vadd.f32 %v4788_v28, %v4687_v32 }
 0x465   : > { %7835 = vmatmul.msk.bf16.gmra.mxu0 %vm2954_vm7, %v10245_v49 }
 0x466   : > { %v10381_v27 = vadd.f32 %v4919_v0, %v4818_v36  ;;  %v10405_v0 = vpack.c.bf16 %v5101_v31, %v5100_v54  ;;  %v5243_v36 = vpack.c.bf16 %v5232_v35, %v5231_v26  ;;  %v5365_v31 = vld [vmem:[#allocation3 + $0xa6] sm:$0xff] }
 0x469   : > { %v4659_v50 = vpop.f32.mrf.mxu2 }
 0x46a   : > { %v4688_v63 = vadd.f32 %v4659_v50, %v4557_v30  ;;  %v4790_v2 = vpop.f32.mrf.mxu3  ;;  %v4531_v55 = vpop.f32.mrf.mxu1 }
 0x46b   : > { %v4921_v8 = vpop.f32.mrf.mxu0  ;;  %v4558_v34 = vadd.f32 %v4531_v55, %v10254_v37  ;;  %v5102_v55 = vld [vmem:[#allocation3 + $0x9c] sm:$0xff] }
 0x46c   : > { %v4819_v25 = vadd.f32 %v4790_v2, %v4688_v63  ;;  %v4971_v2 = vld [vmem:[#allocation3 + $0x9b] sm:$0xff] }
 0x46d   : > { %7806 = vmatmul.msk.bf16.gmra.mxu1 %vm2954_vm7, %v10386_v41 }
 0x46e   : > { %v10390_v49 = vadd.f32 %v4921_v8, %v4819_v25  ;;  %7816 = vmatmul.msk.bf16.gmra.mxu2 %vm2954_vm7, %v10388_v16  ;;  %v5103_v8 = vld [vmem:[#allocation3 + $0xa4] sm:$0xff] }
 0x46f   : > { %7826 = vmatmul.msk.bf16.gmra.mxu3 %vm2954_vm7, %v5242_v20  ;;  %v5233_v20 = vld [vmem:[#allocation3 + $0x9d] sm:$0xff] }
 0x471   : > { %v4662_v6 = vpop.f32.mrf.mxu2 }
 0x472   : > { %v4689_v1 = vadd.f32 %v4662_v6, %v4558_v34  ;;  %v4793_v62 = vpop.f32.mrf.mxu3  ;;  %v4533_v58 = vpop.f32.mrf.mxu1  ;;  %v5234_v6 = vld [vmem:[#allocation3 + $0xa5] sm:$0xff] }
 0x473   : > { %v4924_v37 = vpop.f32.mrf.mxu0  ;;  %v4559_v18 = vadd.f32 %v4533_v58, %v10263_v57  ;;  %v10403_v57 = vpack.c.bf16 %v4970_v43, %v4969_v38  ;;  %v7850_v38 = vld [vmem:[%s10915_s3 + $0x54] sm:$0xf] }
 0x474   : > { %v4820_v29 = vadd.f32 %v4793_v62, %v4689_v1 }
 0x475   : > { %7836 = vmatmul.msk.bf16.gmra.mxu0 %vm2954_vm7, %v10261_v51 }
 0x476   : > { %v10398_v15 = vadd.f32 %v4924_v37, %v4820_v29  ;;  %v10422_v29 = vpack.c.bf16 %v5103_v8, %v5102_v55 }
 0x479   : > { %v4664_v33 = vpop.f32.mrf.mxu2 }
 0x47a   : > { %v4690_v11 = vadd.f32 %v4664_v33, %v4559_v18  ;;  %v4795_v61 = vpop.f32.mrf.mxu3  ;;  %v4536_v52 = vpop.f32.mrf.mxu1  ;;  %v5244_v18 = vpack.c.bf16 %v5234_v6, %v5233_v20  ;;  %v5669_v33 = vsel %vm1900_vm0, %v7850_v38, 0 }
 0x47b   : > { %v4926_v32 = vpop.f32.mrf.mxu0  ;;  %v4560_v56 = vadd.f32 %v4536_v52, %v10270_v22  ;;  %5678 = vmatpush.bf16.msra.mxu2 %v5669_v33 }
 0x47c   : > { %v4821_v28 = vadd.f32 %v4795_v61, %v4690_v11 }
 0x47d   : > { %7807 = vmatmul.msk.bf16.gmra.mxu1 %vm2954_vm7, %v10403_v57 }
 0x47e   : > { %v10407_v51 = vadd.f32 %v4926_v32, %v4821_v28  ;;  %7817 = vmatmul.msk.bf16.gmra.mxu2 %vm2954_vm7, %v10405_v0  ;;  %v5375_v28 = vpack.c.bf16 %v5365_v31, %v10301_v17 }
 0x47f   : > { %7827 = vmatmul.msk.bf16.gmra.mxu3 %vm2954_vm7, %v5243_v36  ;;  %v7870_v36 = vld [vmem:[%s10915_s3 + $0x5c] sm:$0xf] }
 0x481   : > { %v4667_v30 = vpop.f32.mrf.mxu2 }
 0x482   : > { %v4691_v5 = vadd.f32 %v4667_v30, %v4560_v56  ;;  %v4798_v50 = vpop.f32.mrf.mxu3  ;;  %v4538_v10 = vpop.f32.mrf.mxu1  ;;  %v5931_v30 = vsel %vm1900_vm0, %v7870_v36, 0  ;;  %v5481_v36 = vld [vmem:[#allocation3 + $0x38] sm:$0xff] }
 0x483   : > { %v4929_v22 = vpop.f32.mrf.mxu0  ;;  %v4561_v46 = vadd.f32 %v4538_v10, %v10279_v45  ;;  %v10420_v45 = vpack.c.bf16 %v4972_v60, %v4971_v2  ;;  %5940 = vmatpush.bf16.msrb.mxu0 %v5931_v30  ;;  %v4974_v10 = vld [vmem:[#allocation3 + $0xb3] sm:$0xf]  ;;  %v5612_v30 = vld [vmem:[#allocation3 + $0x39] sm:$0xff] }
 0x484   : > { %v4822_v42 = vadd.f32 %v4798_v50, %v4691_v5  ;;  %v10448_v5 = vld [vmem:[#allocation3 + $0xab] sm:$0xff]  ;;  %v5236_v2 = vld [vmem:[#allocation3 + $0xb5] sm:$0xf] }
 0x485   : > { %7837 = vmatmul.msk.bf16.gmra.mxu0 %vm2954_vm7, %v10277_v19 }
 0x486   : > { %v10415_v63 = vadd.f32 %v4929_v22, %v4822_v42  ;;  %v10450_v22 = vld [vmem:[#allocation3 + $0xac] sm:$0xff] }
 0x489   : > { %v4669_v7 = vpop.f32.mrf.mxu2 }
 0x48a   : > { %v4692_v25 = vadd.f32 %v4669_v7, %v4561_v46  ;;  %v4800_v34 = vpop.f32.mrf.mxu3  ;;  %v4541_v1 = vpop.f32.mrf.mxu1  ;;  %v5235_v46 = vld [vmem:[#allocation3 + $0xad] sm:$0xff] }
 0x48b   : > { %v4931_v62 = vpop.f32.mrf.mxu0  ;;  %v4562_v37 = vadd.f32 %v4541_v1, %v10294_v23  ;;  %v7860_v23 = vld [vmem:[%s10915_s3 + $0x58] sm:$0xf]  ;;  %v5245_v20 = vpack.c.bf16 %v5236_v2, %v5235_v46 }
 0x48c   : > { %v4823_v58 = vadd.f32 %v4800_v34, %v4692_v25  ;;  %v5800_v43 = vsel %vm1900_vm0, %v7860_v23, 0  ;;  %v4983_v25 = vpack.c.bf16 %v4974_v10, %v10448_v5 }
 0x48d   : > { %7808 = vmatmul.msk.bf16.gmra.mxu1 %vm2954_vm7, %v10420_v45  ;;  %5809 = vmatpush.bf16.msra.mxu3 %v5800_v43 }
 0x48e   : > { %v10424_v19 = vadd.f32 %v4931_v62, %v4823_v58  ;;  %7818 = vmatmul.msk.bf16.gmra.mxu2 %vm2954_vm7, %v10422_v29  ;;  %v5366_v62 = vld [vmem:[#allocation3 + $0xae] sm:$0xff]  ;;  %v5367_v58 = vld [vmem:[#allocation3 + $0xb6] sm:$0xf] }
 0x48f   : > { %7828 = vmatmul.msk.bf16.gmra.mxu3 %vm2954_vm7, %v5244_v18  ;;  %v5376_v43 = vpack.c.bf16 %v5367_v58, %v5366_v62  ;;  %v5484_v62 = vld [vmem:[#allocation3 + $0x50] sm:$0xff] }
 0x490   : > { %v5614_v58 = vld [vmem:[#allocation3 + $0x49] sm:$0xff] }
 0x491   : > { %v4672_v54 = vpop.f32.mrf.mxu2 }
 0x492   : > { %v4693_v11 = vadd.f32 %v4672_v54, %v4562_v37  ;;  %v4803_v61 = vpop.f32.mrf.mxu3  ;;  %v4543_v26 = vpop.f32.mrf.mxu1 }
 0x493   : > { %v4934_v35 = vpop.f32.mrf.mxu0  ;;  %v4563_v32 = vadd.f32 %v4543_v26, %v10305_v24  ;;  %v5105_v24 = vld [vmem:[#allocation3 + $0xb4] sm:$0xf] }
 0x494   : > { %v4824_v52 = vadd.f32 %v4803_v61, %v4693_v11  ;;  %v5114_v34 = vpack.c.bf16 %v5105_v24, %v10450_v22  ;;  %v5482_v11 = vld [vmem:[#allocation3 + $0x40] sm:$0xff] }
 0x495   : > { %7838 = vmatmul.msk.bf16.gmra.mxu0 %vm2954_vm7, %v5375_v28  ;;  %v5613_v61 = vld [vmem:[#allocation3 + $0x41] sm:$0xff]  ;;  %v5499_v24 = vpack.c.bf16 %v5482_v11, %v5481_v36 }
 0x496   : > { %v10441_v56 = vadd.f32 %v4934_v35, %v4824_v52  ;;  %v5744_v52 = vld [vmem:[#allocation3 + $0x42] sm:$0xff] }
 0x499   : > { %v4674_v50 = vpop.f32.mrf.mxu2 }
 0x49a   : > { %v4694_v42 = vadd.f32 %v4674_v50, %v4563_v32  ;;  %v4805_v17 = vpop.f32.mrf.mxu3  ;;  %v5025_v60 = vpop.f32.mrf.mxu1 }
 0x49b   : > { %v4936_v7 = vpop.f32.mrf.mxu0  ;;  %v5070_v8 = vadd.f32 %v5025_v60, %v10311_v21 }
 0x49c   : > { %v4825_v55 = vadd.f32 %v4805_v17, %v4694_v42  ;;  %v5743_v42 = vld [vmem:[#allocation3 + $0x3a] sm:$0xff] }
 0x49d   : > { %7809 = vmatmul.msk.bf16.gmra.mxu1 %vm2954_vm7, %v4983_v25  ;;  %v5761_v17 = vpack.c.bf16 %v5744_v52, %v5743_v42  ;;  %v5616_v42 = vld [vmem:[#allocation3 + $0x59] sm:$0xff] }
 0x49e   : > { %v10455_v6 = vadd.f32 %v4936_v7, %v4825_v55  ;;  %7819 = vmatmul.msk.bf16.gmra.mxu2 %vm2954_vm7, %v5114_v34 }
 0x49f   : > { %7829 = vmatmul.msk.bf16.gmra.mxu3 %vm2954_vm7, %v5245_v20  ;;  %v5483_v20 = vld [vmem:[#allocation3 + $0x48] sm:$0xff] }
 0x4a1   : > { %v5156_v1 = vpop.f32.mrf.mxu2 }
 0x4a2   : > { %v5201_v37 = vadd.f32 %v5156_v1, %v5070_v8  ;;  %v5287_v18 = vpop.f32.mrf.mxu3  ;;  %v5027_v38 = vpop.f32.mrf.mxu1 }
 0x4a3   : > { %v5418_v21 = vpop.f32.mrf.mxu0  ;;  %v5071_v33 = vadd.f32 %v5027_v38, %v10315_v12  ;;  %v5630_v12 = vpack.c.bf16 %v5613_v61, %v5612_v30 }
 0x4a4   : > { %v5332_v23 = vadd.f32 %v5287_v18, %v5201_v37  ;;  %v5615_v37 = vld [vmem:[#allocation3 + $0x51] sm:$0xff] }
 0x4a5   : > { %7839 = vmatmul.msk.bf16.gmra.mxu0 %vm2954_vm7, %v5376_v43  ;;  %v5631_v61 = vpack.c.bf16 %v5615_v37, %v5614_v58 }
 0x4a6   : > { %v10461_v54 = vadd.f32 %v5418_v21, %v5332_v23  ;;  %v5745_v21 = vld [vmem:[#allocation3 + $0x4a] sm:$0xff]  ;;  %v5746_v23 = vld [vmem:[#allocation3 + $0x52] sm:$0xff] }
 0x4a9   : > { %v5158_v31 = vpop.f32.mrf.mxu2 }
 0x4aa   : > { %v5202_v26 = vadd.f32 %v5158_v31, %v5071_v33  ;;  %v5289_v35 = vpop.f32.mrf.mxu3  ;;  %v5030_v32 = vpop.f32.mrf.mxu1 }
 0x4ab   : > { %v5420_v28 = vpop.f32.mrf.mxu0  ;;  %v5072_v10 = vadd.f32 %v5030_v32, %v10321_v59 }
 0x4ac   : > { %v5333_v50 = vadd.f32 %v5289_v35, %v5202_v26  ;;  %v5762_v26 = vpack.c.bf16 %v5746_v23, %v5745_v21 }
 0x4ad   : > { %7841 = vmatmul.msk.bf16.vlgmr.msra.gmra.mxu1 %vm2954_vm7, %v5499_v24 }
 0x4ae   : > { %v10465_v46 = vadd.f32 %v5420_v28, %v5333_v50  ;;  %7851 = vmatmul.msk.bf16.vlgmr.msra.gmra.mxu2 %vm2954_vm7, %v5630_v12  ;;  %v5486_v12 = vld [vmem:[#allocation3 + $0x60] sm:$0xff] }
 0x4af   : > { %7861 = vmatmul.msk.bf16.vlgmr.msra.gmra.mxu3 %vm2954_vm7, %v5761_v17  ;;  %v5617_v17 = vld [vmem:[#allocation3 + $0x61] sm:$0xff] }
 0x4b1   : > { %v5161_v2 = vpop.f32.mrf.mxu2 }
 0x4b2   : > { %v5203_v7 = vadd.f32 %v5161_v2, %v5072_v10  ;;  %v5292_v60 = vpop.f32.mrf.mxu3  ;;  %v5032_v55 = vpop.f32.mrf.mxu1  ;;  %v5485_v10 = vld [vmem:[#allocation3 + $0x58] sm:$0xff] }
 0x4b3   : > { %v5423_v8 = vpop.f32.mrf.mxu0  ;;  %v5073_v59 = vadd.f32 %v5032_v55, %v10328_v14  ;;  %v5500_v14 = vpack.c.bf16 %v5484_v62, %v5483_v20  ;;  %v5748_v55 = vld [vmem:[#allocation3 + $0x62] sm:$0xff] }
 0x4b4   : > { %v5334_v25 = vadd.f32 %v5292_v60, %v5203_v7  ;;  %v5747_v60 = vld [vmem:[#allocation3 + $0x5a] sm:$0xff] }
 0x4b5   : > { %7871 = vmatmul.msk.bf16.vlgmr.msrb.gmra.mxu0 %vm2954_vm7, %v10326_v48  ;;  %v5763_v62 = vpack.c.bf16 %v5748_v55, %v5747_v60 }
 0x4b6   : > { %v10471_v34 = vadd.f32 %v5423_v8, %v5334_v25 }
 0x4b9   : > { %v5163_v1 = vpop.f32.mrf.mxu2 }
 0x4ba   : > { %v5204_v18 = vadd.f32 %v5163_v1, %v5073_v59  ;;  %v5294_v38 = vpop.f32.mrf.mxu3  ;;  %v5035_v33 = vpop.f32.mrf.mxu1  ;;  %v5632_v1 = vpack.c.bf16 %v5617_v17, %v5616_v42 }
 0x4bb   : > { %v5425_v43 = vpop.f32.mrf.mxu0  ;;  %v5074_v11 = vadd.f32 %v5035_v33, %v10335_v40 }
 0x4bc   : > { %v5335_v31 = vadd.f32 %v5294_v38, %v5204_v18 }
 0x4bd   : > { %7842 = vmatmul.msk.bf16.gmra.mxu1 %vm2954_vm7, %v5500_v14  ;;  %v5618_v14 = vld [vmem:[#allocation3 + $0x69] sm:$0xff] }
 0x4be   : > { %v10476_v35 = vadd.f32 %v5425_v43, %v5335_v31  ;;  %7852 = vmatmul.msk.bf16.gmra.mxu2 %vm2954_vm7, %v5631_v61  ;;  %v5487_v43 = vld [vmem:[#allocation3 + $0x68] sm:$0xff]  ;;  %v5619_v61 = vld [vmem:[#allocation3 + $0x71] sm:$0xff] }
 0x4bf   : > { %7862 = vmatmul.msk.bf16.gmra.mxu3 %vm2954_vm7, %v5762_v26 }
 0x4c1   : > { %v5166_v48 = vpop.f32.mrf.mxu2 }
 0x4c2   : > { %v5205_v52 = vadd.f32 %v5166_v48, %v5074_v11  ;;  %v5297_v32 = vpop.f32.mrf.mxu3  ;;  %v5037_v28 = vpop.f32.mrf.mxu1  ;;  %v5488_v11 = vld [vmem:[#allocation3 + $0x70] sm:$0xff] }
 0x4c3   : > { %v5428_v36 = vpop.f32.mrf.mxu0  ;;  %v5075_v50 = vadd.f32 %v5037_v28, %v10342_v4  ;;  %v5501_v4 = vpack.c.bf16 %v5486_v12, %v5485_v10  ;;  %v5633_v10 = vpack.c.bf16 %v5619_v61, %v5618_v14 }
 0x4c4   : > { %v5336_v30 = vadd.f32 %v5297_v32, %v5205_v52  ;;  %v5749_v52 = vld [vmem:[#allocation3 + $0x6a] sm:$0xff]  ;;  %v5750_v32 = vld [vmem:[#allocation3 + $0x72] sm:$0xff] }
 0x4c5   : > { %7872 = vmatmul.msk.bf16.gmra.mxu0 %vm2954_vm7, %v10340_v13 }
 0x4c6   : > { %v10482_v40 = vadd.f32 %v5428_v36, %v5336_v30 }
 0x4c9   : > { %v5168_v24 = vpop.f32.mrf.mxu2 }
 0x4ca   : > { %v5206_v2 = vadd.f32 %v5168_v24, %v5075_v50  ;;  %v5299_v7 = vpop.f32.mrf.mxu3  ;;  %v5040_v8 = vpop.f32.mrf.mxu1  ;;  %v5764_v24 = vpack.c.bf16 %v5750_v32, %v5749_v52 }
 0x4cb   : > { %v5430_v25 = vpop.f32.mrf.mxu0  ;;  %v5076_v20 = vadd.f32 %v5040_v8, %v10349_v9  ;;  %v7880_v8 = vld [vmem:[%s10915_s3 + $0x60] sm:$0xf] }
 0x4cc   : > { %v5337_v59 = vadd.f32 %v5299_v7, %v5206_v2 }
 0x4cd   : > { %7843 = vmatmul.msk.bf16.gmra.mxu1 %vm2954_vm7, %v5501_v4  ;;  %v5490_v4 = vld [vmem:[#allocation3 + $0x80] sm:$0xff] }
 0x4ce   : > { %v10487_v58 = vadd.f32 %v5430_v25, %v5337_v59  ;;  %7853 = vmatmul.msk.bf16.gmra.mxu2 %vm2954_vm7, %v5632_v1  ;;  %v6062_v25 = vsel %vm1900_vm0, %v7880_v8, 0  ;;  %v5489_v59 = vld [vmem:[#allocation3 + $0x78] sm:$0xff] }
 0x4cf   : > { %7863 = vmatmul.msk.bf16.gmra.mxu3 %vm2954_vm7, %v5763_v62  ;;  %6071 = vmatpush.bf16.msrb.mxu1 %v6062_v25  ;;  %v5620_v1 = vld [vmem:[#allocation3 + $0x79] sm:$0xff]  ;;  %v5621_v62 = vld [vmem:[#allocation3 + $0x81] sm:$0xff] }
 0x4d1   : > { %v5171_v13 = vpop.f32.mrf.mxu2 }
 0x4d2   : > { %v5207_v37 = vadd.f32 %v5171_v13, %v5076_v20  ;;  %v5302_v18 = vpop.f32.mrf.mxu3  ;;  %v5042_v38 = vpop.f32.mrf.mxu1 }
 0x4d3   : > { %v5433_v21 = vpop.f32.mrf.mxu0  ;;  %v5077_v33 = vadd.f32 %v5042_v38, %v10356_v3  ;;  %v5502_v3 = vpack.c.bf16 %v5488_v11, %v5487_v43  ;;  %v5634_v43 = vpack.c.bf16 %v5621_v62, %v5620_v1 }
 0x4d4   : > { %v5338_v23 = vadd.f32 %v5302_v18, %v5207_v37  ;;  %v5752_v18 = vld [vmem:[#allocation3 + $0x82] sm:$0xff] }
 0x4d5   : > { %7873 = vmatmul.msk.bf16.gmra.mxu0 %vm2954_vm7, %v10354_v39 }
 0x4d6   : > { %v10493_v9 = vadd.f32 %v5433_v21, %v5338_v23 }
 0x4d9   : > { %v5173_v31 = vpop.f32.mrf.mxu2 }
 0x4da   : > { %v5208_v26 = vadd.f32 %v5173_v31, %v5077_v33  ;;  %v5304_v48 = vpop.f32.mrf.mxu3  ;;  %v5045_v28 = vpop.f32.mrf.mxu1  ;;  %v5503_v33 = vpack.c.bf16 %v5490_v4, %v5489_v59 }
 0x4db   : > { %v5435_v36 = vpop.f32.mrf.mxu0  ;;  %v5078_v50 = vadd.f32 %v5045_v28, %v10363_v53 }
 0x4dc   : > { %v5339_v30 = vadd.f32 %v5304_v48, %v5208_v26 }
 0x4dd   : > { %7844 = vmatmul.msk.bf16.gmra.mxu1 %vm2954_vm7, %v5502_v3  ;;  %v5622_v3 = vld [vmem:[#allocation3 + $0x89] sm:$0xff] }
 0x4de   : > { %v10498_v12 = vadd.f32 %v5435_v36, %v5339_v30  ;;  %7854 = vmatmul.msk.bf16.gmra.mxu2 %vm2954_vm7, %v5633_v10  ;;  %v5491_v36 = vld [vmem:[#allocation3 + $0x88] sm:$0xff]  ;;  %v5623_v10 = vld [vmem:[#allocation3 + $0x91] sm:$0xff] }
 0x4df   : > { %7864 = vmatmul.msk.bf16.gmra.mxu3 %vm2954_vm7, %v5764_v24  ;;  %v5635_v8 = vpack.c.bf16 %v5623_v10, %v5622_v3 }
 0x4e1   : > { %v5176_v39 = vpop.f32.mrf.mxu2 }
 0x4e2   : > { %v5209_v42 = vadd.f32 %v5176_v39, %v5078_v50  ;;  %v5307_v17 = vpop.f32.mrf.mxu3  ;;  %v5047_v2 = vpop.f32.mrf.mxu1  ;;  %v5492_v50 = vld [vmem:[#allocation3 + $0x90] sm:$0xff] }
 0x4e3   : > { %v5438_v7 = vpop.f32.mrf.mxu0  ;;  %v5079_v55 = vadd.f32 %v5047_v2, %v10374_v47  ;;  %v5751_v47 = vld [vmem:[#allocation3 + $0x7a] sm:$0xff] }
 0x4e4   : > { %v5340_v60 = vadd.f32 %v5307_v17, %v5209_v42  ;;  %v5765_v31 = vpack.c.bf16 %v5752_v18, %v5751_v47  ;;  %v5753_v42 = vld [vmem:[#allocation3 + $0x8a] sm:$0xff]  ;;  %v5754_v17 = vld [vmem:[#allocation3 + $0x92] sm:$0xff] }
 0x4e5   : > { %7874 = vmatmul.msk.bf16.gmra.mxu0 %vm2954_vm7, %v10372_v44  ;;  %v5766_v25 = vpack.c.bf16 %v5754_v17, %v5753_v42  ;;  %v5493_v47 = vld [vmem:[#allocation3 + $0x98] sm:$0xff] }
 0x4e6   : > { %v10504_v53 = vadd.f32 %v5438_v7, %v5340_v60  ;;  %v5627_v42 = vld [vmem:[#allocation3 + $0xb1] sm:$0xff] }
 0x4e9   : > { %v5178_v20 = vpop.f32.mrf.mxu2 }
 0x4ea   : > { %v5210_v13 = vadd.f32 %v5178_v20, %v5079_v55  ;;  %v5309_v37 = vpop.f32.mrf.mxu3  ;;  %v5050_v38 = vpop.f32.mrf.mxu1 }
 0x4eb   : > { %v5440_v21 = vpop.f32.mrf.mxu0  ;;  %v5080_v44 = vadd.f32 %v5050_v38, %v10381_v27  ;;  %v5494_v38 = vld [vmem:[#allocation3 + $0xa0] sm:$0xff] }
 0x4ec   : > { %v5341_v23 = vadd.f32 %v5309_v37, %v5210_v13 }
 0x4ed   : > { %7845 = vmatmul.msk.bf16.gmra.mxu1 %vm2954_vm7, %v5503_v33  ;;  %v5755_v33 = vld [vmem:[#allocation3 + $0x9a] sm:$0xff] }
 0x4ee   : > { %v10513_v11 = vadd.f32 %v5440_v21, %v5341_v23  ;;  %7855 = vmatmul.msk.bf16.gmra.mxu2 %vm2954_vm7, %v5634_v43  ;;  %v5624_v21 = vld [vmem:[#allocation3 + $0x99] sm:$0xff]  ;;  %v5625_v23 = vld [vmem:[#allocation3 + $0xa1] sm:$0xff] }
 0x4ef   : > { %7865 = vmatmul.msk.bf16.gmra.mxu3 %vm2954_vm7, %v5765_v31  ;;  %v5756_v43 = vld [vmem:[#allocation3 + $0xa2] sm:$0xff] }
 0x4f1   : > { %v5181_v14 = vpop.f32.mrf.mxu2 }
 0x4f2   : > { %v5211_v61 = vadd.f32 %v5181_v14, %v5080_v44  ;;  %v5312_v26 = vpop.f32.mrf.mxu3  ;;  %v5052_v48 = vpop.f32.mrf.mxu1 }
 0x4f3   : > { %v5443_v52 = vpop.f32.mrf.mxu0  ;;  %v5081_v28 = vadd.f32 %v5052_v48, %v10390_v49  ;;  %v5504_v49 = vpack.c.bf16 %v5492_v50, %v5491_v36  ;;  %v5767_v48 = vpack.c.bf16 %v5756_v43, %v5755_v33  ;;  %v5628_v33 = vld [vmem:[#allocation3 + $0xb9] sm:$0xff]  ;;  %v5629_v43 = vld [vmem:[#allocation3 + $0xc1] sm:$0xf] }
 0x4f4   : > { %v5342_v32 = vadd.f32 %v5312_v26, %v5211_v61  ;;  %v5505_v61 = vpack.c.bf16 %v5494_v38, %v5493_v47  ;;  %v5636_v26 = vpack.c.bf16 %v5625_v23, %v5624_v21  ;;  %v5497_v21 = vld [vmem:[#allocation3 + $0xb8] sm:$0xff]  ;;  %v5498_v23 = vld [vmem:[#allocation3 + $0xc0] sm:$0xf] }
 0x4f5   : > { %7875 = vmatmul.msk.bf16.gmra.mxu0 %vm2954_vm7, %v10386_v41 }
 0x4f6   : > { %v10519_v27 = vadd.f32 %v5443_v52, %v5342_v32 }
 0x4f9   : > { %v5183_v30 = vpop.f32.mrf.mxu2 }
 0x4fa   : > { %v5212_v24 = vadd.f32 %v5183_v30, %v5081_v28  ;;  %v5314_v39 = vpop.f32.mrf.mxu3  ;;  %v5055_v2 = vpop.f32.mrf.mxu1 }
 0x4fb   : > { %v5445_v7 = vpop.f32.mrf.mxu0  ;;  %v5082_v55 = vadd.f32 %v5055_v2, %v10398_v15  ;;  %v5757_v2 = vld [vmem:[#allocation3 + $0xaa] sm:$0xff] }
 0x4fc   : > { %v5343_v60 = vadd.f32 %v5314_v39, %v5212_v24  ;;  %v5496_v24 = vld [vmem:[#allocation3 + $0xb0] sm:$0xff] }
 0x4fd   : > { %7846 = vmatmul.msk.bf16.gmra.mxu1 %vm2954_vm7, %v5504_v49  ;;  %v5626_v39 = vld [vmem:[#allocation3 + $0xa9] sm:$0xff] }
 0x4fe   : > { %v10524_v59 = vadd.f32 %v5445_v7, %v5343_v60  ;;  %7856 = vmatmul.msk.bf16.gmra.mxu2 %vm2954_vm7, %v5635_v8  ;;  %v5758_v7 = vld [vmem:[#allocation3 + $0xb2] sm:$0xff]  ;;  %v5637_v8 = vpack.c.bf16 %v5627_v42, %v5626_v39 }
 0x4ff   : > { %7866 = vmatmul.msk.bf16.gmra.mxu3 %vm2954_vm7, %v5766_v25  ;;  %v5768_v25 = vpack.c.bf16 %v5758_v7, %v5757_v2  ;;  %v6007_v7 = vld [vmem:[#allocation3 + $0x4c] sm:$0xff] }
 0x501   : > { %v5186_v41 = vpop.f32.mrf.mxu2 }
 0x502   : > { %v5213_v20 = vadd.f32 %v5186_v41, %v5082_v55  ;;  %v5317_v4 = vpop.f32.mrf.mxu3  ;;  %v5057_v1 = vpop.f32.mrf.mxu1  ;;  %v5889_v41 = vld [vmem:[#allocation3 + $0xb3] sm:$0xff] }
 0x503   : > { %v5448_v62 = vpop.f32.mrf.mxu0  ;;  %v10530_v37 = vadd.f32 %v5057_v1, %v10407_v51 }
 0x504   : > { %v5344_v13 = vadd.f32 %v5317_v4, %v5213_v20 }
 0x505   : > { %7876 = vmatmul.msk.bf16.gmra.mxu0 %vm2954_vm7, %v10403_v57 }
 0x506   : > { %v10532_v15 = vadd.f32 %v5448_v62, %v5344_v13 }
 0x509   : > { %v10536_v18 = vpop.f32.mrf.mxu2 }
 0x50a   : > { %v10538_v44 = vpop.f32.mrf.mxu3  ;;  %v5060_v31 = vpop.f32.mrf.mxu1 }
 0x50b   : > { %v10540_v14 = vpop.f32.mrf.mxu0  ;;  %v5084_v51 = vadd.f32 %v5060_v31, %v10415_v63  ;;  %v5495_v63 = vld [vmem:[#allocation3 + $0xa8] sm:$0xff]  ;;  %v5759_v31 = vld [vmem:[#allocation3 + $0xba] sm:$0xff] }
 0x50c   : > { %v5506_v49 = vpack.c.bf16 %v5496_v24, %v5495_v63  ;;  %v6005_v63 = vld [vmem:[#allocation3 + $0x3c] sm:$0xff] }
 0x50d   : > { %7847 = vmatmul.msk.bf16.gmra.mxu1 %vm2954_vm7, %v5505_v61 }
 0x50e   : > { %7857 = vmatmul.msk.bf16.gmra.mxu2 %vm2954_vm7, %v5636_v26 }
 0x50f   : > { %7867 = vmatmul.msk.bf16.gmra.mxu3 %vm2954_vm7, %v5767_v48  ;;  %v5507_v48 = vpack.c.bf16 %v5498_v23, %v5497_v21 }
 0x511   : > { %v5191_v57 = vpop.f32.mrf.mxu2 }
 0x512   : > { %v5215_v52 = vadd.f32 %v5191_v57, %v5084_v51  ;;  %v5322_v32 = vpop.f32.mrf.mxu3  ;;  %v5062_v28 = vpop.f32.mrf.mxu1  ;;  %v5760_v51 = vld [vmem:[#allocation3 + $0xc2] sm:$0xf] }
 0x513   : > { %v5453_v36 = vpop.f32.mrf.mxu0  ;;  %v10547_v50 = vadd.f32 %v5062_v28, %v10424_v19  ;;  %v5769_v57 = vpack.c.bf16 %v5760_v51, %v5759_v31 }
 0x514   : > { %v5346_v30 = vadd.f32 %v5322_v32, %v5215_v52  ;;  %v5891_v52 = vld [vmem:[#allocation3 + $0xc3] sm:$0xf] }
 0x515   : > { %7877 = vmatmul.msk.bf16.gmra.mxu0 %vm2954_vm7, %v10420_v45 }
 0x516   : > { %v10549_v3 = vadd.f32 %v5453_v36, %v5346_v30 }
 0x519   : > { %v10553_v10 = vpop.f32.mrf.mxu2 }
 0x51a   : > { %v10555_v17 = vpop.f32.mrf.mxu3  ;;  %v5065_v60 = vpop.f32.mrf.mxu1 }
 0x51b   : > { %v10557_v55 = vpop.f32.mrf.mxu0  ;;  %v5086_v19 = vadd.f32 %v5065_v60, %v10441_v56  ;;  %v5899_v56 = vpack.c.bf16 %v5889_v41, %v10448_v5  ;;  %v5890_v5 = vld [vmem:[#allocation3 + $0xbb] sm:$0xff] }
 0x51c   : > { %v5900_v36 = vpack.c.bf16 %v5891_v52, %v5890_v5  ;;  %v6008_v60 = vld [vmem:[#allocation3 + $0x54] sm:$0xff]  ;;  %v5216_v52 = vadd.f32 %v10553_v10, %v10547_v50 }
 0x51d   : > { %7848 = vmatmul.msk.bf16.gmra.mxu1 %vm2954_vm7, %v5506_v49  ;;  %v6024_v49 = vpack.c.bf16 %v6008_v60, %v6007_v7 }
 0x51e   : > { %7858 = vmatmul.msk.bf16.gmra.mxu2 %vm2954_vm7, %v5637_v8 }
 0x51f   : > { %7868 = vmatmul.msk.bf16.gmra.mxu3 %vm2954_vm7, %v5768_v25  ;;  %v6009_v25 = vld [vmem:[#allocation3 + $0x5c] sm:$0xff] }
 0x521   : > { %v5196_v45 = vpop.f32.mrf.mxu2 }
 0x522   : > { %v5217_v20 = vadd.f32 %v5196_v45, %v5086_v19  ;;  %v5327_v4 = vpop.f32.mrf.mxu3  ;;  %v5067_v1 = vpop.f32.mrf.mxu1  ;;  %v6010_v45 = vld [vmem:[#allocation3 + $0x64] sm:$0xff] }
 0x523   : > { %v10564_v13 = vadd.f32 %v5067_v1, %v10455_v6  ;;  %v5458_v47 = vpop.f32.mrf.mxu0  ;;  %v5638_v6 = vpack.c.bf16 %v5629_v43, %v5628_v33  ;;  %v6011_v1 = vld [vmem:[#allocation3 + $0x6c] sm:$0xff] }
 0x524   : > { %v5348_v62 = vadd.f32 %v5327_v4, %v5217_v20 }
 0x525   : > { %7878 = vmatmul.msk.bf16.gmra.mxu0 %vm2954_vm7, %v5899_v56 }
 0x526   : > { %v10567_v38 = vadd.f32 %v5458_v47, %v5348_v62  ;;  %v6012_v62 = vld [vmem:[#allocation3 + $0x74] sm:$0xff] }
 0x52a   : > { %v5549_v61 = vpop.f32.mrf.mxu1  ;;  %v5329_v51 = vpop.f32.mrf.mxu3 }
 0x52b   : > { %v10571_v26 = vadd.f32 %v5549_v61, %v10461_v54  ;;  %v6006_v54 = vld [vmem:[#allocation3 + $0x44] sm:$0xff]  ;;  %v5460_v61 = vpop.f32.mrf.mxu0 }
 0x52c   : > { %v6023_v39 = vpack.c.bf16 %v6006_v54, %v6005_v63 }
 0x52d   : > { %7849 = vmatmul.msk.bf16.gmra.mxu1 %vm2954_vm7, %v5507_v48 }
 0x52e   : > { %7859 = vmatmul.msk.bf16.gmra.mxu2 %vm2954_vm7, %v5638_v6 }
 0x52f   : > { %7869 = vmatmul.msk.bf16.gmra.mxu3 %vm2954_vm7, %v5769_v57  ;;  %v8234_v57 = vld [vmem:[%s10917_s5] sm:$0xff] }
 0x530   : > { %6240 = vmatpush.bf16.msrb.mxu3 %v8234_v57 }
 0x532   : > { %v5551_v32 = vpop.f32.mrf.mxu1 }
 0x533   : > { %v10577_v28 = vadd.f32 %v5551_v32, %v10465_v46 }
 0x535   : > { %7879 = vmatmul.msk.bf16.gmra.mxu0 %vm2954_vm7, %v5900_v36 }
 0x53a   : > { %v5554_v30 = vpop.f32.mrf.mxu1 }
 0x53b   : > { %v10581_v24 = vadd.f32 %v5554_v30, %v10471_v34  ;;  %v8236_v30 = vld [vmem:[%s10917_s5 + $0x10] sm:$0xff] }
 0x53c   : > { %6266 = vmatpush.bf16.msra.mxu0 %v8236_v30 }
 0x53d   : > { %7881 = vmatmul.msk.bf16.vlgmr.msrb.gmra.mxu1 %vm2954_vm7, %v6023_v39 }
 0x542   : > { %v5556_v42 = vpop.f32.mrf.mxu1 }
 0x543   : > { %v10585_v2 = vadd.f32 %v5556_v42, %v10476_v35  ;;  %v6025_v35 = vpack.c.bf16 %v6010_v45, %v6009_v25  ;;  %v6020_v42 = vld [vmem:[#allocation3 + $0xb4] sm:$0xff] }
 0x54a   : > { %v5559_v46 = vpop.f32.mrf.mxu1 }
 0x54b   : > { %v10588_v19 = vadd.f32 %v5559_v46, %v10482_v40 }
 0x54d   : > { %7882 = vmatmul.msk.bf16.gmra.mxu1 %vm2954_vm7, %v6024_v49  ;;  %v6030_v49 = vpack.c.bf16 %v6020_v42, %v10450_v22 }
 0x552   : > { %v5561_v8 = vpop.f32.mrf.mxu1 }
 0x553   : > { %v10592_v34 = vadd.f32 %v5561_v8, %v10487_v58  ;;  %v6026_v58 = vpack.c.bf16 %v6012_v62, %v6011_v1  ;;  %v6022_v1 = vld [vmem:[#allocation3 + $0xc4] sm:$0xf] }
 0x55a   : > { %v5564_v41 = vpop.f32.mrf.mxu1 }
 0x55b   : > { %v10595_v20 = vadd.f32 %v5564_v41, %v10493_v9 }
 0x55d   : > { %7883 = vmatmul.msk.bf16.gmra.mxu1 %vm2954_vm7, %v6025_v35 }
 0x562   : > { %v5566_v4 = vpop.f32.mrf.mxu1 }
 0x563   : > { %v10599_v40 = vadd.f32 %v5566_v4, %v10498_v12  ;;  %v5198_v12 = vpop.f32.mrf.mxu2 }
 0x564   : > { %v5218_v7 = vadd.f32 %v5198_v12, %v10564_v13  ;;  %v6021_v13 = vld [vmem:[#allocation3 + $0xbc] sm:$0xff] }
 0x566   : > { %v5349_v8 = vadd.f32 %v5329_v51, %v5218_v7 }
 0x568   : > { %v5480_v25 = vadd.f32 %v5460_v61, %v5349_v8 }
 0x56a   : > { %v5569_v56 = vpop.f32.mrf.mxu1 }
 0x56b   : > { %v10602_v47 = vadd.f32 %v5569_v56, %v10504_v53  ;;  %v8235_v53 = vld [vmem:[%s10917_s5 + $0x8] sm:$0xff] }
 0x56c   : > { %6218 = vmatpush.bf16.msrb.mxu2 %v8235_v53 }
 0x56d   : > { %7884 = vmatmul.msk.bf16.gmra.mxu1 %vm2954_vm7, %v6026_v58  ;;  %v6031_v58 = vpack.c.bf16 %v6022_v1, %v6021_v13 }
 0x572   : > { %v5571_v21 = vpop.f32.mrf.mxu1 }
 0x573   : > { %v10606_v9 = vadd.f32 %v5571_v21, %v10513_v11 }
 0x57a   : > { %v5574_v23 = vpop.f32.mrf.mxu1 }
 0x57b   : > { %v10609_v33 = vadd.f32 %v5574_v23, %v10519_v27  ;;  %v5680_v27 = vpop.f32.mrf.mxu2 }
 0x57c   : > { %v5725_v12 = vadd.f32 %v5680_v27, %v10571_v26 }
 0x57d   : > { %7885 = vmatmul.msk.bf16.gmra.mxu1 %vm2954_vm7, %v10388_v16  ;;  %v5811_v16 = vpop.f32.mrf.mxu3 }
 0x582   : > { %v5576_v43 = vpop.f32.mrf.mxu1 }
 0x583   : > { %v10614_v31 = vadd.f32 %v5576_v43, %v10524_v59  ;;  %v5942_v59 = vpop.f32.mrf.mxu0  ;;  %v5682_v5 = vpop.f32.mrf.mxu2 }
 0x585   : > { %v5813_v36 = vpop.f32.mrf.mxu3 }
 0x58a   : > { %v5579_v11 = vpop.f32.mrf.mxu1 }
 0x58b   : > { %v10620_v48 = vadd.f32 %v5579_v11, %v10532_v15  ;;  %v5944_v54 = vpop.f32.mrf.mxu0  ;;  %v5685_v63 = vpop.f32.mrf.mxu2  ;;  %v5856_v11 = vadd.f32 %v5811_v16, %v5725_v12 }
 0x58c   : > { %v5727_v43 = vadd.f32 %v5685_v63, %v10581_v24 }
 0x58d   : > { %7886 = vmatmul.msk.bf16.gmra.mxu1 %vm2954_vm7, %v10405_v0  ;;  %v5347_v0 = vadd.f32 %v10555_v17, %v5216_v52 }
 0x58f   : > { %v5478_v39 = vadd.f32 %v10557_v55, %v5347_v0 }
 0x592   : > { %v10624_v6 = vpop.f32.mrf.mxu1 }
 0x593   : > { %v5947_v17 = vpop.f32.mrf.mxu0  ;;  %v5687_v60 = vpop.f32.mrf.mxu2 }
 0x59a   : > { %v5584_v32 = vpop.f32.mrf.mxu1 }
 0x59b   : > { %v10632_v15 = vadd.f32 %v5584_v32, %v10549_v3  ;;  %v5816_v3 = vpop.f32.mrf.mxu3  ;;  %v5949_v41 = vpop.f32.mrf.mxu0 }
 0x59c   : > { %v10651_v4 = vpop.f32.mrf.mxu2  ;;  %v5858_v57 = vadd.f32 %v5816_v3, %v5727_v43 }
 0x59d   : > { %7887 = vmatmul.msk.bf16.gmra.mxu1 %vm2954_vm7, %v10422_v29 }
 0x59e   : > { %v5989_v30 = vadd.f32 %v5947_v17, %v5858_v57 }
 0x5a2   : > { %v5586_v50 = vpop.f32.mrf.mxu1 }
 0x5a3   : > { %v10641_v10 = vadd.f32 %v5586_v50, %v5478_v39  ;;  %v5818_v55 = vpop.f32.mrf.mxu3  ;;  %v10656_v22 = vpop.f32.mrf.mxu0 }
 0x5a4   : > { %v5692_v21 = vpop.f32.mrf.mxu2 }
 0x5aa   : > { %v5589_v46 = vpop.f32.mrf.mxu1 }
 0x5ab   : > { %v10645_v29 = vadd.f32 %v5589_v46, %v10567_v38  ;;  %v10653_v62 = vpop.f32.mrf.mxu3  ;;  %v5726_v38 = vadd.f32 %v5682_v5, %v10577_v28  ;;  %v5954_v32 = vpop.f32.mrf.mxu0  ;;  %v10664_v28 = vld [vmem:[%s10916_s4] ss:$0 sm:$0xff]  ;;  %v5987_v5 = vadd.f32 %v5942_v59, %v5856_v11 }
 0x5ac   : > { %v5695_v0 = vpop.f32.mrf.mxu2 }
 0x5ad   : > { %7888 = vmatmul.msk.bf16.gmra.mxu1 %vm2954_vm7, %v6030_v49  ;;  %v5857_v23 = vadd.f32 %v5813_v36, %v5726_v38  ;;  %v5728_v36 = vadd.f32 %v5687_v60, %v10585_v2 }
 0x5af   : > { %v5988_v51 = vadd.f32 %v5944_v54, %v5857_v23  ;;  %v5859_v16 = vadd.f32 %v5818_v55, %v5728_v36  ;;  %v8238_v55 = vld [vmem:[%s10917_s5 + $0x20] sm:$0xff] }
 0x5b0   : > { %6324 = vmatpush.bf16.msra.mxu3 %v8238_v55 }
 0x5b1   : > { %v5990_v7 = vadd.f32 %v5949_v41, %v5859_v16 }
 0x5b2   : > { %v5591_v45 = vpop.f32.mrf.mxu1 }
 0x5b3   : > { %v10649_v35 = vadd.f32 %v5591_v45, %v5480_v25  ;;  %v5823_v61 = vpop.f32.mrf.mxu3  ;;  %v5957_v59 = vpop.f32.mrf.mxu0 }
 0x5b4   : > { %v10670_v49 = vpop.f32.mrf.mxu2 }
 0x5ba   : > { %v6073_v56 = vpop.f32.mrf.mxu1 }
 0x5bb   : > { %v6118_v24 = vadd.f32 %v6073_v56, %v5987_v5  ;;  %v5826_v50 = vpop.f32.mrf.mxu3 }
 0x5bc   : > { %v5700_v11 = vpop.f32.mrf.mxu2 }
 0x5bd   : > { %7889 = vmatmul.msk.bf16.gmra.mxu1 %vm2954_vm7, %v6031_v58  ;;  %v6140_v3 = vadd.f32 %v10664_v28, %v6118_v24  ;;  %v5730_v58 = vadd.f32 %v5692_v21, %v10592_v34  ;;  %v8239_v34 = vld [vmem:[%s10917_s5 + $0x28] sm:$0xff]  ;;  %v8241_v21 = vld [vmem:[%s10917_s5 + $0x38] sm:$0xff] }
 0x5be   : > { %6366 = vmatpush.bf16.msrb.mxu0 %v8239_v34 }
 0x5bf   : > { %v6158_v2 = vmax.f32 %v6140_v3, 0.0  ;;  %v5861_v36 = vadd.f32 %v5823_v61, %v5730_v58 }
 0x5c1   : > { %v5992_v24 = vadd.f32 %v5954_v32, %v5861_v36 }
 0x5c2   : > { %v6075_v53 = vpop.f32.mrf.mxu1 }
 0x5c3   : > { %v6119_v52 = vadd.f32 %v6075_v53, %v5988_v51  ;;  %v10677_v56 = vpop.f32.mrf.mxu3  ;;  %v10680_v53 = vpop.f32.mrf.mxu0 }
 0x5c5   : > { %v6141_v26 = vadd.f32 %v10664_v28, %v6119_v52 }
 0x5c7   : > { %v6159_v63 = vmax.f32 %v6141_v26, 0.0  ;;  %v5729_v26 = vadd.f32 %v10651_v4, %v10588_v19  ;;  %v5702_v19 = vpop.f32.mrf.mxu2 }
 0x5c9   : > { %v6180_v46 = vrot.slane %v6159_v63, 6  ;;  %v5860_v3 = vadd.f32 %v10653_v62, %v5729_v26  ;;  %v5732_v26 = vadd.f32 %v10670_v49, %v10599_v40  ;;  %v8245_v40 = vld [vmem:[%s10917_s5 + $0x58] sm:$0xff] }
 0x5ca   : > { %v6078_v27 = vpop.f32.mrf.mxu1 }
 0x5cb   : > { %v6120_v54 = vadd.f32 %v6078_v27, %v5989_v30  ;;  %v8237_v30 = vld [vmem:[%s10917_s5 + $0x18] sm:$0xff]  ;;  %v5731_v27 = vadd.f32 %v5695_v0, %v10595_v20  ;;  %v5831_v16 = vpop.f32.mrf.mxu3  ;;  %v5991_v20 = vadd.f32 %v10656_v22, %v5860_v3 }
 0x5cc   : > { %6293 = vmatpush.bf16.msra.mxu2 %v8237_v30 }
 0x5cd   : > { %v6142_v39 = vadd.f32 %v10664_v28, %v6120_v54  ;;  %v8240_v54 = vld [vmem:[%s10917_s5 + $0x30] sm:$0xff] }
 0x5cf   : > { %v6160_v42 = vmax.f32 %v6142_v39, 0.0  ;;  %v5705_v58 = vpop.f32.mrf.mxu2 }
 0x5d1   : > { %v6181_v17 = vrot.slane %v6160_v42, 6  ;;  %v5862_v42 = vadd.f32 %v5826_v50, %v5731_v27  ;;  %v5734_v27 = vadd.f32 %v5702_v19, %v10606_v9  ;;  %v5863_v9 = vadd.f32 %v10677_v56, %v5732_v26 }
 0x5d2   : > { %v6080_v60 = vpop.f32.mrf.mxu1 }
 0x5d3   : > { %v6182_v8 = vsel %vm6179_vm8, %v6180_v46, %v6181_v17  ;;  %v6121_v25 = vadd.f32 %v6080_v60, %v5990_v7  ;;  %v5962_v7 = vpop.f32.mrf.mxu0  ;;  %v5993_v0 = vadd.f32 %v5957_v59, %v5862_v42 }
 0x5d4   : > { %v6187_v45 = vmax.f32 %v6158_v2, %v6182_v8 }
 0x5d5   : > { %v6143_v13 = vadd.f32 %v10664_v28, %v6121_v25 }
 0x5d6   : > { %v6190_v1 = vrot.slane %v6187_v45, 1 }
 0x5d7   : > { %v6161_v41 = vmax.f32 %v6143_v13, 0.0 }
 0x5d8   : > { %v6192_v38 = vmax.f32 %v6187_v45, %v6190_v1  ;;  %v5833_v45 = vpop.f32.mrf.mxu3 }
 0x5d9   : > { %v6183_v23 = vrot.slane %v6161_v41, 6  ;;  %v5865_v3 = vadd.f32 %v5833_v45, %v5734_v27 }
 0x5da   : > { %v6193_v12 = vpack.c.bf16 %v6192_v38, %v6192_v38  ;;  %v6083_v43 = vpop.f32.mrf.mxu1 }
 0x5db   : > { %v6184_v51 = vsel %vm6179_vm8, %v6181_v17, %v6183_v23  ;;  %v6122_v60 = vadd.f32 %v6083_v43, %v5991_v20  ;;  %v5964_v38 = vpop.f32.mrf.mxu0 }
 0x5dc   : > { %v6188_v57 = vmax.f32 %v6159_v63, %v6184_v51  ;;  %7901 = vmatmul.msk.bf16.vlgmr.msrb.gmra.mxu3 %vm6207_vm9, %v6193_v12  ;;  %v6200_v52 = vrot.slane %v6193_v12, 1  ;;  %v6249_v5 = vrot.slane %v6193_v12, 2  ;;  %v6276_v62 = vrot.slane %v6193_v12, 3 }
 0x5dd   : > { %6424 = vmatpush.bf16.msrb.mxu3 %v8241_v21  ;;  %v6144_v1 = vadd.f32 %v10664_v28, %v6122_v60  ;;  %v5733_v12 = vadd.f32 %v5700_v11, %v10602_v47 }
 0x5de   : > { %7896 = vmatmul.msk.bf16.vlgmr.msrb.gmra.mxu2 %vm6207_vm9, %v6200_v52  ;;  %7908 = vmatmul.msk.bf16.vlgmr.msra.gmra.mxu0 %vm6207_vm9, %v6249_v5  ;;  %v6301_v63 = vrot.slane %v6188_v57, 1 }
 0x5df   : > { %6393 = vmatpush.bf16.msrb.mxu2 %v8240_v54  ;;  %v6162_v51 = vmax.f32 %v6144_v1, 0.0  ;;  %v5864_v36 = vadd.f32 %v5831_v16, %v5733_v12 }
 0x5e0   : > { %v6303_v4 = vmax.f32 %v6188_v57, %v6301_v63  ;;  %v8242_v57 = vld [vmem:[%s10917_s5 + $0x40] sm:$0xff]  ;;  %v5836_v34 = vpop.f32.mrf.mxu3  ;;  %v10717_v63 = vpop.f32.mrf.mxu2 }
 0x5e1   : > { %6452 = vmatpush.bf16.msra.mxu0 %v8242_v57  ;;  %v5995_v49 = vadd.f32 %v5962_v7, %v5864_v36 }
 0x5e2   : > { %v6085_v61 = vpop.f32.mrf.mxu1  ;;  %v6304_v2 = vpack.c.bf16 %v6303_v4, %v6303_v4  ;;  %v5996_v4 = vadd.f32 %v5964_v38, %v5865_v3 }
 0x5e3   : > { %v6123_v39 = vadd.f32 %v6085_v61, %v5992_v24  ;;  %v5967_v54 = vpop.f32.mrf.mxu0  ;;  %v8243_v61 = vld [vmem:[%s10917_s5 + $0x48] sm:$0xff] }
 0x5e5   : > { %v6145_v46 = vadd.f32 %v10664_v28, %v6123_v39  ;;  %v8244_v39 = vld [vmem:[%s10917_s5 + $0x50] sm:$0xff] }
 0x5e7   : > { %v6163_v32 = vmax.f32 %v6145_v46, 0.0  ;;  %v5994_v46 = vadd.f32 %v10680_v53, %v5863_v9  ;;  %v5736_v9 = vadd.f32 %v10717_v63, %v10614_v31 }
 0x5e8   : > { %v10732_v19 = vpop.f32.mrf.mxu3  ;;  %v5710_v60 = vpop.f32.mrf.mxu2 }
 0x5e9   : > { %v6333_v17 = vrot.slane %v6163_v32, 6  ;;  %v5735_v32 = vadd.f32 %v5705_v58, %v10609_v33  ;;  %v8246_v58 = vld [vmem:[%s10917_s5 + $0x60] sm:$0xff]  ;;  %v5737_v36 = vadd.f32 %v5710_v60, %v10620_v48 }
 0x5ea   : > { %v6088_v8 = vpop.f32.mrf.mxu1  ;;  %v8250_v48 = vld [vmem:[%s10917_s5 + $0x80] sm:$0xff] }
 0x5eb   : > { %v6338_v25 = vmax.f32 %v6161_v41, %v6333_v17  ;;  %v6124_v55 = vadd.f32 %v6088_v8, %v5993_v0  ;;  %v10736_v0 = vpop.f32.mrf.mxu0  ;;  %v5866_v8 = vadd.f32 %v5836_v34, %v5735_v32  ;;  %v5867_v32 = vadd.f32 %v10732_v19, %v5736_v9 }
 0x5ec   : > { %7922 = vmatmul.msk.bf16.vlgmr.msra.gmra.mxu3 %vm6207_vm9, %v6304_v2 }
 0x5ed   : > { %v6341_v50 = vrot.slane %v6338_v25, 1  ;;  %v6146_v13 = vadd.f32 %v10664_v28, %v6124_v55  ;;  %6522 = vmatpush.bf16.msra.mxu3 %v8244_v39  ;;  %v5998_v63 = vadd.f32 %v10736_v0, %v5867_v32 }
 0x5ee   : > { %7915 = vmatmul.msk.bf16.vlgmr.msra.gmra.mxu2 %vm6207_vm9, %v6276_v62  ;;  %v5997_v62 = vadd.f32 %v5967_v54, %v5866_v8 }
 0x5ef   : > { %v6343_v22 = vmax.f32 %v6338_v25, %v6341_v50  ;;  %v6164_v59 = vmax.f32 %v6146_v13, 0.0  ;;  %6479 = vmatpush.bf16.msra.mxu2 %v8243_v61 }
 0x5f0   : > { %v5841_v13 = vpop.f32.mrf.mxu3 }
 0x5f1   : > { %v6344_v23 = vpack.c.bf16 %v6343_v22, %v6343_v22  ;;  %v6334_v43 = vrot.slane %v6164_v59, 6  ;;  %v5868_v39 = vadd.f32 %v5841_v13, %v5737_v36 }
 0x5f2   : > { %v6090_v41 = vpop.f32.mrf.mxu1 }
 0x5f3   : > { %v6349_v52 = vrot.slane %v6344_v23, 2  ;;  %v6335_v5 = vsel %vm6179_vm8, %v6333_v17, %v6334_v43  ;;  %v6376_v16 = vrot.slane %v6344_v23, 3  ;;  %v6125_v56 = vadd.f32 %v6090_v41, %v5994_v46  ;;  %v8247_v23 = vld [vmem:[%s10917_s5 + $0x68] sm:$0xff]  ;;  %v5972_v57 = vpop.f32.mrf.mxu0 }
 0x5f4   : > { %v6339_v30 = vmax.f32 %v6162_v51, %v6335_v5  ;;  %v5214_v41 = vadd.f32 %v10536_v18, %v10530_v37  ;;  %v5999_v3 = vadd.f32 %v5972_v57, %v5868_v39  ;;  %v8251_v46 = vld [vmem:[%s10917_s5 + $0x88] sm:$0xff]  ;;  %v8253_v57 = vld [vmem:[%s10917_s5 + $0x98] sm:$0xff] }
 0x5f5   : > { %7929 = vmatmul.msk.bf16.vlgmr.msrb.gmra.mxu0 %vm6207_vm9, %v6349_v52  ;;  %v6147_v53 = vadd.f32 %v10664_v28, %v6125_v56  ;;  %v5712_v52 = vpop.f32.mrf.mxu2 }
 0x5f6   : > { %v6401_v21 = vrot.slane %v6339_v30, 1  ;;  %6550 = vmatpush.bf16.msrb.mxu0 %v8245_v40 }
 0x5f7   : > { %v6165_v1 = vmax.f32 %v6147_v53, 0.0 }
 0x5f8   : > { %v6403_v24 = vmax.f32 %v6339_v30, %v6401_v21  ;;  %v5345_v21 = vadd.f32 %v10538_v44, %v5214_v41  ;;  %v5843_v18 = vpop.f32.mrf.mxu3  ;;  %v8249_v44 = vld [vmem:[%s10917_s5 + $0x78] sm:$0xff]  ;;  %v8252_v41 = vld [vmem:[%s10917_s5 + $0x90] sm:$0xff] }
 0x5fa   : > { %v6404_v47 = vpack.c.bf16 %v6403_v24, %v6403_v24  ;;  %v6093_v11 = vpop.f32.mrf.mxu1  ;;  %v5476_v61 = vadd.f32 %v10540_v14, %v5345_v21 }
 0x5fb   : > { %v6126_v42 = vadd.f32 %v6093_v11, %v5995_v49  ;;  %v8248_v11 = vld [vmem:[%s10917_s5 + $0x70] sm:$0xff]  ;;  %v5974_v49 = vpop.f32.mrf.mxu0 }
 0x5fc   : > { %7943 = vmatmul.msk.bf16.vlgmr.msrb.gmra.mxu3 %vm6207_vm9, %v6404_v47  ;;  %v6435_v17 = vrot.slane %v6404_v47, 1  ;;  %v6462_v43 = vrot.slane %v6404_v47, 2  ;;  %v5607_v40 = vadd.f32 %v10624_v6, %v5476_v61 }
 0x5fd   : > { %v6148_v7 = vadd.f32 %v10664_v28, %v6126_v42  ;;  %6604 = vmatpush.bf16.msrb.mxu3 %v8247_v23 }
 0x5fe   : > { %7936 = vmatmul.msk.bf16.vlgmr.msrb.gmra.mxu2 %vm6207_vm9, %v6376_v16  ;;  %v5715_v16 = vpop.f32.mrf.mxu2  ;;  %v5738_v42 = vadd.f32 %v5712_v52, %v5607_v40 }
 0x5ff   : > { %v6166_v25 = vmax.f32 %v6148_v7, 0.0  ;;  %6577 = vmatpush.bf16.msrb.mxu2 %v8246_v58 }
 0x600   : > { %v5869_v56 = vadd.f32 %v5843_v18, %v5738_v42 }
 0x601   : > { %v6489_v33 = vrot.slane %v6166_v25, 6 }
 0x602   : > { %v6095_v20 = vpop.f32.mrf.mxu1  ;;  %v6000_v60 = vadd.f32 %v5974_v49, %v5869_v56 }
 0x603   : > { %v6127_v2 = vadd.f32 %v6095_v20, %v5996_v4  ;;  %v5977_v8 = vpop.f32.mrf.mxu0 }
 0x605   : > { %v6149_v55 = vadd.f32 %v10664_v28, %v6127_v2  ;;  %7950 = vmatmul.msk.bf16.vlgmr.msra.gmra.mxu0 %vm6207_vm9, %v6435_v17  ;;  %v5846_v17 = vpop.f32.mrf.mxu3 }
 0x606   : > { %6635 = vmatpush.bf16.msra.mxu0 %v8248_v11  ;;  %v8255_v11 = vld [vmem:[%s10917_s5 + $0xa8] sm:$0xff] }
 0x607   : > { %v6167_v45 = vmax.f32 %v6149_v55, 0.0  ;;  %v5717_v55 = vpop.f32.mrf.mxu2 }
 0x609   : > { %v6490_v50 = vrot.slane %v6167_v45, 6 }
 0x60a   : > { %v6098_v38 = vpop.f32.mrf.mxu1 }
 0x60b   : > { %v6491_v22 = vsel %vm6179_vm8, %v6489_v33, %v6490_v50  ;;  %v6128_v59 = vadd.f32 %v6098_v38, %v5997_v62 }
 0x60c   : > { %v6496_v51 = vmax.f32 %v6165_v1, %v6491_v22 }
 0x60d   : > { %v6150_v12 = vadd.f32 %v10664_v28, %v6128_v59  ;;  %v5848_v59 = vpop.f32.mrf.mxu3 }
 0x60e   : > { %v6499_v5 = vrot.slane %v6496_v51, 1  ;;  %7957 = vmatmul.msk.bf16.vlgmr.msra.gmra.mxu2 %vm6207_vm9, %v6462_v43 }
 0x60f   : > { %v6168_v30 = vmax.f32 %v6150_v12, 0.0  ;;  %6677 = vmatpush.bf16.msra.mxu2 %v8249_v44  ;;  %v5740_v12 = vadd.f32 %v5717_v55, %v10641_v10  ;;  %v8256_v44 = vld [vmem:[%s10917_s5 + $0xb0] sm:$0xff] }
 0x610   : > { %v6501_v34 = vmax.f32 %v6496_v51, %v6499_v5 }
 0x611   : > { %v6492_v26 = vrot.slane %v6168_v30, 6 }
 0x612   : > { %v6502_v24 = vpack.c.bf16 %v6501_v34, %v6501_v34  ;;  %v6100_v27 = vpop.f32.mrf.mxu1  ;;  %v5720_v34 = vpop.f32.mrf.mxu2 }
 0x613   : > { %v6493_v37 = vsel %vm6179_vm8, %v6490_v50, %v6492_v26  ;;  %v6129_v53 = vadd.f32 %v6100_v27, %v5998_v63  ;;  %v5871_v26 = vadd.f32 %v5848_v59, %v5740_v12 }
 0x614   : > { %v6497_v54 = vmax.f32 %v6166_v25, %v6493_v37  ;;  %7964 = vmatmul.msk.bf16.vlgmr.msra.gmra.mxu3 %vm6207_vm9, %v6502_v24  ;;  %v6533_v47 = vrot.slane %v6502_v24, 1  ;;  %v6560_v6 = vrot.slane %v6502_v24, 2  ;;  %v6587_v62 = vrot.slane %v6502_v24, 3 }
 0x615   : > { %6704 = vmatpush.bf16.msra.mxu3 %v8250_v48  ;;  %v6151_v38 = vadd.f32 %v10664_v28, %v6129_v53  ;;  %v5739_v24 = vadd.f32 %v5715_v16, %v10632_v15  ;;  %v5741_v37 = vadd.f32 %v5720_v34, %v10645_v29  ;;  %v5851_v18 = vpop.f32.mrf.mxu3  ;;  %v8257_v29 = vld [vmem:[%s10917_s5 + $0xb8] sm:$0xff] }
 0x616   : > { %7971 = vmatmul.msk.bf16.vlgmr.msrb.gmra.mxu0 %vm6207_vm9, %v6533_v47  ;;  %v6612_v7 = vrot.slane %v6497_v54, 1  ;;  %v8254_v47 = vld [vmem:[%s10917_s5 + $0xa0] sm:$0xff] }
 0x617   : > { %6735 = vmatpush.bf16.msrb.mxu0 %v8251_v46  ;;  %v6169_v43 = vmax.f32 %v6151_v38, 0.0  ;;  %v5870_v15 = vadd.f32 %v5846_v17, %v5739_v24  ;;  %v5872_v39 = vadd.f32 %v5851_v18, %v5741_v37 }
 0x618   : > { %v6614_v2 = vmax.f32 %v6497_v54, %v6612_v7  ;;  %v8258_v7 = vld [vmem:[%s10917_s5 + $0xc0] sm:$0xff] }
 0x619   : > { %v6001_v16 = vadd.f32 %v5977_v8, %v5870_v15 }
 0x61a   : > { %v6103_v14 = vpop.f32.mrf.mxu1  ;;  %v6615_v50 = vpack.c.bf16 %v6614_v2, %v6614_v2  ;;  %v5722_v9 = vpop.f32.mrf.mxu2 }
 0x61b   : > { %v6130_v4 = vadd.f32 %v6103_v14, %v5999_v3  ;;  %v5742_v42 = vadd.f32 %v5722_v9, %v10649_v35 }
 0x61d   : > { %v6152_v20 = vadd.f32 %v10664_v28, %v6130_v4 }
 0x61e   : > { %7978 = vmatmul.msk.bf16.vlgmr.msrb.gmra.mxu2 %vm6207_vm9, %v6560_v6  ;;  %v5853_v6 = vpop.f32.mrf.mxu3 }
 0x61f   : > { %v6170_v31 = vmax.f32 %v6152_v20, 0.0  ;;  %6763 = vmatpush.bf16.msrb.mxu2 %v8252_v41  ;;  %v5873_v20 = vadd.f32 %v5853_v6, %v5742_v42  ;;  %v8266_v42 = vld [vmem:[%s10919_s7 + $0x38] sm:$0xff]  ;;  %v8265_v6 = vld [vmem:[%s10919_s7 + $0x30] sm:$0xff] }
 0x620   : > { %7022 = vmatpush.bf16.msra.mxu1 %v8266_v42 }
 0x621   : > { %v6644_v25 = vrot.slane %v6170_v31, 6 }
 0x622   : > { %v6105_v45 = vpop.f32.mrf.mxu1 }
 0x623   : > { %v6649_v19 = vmax.f32 %v6168_v30, %v6644_v25  ;;  %v6131_v33 = vadd.f32 %v6105_v45, %v6000_v60  ;;  %v5979_v30 = vpop.f32.mrf.mxu0 }
 0x624   : > { %7985 = vmatmul.msk.bf16.vlgmr.msrb.gmra.mxu3 %vm6207_vm9, %v6587_v62  ;;  %v6002_v48 = vadd.f32 %v5979_v30, %v5871_v26  ;;  %7023 = vmatpush.bf16.msra.mxu1 %v8265_v6 }
 0x625   : > { %v6652_v13 = vrot.slane %v6649_v19, 1  ;;  %v6153_v1 = vadd.f32 %v10664_v28, %v6131_v33  ;;  %6790 = vmatpush.bf16.msrb.mxu3 %v8253_v57 }
 0x626   : > { %7992 = vmatmul.msk.bf16.vlgmr.msra.gmra.mxu0 %vm6207_vm9, %v6615_v50 }
 0x627   : > { %v6654_v0 = vmax.f32 %v6649_v19, %v6652_v13  ;;  %v6171_v22 = vmax.f32 %v6153_v1, 0.0  ;;  %6833 = vmatpush.bf16.msra.mxu0 %v8254_v47 }
 0x629   : > { %v6655_v58 = vpack.c.bf16 %v6654_v0, %v6654_v0  ;;  %v6645_v23 = vrot.slane %v6171_v22, 6 }
 0x62a   : > { %v6108_v51 = vpop.f32.mrf.mxu1 }
 0x62b   : > { %v6660_v52 = vrot.slane %v6655_v58, 2  ;;  %v6646_v5 = vsel %vm6179_vm8, %v6644_v25, %v6645_v23  ;;  %v6687_v54 = vrot.slane %v6655_v58, 3  ;;  %v5982_v49 = vpop.f32.mrf.mxu0  ;;  %v6132_v14 = vadd.f32 %v6108_v51, %v6001_v16 }
 0x62c   : > { %v6650_v21 = vmax.f32 %v6169_v43, %v6646_v5  ;;  %v6003_v3 = vadd.f32 %v5982_v49, %v5872_v39 }
 0x62d   : > { %v6154_v63 = vadd.f32 %v10664_v28, %v6132_v14 }
 0x62e   : > { %v6712_v36 = vrot.slane %v6650_v21, 1  ;;  %7999 = vmatmul.msk.bf16.vlgmr.msra.gmra.mxu2 %vm6207_vm9, %v6660_v52 }
 0x62f   : > { %6861 = vmatpush.bf16.msra.mxu2 %v8255_v11  ;;  %v6172_v53 = vmax.f32 %v6154_v63, 0.0 }
 0x630   : > { %v6714_v27 = vmax.f32 %v6650_v21, %v6712_v36 }
 0x632   : > { %v6110_v10 = vpop.f32.mrf.mxu1  ;;  %v6715_v61 = vpack.c.bf16 %v6714_v27, %v6714_v27 }
 0x633   : > { %v6133_v40 = vadd.f32 %v6110_v10, %v6002_v48  ;;  %v5984_v2 = vpop.f32.mrf.mxu0 }
 0x634   : > { %8006 = vmatmul.msk.bf16.vlgmr.msra.gmra.mxu3 %vm6207_vm9, %v6687_v54  ;;  %v6746_v56 = vrot.slane %v6715_v61, 1  ;;  %v6004_v60 = vadd.f32 %v5984_v2, %v5873_v20  ;;  %v6773_v55 = vrot.slane %v6715_v61, 2  ;;  %v8264_v2 = vld [vmem:[%s10919_s7 + $0x28] sm:$0xff] }
 0x635   : > { %6888 = vmatpush.bf16.msra.mxu3 %v8256_v44  ;;  %v6155_v46 = vadd.f32 %v10664_v28, %v6133_v40  ;;  %7024 = vmatpush.bf16.msra.mxu1 %v8264_v2 }
 0x636   : > { %8013 = vmatmul.msk.bf16.vlgmr.msrb.gmra.mxu0 %vm6207_vm9, %v6715_v61 }
 0x637   : > { %6915 = vmatpush.bf16.msrb.mxu0 %v8257_v29  ;;  %v6173_v17 = vmax.f32 %v6155_v46, 0.0 }
 0x639   : > { %v6800_v8 = vrot.slane %v6173_v17, 6 }
 0x63a   : > { %v6113_v4 = vpop.f32.mrf.mxu1 }
 0x63b   : > { %v6134_v32 = vadd.f32 %v6113_v4, %v6003_v3 }
 0x63d   : > { %v6156_v31 = vadd.f32 %v10664_v28, %v6134_v32 }
 0x63e   : > { %8020 = vmatmul.msk.bf16.vlgmr.msrb.gmra.mxu2 %vm6207_vm9, %v6746_v56 }
 0x63f   : > { %v6174_v35 = vmax.f32 %v6156_v31, 0.0  ;;  %6946 = vmatpush.bf16.msrb.mxu2 %v8258_v7 }
 0x641   : > { %v6801_v25 = vrot.slane %v6174_v35, 6 }
 0x642   : > { %v6115_v45 = vpop.f32.mrf.mxu1 }
 0x643   : > { %v6802_v62 = vsel %vm6179_vm8, %v6800_v8, %v6801_v25  ;;  %v6135_v19 = vadd.f32 %v6115_v45, %v6004_v60 }
 0x644   : > { %v6807_v33 = vmax.f32 %v6172_v53, %v6802_v62  ;;  %8027 = vmatmul.msk.bf16.vlgmr.msrb.gmra.mxu3 %vm6207_vm9, %v6773_v55  ;;  %v8263_v55 = vld [vmem:[%s10919_s7 + $0x20] sm:$0xff]  ;;  %v8262_v62 = vld [vmem:[%s10919_s7 + $0x18] sm:$0xff] }
 0x645   : > { %v6157_v50 = vadd.f32 %v10664_v28, %v6135_v19  ;;  %7025 = vmatpush.bf16.msra.mxu1 %v8263_v55 }
 0x646   : > { %v6810_v13 = vrot.slane %v6807_v33, 1 }
 0x647   : > { %v6175_v1 = vmax.f32 %v6157_v50, 0.0 }
 0x648   : > { %v6812_v38 = vmax.f32 %v6807_v33, %v6810_v13  ;;  %v8261_v13 = vld [vmem:[%s10919_s7 + $0x10] sm:$0xff] }
 0x649   : > { %v6803_v0 = vrot.slane %v6175_v1, 6  ;;  %7026 = vmatpush.bf16.msra.mxu1 %v8262_v62 }
 0x64a   : > { %v6813_v22 = vpack.c.bf16 %v6812_v38, %v6812_v38 }
 0x64b   : > { %v6804_v59 = vsel %vm6179_vm8, %v6801_v25, %v6803_v0 }
 0x64c   : > { %v6808_v58 = vmax.f32 %v6173_v17, %v6804_v59  ;;  %8034 = vmatmul.msk.bf16.vlgmr.msra.gmra.mxu0 %vm6207_vm9, %v6813_v22  ;;  %v6844_v23 = vrot.slane %v6813_v22, 1  ;;  %v6871_v43 = vrot.slane %v6813_v22, 2  ;;  %v6898_v57 = vrot.slane %v6813_v22, 3 }
 0x64d   : > { %7027 = vmatpush.bf16.msra.mxu1 %v8261_v13 }
 0x64e   : > { %8041 = vmatmul.msk.bf16.vlgmr.msra.gmra.mxu2 %vm6207_vm9, %v6844_v23  ;;  %v6923_v51 = vrot.slane %v6808_v58, 1  ;;  %v8260_v23 = vld [vmem:[%s10919_s7 + $0x8] sm:$0xff] }
 0x650   : > { %v6925_v41 = vmax.f32 %v6808_v58, %v6923_v51 }
 0x651   : > { %7028 = vmatpush.bf16.msra.mxu1 %v8260_v23 }
 0x652   : > { %v6926_v12 = vpack.c.bf16 %v6925_v41, %v6925_v41 }
 0x654   : > { %8048 = vmatmul.msk.bf16.vlgmr.msra.gmra.mxu3 %vm6207_vm9, %v6871_v43 }
 0x65b   : > { %v6268_v28 = vpop.f32.mrf.mxu0 }
 0x65c   : > { %8055 = vmatmul.msk.bf16.vlgmr.msrb.gmra.mxu0 %vm6207_vm9, %v6898_v57  ;;  %v8259_v57 = vld [vmem:[%s10919_s7] sm:$0xff] }
 0x65d   : > { %7029 = vmatpush.bf16.msra.mxu1 %v8259_v57 }
 0x65e   : > { %8062 = vmatmul.msk.bf16.vlgmr.msrb.gmra.mxu2 %vm6207_vm9, %v6926_v12 }
 0x65f   : > { %v6242_v52 = vpop.f32.mrf.mxu3 }
 0x661   : > { %v6220_v5 = vpop.f32.mrf.mxu2 }
 0x662   : > { %v6243_v30 = vadd.f32 %v6242_v52, %v6220_v5  ;;  %v8273_v52 = vld [vmem:[%s10921_s9 + $0x30] sm:$0xff] }
 0x663   : > { %v6270_v34 = vpop.f32.mrf.mxu0 }
 0x664   : > { %v6272_v21 = vadd.f32 %v6268_v28, %v6243_v30  ;;  %v8274_v28 = vld [vmem:[%s10921_s9 + $0x38] sm:$0xff]  ;;  %v8272_v34 = vld [vmem:[%s10921_s9 + $0x28] sm:$0xff] }
 0x665   : > { %7102 = vmatpush.bf16.msrb.mxu3 %v8274_v28 }
 0x667   : > { %v6244_v36 = vpop.f32.mrf.mxu3 }
 0x669   : > { %v6222_v26 = vpop.f32.mrf.mxu2  ;;  %7103 = vmatpush.bf16.msrb.mxu3 %v8273_v52 }
 0x66d   : > { %7104 = vmatpush.bf16.msrb.mxu3 %v8272_v34 }
 0x66f   : > { %v6326_v24 = vpop.f32.mrf.mxu3 }
 0x671   : > { %v6295_v27 = vpop.f32.mrf.mxu2 }
 0x672   : > { %v6299_v37 = vadd.f32 %v6295_v27, %v6272_v21  ;;  %v6368_v18 = vpop.f32.mrf.mxu0  ;;  %v8271_v27 = vld [vmem:[%s10921_s9 + $0x20] sm:$0xff] }
 0x673   : > { %7105 = vmatpush.bf16.msrb.mxu3 %v8271_v27 }
 0x674   : > { %v6330_v54 = vadd.f32 %v6326_v24, %v6299_v37 }
 0x676   : > { %v6372_v10 = vadd.f32 %v6368_v18, %v6330_v54  ;;  %v8270_v54 = vld [vmem:[%s10921_s9 + $0x18] sm:$0xff] }
 0x677   : > { %v6328_v47 = vpop.f32.mrf.mxu3  ;;  %7106 = vmatpush.bf16.msrb.mxu3 %v8270_v54 }
 0x679   : > { %v6297_v11 = vpop.f32.mrf.mxu2 }
 0x67a   : > { %v6370_v44 = vpop.f32.mrf.mxu0 }
 0x67f   : > { %v6426_v48 = vpop.f32.mrf.mxu3 }
 0x681   : > { %v6395_v15 = vpop.f32.mrf.mxu2 }
 0x682   : > { %v6399_v61 = vadd.f32 %v6395_v15, %v6372_v10  ;;  %v6454_v29 = vpop.f32.mrf.mxu0 }
 0x684   : > { %v6430_v39 = vadd.f32 %v6426_v48, %v6399_v61  ;;  %v8269_v48 = vld [vmem:[%s10921_s9 + $0x10] sm:$0xff] }
 0x685   : > { %7107 = vmatpush.bf16.msrb.mxu3 %v8269_v48 }
 0x686   : > { %v6458_v25 = vadd.f32 %v6454_v29, %v6430_v39 }
 0x687   : > { %v6428_v40 = vpop.f32.mrf.mxu3 }
 0x688   : > { %v6953_v40 = vld [vmem:[%s10918_s6] sm:$0x1] }
 0x689   : > { %v6397_v49 = vpop.f32.mrf.mxu2 }
 0x68a   : > { %v6456_v9 = vpop.f32.mrf.mxu0 }
 0x691   : > { %v6481_v16 = vpop.f32.mrf.mxu2 }
 0x692   : > { %v6485_v45 = vadd.f32 %v6481_v16, %v6458_v25 }
 0x693   : > { %v6552_v3 = vpop.f32.mrf.mxu0 }
 0x697   : > { %v6524_v46 = vpop.f32.mrf.mxu3 }
 0x698   : > { %v6528_v33 = vadd.f32 %v6524_v46, %v6485_v45  ;;  %v8268_v46 = vld [vmem:[%s10921_s9 + $0x8] sm:$0xff] }
 0x699   : > { %v6483_v14 = vpop.f32.mrf.mxu2  ;;  %7108 = vmatpush.bf16.msrb.mxu3 %v8268_v46 }
 0x69a   : > { %v6556_v1 = vadd.f32 %v6552_v3, %v6528_v33  ;;  %v8267_v14 = vld [vmem:[%s10921_s9] sm:$0xff] }
 0x69b   : > { %v6554_v4 = vpop.f32.mrf.mxu0 }
 0x69c   : > { %v6973_v4 = vld [vmem:[%s10920_s8] sm:$0x1] }
 0x69d   : > { %7109 = vmatpush.bf16.msrb.mxu3 %v8267_v14 }
 0x69f   : > { %v6526_v32 = vpop.f32.mrf.mxu3 }
 0x6a1   : > { %v6579_v7 = vpop.f32.mrf.mxu2 }
 0x6a2   : > { %v6583_v0 = vadd.f32 %v6579_v7, %v6556_v1 }
 0x6a3   : > { %v6637_v56 = vpop.f32.mrf.mxu0 }
 0x6a7   : > { %v6606_v20 = vpop.f32.mrf.mxu3 }
 0x6a8   : > { %v6610_v22 = vadd.f32 %v6606_v20, %v6583_v0 }
 0x6a9   : > { %v6581_v17 = vpop.f32.mrf.mxu2 }
 0x6aa   : > { %v6641_v58 = vadd.f32 %v6637_v56, %v6610_v22  ;;  %v7053_v17 = vld [vmem:[%s10922_s10] sm:$0x1] }
 0x6ab   : > { %v6639_v31 = vpop.f32.mrf.mxu0 }
 0x6af   : > { %v6608_v63 = vpop.f32.mrf.mxu3 }
 0x6b1   : > { %v6679_v35 = vpop.f32.mrf.mxu2 }
 0x6b2   : > { %v6683_v41 = vadd.f32 %v6679_v35, %v6641_v58 }
 0x6b3   : > { %v6737_v60 = vpop.f32.mrf.mxu0 }
 0x6b7   : > { %v6706_v8 = vpop.f32.mrf.mxu3 }
 0x6b8   : > { %v6710_v12 = vadd.f32 %v6706_v8, %v6683_v41 }
 0x6b9   : > { %v6681_v53 = vpop.f32.mrf.mxu2 }
 0x6ba   : > { %v6741_v30 = vadd.f32 %v6737_v60, %v6710_v12 }
 0x6bb   : > { %v6739_v19 = vpop.f32.mrf.mxu0 }
 0x6bf   : > { %v6708_v50 = vpop.f32.mrf.mxu3 }
 0x6c1   : > { %v6765_v38 = vpop.f32.mrf.mxu2 }
 0x6c2   : > { %v6769_v26 = vadd.f32 %v6765_v38, %v6741_v30 }
 0x6c7   : > { %v6792_v59 = vpop.f32.mrf.mxu3 }
 0x6c8   : > { %v6796_v24 = vadd.f32 %v6792_v59, %v6769_v26 }
 0x6c9   : > { %v6767_v43 = vpop.f32.mrf.mxu2  ;;  %v6835_v51 = vpop.f32.mrf.mxu0 }
 0x6ca   : > { %v6839_v18 = vadd.f32 %v6835_v51, %v6796_v24 }
 0x6cf   : > { %v6794_v5 = vpop.f32.mrf.mxu3 }
 0x6d1   : > { %v6837_v21 = vpop.f32.mrf.mxu0  ;;  %v6863_v36 = vpop.f32.mrf.mxu2 }
 0x6d2   : > { %v6867_v11 = vadd.f32 %v6863_v36, %v6839_v18 }
 0x6d7   : > { %v6890_v37 = vpop.f32.mrf.mxu3 }
 0x6d8   : > { %v6894_v44 = vadd.f32 %v6890_v37, %v6867_v11 }
 0x6d9   : > { %v6865_v10 = vpop.f32.mrf.mxu2  ;;  %v6917_v47 = vpop.f32.mrf.mxu0 }
 0x6da   : > { %v6921_v61 = vadd.f32 %v6917_v47, %v6894_v44 }
 0x6df   : > { %v6892_v15 = vpop.f32.mrf.mxu3 }
 0x6e1   : > { %v6919_v29 = vpop.f32.mrf.mxu0  ;;  %v6948_v39 = vpop.f32.mrf.mxu2 }
 0x6e2   : > { %v6952_v49 = vadd.f32 %v6948_v39, %v6921_v61 }
 0x6e4   : > { %v6954_v9 = vadd.f32 %v6953_v40, %v6952_v49 }
 0x6e6   : > { %v6955_v16 = vmax.f32 %v6954_v9, 0.0 }
 0x6e8   : > { %v6956_v3 = vpack.c.bf16 %v6955_v16, %v6955_v16 }
 0x6e9   : > { %v6950_v42 = vpop.f32.mrf.mxu2 }
 0x6ea   : > { %7030 = vmatmul.bf16.vlgmr.msra.gmra.mxu1 %v6956_v3 }
 0x767   : > { %v7031_v32 = vpop.f32.mrf.mxu1 }
 0x768   : > { %v7032_v7 = vadd.f32 %v7031_v32, %v6973_v4 }
 0x76a   : > { %v7035_v6 = vmax.f32 %v7032_v7, 0.0 }
 0x76c   : > { %v7036_v56 = vpack.c.bf16 %v7035_v6, %v7035_v6 }
 0x76e   : > { %7110 = vmatmul.bf16.vlgmr.msrb.gmra.mxu3 %v7036_v56 }
 0x76f   : > { %v7033_v20 = vpop.f32.mrf.mxu1 }
 0x7f1   : > { %v7111_v31 = vpop.f32.mrf.mxu3 }
 0x7f2   : > { %v7112_v63 = vadd.f32 %v7111_v31, %v7053_v17 }
 0x7f4   : > { %7115 = vst [vmem:[%s378_s22] sm:$0x1] %v7112_v63 }
 0x7f5   : > { %8793 = shalt.err (!%p8790_p3)
}
 0x7f6   : > { %8708 = dma.vmem_to_hbm [thread:$0]  (%p8929_p5), %s7128_s24, 16, %s7130_s19, %s7117_s26  }
 0x7f9   : > { %v7113_v35 = vpop.f32.mrf.mxu3 }
 0x7fa PF: > { %p8714_p4 = scmp.ge.s32.totalorder %s8828_s20, 2  ;;  %s7141_s29 = sand.u32 1, %s8816_s17  }
 0x7fb   : > { %s7142_s15 = scalar_lea.sflag [#allocation5], %s7141_s29 }
 0x7fc   : > { %p8711_p7 = pnand %p8714_p4, %p8933_p6 }
 0x7fe   : > { %p8712_p8 = pneg %p8711_p7 }
 0x800   : > { %8811 = dma.done.wait (%p8712_p8), %s7142_s15, 16  }
 0x801   : > { %8813 = vsyncadd (%p8712_p8), %s7142_s15, 4294967280  ;;  %s10944_s22 = sld [smem:[#allocation7_spill]]  ;;  %p21_p9 = scmp.ge.s32.totalorder %s8916_s23, 4  }
 0x802   : > { %s10945_s19 = sld [smem:[#allocation8_spill]]  ;;  %s10946_s17 = smov %s8820_s18 }
 0x803   : > { %s10948_s20 = smov %s8916_s23  ;;  %23 = sbr.rel (!%p21_p9) target bundleno = 3 (0x3), region = 147 }
 0x807   : > { %s10947_s18 = smov %s10944_s22 }
 0x808   :  { %7147 = vsyncpa [#allocation5], 1 }
 0x809   :  { %7149 = vsyncpa [#allocation5 + $0x1], 1 }

</bundles_post_ra>
